<compile_context>
chip_gen: v7x
topology: tpu7x:2x2x1
jax: 0.10.0
libtpu: 0.0.40
codegen_flags: <defaults>
</compile_context>

<pallas_src>
import jax
import jax.numpy as jnp
from jax import lax
from jax.experimental import pallas as pl
from jax.experimental.pallas import tpu as pltpu

# ----------------------------- config ---------------------------------------
C_IN, H_IN, W_IN = 4, 36, 36          # conv stack spatial: 36 -> 8 -> 3 -> 1
N_TIME, N_BATCH = 4, 2
HIDDEN = 32                           # small stand-in for ROLLOUT_HIDDEN=256
TB = N_TIME * N_BATCH                 # flattened (time, batch) items

K1, K2, K3 = 8, 4, 3                  # conv kernel sizes
S1, S2 = 8, 3                         # conv1 / conv2 output spatial extent
C1, C2, C3 = 32, 64, 64               # conv output channels


# ----------------------------- fused Pallas kernel ---------------------------
def rollout_encoder_kernel(p1_ref, rew_ref,
                           w1_ref, b1_ref, w2_ref, b2_ref, w3_ref, b3_ref,
                           wih_c_ref, wih_r_ref, whh_ref, bg_ref,
                           out_ref):
    f32 = jnp.float32

    # ---- conv1: one (512,256)@(256,32) GEMM, fused bias + ReLU --------------
    a1 = jnp.dot(p1_ref[...], w1_ref[...], preferred_element_type=f32)
    a1 = jnp.maximum(a1 + b1_ref[...], 0.0)      # (S1*S1*TB, C1); rows=(ho,wo,n)

    def a1_at(h, w):                              # (TB, C1); sublane-aligned slice
        r = (h * S1 + w) * TB
        return a1[r:r + TB, :]

    # ---- conv2 + conv3 fused -------------------------------------------------
    # conv3 has a 1x1 output, so its kernel offset equals the conv2 output
    # position: accumulate conv3 directly from each conv2 output tile.
    acc3 = jnp.zeros((TB, C3), f32)
    for ho in range(S2):
        for wo in range(S2):
            acc = jnp.zeros((TB, C2), f32)
            for kh in range(K2):
                for kw in range(K2):
                    acc = acc + jnp.dot(a1_at(2 * ho + kh, 2 * wo + kw),
                                        w2_ref[kh * K2 + kw],
                                        preferred_element_type=f32)
            a2 = jnp.maximum(acc + b2_ref[...], 0.0)             # (TB, C2)
            acc3 = acc3 + jnp.dot(a2, w3_ref[ho * S2 + wo],
                                  preferred_element_type=f32)
    conv_out = jnp.maximum(acc3 + b3_ref[...], 0.0)              # (TB, C3); row=t*B+b

    # ---- LSTM, fully unrolled over time; h/c stay on-chip --------------------
    rew = rew_ref[...]                                           # (TB, 1)
    h = jnp.zeros((N_BATCH, HIDDEN), f32)
    c = jnp.zeros((N_BATCH, HIDDEN), f32)
    for t in range(N_TIME):
        x_t = conv_out[t * N_BATCH:(t + 1) * N_BATCH, :]         # (B, C3)
        r_t = rew[t * N_BATCH:(t + 1) * N_BATCH, :]              # (B, 1)
        gates = []
        for k in range(4):                                       # i, f, g, o
            gates.append(
                jnp.dot(x_t, wih_c_ref[k], preferred_element_type=f32)
                + r_t * wih_r_ref[k]                             # rank-1 reward term
                + jnp.dot(h, whh_ref[k], preferred_element_type=f32)
                + bg_ref[k])
        i_g = jax.nn.sigmoid(gates[0])
        f_g = jax.nn.sigmoid(gates[1])
        g_g = jnp.tanh(gates[2])
        o_g = jax.nn.sigmoid(gates[3])
        c = f_g * c + i_g * g_g
        h = o_g * jnp.tanh(c)

    out_ref[...] = h                                             # single final store


# ----------------------------- host-side prep (cheap, one-time) --------------
def conv1_patches(obs):
    """(T,B,C,36,36) -> (S1*S1*TB, K1*K1*C) conv1 im2col patches.

    Uses the k == 2*stride structure: one space-to-depth transpose plus a 2x2
    halo concat (4 unit-stride slices) replaces the old 64-slice im2col loop.
    Feature order is (dh, dw, rh, rw, c); rows are (ho, wo, n) so each spatial
    position of the conv1 output is one contiguous TB-row (sublane) block.
    """
    x = obs.reshape(TB, C_IN, 9, 4, 9, 4)            # (n, c, hb, rh, wb, rw)
    x = x.transpose(2, 4, 0, 3, 5, 1)                # (hb, wb, n, rh, rw, c)
    x = x.reshape(9, 9, TB, 16 * C_IN)               # (9, 9, TB, 64)
    cols = [x[dh:dh + S1, dw:dw + S1] for dh in (0, 1) for dw in (0, 1)]
    p = jnp.concatenate(cols, axis=-1)               # (8, 8, TB, 256)
    return p.reshape(S1 * S1 * TB, K1 * K1 * C_IN)   # (512, 256)


def pack_params(params):
    """Permute PyTorch-layout weights once into kernel-friendly layouts."""
    # conv1: (O,C,kh,kw) with kh=4*dh+rh, kw=4*dw+rw -> (dh,dw,rh,rw,c, O)
    w1 = params["w1"].reshape(C1, C_IN, 2, 4, 2, 4)
    w1 = w1.transpose(2, 4, 3, 5, 1, 0).reshape(K1 * K1 * C_IN, C1)   # (256, 32)
    b1 = params["b1"].reshape(1, C1)
    # conv2/conv3: per kernel-offset (C_in, C_out) matrices
    w2 = params["w2"].transpose(2, 3, 1, 0).reshape(K2 * K2, C1, C2)  # (16, 32, 64)
    b2 = params["b2"].reshape(1, C2)
    w3 = params["w3"].transpose(2, 3, 1, 0).reshape(K3 * K3, C2, C3)  # (9, 64, 64)
    b3 = params["b3"].reshape(1, C3)
    # LSTM: split per gate; conv-features part (K=64) and reward row separately
    wih = params["w_ih"].reshape(4, HIDDEN, C3 + 1)                   # (4, 32, 65)
    wih_c = wih[:, :, :C3].transpose(0, 2, 1)                         # (4, 64, 32)
    wih_r = wih[:, :, C3:].transpose(0, 2, 1)                         # (4, 1, 32)
    whh = params["w_hh"].reshape(4, HIDDEN, HIDDEN).transpose(0, 2, 1)  # (4, 32, 32)
    bg = (params["b_ih"] + params["b_hh"]).reshape(4, 1, HIDDEN)      # (4, 1, 32)
    return w1, b1, w2, b2, w3, b3, wih_c, wih_r, whh, bg


@jax.jit
def rollout_encoder_forward(params, obs_v, reward_v):
    """obs_v: (T, B, C, H, W), reward_v: (T, B, 1) -> (B*HIDDEN,)"""
    p1 = conv1_patches(obs_v.astype(jnp.float32))                 # (512, 256)
    rew = reward_v.astype(jnp.float32).reshape(TB, 1)             # row = t*B + b
    packed = pack_params(params)
    vmem = pl.BlockSpec(memory_space=pltpu.MemorySpace.VMEM)
    h_last = pl.pallas_call(
        rollout_encoder_kernel,
        out_shape=jax.ShapeDtypeStruct((N_BATCH, HIDDEN), jnp.float32),
        in_specs=[vmem] * 12,          # whole arrays resident in VMEM, no grid
        out_specs=vmem,
    )(p1, rew, *packed)
    return h_last.reshape(-1)


# ----------------------------- pure-JAX reference ----------------------------
def reference_forward(params, obs_v, reward_v):
    T, B = obs_v.shape[0], obs_v.shape[1]
    x = obs_v.reshape(T * B, *obs_v.shape[2:]).astype(jnp.float32)
    dn = ("NCHW", "OIHW", "NCHW")
    for w, b, s in [(params["w1"], params["b1"], 4),
                    (params["w2"], params["b2"], 2),
                    (params["w3"], params["b3"], 1)]:
        x = lax.conv_general_dilated(x, w, (s, s), "VALID",
                                     dimension_numbers=dn)
        x = jnp.maximum(x + b.reshape(1, -1, 1, 1), 0.0)
    conv_out = x.reshape(T, B, -1)
    rnn_in = jnp.concatenate([conv_out, reward_v.astype(jnp.float32)], axis=2)
    H = HIDDEN
    h = jnp.zeros((B, H), jnp.float32)
    c = jnp.zeros((B, H), jnp.float32)
    for t in range(T):
        g = (rnn_in[t] @ params["w_ih"].T + params["b_ih"]
             + h @ params["w_hh"].T + params["b_hh"])
        i_g = jax.nn.sigmoid(g[:, :H])
        f_g = jax.nn.sigmoid(g[:, H:2 * H])
        g_g = jnp.tanh(g[:, 2 * H:3 * H])
        o_g = jax.nn.sigmoid(g[:, 3 * H:])
        c = f_g * c + i_g * g_g
        h = o_g * jnp.tanh(c)
    return h.reshape(-1)


# ----------------------------- params / main ---------------------------------
def make_params(key):
    ks = jax.random.split(key, 10)
    din = C3 + 1  # conv_out_size (64*1*1) + 1 reward
    u = lambda k, shp, scale: jax.random.uniform(k, shp, jnp.float32,
                                                 -scale, scale)
    return {
        "w1": u(ks[0], (C1, C_IN, K1, K1), 0.06),
        "b1": u(ks[1], (C1,), 0.06),
        "w2": u(ks[2], (C2, C1, K2, K2), 0.04),
        "b2": u(ks[3], (C2,), 0.04),
        "w3": u(ks[4], (C3, C2, K3, K3), 0.04),
        "b3": u(ks[5], (C3,), 0.04),
        "w_ih": u(ks[6], (4 * HIDDEN, din), 0.1),
        "w_hh": u(ks[7], (4 * HIDDEN, HIDDEN), 0.1),
        "b_ih": u(ks[8], (4 * HIDDEN,), 0.1),
        "b_hh": u(ks[9], (4 * HIDDEN,), 0.1),
    }


if __name__ == "__main__":
    key = jax.random.PRNGKey(0)
    k_obs, k_rew, k_par = jax.random.split(key, 3)
    obs_v = jax.random.normal(k_obs, (N_TIME, N_BATCH, C_IN, H_IN, W_IN),
                              jnp.float32)
    reward_v = jax.random.normal(k_rew, (N_TIME, N_BATCH, 1), jnp.float32)
    params = make_params(k_par)

    out = rollout_encoder_forward(params, obs_v, reward_v)
    out = jax.block_until_ready(out)

    ref = reference_forward(params, obs_v, reward_v)
    assert out.shape == (N_BATCH * HIDDEN,)
    assert jnp.allclose(out, ref, rtol=2e-3, atol=2e-3), \
        f"max abs err {jnp.max(jnp.abs(out - ref))}"

    print("KERNEL_OK")
</pallas_src>

<mosaic_0001>
module attributes {stable_mosaic.version = 11 : i64} {
  func.func @rollout_encoder_kernel(%arg0: memref<512x256xf32, #tpu.memory_space<vmem>>, %arg1: memref<8x1xf32, #tpu.memory_space<vmem>>, %arg2: memref<256x32xf32, #tpu.memory_space<vmem>>, %arg3: memref<1x32xf32, #tpu.memory_space<vmem>>, %arg4: memref<16x32x64xf32, #tpu.memory_space<vmem>>, %arg5: memref<1x64xf32, #tpu.memory_space<vmem>>, %arg6: memref<9x64x64xf32, #tpu.memory_space<vmem>>, %arg7: memref<1x64xf32, #tpu.memory_space<vmem>>, %arg8: memref<4x64x32xf32, #tpu.memory_space<vmem>>, %arg9: memref<4x1x32xf32, #tpu.memory_space<vmem>>, %arg10: memref<4x32x32xf32, #tpu.memory_space<vmem>>, %arg11: memref<4x1x32xf32, #tpu.memory_space<vmem>>, %arg12: memref<2x32xf32, #tpu.memory_space<vmem>>) attributes {dimension_semantics = [], scalar_prefetch = 0 : i64, scratch_operands = 0 : i64, tpu.core_type = #tpu.core_type<tc>} {
    %c0 = arith.constant 0 : index
    %c0_0 = arith.constant 0 : index
    %0 = vector.load %arg0[%c0, %c0_0] : memref<512x256xf32, #tpu.memory_space<vmem>>, vector<512x256xf32>
    %c0_1 = arith.constant 0 : index
    %c0_2 = arith.constant 0 : index
    %1 = vector.load %arg2[%c0_1, %c0_2] : memref<256x32xf32, #tpu.memory_space<vmem>>, vector<256x32xf32>
    %cst = arith.constant dense<0.000000e+00> : vector<512x32xf32>
    %2 = tpu.matmul %0, %1, %cst {dimension_numbers = #tpu.dot_dimension_numbers<[1], [0], [0], [1], [0, 0, 1, 1], [], []>} : vector<512x256xf32>, vector<256x32xf32>, vector<512x32xf32> -> vector<512x32xf32>
    %c0_3 = arith.constant 0 : index
    %c0_4 = arith.constant 0 : index
    %3 = vector.load %arg3[%c0_3, %c0_4] : memref<1x32xf32, #tpu.memory_space<vmem>>, vector<1x32xf32>
    %4 = vector.broadcast %3 : vector<1x32xf32> to vector<512x32xf32>
    %5 = arith.addf %2, %4 : vector<512x32xf32>
    %cst_5 = arith.constant 0.000000e+00 : f32
    %6 = vector.broadcast %cst_5 : f32 to vector<512x32xf32>
    %7 = arith.maximumf %5, %6 : vector<512x32xf32>
    %cst_6 = arith.constant 0.000000e+00 : f32
    %8 = vector.broadcast %cst_6 : f32 to vector<8x64xf32>
    %cst_7 = arith.constant 0.000000e+00 : f32
    %9 = vector.broadcast %cst_7 : f32 to vector<8x64xf32>
    %10 = vector.extract_strided_slice %7 {offsets = [0, 0], sizes = [8, 32], strides = [1, 1]} : vector<512x32xf32> to vector<8x32xf32>
    %c0_8 = arith.constant 0 : index
    %c0_9 = arith.constant 0 : index
    %c0_10 = arith.constant 0 : index
    %11 = vector.load %arg4[%c0_8, %c0_9, %c0_10] : memref<16x32x64xf32, #tpu.memory_space<vmem>>, vector<1x32x64xf32>
    %12 = vector.shape_cast %11 : vector<1x32x64xf32> to vector<32x64xf32>
    %cst_11 = arith.constant dense<0.000000e+00> : vector<8x64xf32>
    %13 = tpu.matmul %10, %12, %cst_11 {dimension_numbers = #tpu.dot_dimension_numbers<[1], [0], [0], [1], [0, 0, 1, 1], [], []>} : vector<8x32xf32>, vector<32x64xf32>, vector<8x64xf32> -> vector<8x64xf32>
    %14 = arith.addf %9, %13 : vector<8x64xf32>
    %15 = vector.extract_strided_slice %7 {offsets = [8, 0], sizes = [8, 32], strides = [1, 1]} : vector<512x32xf32> to vector<8x32xf32>
    %c1 = arith.constant 1 : index
    %c0_12 = arith.constant 0 : index
    %c0_13 = arith.constant 0 : index
    %16 = vector.load %arg4[%c1, %c0_12, %c0_13] : memref<16x32x64xf32, #tpu.memory_space<vmem>>, vector<1x32x64xf32>
    %17 = vector.shape_cast %16 : vector<1x32x64xf32> to vector<32x64xf32>
    %cst_14 = arith.constant dense<0.000000e+00> : vector<8x64xf32>
    %18 = tpu.matmul %15, %17, %cst_14 {dimension_numbers = #tpu.dot_dimension_numbers<[1], [0], [0], [1], [0, 0, 1, 1], [], []>} : vector<8x32xf32>, vector<32x64xf32>, vector<8x64xf32> -> vector<8x64xf32>
    %19 = arith.addf %14, %18 : vector<8x64xf32>
    %20 = vector.extract_strided_slice %7 {offsets = [16, 0], sizes = [8, 32], strides = [1, 1]} : vector<512x32xf32> to vector<8x32xf32>
    %c2 = arith.constant 2 : index
    %c0_15 = arith.constant 0 : index
    %c0_16 = arith.constant 0 : index
    %21 = vector.load %arg4[%c2, %c0_15, %c0_16] : memref<16x32x64xf32, #tpu.memory_space<vmem>>, vector<1x32x64xf32>
    %22 = vector.shape_cast %21 : vector<1x32x64xf32> to vector<32x64xf32>
    %cst_17 = arith.constant dense<0.000000e+00> : vector<8x64xf32>
    %23 = tpu.matmul %20, %22, %cst_17 {dimension_numbers = #tpu.dot_dimension_numbers<[1], [0], [0], [1], [0, 0, 1, 1], [], []>} : vector<8x32xf32>, vector<32x64xf32>, vector<8x64xf32> -> vector<8x64xf32>
    %24 = arith.addf %19, %23 : vector<8x64xf32>
    %25 = vector.extract_strided_slice %7 {offsets = [24, 0], sizes = [8, 32], strides = [1, 1]} : vector<512x32xf32> to vector<8x32xf32>
    %c3 = arith.constant 3 : index
    %c0_18 = arith.constant 0 : index
    %c0_19 = arith.constant 0 : index
    %26 = vector.load %arg4[%c3, %c0_18, %c0_19] : memref<16x32x64xf32, #tpu.memory_space<vmem>>, vector<1x32x64xf32>
    %27 = vector.shape_cast %26 : vector<1x32x64xf32> to vector<32x64xf32>
    %cst_20 = arith.constant dense<0.000000e+00> : vector<8x64xf32>
    %28 = tpu.matmul %25, %27, %cst_20 {dimension_numbers = #tpu.dot_dimension_numbers<[1], [0], [0], [1], [0, 0, 1, 1], [], []>} : vector<8x32xf32>, vector<32x64xf32>, vector<8x64xf32> -> vector<8x64xf32>
    %29 = arith.addf %24, %28 : vector<8x64xf32>
    %30 = vector.extract_strided_slice %7 {offsets = [64, 0], sizes = [8, 32], strides = [1, 1]} : vector<512x32xf32> to vector<8x32xf32>
    %c4 = arith.constant 4 : index
    %c0_21 = arith.constant 0 : index
    %c0_22 = arith.constant 0 : index
    %31 = vector.load %arg4[%c4, %c0_21, %c0_22] : memref<16x32x64xf32, #tpu.memory_space<vmem>>, vector<1x32x64xf32>
    %32 = vector.shape_cast %31 : vector<1x32x64xf32> to vector<32x64xf32>
    %cst_23 = arith.constant dense<0.000000e+00> : vector<8x64xf32>
    %33 = tpu.matmul %30, %32, %cst_23 {dimension_numbers = #tpu.dot_dimension_numbers<[1], [0], [0], [1], [0, 0, 1, 1], [], []>} : vector<8x32xf32>, vector<32x64xf32>, vector<8x64xf32> -> vector<8x64xf32>
    %34 = arith.addf %29, %33 : vector<8x64xf32>
    %35 = vector.extract_strided_slice %7 {offsets = [72, 0], sizes = [8, 32], strides = [1, 1]} : vector<512x32xf32> to vector<8x32xf32>
    %c5 = arith.constant 5 : index
    %c0_24 = arith.constant 0 : index
    %c0_25 = arith.constant 0 : index
    %36 = vector.load %arg4[%c5, %c0_24, %c0_25] : memref<16x32x64xf32, #tpu.memory_space<vmem>>, vector<1x32x64xf32>
    %37 = vector.shape_cast %36 : vector<1x32x64xf32> to vector<32x64xf32>
    %cst_26 = arith.constant dense<0.000000e+00> : vector<8x64xf32>
    %38 = tpu.matmul %35, %37, %cst_26 {dimension_numbers = #tpu.dot_dimension_numbers<[1], [0], [0], [1], [0, 0, 1, 1], [], []>} : vector<8x32xf32>, vector<32x64xf32>, vector<8x64xf32> -> vector<8x64xf32>
    %39 = arith.addf %34, %38 : vector<8x64xf32>
    %40 = vector.extract_strided_slice %7 {offsets = [80, 0], sizes = [8, 32], strides = [1, 1]} : vector<512x32xf32> to vector<8x32xf32>
    %c6 = arith.constant 6 : index
    %c0_27 = arith.constant 0 : index
    %c0_28 = arith.constant 0 : index
    %41 = vector.load %arg4[%c6, %c0_27, %c0_28] : memref<16x32x64xf32, #tpu.memory_space<vmem>>, vector<1x32x64xf32>
    %42 = vector.shape_cast %41 : vector<1x32x64xf32> to vector<32x64xf32>
    %cst_29 = arith.constant dense<0.000000e+00> : vector<8x64xf32>
    %43 = tpu.matmul %40, %42, %cst_29 {dimension_numbers = #tpu.dot_dimension_numbers<[1], [0], [0], [1], [0, 0, 1, 1], [], []>} : vector<8x32xf32>, vector<32x64xf32>, vector<8x64xf32> -> vector<8x64xf32>
    %44 = arith.addf %39, %43 : vector<8x64xf32>
    %45 = vector.extract_strided_slice %7 {offsets = [88, 0], sizes = [8, 32], strides = [1, 1]} : vector<512x32xf32> to vector<8x32xf32>
    %c7 = arith.constant 7 : index
    %c0_30 = arith.constant 0 : index
    %c0_31 = arith.constant 0 : index
    %46 = vector.load %arg4[%c7, %c0_30, %c0_31] : memref<16x32x64xf32, #tpu.memory_space<vmem>>, vector<1x32x64xf32>
    %47 = vector.shape_cast %46 : vector<1x32x64xf32> to vector<32x64xf32>
    %cst_32 = arith.constant dense<0.000000e+00> : vector<8x64xf32>
    %48 = tpu.matmul %45, %47, %cst_32 {dimension_numbers = #tpu.dot_dimension_numbers<[1], [0], [0], [1], [0, 0, 1, 1], [], []>} : vector<8x32xf32>, vector<32x64xf32>, vector<8x64xf32> -> vector<8x64xf32>
    %49 = arith.addf %44, %48 : vector<8x64xf32>
    %50 = vector.extract_strided_slice %7 {offsets = [128, 0], sizes = [8, 32], strides = [1, 1]} : vector<512x32xf32> to vector<8x32xf32>
    %c8 = arith.constant 8 : index
    %c0_33 = arith.constant 0 : index
    %c0_34 = arith.constant 0 : index
    %51 = vector.load %arg4[%c8, %c0_33, %c0_34] : memref<16x32x64xf32, #tpu.memory_space<vmem>>, vector<1x32x64xf32>
    %52 = vector.shape_cast %51 : vector<1x32x64xf32> to vector<32x64xf32>
    %cst_35 = arith.constant dense<0.000000e+00> : vector<8x64xf32>
    %53 = tpu.matmul %50, %52, %cst_35 {dimension_numbers = #tpu.dot_dimension_numbers<[1], [0], [0], [1], [0, 0, 1, 1], [], []>} : vector<8x32xf32>, vector<32x64xf32>, vector<8x64xf32> -> vector<8x64xf32>
    %54 = arith.addf %49, %53 : vector<8x64xf32>
    %55 = vector.extract_strided_slice %7 {offsets = [136, 0], sizes = [8, 32], strides = [1, 1]} : vector<512x32xf32> to vector<8x32xf32>
    %c9 = arith.constant 9 : index
    %c0_36 = arith.constant 0 : index
    %c0_37 = arith.constant 0 : index
    %56 = vector.load %arg4[%c9, %c0_36, %c0_37] : memref<16x32x64xf32, #tpu.memory_space<vmem>>, vector<1x32x64xf32>
    %57 = vector.shape_cast %56 : vector<1x32x64xf32> to vector<32x64xf32>
    %cst_38 = arith.constant dense<0.000000e+00> : vector<8x64xf32>
    %58 = tpu.matmul %55, %57, %cst_38 {dimension_numbers = #tpu.dot_dimension_numbers<[1], [0], [0], [1], [0, 0, 1, 1], [], []>} : vector<8x32xf32>, vector<32x64xf32>, vector<8x64xf32> -> vector<8x64xf32>
    %59 = arith.addf %54, %58 : vector<8x64xf32>
    %60 = vector.extract_strided_slice %7 {offsets = [144, 0], sizes = [8, 32], strides = [1, 1]} : vector<512x32xf32> to vector<8x32xf32>
    %c10 = arith.constant 10 : index
    %c0_39 = arith.constant 0 : index
    %c0_40 = arith.constant 0 : index
    %61 = vector.load %arg4[%c10, %c0_39, %c0_40] : memref<16x32x64xf32, #tpu.memory_space<vmem>>, vector<1x32x64xf32>
    %62 = vector.shape_cast %61 : vector<1x32x64xf32> to vector<32x64xf32>
    %cst_41 = arith.constant dense<0.000000e+00> : vector<8x64xf32>
    %63 = tpu.matmul %60, %62, %cst_41 {dimension_numbers = #tpu.dot_dimension_numbers<[1], [0], [0], [1], [0, 0, 1, 1], [], []>} : vector<8x32xf32>, vector<32x64xf32>, vector<8x64xf32> -> vector<8x64xf32>
    %64 = arith.addf %59, %63 : vector<8x64xf32>
    %65 = vector.extract_strided_slice %7 {offsets = [152, 0], sizes = [8, 32], strides = [1, 1]} : vector<512x32xf32> to vector<8x32xf32>
    %c11 = arith.constant 11 : index
    %c0_42 = arith.constant 0 : index
    %c0_43 = arith.constant 0 : index
    %66 = vector.load %arg4[%c11, %c0_42, %c0_43] : memref<16x32x64xf32, #tpu.memory_space<vmem>>, vector<1x32x64xf32>
    %67 = vector.shape_cast %66 : vector<1x32x64xf32> to vector<32x64xf32>
    %cst_44 = arith.constant dense<0.000000e+00> : vector<8x64xf32>
    %68 = tpu.matmul %65, %67, %cst_44 {dimension_numbers = #tpu.dot_dimension_numbers<[1], [0], [0], [1], [0, 0, 1, 1], [], []>} : vector<8x32xf32>, vector<32x64xf32>, vector<8x64xf32> -> vector<8x64xf32>
    %69 = arith.addf %64, %68 : vector<8x64xf32>
    %70 = vector.extract_strided_slice %7 {offsets = [192, 0], sizes = [8, 32], strides = [1, 1]} : vector<512x32xf32> to vector<8x32xf32>
    %c12 = arith.constant 12 : index
    %c0_45 = arith.constant 0 : index
    %c0_46 = arith.constant 0 : index
    %71 = vector.load %arg4[%c12, %c0_45, %c0_46] : memref<16x32x64xf32, #tpu.memory_space<vmem>>, vector<1x32x64xf32>
    %72 = vector.shape_cast %71 : vector<1x32x64xf32> to vector<32x64xf32>
    %cst_47 = arith.constant dense<0.000000e+00> : vector<8x64xf32>
    %73 = tpu.matmul %70, %72, %cst_47 {dimension_numbers = #tpu.dot_dimension_numbers<[1], [0], [0], [1], [0, 0, 1, 1], [], []>} : vector<8x32xf32>, vector<32x64xf32>, vector<8x64xf32> -> vector<8x64xf32>
    %74 = arith.addf %69, %73 : vector<8x64xf32>
    %75 = vector.extract_strided_slice %7 {offsets = [200, 0], sizes = [8, 32], strides = [1, 1]} : vector<512x32xf32> to vector<8x32xf32>
    %c13 = arith.constant 13 : index
    %c0_48 = arith.constant 0 : index
    %c0_49 = arith.constant 0 : index
    %76 = vector.load %arg4[%c13, %c0_48, %c0_49] : memref<16x32x64xf32, #tpu.memory_space<vmem>>, vector<1x32x64xf32>
    %77 = vector.shape_cast %76 : vector<1x32x64xf32> to vector<32x64xf32>
    %cst_50 = arith.constant dense<0.000000e+00> : vector<8x64xf32>
    %78 = tpu.matmul %75, %77, %cst_50 {dimension_numbers = #tpu.dot_dimension_numbers<[1], [0], [0], [1], [0, 0, 1, 1], [], []>} : vector<8x32xf32>, vector<32x64xf32>, vector<8x64xf32> -> vector<8x64xf32>
    %79 = arith.addf %74, %78 : vector<8x64xf32>
    %80 = vector.extract_strided_slice %7 {offsets = [208, 0], sizes = [8, 32], strides = [1, 1]} : vector<512x32xf32> to vector<8x32xf32>
    %c14 = arith.constant 14 : index
    %c0_51 = arith.constant 0 : index
    %c0_52 = arith.constant 0 : index
    %81 = vector.load %arg4[%c14, %c0_51, %c0_52] : memref<16x32x64xf32, #tpu.memory_space<vmem>>, vector<1x32x64xf32>
    %82 = vector.shape_cast %81 : vector<1x32x64xf32> to vector<32x64xf32>
    %cst_53 = arith.constant dense<0.000000e+00> : vector<8x64xf32>
    %83 = tpu.matmul %80, %82, %cst_53 {dimension_numbers = #tpu.dot_dimension_numbers<[1], [0], [0], [1], [0, 0, 1, 1], [], []>} : vector<8x32xf32>, vector<32x64xf32>, vector<8x64xf32> -> vector<8x64xf32>
    %84 = arith.addf %79, %83 : vector<8x64xf32>
    %85 = vector.extract_strided_slice %7 {offsets = [216, 0], sizes = [8, 32], strides = [1, 1]} : vector<512x32xf32> to vector<8x32xf32>
    %c15 = arith.constant 15 : index
    %c0_54 = arith.constant 0 : index
    %c0_55 = arith.constant 0 : index
    %86 = vector.load %arg4[%c15, %c0_54, %c0_55] : memref<16x32x64xf32, #tpu.memory_space<vmem>>, vector<1x32x64xf32>
    %87 = vector.shape_cast %86 : vector<1x32x64xf32> to vector<32x64xf32>
    %cst_56 = arith.constant dense<0.000000e+00> : vector<8x64xf32>
    %88 = tpu.matmul %85, %87, %cst_56 {dimension_numbers = #tpu.dot_dimension_numbers<[1], [0], [0], [1], [0, 0, 1, 1], [], []>} : vector<8x32xf32>, vector<32x64xf32>, vector<8x64xf32> -> vector<8x64xf32>
    %89 = arith.addf %84, %88 : vector<8x64xf32>
    %c0_57 = arith.constant 0 : index
    %c0_58 = arith.constant 0 : index
    %90 = vector.load %arg5[%c0_57, %c0_58] : memref<1x64xf32, #tpu.memory_space<vmem>>, vector<1x64xf32>
    %91 = vector.broadcast %90 : vector<1x64xf32> to vector<8x64xf32>
    %92 = arith.addf %89, %91 : vector<8x64xf32>
    %cst_59 = arith.constant 0.000000e+00 : f32
    %93 = vector.broadcast %cst_59 : f32 to vector<8x64xf32>
    %94 = arith.maximumf %92, %93 : vector<8x64xf32>
    %c0_60 = arith.constant 0 : index
    %c0_61 = arith.constant 0 : index
    %c0_62 = arith.constant 0 : index
    %95 = vector.load %arg6[%c0_60, %c0_61, %c0_62] : memref<9x64x64xf32, #tpu.memory_space<vmem>>, vector<1x64x64xf32>
    %96 = vector.shape_cast %95 : vector<1x64x64xf32> to vector<64x64xf32>
    %cst_63 = arith.constant dense<0.000000e+00> : vector<8x64xf32>
    %97 = tpu.matmul %94, %96, %cst_63 {dimension_numbers = #tpu.dot_dimension_numbers<[1], [0], [0], [1], [0, 0, 1, 1], [], []>} : vector<8x64xf32>, vector<64x64xf32>, vector<8x64xf32> -> vector<8x64xf32>
    %98 = arith.addf %8, %97 : vector<8x64xf32>
    %cst_64 = arith.constant 0.000000e+00 : f32
    %99 = vector.broadcast %cst_64 : f32 to vector<8x64xf32>
    %100 = vector.extract_strided_slice %7 {offsets = [16, 0], sizes = [8, 32], strides = [1, 1]} : vector<512x32xf32> to vector<8x32xf32>
    %c0_65 = arith.constant 0 : index
    %c0_66 = arith.constant 0 : index
    %c0_67 = arith.constant 0 : index
    %101 = vector.load %arg4[%c0_65, %c0_66, %c0_67] : memref<16x32x64xf32, #tpu.memory_space<vmem>>, vector<1x32x64xf32>
    %102 = vector.shape_cast %101 : vector<1x32x64xf32> to vector<32x64xf32>
    %cst_68 = arith.constant dense<0.000000e+00> : vector<8x64xf32>
    %103 = tpu.matmul %100, %102, %cst_68 {dimension_numbers = #tpu.dot_dimension_numbers<[1], [0], [0], [1], [0, 0, 1, 1], [], []>} : vector<8x32xf32>, vector<32x64xf32>, vector<8x64xf32> -> vector<8x64xf32>
    %104 = arith.addf %99, %103 : vector<8x64xf32>
    %105 = vector.extract_strided_slice %7 {offsets = [24, 0], sizes = [8, 32], strides = [1, 1]} : vector<512x32xf32> to vector<8x32xf32>
    %c1_69 = arith.constant 1 : index
    %c0_70 = arith.constant 0 : index
    %c0_71 = arith.constant 0 : index
    %106 = vector.load %arg4[%c1_69, %c0_70, %c0_71] : memref<16x32x64xf32, #tpu.memory_space<vmem>>, vector<1x32x64xf32>
    %107 = vector.shape_cast %106 : vector<1x32x64xf32> to vector<32x64xf32>
    %cst_72 = arith.constant dense<0.000000e+00> : vector<8x64xf32>
    %108 = tpu.matmul %105, %107, %cst_72 {dimension_numbers = #tpu.dot_dimension_numbers<[1], [0], [0], [1], [0, 0, 1, 1], [], []>} : vector<8x32xf32>, vector<32x64xf32>, vector<8x64xf32> -> vector<8x64xf32>
    %109 = arith.addf %104, %108 : vector<8x64xf32>
    %110 = vector.extract_strided_slice %7 {offsets = [32, 0], sizes = [8, 32], strides = [1, 1]} : vector<512x32xf32> to vector<8x32xf32>
    %c2_73 = arith.constant 2 : index
    %c0_74 = arith.constant 0 : index
    %c0_75 = arith.constant 0 : index
    %111 = vector.load %arg4[%c2_73, %c0_74, %c0_75] : memref<16x32x64xf32, #tpu.memory_space<vmem>>, vector<1x32x64xf32>
    %112 = vector.shape_cast %111 : vector<1x32x64xf32> to vector<32x64xf32>
    %cst_76 = arith.constant dense<0.000000e+00> : vector<8x64xf32>
    %113 = tpu.matmul %110, %112, %cst_76 {dimension_numbers = #tpu.dot_dimension_numbers<[1], [0], [0], [1], [0, 0, 1, 1], [], []>} : vector<8x32xf32>, vector<32x64xf32>, vector<8x64xf32> -> vector<8x64xf32>
    %114 = arith.addf %109, %113 : vector<8x64xf32>
    %115 = vector.extract_strided_slice %7 {offsets = [40, 0], sizes = [8, 32], strides = [1, 1]} : vector<512x32xf32> to vector<8x32xf32>
    %c3_77 = arith.constant 3 : index
    %c0_78 = arith.constant 0 : index
    %c0_79 = arith.constant 0 : index
    %116 = vector.load %arg4[%c3_77, %c0_78, %c0_79] : memref<16x32x64xf32, #tpu.memory_space<vmem>>, vector<1x32x64xf32>
    %117 = vector.shape_cast %116 : vector<1x32x64xf32> to vector<32x64xf32>
    %cst_80 = arith.constant dense<0.000000e+00> : vector<8x64xf32>
    %118 = tpu.matmul %115, %117, %cst_80 {dimension_numbers = #tpu.dot_dimension_numbers<[1], [0], [0], [1], [0, 0, 1, 1], [], []>} : vector<8x32xf32>, vector<32x64xf32>, vector<8x64xf32> -> vector<8x64xf32>
    %119 = arith.addf %114, %118 : vector<8x64xf32>
    %120 = vector.extract_strided_slice %7 {offsets = [80, 0], sizes = [8, 32], strides = [1, 1]} : vector<512x32xf32> to vector<8x32xf32>
    %c4_81 = arith.constant 4 : index
    %c0_82 = arith.constant 0 : index
    %c0_83 = arith.constant 0 : index
    %121 = vector.load %arg4[%c4_81, %c0_82, %c0_83] : memref<16x32x64xf32, #tpu.memory_space<vmem>>, vector<1x32x64xf32>
    %122 = vector.shape_cast %121 : vector<1x32x64xf32> to vector<32x64xf32>
    %cst_84 = arith.constant dense<0.000000e+00> : vector<8x64xf32>
    %123 = tpu.matmul %120, %122, %cst_84 {dimension_numbers = #tpu.dot_dimension_numbers<[1], [0], [0], [1], [0, 0, 1, 1], [], []>} : vector<8x32xf32>, vector<32x64xf32>, vector<8x64xf32> -> vector<8x64xf32>
    %124 = arith.addf %119, %123 : vector<8x64xf32>
    %125 = vector.extract_strided_slice %7 {offsets = [88, 0], sizes = [8, 32], strides = [1, 1]} : vector<512x32xf32> to vector<8x32xf32>
    %c5_85 = arith.constant 5 : index
    %c0_86 = arith.constant 0 : index
    %c0_87 = arith.constant 0 : index
    %126 = vector.load %arg4[%c5_85, %c0_86, %c0_87] : memref<16x32x64xf32, #tpu.memory_space<vmem>>, vector<1x32x64xf32>
    %127 = vector.shape_cast %126 : vector<1x32x64xf32> to vector<32x64xf32>
    %cst_88 = arith.constant dense<0.000000e+00> : vector<8x64xf32>
    %128 = tpu.matmul %125, %127, %cst_88 {dimension_numbers = #tpu.dot_dimension_numbers<[1], [0], [0], [1], [0, 0, 1, 1], [], []>} : vector<8x32xf32>, vector<32x64xf32>, vector<8x64xf32> -> vector<8x64xf32>
    %129 = arith.addf %124, %128 : vector<8x64xf32>
    %130 = vector.extract_strided_slice %7 {offsets = [96, 0], sizes = [8, 32], strides = [1, 1]} : vector<512x32xf32> to vector<8x32xf32>
    %c6_89 = arith.constant 6 : index
    %c0_90 = arith.constant 0 : index
    %c0_91 = arith.constant 0 : index
    %131 = vector.load %arg4[%c6_89, %c0_90, %c0_91] : memref<16x32x64xf32, #tpu.memory_space<vmem>>, vector<1x32x64xf32>
    %132 = vector.shape_cast %131 : vector<1x32x64xf32> to vector<32x64xf32>
    %cst_92 = arith.constant dense<0.000000e+00> : vector<8x64xf32>
    %133 = tpu.matmul %130, %132, %cst_92 {dimension_numbers = #tpu.dot_dimension_numbers<[1], [0], [0], [1], [0, 0, 1, 1], [], []>} : vector<8x32xf32>, vector<32x64xf32>, vector<8x64xf32> -> vector<8x64xf32>
    %134 = arith.addf %129, %133 : vector<8x64xf32>
    %135 = vector.extract_strided_slice %7 {offsets = [104, 0], sizes = [8, 32], strides = [1, 1]} : vector<512x32xf32> to vector<8x32xf32>
    %c7_93 = arith.constant 7 : index
    %c0_94 = arith.constant 0 : index
    %c0_95 = arith.constant 0 : index
    %136 = vector.load %arg4[%c7_93, %c0_94, %c0_95] : memref<16x32x64xf32, #tpu.memory_space<vmem>>, vector<1x32x64xf32>
    %137 = vector.shape_cast %136 : vector<1x32x64xf32> to vector<32x64xf32>
    %cst_96 = arith.constant dense<0.000000e+00> : vector<8x64xf32>
    %138 = tpu.matmul %135, %137, %cst_96 {dimension_numbers = #tpu.dot_dimension_numbers<[1], [0], [0], [1], [0, 0, 1, 1], [], []>} : vector<8x32xf32>, vector<32x64xf32>, vector<8x64xf32> -> vector<8x64xf32>
    %139 = arith.addf %134, %138 : vector<8x64xf32>
    %140 = vector.extract_strided_slice %7 {offsets = [144, 0], sizes = [8, 32], strides = [1, 1]} : vector<512x32xf32> to vector<8x32xf32>
    %c8_97 = arith.constant 8 : index
    %c0_98 = arith.constant 0 : index
    %c0_99 = arith.constant 0 : index
    %141 = vector.load %arg4[%c8_97, %c0_98, %c0_99] : memref<16x32x64xf32, #tpu.memory_space<vmem>>, vector<1x32x64xf32>
    %142 = vector.shape_cast %141 : vector<1x32x64xf32> to vector<32x64xf32>
    %cst_100 = arith.constant dense<0.000000e+00> : vector<8x64xf32>
    %143 = tpu.matmul %140, %142, %cst_100 {dimension_numbers = #tpu.dot_dimension_numbers<[1], [0], [0], [1], [0, 0, 1, 1], [], []>} : vector<8x32xf32>, vector<32x64xf32>, vector<8x64xf32> -> vector<8x64xf32>
    %144 = arith.addf %139, %143 : vector<8x64xf32>
    %145 = vector.extract_strided_slice %7 {offsets = [152, 0], sizes = [8, 32], strides = [1, 1]} : vector<512x32xf32> to vector<8x32xf32>
    %c9_101 = arith.constant 9 : index
    %c0_102 = arith.constant 0 : index
    %c0_103 = arith.constant 0 : index
    %146 = vector.load %arg4[%c9_101, %c0_102, %c0_103] : memref<16x32x64xf32, #tpu.memory_space<vmem>>, vector<1x32x64xf32>
    %147 = vector.shape_cast %146 : vector<1x32x64xf32> to vector<32x64xf32>
    %cst_104 = arith.constant dense<0.000000e+00> : vector<8x64xf32>
    %148 = tpu.matmul %145, %147, %cst_104 {dimension_numbers = #tpu.dot_dimension_numbers<[1], [0], [0], [1], [0, 0, 1, 1], [], []>} : vector<8x32xf32>, vector<32x64xf32>, vector<8x64xf32> -> vector<8x64xf32>
    %149 = arith.addf %144, %148 : vector<8x64xf32>
    %150 = vector.extract_strided_slice %7 {offsets = [160, 0], sizes = [8, 32], strides = [1, 1]} : vector<512x32xf32> to vector<8x32xf32>
    %c10_105 = arith.constant 10 : index
    %c0_106 = arith.constant 0 : index
    %c0_107 = arith.constant 0 : index
    %151 = vector.load %arg4[%c10_105, %c0_106, %c0_107] : memref<16x32x64xf32, #tpu.memory_space<vmem>>, vector<1x32x64xf32>
    %152 = vector.shape_cast %151 : vector<1x32x64xf32> to vector<32x64xf32>
    %cst_108 = arith.constant dense<0.000000e+00> : vector<8x64xf32>
    %153 = tpu.matmul %150, %152, %cst_108 {dimension_numbers = #tpu.dot_dimension_numbers<[1], [0], [0], [1], [0, 0, 1, 1], [], []>} : vector<8x32xf32>, vector<32x64xf32>, vector<8x64xf32> -> vector<8x64xf32>
    %154 = arith.addf %149, %153 : vector<8x64xf32>
    %155 = vector.extract_strided_slice %7 {offsets = [168, 0], sizes = [8, 32], strides = [1, 1]} : vector<512x32xf32> to vector<8x32xf32>
    %c11_109 = arith.constant 11 : index
    %c0_110 = arith.constant 0 : index
    %c0_111 = arith.constant 0 : index
    %156 = vector.load %arg4[%c11_109, %c0_110, %c0_111] : memref<16x32x64xf32, #tpu.memory_space<vmem>>, vector<1x32x64xf32>
    %157 = vector.shape_cast %156 : vector<1x32x64xf32> to vector<32x64xf32>
    %cst_112 = arith.constant dense<0.000000e+00> : vector<8x64xf32>
    %158 = tpu.matmul %155, %157, %cst_112 {dimension_numbers = #tpu.dot_dimension_numbers<[1], [0], [0], [1], [0, 0, 1, 1], [], []>} : vector<8x32xf32>, vector<32x64xf32>, vector<8x64xf32> -> vector<8x64xf32>
    %159 = arith.addf %154, %158 : vector<8x64xf32>
    %160 = vector.extract_strided_slice %7 {offsets = [208, 0], sizes = [8, 32], strides = [1, 1]} : vector<512x32xf32> to vector<8x32xf32>
    %c12_113 = arith.constant 12 : index
    %c0_114 = arith.constant 0 : index
    %c0_115 = arith.constant 0 : index
    %161 = vector.load %arg4[%c12_113, %c0_114, %c0_115] : memref<16x32x64xf32, #tpu.memory_space<vmem>>, vector<1x32x64xf32>
    %162 = vector.shape_cast %161 : vector<1x32x64xf32> to vector<32x64xf32>
    %cst_116 = arith.constant dense<0.000000e+00> : vector<8x64xf32>
    %163 = tpu.matmul %160, %162, %cst_116 {dimension_numbers = #tpu.dot_dimension_numbers<[1], [0], [0], [1], [0, 0, 1, 1], [], []>} : vector<8x32xf32>, vector<32x64xf32>, vector<8x64xf32> -> vector<8x64xf32>
    %164 = arith.addf %159, %163 : vector<8x64xf32>
    %165 = vector.extract_strided_slice %7 {offsets = [216, 0], sizes = [8, 32], strides = [1, 1]} : vector<512x32xf32> to vector<8x32xf32>
    %c13_117 = arith.constant 13 : index
    %c0_118 = arith.constant 0 : index
    %c0_119 = arith.constant 0 : index
    %166 = vector.load %arg4[%c13_117, %c0_118, %c0_119] : memref<16x32x64xf32, #tpu.memory_space<vmem>>, vector<1x32x64xf32>
    %167 = vector.shape_cast %166 : vector<1x32x64xf32> to vector<32x64xf32>
    %cst_120 = arith.constant dense<0.000000e+00> : vector<8x64xf32>
    %168 = tpu.matmul %165, %167, %cst_120 {dimension_numbers = #tpu.dot_dimension_numbers<[1], [0], [0], [1], [0, 0, 1, 1], [], []>} : vector<8x32xf32>, vector<32x64xf32>, vector<8x64xf32> -> vector<8x64xf32>
    %169 = arith.addf %164, %168 : vector<8x64xf32>
    %170 = vector.extract_strided_slice %7 {offsets = [224, 0], sizes = [8, 32], strides = [1, 1]} : vector<512x32xf32> to vector<8x32xf32>
    %c14_121 = arith.constant 14 : index
    %c0_122 = arith.constant 0 : index
    %c0_123 = arith.constant 0 : index
    %171 = vector.load %arg4[%c14_121, %c0_122, %c0_123] : memref<16x32x64xf32, #tpu.memory_space<vmem>>, vector<1x32x64xf32>
    %172 = vector.shape_cast %171 : vector<1x32x64xf32> to vector<32x64xf32>
    %cst_124 = arith.constant dense<0.000000e+00> : vector<8x64xf32>
    %173 = tpu.matmul %170, %172, %cst_124 {dimension_numbers = #tpu.dot_dimension_numbers<[1], [0], [0], [1], [0, 0, 1, 1], [], []>} : vector<8x32xf32>, vector<32x64xf32>, vector<8x64xf32> -> vector<8x64xf32>
    %174 = arith.addf %169, %173 : vector<8x64xf32>
    %175 = vector.extract_strided_slice %7 {offsets = [232, 0], sizes = [8, 32], strides = [1, 1]} : vector<512x32xf32> to vector<8x32xf32>
    %c15_125 = arith.constant 15 : index
    %c0_126 = arith.constant 0 : index
    %c0_127 = arith.constant 0 : index
    %176 = vector.load %arg4[%c15_125, %c0_126, %c0_127] : memref<16x32x64xf32, #tpu.memory_space<vmem>>, vector<1x32x64xf32>
    %177 = vector.shape_cast %176 : vector<1x32x64xf32> to vector<32x64xf32>
    %cst_128 = arith.constant dense<0.000000e+00> : vector<8x64xf32>
    %178 = tpu.matmul %175, %177, %cst_128 {dimension_numbers = #tpu.dot_dimension_numbers<[1], [0], [0], [1], [0, 0, 1, 1], [], []>} : vector<8x32xf32>, vector<32x64xf32>, vector<8x64xf32> -> vector<8x64xf32>
    %179 = arith.addf %174, %178 : vector<8x64xf32>
    %c0_129 = arith.constant 0 : index
    %c0_130 = arith.constant 0 : index
    %180 = vector.load %arg5[%c0_129, %c0_130] : memref<1x64xf32, #tpu.memory_space<vmem>>, vector<1x64xf32>
    %181 = vector.broadcast %180 : vector<1x64xf32> to vector<8x64xf32>
    %182 = arith.addf %179, %181 : vector<8x64xf32>
    %cst_131 = arith.constant 0.000000e+00 : f32
    %183 = vector.broadcast %cst_131 : f32 to vector<8x64xf32>
    %184 = arith.maximumf %182, %183 : vector<8x64xf32>
    %c1_132 = arith.constant 1 : index
    %c0_133 = arith.constant 0 : index
    %c0_134 = arith.constant 0 : index
    %185 = vector.load %arg6[%c1_132, %c0_133, %c0_134] : memref<9x64x64xf32, #tpu.memory_space<vmem>>, vector<1x64x64xf32>
    %186 = vector.shape_cast %185 : vector<1x64x64xf32> to vector<64x64xf32>
    %cst_135 = arith.constant dense<0.000000e+00> : vector<8x64xf32>
    %187 = tpu.matmul %184, %186, %cst_135 {dimension_numbers = #tpu.dot_dimension_numbers<[1], [0], [0], [1], [0, 0, 1, 1], [], []>} : vector<8x64xf32>, vector<64x64xf32>, vector<8x64xf32> -> vector<8x64xf32>
    %188 = arith.addf %98, %187 : vector<8x64xf32>
    %cst_136 = arith.constant 0.000000e+00 : f32
    %189 = vector.broadcast %cst_136 : f32 to vector<8x64xf32>
    %190 = vector.extract_strided_slice %7 {offsets = [32, 0], sizes = [8, 32], strides = [1, 1]} : vector<512x32xf32> to vector<8x32xf32>
    %c0_137 = arith.constant 0 : index
    %c0_138 = arith.constant 0 : index
    %c0_139 = arith.constant 0 : index
    %191 = vector.load %arg4[%c0_137, %c0_138, %c0_139] : memref<16x32x64xf32, #tpu.memory_space<vmem>>, vector<1x32x64xf32>
    %192 = vector.shape_cast %191 : vector<1x32x64xf32> to vector<32x64xf32>
    %cst_140 = arith.constant dense<0.000000e+00> : vector<8x64xf32>
    %193 = tpu.matmul %190, %192, %cst_140 {dimension_numbers = #tpu.dot_dimension_numbers<[1], [0], [0], [1], [0, 0, 1, 1], [], []>} : vector<8x32xf32>, vector<32x64xf32>, vector<8x64xf32> -> vector<8x64xf32>
    %194 = arith.addf %189, %193 : vector<8x64xf32>
    %195 = vector.extract_strided_slice %7 {offsets = [40, 0], sizes = [8, 32], strides = [1, 1]} : vector<512x32xf32> to vector<8x32xf32>
    %c1_141 = arith.constant 1 : index
    %c0_142 = arith.constant 0 : index
    %c0_143 = arith.constant 0 : index
    %196 = vector.load %arg4[%c1_141, %c0_142, %c0_143] : memref<16x32x64xf32, #tpu.memory_space<vmem>>, vector<1x32x64xf32>
    %197 = vector.shape_cast %196 : vector<1x32x64xf32> to vector<32x64xf32>
    %cst_144 = arith.constant dense<0.000000e+00> : vector<8x64xf32>
    %198 = tpu.matmul %195, %197, %cst_144 {dimension_numbers = #tpu.dot_dimension_numbers<[1], [0], [0], [1], [0, 0, 1, 1], [], []>} : vector<8x32xf32>, vector<32x64xf32>, vector<8x64xf32> -> vector<8x64xf32>
    %199 = arith.addf %194, %198 : vector<8x64xf32>
    %200 = vector.extract_strided_slice %7 {offsets = [48, 0], sizes = [8, 32], strides = [1, 1]} : vector<512x32xf32> to vector<8x32xf32>
    %c2_145 = arith.constant 2 : index
    %c0_146 = arith.constant 0 : index
    %c0_147 = arith.constant 0 : index
    %201 = vector.load %arg4[%c2_145, %c0_146, %c0_147] : memref<16x32x64xf32, #tpu.memory_space<vmem>>, vector<1x32x64xf32>
    %202 = vector.shape_cast %201 : vector<1x32x64xf32> to vector<32x64xf32>
    %cst_148 = arith.constant dense<0.000000e+00> : vector<8x64xf32>
    %203 = tpu.matmul %200, %202, %cst_148 {dimension_numbers = #tpu.dot_dimension_numbers<[1], [0], [0], [1], [0, 0, 1, 1], [], []>} : vector<8x32xf32>, vector<32x64xf32>, vector<8x64xf32> -> vector<8x64xf32>
    %204 = arith.addf %199, %203 : vector<8x64xf32>
    %205 = vector.extract_strided_slice %7 {offsets = [56, 0], sizes = [8, 32], strides = [1, 1]} : vector<512x32xf32> to vector<8x32xf32>
    %c3_149 = arith.constant 3 : index
    %c0_150 = arith.constant 0 : index
    %c0_151 = arith.constant 0 : index
    %206 = vector.load %arg4[%c3_149, %c0_150, %c0_151] : memref<16x32x64xf32, #tpu.memory_space<vmem>>, vector<1x32x64xf32>
    %207 = vector.shape_cast %206 : vector<1x32x64xf32> to vector<32x64xf32>
    %cst_152 = arith.constant dense<0.000000e+00> : vector<8x64xf32>
    %208 = tpu.matmul %205, %207, %cst_152 {dimension_numbers = #tpu.dot_dimension_numbers<[1], [0], [0], [1], [0, 0, 1, 1], [], []>} : vector<8x32xf32>, vector<32x64xf32>, vector<8x64xf32> -> vector<8x64xf32>
    %209 = arith.addf %204, %208 : vector<8x64xf32>
    %210 = vector.extract_strided_slice %7 {offsets = [96, 0], sizes = [8, 32], strides = [1, 1]} : vector<512x32xf32> to vector<8x32xf32>
    %c4_153 = arith.constant 4 : index
    %c0_154 = arith.constant 0 : index
    %c0_155 = arith.constant 0 : index
    %211 = vector.load %arg4[%c4_153, %c0_154, %c0_155] : memref<16x32x64xf32, #tpu.memory_space<vmem>>, vector<1x32x64xf32>
    %212 = vector.shape_cast %211 : vector<1x32x64xf32> to vector<32x64xf32>
    %cst_156 = arith.constant dense<0.000000e+00> : vector<8x64xf32>
    %213 = tpu.matmul %210, %212, %cst_156 {dimension_numbers = #tpu.dot_dimension_numbers<[1], [0], [0], [1], [0, 0, 1, 1], [], []>} : vector<8x32xf32>, vector<32x64xf32>, vector<8x64xf32> -> vector<8x64xf32>
    %214 = arith.addf %209, %213 : vector<8x64xf32>
    %215 = vector.extract_strided_slice %7 {offsets = [104, 0], sizes = [8, 32], strides = [1, 1]} : vector<512x32xf32> to vector<8x32xf32>
    %c5_157 = arith.constant 5 : index
    %c0_158 = arith.constant 0 : index
    %c0_159 = arith.constant 0 : index
    %216 = vector.load %arg4[%c5_157, %c0_158, %c0_159] : memref<16x32x64xf32, #tpu.memory_space<vmem>>, vector<1x32x64xf32>
    %217 = vector.shape_cast %216 : vector<1x32x64xf32> to vector<32x64xf32>
    %cst_160 = arith.constant dense<0.000000e+00> : vector<8x64xf32>
    %218 = tpu.matmul %215, %217, %cst_160 {dimension_numbers = #tpu.dot_dimension_numbers<[1], [0], [0], [1], [0, 0, 1, 1], [], []>} : vector<8x32xf32>, vector<32x64xf32>, vector<8x64xf32> -> vector<8x64xf32>
    %219 = arith.addf %214, %218 : vector<8x64xf32>
    %220 = vector.extract_strided_slice %7 {offsets = [112, 0], sizes = [8, 32], strides = [1, 1]} : vector<512x32xf32> to vector<8x32xf32>
    %c6_161 = arith.constant 6 : index
    %c0_162 = arith.constant 0 : index
    %c0_163 = arith.constant 0 : index
    %221 = vector.load %arg4[%c6_161, %c0_162, %c0_163] : memref<16x32x64xf32, #tpu.memory_space<vmem>>, vector<1x32x64xf32>
    %222 = vector.shape_cast %221 : vector<1x32x64xf32> to vector<32x64xf32>
    %cst_164 = arith.constant dense<0.000000e+00> : vector<8x64xf32>
    %223 = tpu.matmul %220, %222, %cst_164 {dimension_numbers = #tpu.dot_dimension_numbers<[1], [0], [0], [1], [0, 0, 1, 1], [], []>} : vector<8x32xf32>, vector<32x64xf32>, vector<8x64xf32> -> vector<8x64xf32>
    %224 = arith.addf %219, %223 : vector<8x64xf32>
    %225 = vector.extract_strided_slice %7 {offsets = [120, 0], sizes = [8, 32], strides = [1, 1]} : vector<512x32xf32> to vector<8x32xf32>
    %c7_165 = arith.constant 7 : index
    %c0_166 = arith.constant 0 : index
    %c0_167 = arith.constant 0 : index
    %226 = vector.load %arg4[%c7_165, %c0_166, %c0_167] : memref<16x32x64xf32, #tpu.memory_space<vmem>>, vector<1x32x64xf32>
    %227 = vector.shape_cast %226 : vector<1x32x64xf32> to vector<32x64xf32>
    %cst_168 = arith.constant dense<0.000000e+00> : vector<8x64xf32>
    %228 = tpu.matmul %225, %227, %cst_168 {dimension_numbers = #tpu.dot_dimension_numbers<[1], [0], [0], [1], [0, 0, 1, 1], [], []>} : vector<8x32xf32>, vector<32x64xf32>, vector<8x64xf32> -> vector<8x64xf32>
    %229 = arith.addf %224, %228 : vector<8x64xf32>
    %230 = vector.extract_strided_slice %7 {offsets = [160, 0], sizes = [8, 32], strides = [1, 1]} : vector<512x32xf32> to vector<8x32xf32>
    %c8_169 = arith.constant 8 : index
    %c0_170 = arith.constant 0 : index
    %c0_171 = arith.constant 0 : index
    %231 = vector.load %arg4[%c8_169, %c0_170, %c0_171] : memref<16x32x64xf32, #tpu.memory_space<vmem>>, vector<1x32x64xf32>
    %232 = vector.shape_cast %231 : vector<1x32x64xf32> to vector<32x64xf32>
    %cst_172 = arith.constant dense<0.000000e+00> : vector<8x64xf32>
    %233 = tpu.matmul %230, %232, %cst_172 {dimension_numbers = #tpu.dot_dimension_numbers<[1], [0], [0], [1], [0, 0, 1, 1], [], []>} : vector<8x32xf32>, vector<32x64xf32>, vector<8x64xf32> -> vector<8x64xf32>
    %234 = arith.addf %229, %233 : vector<8x64xf32>
    %235 = vector.extract_strided_slice %7 {offsets = [168, 0], sizes = [8, 32], strides = [1, 1]} : vector<512x32xf32> to vector<8x32xf32>
    %c9_173 = arith.constant 9 : index
    %c0_174 = arith.constant 0 : index
    %c0_175 = arith.constant 0 : index
    %236 = vector.load %arg4[%c9_173, %c0_174, %c0_175] : memref<16x32x64xf32, #tpu.memory_space<vmem>>, vector<1x32x64xf32>
    %237 = vector.shape_cast %236 : vector<1x32x64xf32> to vector<32x64xf32>
    %cst_176 = arith.constant dense<0.000000e+00> : vector<8x64xf32>
    %238 = tpu.matmul %235, %237, %cst_176 {dimension_numbers = #tpu.dot_dimension_numbers<[1], [0], [0], [1], [0, 0, 1, 1], [], []>} : vector<8x32xf32>, vector<32x64xf32>, vector<8x64xf32> -> vector<8x64xf32>
    %239 = arith.addf %234, %238 : vector<8x64xf32>
    %240 = vector.extract_strided_slice %7 {offsets = [176, 0], sizes = [8, 32], strides = [1, 1]} : vector<512x32xf32> to vector<8x32xf32>
    %c10_177 = arith.constant 10 : index
    %c0_178 = arith.constant 0 : index
    %c0_179 = arith.constant 0 : index
    %241 = vector.load %arg4[%c10_177, %c0_178, %c0_179] : memref<16x32x64xf32, #tpu.memory_space<vmem>>, vector<1x32x64xf32>
    %242 = vector.shape_cast %241 : vector<1x32x64xf32> to vector<32x64xf32>
    %cst_180 = arith.constant dense<0.000000e+00> : vector<8x64xf32>
    %243 = tpu.matmul %240, %242, %cst_180 {dimension_numbers = #tpu.dot_dimension_numbers<[1], [0], [0], [1], [0, 0, 1, 1], [], []>} : vector<8x32xf32>, vector<32x64xf32>, vector<8x64xf32> -> vector<8x64xf32>
    %244 = arith.addf %239, %243 : vector<8x64xf32>
    %245 = vector.extract_strided_slice %7 {offsets = [184, 0], sizes = [8, 32], strides = [1, 1]} : vector<512x32xf32> to vector<8x32xf32>
    %c11_181 = arith.constant 11 : index
    %c0_182 = arith.constant 0 : index
    %c0_183 = arith.constant 0 : index
    %246 = vector.load %arg4[%c11_181, %c0_182, %c0_183] : memref<16x32x64xf32, #tpu.memory_space<vmem>>, vector<1x32x64xf32>
    %247 = vector.shape_cast %246 : vector<1x32x64xf32> to vector<32x64xf32>
    %cst_184 = arith.constant dense<0.000000e+00> : vector<8x64xf32>
    %248 = tpu.matmul %245, %247, %cst_184 {dimension_numbers = #tpu.dot_dimension_numbers<[1], [0], [0], [1], [0, 0, 1, 1], [], []>} : vector<8x32xf32>, vector<32x64xf32>, vector<8x64xf32> -> vector<8x64xf32>
    %249 = arith.addf %244, %248 : vector<8x64xf32>
    %250 = vector.extract_strided_slice %7 {offsets = [224, 0], sizes = [8, 32], strides = [1, 1]} : vector<512x32xf32> to vector<8x32xf32>
    %c12_185 = arith.constant 12 : index
    %c0_186 = arith.constant 0 : index
    %c0_187 = arith.constant 0 : index
    %251 = vector.load %arg4[%c12_185, %c0_186, %c0_187] : memref<16x32x64xf32, #tpu.memory_space<vmem>>, vector<1x32x64xf32>
    %252 = vector.shape_cast %251 : vector<1x32x64xf32> to vector<32x64xf32>
    %cst_188 = arith.constant dense<0.000000e+00> : vector<8x64xf32>
    %253 = tpu.matmul %250, %252, %cst_188 {dimension_numbers = #tpu.dot_dimension_numbers<[1], [0], [0], [1], [0, 0, 1, 1], [], []>} : vector<8x32xf32>, vector<32x64xf32>, vector<8x64xf32> -> vector<8x64xf32>
    %254 = arith.addf %249, %253 : vector<8x64xf32>
    %255 = vector.extract_strided_slice %7 {offsets = [232, 0], sizes = [8, 32], strides = [1, 1]} : vector<512x32xf32> to vector<8x32xf32>
    %c13_189 = arith.constant 13 : index
    %c0_190 = arith.constant 0 : index
    %c0_191 = arith.constant 0 : index
    %256 = vector.load %arg4[%c13_189, %c0_190, %c0_191] : memref<16x32x64xf32, #tpu.memory_space<vmem>>, vector<1x32x64xf32>
    %257 = vector.shape_cast %256 : vector<1x32x64xf32> to vector<32x64xf32>
    %cst_192 = arith.constant dense<0.000000e+00> : vector<8x64xf32>
    %258 = tpu.matmul %255, %257, %cst_192 {dimension_numbers = #tpu.dot_dimension_numbers<[1], [0], [0], [1], [0, 0, 1, 1], [], []>} : vector<8x32xf32>, vector<32x64xf32>, vector<8x64xf32> -> vector<8x64xf32>
    %259 = arith.addf %254, %258 : vector<8x64xf32>
    %260 = vector.extract_strided_slice %7 {offsets = [240, 0], sizes = [8, 32], strides = [1, 1]} : vector<512x32xf32> to vector<8x32xf32>
    %c14_193 = arith.constant 14 : index
    %c0_194 = arith.constant 0 : index
    %c0_195 = arith.constant 0 : index
    %261 = vector.load %arg4[%c14_193, %c0_194, %c0_195] : memref<16x32x64xf32, #tpu.memory_space<vmem>>, vector<1x32x64xf32>
    %262 = vector.shape_cast %261 : vector<1x32x64xf32> to vector<32x64xf32>
    %cst_196 = arith.constant dense<0.000000e+00> : vector<8x64xf32>
    %263 = tpu.matmul %260, %262, %cst_196 {dimension_numbers = #tpu.dot_dimension_numbers<[1], [0], [0], [1], [0, 0, 1, 1], [], []>} : vector<8x32xf32>, vector<32x64xf32>, vector<8x64xf32> -> vector<8x64xf32>
    %264 = arith.addf %259, %263 : vector<8x64xf32>
    %265 = vector.extract_strided_slice %7 {offsets = [248, 0], sizes = [8, 32], strides = [1, 1]} : vector<512x32xf32> to vector<8x32xf32>
    %c15_197 = arith.constant 15 : index
    %c0_198 = arith.constant 0 : index
    %c0_199 = arith.constant 0 : index
    %266 = vector.load %arg4[%c15_197, %c0_198, %c0_199] : memref<16x32x64xf32, #tpu.memory_space<vmem>>, vector<1x32x64xf32>
    %267 = vector.shape_cast %266 : vector<1x32x64xf32> to vector<32x64xf32>
    %cst_200 = arith.constant dense<0.000000e+00> : vector<8x64xf32>
    %268 = tpu.matmul %265, %267, %cst_200 {dimension_numbers = #tpu.dot_dimension_numbers<[1], [0], [0], [1], [0, 0, 1, 1], [], []>} : vector<8x32xf32>, vector<32x64xf32>, vector<8x64xf32> -> vector<8x64xf32>
    %269 = arith.addf %264, %268 : vector<8x64xf32>
    %c0_201 = arith.constant 0 : index
    %c0_202 = arith.constant 0 : index
    %270 = vector.load %arg5[%c0_201, %c0_202] : memref<1x64xf32, #tpu.memory_space<vmem>>, vector<1x64xf32>
    %271 = vector.broadcast %270 : vector<1x64xf32> to vector<8x64xf32>
    %272 = arith.addf %269, %271 : vector<8x64xf32>
    %cst_203 = arith.constant 0.000000e+00 : f32
    %273 = vector.broadcast %cst_203 : f32 to vector<8x64xf32>
    %274 = arith.maximumf %272, %273 : vector<8x64xf32>
    %c2_204 = arith.constant 2 : index
    %c0_205 = arith.constant 0 : index
    %c0_206 = arith.constant 0 : index
    %275 = vector.load %arg6[%c2_204, %c0_205, %c0_206] : memref<9x64x64xf32, #tpu.memory_space<vmem>>, vector<1x64x64xf32>
    %276 = vector.shape_cast %275 : vector<1x64x64xf32> to vector<64x64xf32>
    %cst_207 = arith.constant dense<0.000000e+00> : vector<8x64xf32>
    %277 = tpu.matmul %274, %276, %cst_207 {dimension_numbers = #tpu.dot_dimension_numbers<[1], [0], [0], [1], [0, 0, 1, 1], [], []>} : vector<8x64xf32>, vector<64x64xf32>, vector<8x64xf32> -> vector<8x64xf32>
    %278 = arith.addf %188, %277 : vector<8x64xf32>
    %cst_208 = arith.constant 0.000000e+00 : f32
    %279 = vector.broadcast %cst_208 : f32 to vector<8x64xf32>
    %280 = vector.extract_strided_slice %7 {offsets = [128, 0], sizes = [8, 32], strides = [1, 1]} : vector<512x32xf32> to vector<8x32xf32>
    %c0_209 = arith.constant 0 : index
    %c0_210 = arith.constant 0 : index
    %c0_211 = arith.constant 0 : index
    %281 = vector.load %arg4[%c0_209, %c0_210, %c0_211] : memref<16x32x64xf32, #tpu.memory_space<vmem>>, vector<1x32x64xf32>
    %282 = vector.shape_cast %281 : vector<1x32x64xf32> to vector<32x64xf32>
    %cst_212 = arith.constant dense<0.000000e+00> : vector<8x64xf32>
    %283 = tpu.matmul %280, %282, %cst_212 {dimension_numbers = #tpu.dot_dimension_numbers<[1], [0], [0], [1], [0, 0, 1, 1], [], []>} : vector<8x32xf32>, vector<32x64xf32>, vector<8x64xf32> -> vector<8x64xf32>
    %284 = arith.addf %279, %283 : vector<8x64xf32>
    %285 = vector.extract_strided_slice %7 {offsets = [136, 0], sizes = [8, 32], strides = [1, 1]} : vector<512x32xf32> to vector<8x32xf32>
    %c1_213 = arith.constant 1 : index
    %c0_214 = arith.constant 0 : index
    %c0_215 = arith.constant 0 : index
    %286 = vector.load %arg4[%c1_213, %c0_214, %c0_215] : memref<16x32x64xf32, #tpu.memory_space<vmem>>, vector<1x32x64xf32>
    %287 = vector.shape_cast %286 : vector<1x32x64xf32> to vector<32x64xf32>
    %cst_216 = arith.constant dense<0.000000e+00> : vector<8x64xf32>
    %288 = tpu.matmul %285, %287, %cst_216 {dimension_numbers = #tpu.dot_dimension_numbers<[1], [0], [0], [1], [0, 0, 1, 1], [], []>} : vector<8x32xf32>, vector<32x64xf32>, vector<8x64xf32> -> vector<8x64xf32>
    %289 = arith.addf %284, %288 : vector<8x64xf32>
    %290 = vector.extract_strided_slice %7 {offsets = [144, 0], sizes = [8, 32], strides = [1, 1]} : vector<512x32xf32> to vector<8x32xf32>
    %c2_217 = arith.constant 2 : index
    %c0_218 = arith.constant 0 : index
    %c0_219 = arith.constant 0 : index
    %291 = vector.load %arg4[%c2_217, %c0_218, %c0_219] : memref<16x32x64xf32, #tpu.memory_space<vmem>>, vector<1x32x64xf32>
    %292 = vector.shape_cast %291 : vector<1x32x64xf32> to vector<32x64xf32>
    %cst_220 = arith.constant dense<0.000000e+00> : vector<8x64xf32>
    %293 = tpu.matmul %290, %292, %cst_220 {dimension_numbers = #tpu.dot_dimension_numbers<[1], [0], [0], [1], [0, 0, 1, 1], [], []>} : vector<8x32xf32>, vector<32x64xf32>, vector<8x64xf32> -> vector<8x64xf32>
    %294 = arith.addf %289, %293 : vector<8x64xf32>
    %295 = vector.extract_strided_slice %7 {offsets = [152, 0], sizes = [8, 32], strides = [1, 1]} : vector<512x32xf32> to vector<8x32xf32>
    %c3_221 = arith.constant 3 : index
    %c0_222 = arith.constant 0 : index
    %c0_223 = arith.constant 0 : index
    %296 = vector.load %arg4[%c3_221, %c0_222, %c0_223] : memref<16x32x64xf32, #tpu.memory_space<vmem>>, vector<1x32x64xf32>
    %297 = vector.shape_cast %296 : vector<1x32x64xf32> to vector<32x64xf32>
    %cst_224 = arith.constant dense<0.000000e+00> : vector<8x64xf32>
    %298 = tpu.matmul %295, %297, %cst_224 {dimension_numbers = #tpu.dot_dimension_numbers<[1], [0], [0], [1], [0, 0, 1, 1], [], []>} : vector<8x32xf32>, vector<32x64xf32>, vector<8x64xf32> -> vector<8x64xf32>
    %299 = arith.addf %294, %298 : vector<8x64xf32>
    %300 = vector.extract_strided_slice %7 {offsets = [192, 0], sizes = [8, 32], strides = [1, 1]} : vector<512x32xf32> to vector<8x32xf32>
    %c4_225 = arith.constant 4 : index
    %c0_226 = arith.constant 0 : index
    %c0_227 = arith.constant 0 : index
    %301 = vector.load %arg4[%c4_225, %c0_226, %c0_227] : memref<16x32x64xf32, #tpu.memory_space<vmem>>, vector<1x32x64xf32>
    %302 = vector.shape_cast %301 : vector<1x32x64xf32> to vector<32x64xf32>
    %cst_228 = arith.constant dense<0.000000e+00> : vector<8x64xf32>
    %303 = tpu.matmul %300, %302, %cst_228 {dimension_numbers = #tpu.dot_dimension_numbers<[1], [0], [0], [1], [0, 0, 1, 1], [], []>} : vector<8x32xf32>, vector<32x64xf32>, vector<8x64xf32> -> vector<8x64xf32>
    %304 = arith.addf %299, %303 : vector<8x64xf32>
    %305 = vector.extract_strided_slice %7 {offsets = [200, 0], sizes = [8, 32], strides = [1, 1]} : vector<512x32xf32> to vector<8x32xf32>
    %c5_229 = arith.constant 5 : index
    %c0_230 = arith.constant 0 : index
    %c0_231 = arith.constant 0 : index
    %306 = vector.load %arg4[%c5_229, %c0_230, %c0_231] : memref<16x32x64xf32, #tpu.memory_space<vmem>>, vector<1x32x64xf32>
    %307 = vector.shape_cast %306 : vector<1x32x64xf32> to vector<32x64xf32>
    %cst_232 = arith.constant dense<0.000000e+00> : vector<8x64xf32>
    %308 = tpu.matmul %305, %307, %cst_232 {dimension_numbers = #tpu.dot_dimension_numbers<[1], [0], [0], [1], [0, 0, 1, 1], [], []>} : vector<8x32xf32>, vector<32x64xf32>, vector<8x64xf32> -> vector<8x64xf32>
    %309 = arith.addf %304, %308 : vector<8x64xf32>
    %310 = vector.extract_strided_slice %7 {offsets = [208, 0], sizes = [8, 32], strides = [1, 1]} : vector<512x32xf32> to vector<8x32xf32>
    %c6_233 = arith.constant 6 : index
    %c0_234 = arith.constant 0 : index
    %c0_235 = arith.constant 0 : index
    %311 = vector.load %arg4[%c6_233, %c0_234, %c0_235] : memref<16x32x64xf32, #tpu.memory_space<vmem>>, vector<1x32x64xf32>
    %312 = vector.shape_cast %311 : vector<1x32x64xf32> to vector<32x64xf32>
    %cst_236 = arith.constant dense<0.000000e+00> : vector<8x64xf32>
    %313 = tpu.matmul %310, %312, %cst_236 {dimension_numbers = #tpu.dot_dimension_numbers<[1], [0], [0], [1], [0, 0, 1, 1], [], []>} : vector<8x32xf32>, vector<32x64xf32>, vector<8x64xf32> -> vector<8x64xf32>
    %314 = arith.addf %309, %313 : vector<8x64xf32>
    %315 = vector.extract_strided_slice %7 {offsets = [216, 0], sizes = [8, 32], strides = [1, 1]} : vector<512x32xf32> to vector<8x32xf32>
    %c7_237 = arith.constant 7 : index
    %c0_238 = arith.constant 0 : index
    %c0_239 = arith.constant 0 : index
    %316 = vector.load %arg4[%c7_237, %c0_238, %c0_239] : memref<16x32x64xf32, #tpu.memory_space<vmem>>, vector<1x32x64xf32>
    %317 = vector.shape_cast %316 : vector<1x32x64xf32> to vector<32x64xf32>
    %cst_240 = arith.constant dense<0.000000e+00> : vector<8x64xf32>
    %318 = tpu.matmul %315, %317, %cst_240 {dimension_numbers = #tpu.dot_dimension_numbers<[1], [0], [0], [1], [0, 0, 1, 1], [], []>} : vector<8x32xf32>, vector<32x64xf32>, vector<8x64xf32> -> vector<8x64xf32>
    %319 = arith.addf %314, %318 : vector<8x64xf32>
    %320 = vector.extract_strided_slice %7 {offsets = [256, 0], sizes = [8, 32], strides = [1, 1]} : vector<512x32xf32> to vector<8x32xf32>
    %c8_241 = arith.constant 8 : index
    %c0_242 = arith.constant 0 : index
    %c0_243 = arith.constant 0 : index
    %321 = vector.load %arg4[%c8_241, %c0_242, %c0_243] : memref<16x32x64xf32, #tpu.memory_space<vmem>>, vector<1x32x64xf32>
    %322 = vector.shape_cast %321 : vector<1x32x64xf32> to vector<32x64xf32>
    %cst_244 = arith.constant dense<0.000000e+00> : vector<8x64xf32>
    %323 = tpu.matmul %320, %322, %cst_244 {dimension_numbers = #tpu.dot_dimension_numbers<[1], [0], [0], [1], [0, 0, 1, 1], [], []>} : vector<8x32xf32>, vector<32x64xf32>, vector<8x64xf32> -> vector<8x64xf32>
    %324 = arith.addf %319, %323 : vector<8x64xf32>
    %325 = vector.extract_strided_slice %7 {offsets = [264, 0], sizes = [8, 32], strides = [1, 1]} : vector<512x32xf32> to vector<8x32xf32>
    %c9_245 = arith.constant 9 : index
    %c0_246 = arith.constant 0 : index
    %c0_247 = arith.constant 0 : index
    %326 = vector.load %arg4[%c9_245, %c0_246, %c0_247] : memref<16x32x64xf32, #tpu.memory_space<vmem>>, vector<1x32x64xf32>
    %327 = vector.shape_cast %326 : vector<1x32x64xf32> to vector<32x64xf32>
    %cst_248 = arith.constant dense<0.000000e+00> : vector<8x64xf32>
    %328 = tpu.matmul %325, %327, %cst_248 {dimension_numbers = #tpu.dot_dimension_numbers<[1], [0], [0], [1], [0, 0, 1, 1], [], []>} : vector<8x32xf32>, vector<32x64xf32>, vector<8x64xf32> -> vector<8x64xf32>
    %329 = arith.addf %324, %328 : vector<8x64xf32>
    %330 = vector.extract_strided_slice %7 {offsets = [272, 0], sizes = [8, 32], strides = [1, 1]} : vector<512x32xf32> to vector<8x32xf32>
    %c10_249 = arith.constant 10 : index
    %c0_250 = arith.constant 0 : index
    %c0_251 = arith.constant 0 : index
    %331 = vector.load %arg4[%c10_249, %c0_250, %c0_251] : memref<16x32x64xf32, #tpu.memory_space<vmem>>, vector<1x32x64xf32>
    %332 = vector.shape_cast %331 : vector<1x32x64xf32> to vector<32x64xf32>
    %cst_252 = arith.constant dense<0.000000e+00> : vector<8x64xf32>
    %333 = tpu.matmul %330, %332, %cst_252 {dimension_numbers = #tpu.dot_dimension_numbers<[1], [0], [0], [1], [0, 0, 1, 1], [], []>} : vector<8x32xf32>, vector<32x64xf32>, vector<8x64xf32> -> vector<8x64xf32>
    %334 = arith.addf %329, %333 : vector<8x64xf32>
    %335 = vector.extract_strided_slice %7 {offsets = [280, 0], sizes = [8, 32], strides = [1, 1]} : vector<512x32xf32> to vector<8x32xf32>
    %c11_253 = arith.constant 11 : index
    %c0_254 = arith.constant 0 : index
    %c0_255 = arith.constant 0 : index
    %336 = vector.load %arg4[%c11_253, %c0_254, %c0_255] : memref<16x32x64xf32, #tpu.memory_space<vmem>>, vector<1x32x64xf32>
    %337 = vector.shape_cast %336 : vector<1x32x64xf32> to vector<32x64xf32>
    %cst_256 = arith.constant dense<0.000000e+00> : vector<8x64xf32>
    %338 = tpu.matmul %335, %337, %cst_256 {dimension_numbers = #tpu.dot_dimension_numbers<[1], [0], [0], [1], [0, 0, 1, 1], [], []>} : vector<8x32xf32>, vector<32x64xf32>, vector<8x64xf32> -> vector<8x64xf32>
    %339 = arith.addf %334, %338 : vector<8x64xf32>
    %340 = vector.extract_strided_slice %7 {offsets = [320, 0], sizes = [8, 32], strides = [1, 1]} : vector<512x32xf32> to vector<8x32xf32>
    %c12_257 = arith.constant 12 : index
    %c0_258 = arith.constant 0 : index
    %c0_259 = arith.constant 0 : index
    %341 = vector.load %arg4[%c12_257, %c0_258, %c0_259] : memref<16x32x64xf32, #tpu.memory_space<vmem>>, vector<1x32x64xf32>
    %342 = vector.shape_cast %341 : vector<1x32x64xf32> to vector<32x64xf32>
    %cst_260 = arith.constant dense<0.000000e+00> : vector<8x64xf32>
    %343 = tpu.matmul %340, %342, %cst_260 {dimension_numbers = #tpu.dot_dimension_numbers<[1], [0], [0], [1], [0, 0, 1, 1], [], []>} : vector<8x32xf32>, vector<32x64xf32>, vector<8x64xf32> -> vector<8x64xf32>
    %344 = arith.addf %339, %343 : vector<8x64xf32>
    %345 = vector.extract_strided_slice %7 {offsets = [328, 0], sizes = [8, 32], strides = [1, 1]} : vector<512x32xf32> to vector<8x32xf32>
    %c13_261 = arith.constant 13 : index
    %c0_262 = arith.constant 0 : index
    %c0_263 = arith.constant 0 : index
    %346 = vector.load %arg4[%c13_261, %c0_262, %c0_263] : memref<16x32x64xf32, #tpu.memory_space<vmem>>, vector<1x32x64xf32>
    %347 = vector.shape_cast %346 : vector<1x32x64xf32> to vector<32x64xf32>
    %cst_264 = arith.constant dense<0.000000e+00> : vector<8x64xf32>
    %348 = tpu.matmul %345, %347, %cst_264 {dimension_numbers = #tpu.dot_dimension_numbers<[1], [0], [0], [1], [0, 0, 1, 1], [], []>} : vector<8x32xf32>, vector<32x64xf32>, vector<8x64xf32> -> vector<8x64xf32>
    %349 = arith.addf %344, %348 : vector<8x64xf32>
    %350 = vector.extract_strided_slice %7 {offsets = [336, 0], sizes = [8, 32], strides = [1, 1]} : vector<512x32xf32> to vector<8x32xf32>
    %c14_265 = arith.constant 14 : index
    %c0_266 = arith.constant 0 : index
    %c0_267 = arith.constant 0 : index
    %351 = vector.load %arg4[%c14_265, %c0_266, %c0_267] : memref<16x32x64xf32, #tpu.memory_space<vmem>>, vector<1x32x64xf32>
    %352 = vector.shape_cast %351 : vector<1x32x64xf32> to vector<32x64xf32>
    %cst_268 = arith.constant dense<0.000000e+00> : vector<8x64xf32>
    %353 = tpu.matmul %350, %352, %cst_268 {dimension_numbers = #tpu.dot_dimension_numbers<[1], [0], [0], [1], [0, 0, 1, 1], [], []>} : vector<8x32xf32>, vector<32x64xf32>, vector<8x64xf32> -> vector<8x64xf32>
    %354 = arith.addf %349, %353 : vector<8x64xf32>
    %355 = vector.extract_strided_slice %7 {offsets = [344, 0], sizes = [8, 32], strides = [1, 1]} : vector<512x32xf32> to vector<8x32xf32>
    %c15_269 = arith.constant 15 : index
    %c0_270 = arith.constant 0 : index
    %c0_271 = arith.constant 0 : index
    %356 = vector.load %arg4[%c15_269, %c0_270, %c0_271] : memref<16x32x64xf32, #tpu.memory_space<vmem>>, vector<1x32x64xf32>
    %357 = vector.shape_cast %356 : vector<1x32x64xf32> to vector<32x64xf32>
    %cst_272 = arith.constant dense<0.000000e+00> : vector<8x64xf32>
    %358 = tpu.matmul %355, %357, %cst_272 {dimension_numbers = #tpu.dot_dimension_numbers<[1], [0], [0], [1], [0, 0, 1, 1], [], []>} : vector<8x32xf32>, vector<32x64xf32>, vector<8x64xf32> -> vector<8x64xf32>
    %359 = arith.addf %354, %358 : vector<8x64xf32>
    %c0_273 = arith.constant 0 : index
    %c0_274 = arith.constant 0 : index
    %360 = vector.load %arg5[%c0_273, %c0_274] : memref<1x64xf32, #tpu.memory_space<vmem>>, vector<1x64xf32>
    %361 = vector.broadcast %360 : vector<1x64xf32> to vector<8x64xf32>
    %362 = arith.addf %359, %361 : vector<8x64xf32>
    %cst_275 = arith.constant 0.000000e+00 : f32
    %363 = vector.broadcast %cst_275 : f32 to vector<8x64xf32>
    %364 = arith.maximumf %362, %363 : vector<8x64xf32>
    %c3_276 = arith.constant 3 : index
    %c0_277 = arith.constant 0 : index
    %c0_278 = arith.constant 0 : index
    %365 = vector.load %arg6[%c3_276, %c0_277, %c0_278] : memref<9x64x64xf32, #tpu.memory_space<vmem>>, vector<1x64x64xf32>
    %366 = vector.shape_cast %365 : vector<1x64x64xf32> to vector<64x64xf32>
    %cst_279 = arith.constant dense<0.000000e+00> : vector<8x64xf32>
    %367 = tpu.matmul %364, %366, %cst_279 {dimension_numbers = #tpu.dot_dimension_numbers<[1], [0], [0], [1], [0, 0, 1, 1], [], []>} : vector<8x64xf32>, vector<64x64xf32>, vector<8x64xf32> -> vector<8x64xf32>
    %368 = arith.addf %278, %367 : vector<8x64xf32>
    %cst_280 = arith.constant 0.000000e+00 : f32
    %369 = vector.broadcast %cst_280 : f32 to vector<8x64xf32>
    %370 = vector.extract_strided_slice %7 {offsets = [144, 0], sizes = [8, 32], strides = [1, 1]} : vector<512x32xf32> to vector<8x32xf32>
    %c0_281 = arith.constant 0 : index
    %c0_282 = arith.constant 0 : index
    %c0_283 = arith.constant 0 : index
    %371 = vector.load %arg4[%c0_281, %c0_282, %c0_283] : memref<16x32x64xf32, #tpu.memory_space<vmem>>, vector<1x32x64xf32>
    %372 = vector.shape_cast %371 : vector<1x32x64xf32> to vector<32x64xf32>
    %cst_284 = arith.constant dense<0.000000e+00> : vector<8x64xf32>
    %373 = tpu.matmul %370, %372, %cst_284 {dimension_numbers = #tpu.dot_dimension_numbers<[1], [0], [0], [1], [0, 0, 1, 1], [], []>} : vector<8x32xf32>, vector<32x64xf32>, vector<8x64xf32> -> vector<8x64xf32>
    %374 = arith.addf %369, %373 : vector<8x64xf32>
    %375 = vector.extract_strided_slice %7 {offsets = [152, 0], sizes = [8, 32], strides = [1, 1]} : vector<512x32xf32> to vector<8x32xf32>
    %c1_285 = arith.constant 1 : index
    %c0_286 = arith.constant 0 : index
    %c0_287 = arith.constant 0 : index
    %376 = vector.load %arg4[%c1_285, %c0_286, %c0_287] : memref<16x32x64xf32, #tpu.memory_space<vmem>>, vector<1x32x64xf32>
    %377 = vector.shape_cast %376 : vector<1x32x64xf32> to vector<32x64xf32>
    %cst_288 = arith.constant dense<0.000000e+00> : vector<8x64xf32>
    %378 = tpu.matmul %375, %377, %cst_288 {dimension_numbers = #tpu.dot_dimension_numbers<[1], [0], [0], [1], [0, 0, 1, 1], [], []>} : vector<8x32xf32>, vector<32x64xf32>, vector<8x64xf32> -> vector<8x64xf32>
    %379 = arith.addf %374, %378 : vector<8x64xf32>
    %380 = vector.extract_strided_slice %7 {offsets = [160, 0], sizes = [8, 32], strides = [1, 1]} : vector<512x32xf32> to vector<8x32xf32>
    %c2_289 = arith.constant 2 : index
    %c0_290 = arith.constant 0 : index
    %c0_291 = arith.constant 0 : index
    %381 = vector.load %arg4[%c2_289, %c0_290, %c0_291] : memref<16x32x64xf32, #tpu.memory_space<vmem>>, vector<1x32x64xf32>
    %382 = vector.shape_cast %381 : vector<1x32x64xf32> to vector<32x64xf32>
    %cst_292 = arith.constant dense<0.000000e+00> : vector<8x64xf32>
    %383 = tpu.matmul %380, %382, %cst_292 {dimension_numbers = #tpu.dot_dimension_numbers<[1], [0], [0], [1], [0, 0, 1, 1], [], []>} : vector<8x32xf32>, vector<32x64xf32>, vector<8x64xf32> -> vector<8x64xf32>
    %384 = arith.addf %379, %383 : vector<8x64xf32>
    %385 = vector.extract_strided_slice %7 {offsets = [168, 0], sizes = [8, 32], strides = [1, 1]} : vector<512x32xf32> to vector<8x32xf32>
    %c3_293 = arith.constant 3 : index
    %c0_294 = arith.constant 0 : index
    %c0_295 = arith.constant 0 : index
    %386 = vector.load %arg4[%c3_293, %c0_294, %c0_295] : memref<16x32x64xf32, #tpu.memory_space<vmem>>, vector<1x32x64xf32>
    %387 = vector.shape_cast %386 : vector<1x32x64xf32> to vector<32x64xf32>
    %cst_296 = arith.constant dense<0.000000e+00> : vector<8x64xf32>
    %388 = tpu.matmul %385, %387, %cst_296 {dimension_numbers = #tpu.dot_dimension_numbers<[1], [0], [0], [1], [0, 0, 1, 1], [], []>} : vector<8x32xf32>, vector<32x64xf32>, vector<8x64xf32> -> vector<8x64xf32>
    %389 = arith.addf %384, %388 : vector<8x64xf32>
    %390 = vector.extract_strided_slice %7 {offsets = [208, 0], sizes = [8, 32], strides = [1, 1]} : vector<512x32xf32> to vector<8x32xf32>
    %c4_297 = arith.constant 4 : index
    %c0_298 = arith.constant 0 : index
    %c0_299 = arith.constant 0 : index
    %391 = vector.load %arg4[%c4_297, %c0_298, %c0_299] : memref<16x32x64xf32, #tpu.memory_space<vmem>>, vector<1x32x64xf32>
    %392 = vector.shape_cast %391 : vector<1x32x64xf32> to vector<32x64xf32>
    %cst_300 = arith.constant dense<0.000000e+00> : vector<8x64xf32>
    %393 = tpu.matmul %390, %392, %cst_300 {dimension_numbers = #tpu.dot_dimension_numbers<[1], [0], [0], [1], [0, 0, 1, 1], [], []>} : vector<8x32xf32>, vector<32x64xf32>, vector<8x64xf32> -> vector<8x64xf32>
    %394 = arith.addf %389, %393 : vector<8x64xf32>
    %395 = vector.extract_strided_slice %7 {offsets = [216, 0], sizes = [8, 32], strides = [1, 1]} : vector<512x32xf32> to vector<8x32xf32>
    %c5_301 = arith.constant 5 : index
    %c0_302 = arith.constant 0 : index
    %c0_303 = arith.constant 0 : index
    %396 = vector.load %arg4[%c5_301, %c0_302, %c0_303] : memref<16x32x64xf32, #tpu.memory_space<vmem>>, vector<1x32x64xf32>
    %397 = vector.shape_cast %396 : vector<1x32x64xf32> to vector<32x64xf32>
    %cst_304 = arith.constant dense<0.000000e+00> : vector<8x64xf32>
    %398 = tpu.matmul %395, %397, %cst_304 {dimension_numbers = #tpu.dot_dimension_numbers<[1], [0], [0], [1], [0, 0, 1, 1], [], []>} : vector<8x32xf32>, vector<32x64xf32>, vector<8x64xf32> -> vector<8x64xf32>
    %399 = arith.addf %394, %398 : vector<8x64xf32>
    %400 = vector.extract_strided_slice %7 {offsets = [224, 0], sizes = [8, 32], strides = [1, 1]} : vector<512x32xf32> to vector<8x32xf32>
    %c6_305 = arith.constant 6 : index
    %c0_306 = arith.constant 0 : index
    %c0_307 = arith.constant 0 : index
    %401 = vector.load %arg4[%c6_305, %c0_306, %c0_307] : memref<16x32x64xf32, #tpu.memory_space<vmem>>, vector<1x32x64xf32>
    %402 = vector.shape_cast %401 : vector<1x32x64xf32> to vector<32x64xf32>
    %cst_308 = arith.constant dense<0.000000e+00> : vector<8x64xf32>
    %403 = tpu.matmul %400, %402, %cst_308 {dimension_numbers = #tpu.dot_dimension_numbers<[1], [0], [0], [1], [0, 0, 1, 1], [], []>} : vector<8x32xf32>, vector<32x64xf32>, vector<8x64xf32> -> vector<8x64xf32>
    %404 = arith.addf %399, %403 : vector<8x64xf32>
    %405 = vector.extract_strided_slice %7 {offsets = [232, 0], sizes = [8, 32], strides = [1, 1]} : vector<512x32xf32> to vector<8x32xf32>
    %c7_309 = arith.constant 7 : index
    %c0_310 = arith.constant 0 : index
    %c0_311 = arith.constant 0 : index
    %406 = vector.load %arg4[%c7_309, %c0_310, %c0_311] : memref<16x32x64xf32, #tpu.memory_space<vmem>>, vector<1x32x64xf32>
    %407 = vector.shape_cast %406 : vector<1x32x64xf32> to vector<32x64xf32>
    %cst_312 = arith.constant dense<0.000000e+00> : vector<8x64xf32>
    %408 = tpu.matmul %405, %407, %cst_312 {dimension_numbers = #tpu.dot_dimension_numbers<[1], [0], [0], [1], [0, 0, 1, 1], [], []>} : vector<8x32xf32>, vector<32x64xf32>, vector<8x64xf32> -> vector<8x64xf32>
    %409 = arith.addf %404, %408 : vector<8x64xf32>
    %410 = vector.extract_strided_slice %7 {offsets = [272, 0], sizes = [8, 32], strides = [1, 1]} : vector<512x32xf32> to vector<8x32xf32>
    %c8_313 = arith.constant 8 : index
    %c0_314 = arith.constant 0 : index
    %c0_315 = arith.constant 0 : index
    %411 = vector.load %arg4[%c8_313, %c0_314, %c0_315] : memref<16x32x64xf32, #tpu.memory_space<vmem>>, vector<1x32x64xf32>
    %412 = vector.shape_cast %411 : vector<1x32x64xf32> to vector<32x64xf32>
    %cst_316 = arith.constant dense<0.000000e+00> : vector<8x64xf32>
    %413 = tpu.matmul %410, %412, %cst_316 {dimension_numbers = #tpu.dot_dimension_numbers<[1], [0], [0], [1], [0, 0, 1, 1], [], []>} : vector<8x32xf32>, vector<32x64xf32>, vector<8x64xf32> -> vector<8x64xf32>
    %414 = arith.addf %409, %413 : vector<8x64xf32>
    %415 = vector.extract_strided_slice %7 {offsets = [280, 0], sizes = [8, 32], strides = [1, 1]} : vector<512x32xf32> to vector<8x32xf32>
    %c9_317 = arith.constant 9 : index
    %c0_318 = arith.constant 0 : index
    %c0_319 = arith.constant 0 : index
    %416 = vector.load %arg4[%c9_317, %c0_318, %c0_319] : memref<16x32x64xf32, #tpu.memory_space<vmem>>, vector<1x32x64xf32>
    %417 = vector.shape_cast %416 : vector<1x32x64xf32> to vector<32x64xf32>
    %cst_320 = arith.constant dense<0.000000e+00> : vector<8x64xf32>
    %418 = tpu.matmul %415, %417, %cst_320 {dimension_numbers = #tpu.dot_dimension_numbers<[1], [0], [0], [1], [0, 0, 1, 1], [], []>} : vector<8x32xf32>, vector<32x64xf32>, vector<8x64xf32> -> vector<8x64xf32>
    %419 = arith.addf %414, %418 : vector<8x64xf32>
    %420 = vector.extract_strided_slice %7 {offsets = [288, 0], sizes = [8, 32], strides = [1, 1]} : vector<512x32xf32> to vector<8x32xf32>
    %c10_321 = arith.constant 10 : index
    %c0_322 = arith.constant 0 : index
    %c0_323 = arith.constant 0 : index
    %421 = vector.load %arg4[%c10_321, %c0_322, %c0_323] : memref<16x32x64xf32, #tpu.memory_space<vmem>>, vector<1x32x64xf32>
    %422 = vector.shape_cast %421 : vector<1x32x64xf32> to vector<32x64xf32>
    %cst_324 = arith.constant dense<0.000000e+00> : vector<8x64xf32>
    %423 = tpu.matmul %420, %422, %cst_324 {dimension_numbers = #tpu.dot_dimension_numbers<[1], [0], [0], [1], [0, 0, 1, 1], [], []>} : vector<8x32xf32>, vector<32x64xf32>, vector<8x64xf32> -> vector<8x64xf32>
    %424 = arith.addf %419, %423 : vector<8x64xf32>
    %425 = vector.extract_strided_slice %7 {offsets = [296, 0], sizes = [8, 32], strides = [1, 1]} : vector<512x32xf32> to vector<8x32xf32>
    %c11_325 = arith.constant 11 : index
    %c0_326 = arith.constant 0 : index
    %c0_327 = arith.constant 0 : index
    %426 = vector.load %arg4[%c11_325, %c0_326, %c0_327] : memref<16x32x64xf32, #tpu.memory_space<vmem>>, vector<1x32x64xf32>
    %427 = vector.shape_cast %426 : vector<1x32x64xf32> to vector<32x64xf32>
    %cst_328 = arith.constant dense<0.000000e+00> : vector<8x64xf32>
    %428 = tpu.matmul %425, %427, %cst_328 {dimension_numbers = #tpu.dot_dimension_numbers<[1], [0], [0], [1], [0, 0, 1, 1], [], []>} : vector<8x32xf32>, vector<32x64xf32>, vector<8x64xf32> -> vector<8x64xf32>
    %429 = arith.addf %424, %428 : vector<8x64xf32>
    %430 = vector.extract_strided_slice %7 {offsets = [336, 0], sizes = [8, 32], strides = [1, 1]} : vector<512x32xf32> to vector<8x32xf32>
    %c12_329 = arith.constant 12 : index
    %c0_330 = arith.constant 0 : index
    %c0_331 = arith.constant 0 : index
    %431 = vector.load %arg4[%c12_329, %c0_330, %c0_331] : memref<16x32x64xf32, #tpu.memory_space<vmem>>, vector<1x32x64xf32>
    %432 = vector.shape_cast %431 : vector<1x32x64xf32> to vector<32x64xf32>
    %cst_332 = arith.constant dense<0.000000e+00> : vector<8x64xf32>
    %433 = tpu.matmul %430, %432, %cst_332 {dimension_numbers = #tpu.dot_dimension_numbers<[1], [0], [0], [1], [0, 0, 1, 1], [], []>} : vector<8x32xf32>, vector<32x64xf32>, vector<8x64xf32> -> vector<8x64xf32>
    %434 = arith.addf %429, %433 : vector<8x64xf32>
    %435 = vector.extract_strided_slice %7 {offsets = [344, 0], sizes = [8, 32], strides = [1, 1]} : vector<512x32xf32> to vector<8x32xf32>
    %c13_333 = arith.constant 13 : index
    %c0_334 = arith.constant 0 : index
    %c0_335 = arith.constant 0 : index
    %436 = vector.load %arg4[%c13_333, %c0_334, %c0_335] : memref<16x32x64xf32, #tpu.memory_space<vmem>>, vector<1x32x64xf32>
    %437 = vector.shape_cast %436 : vector<1x32x64xf32> to vector<32x64xf32>
    %cst_336 = arith.constant dense<0.000000e+00> : vector<8x64xf32>
    %438 = tpu.matmul %435, %437, %cst_336 {dimension_numbers = #tpu.dot_dimension_numbers<[1], [0], [0], [1], [0, 0, 1, 1], [], []>} : vector<8x32xf32>, vector<32x64xf32>, vector<8x64xf32> -> vector<8x64xf32>
    %439 = arith.addf %434, %438 : vector<8x64xf32>
    %440 = vector.extract_strided_slice %7 {offsets = [352, 0], sizes = [8, 32], strides = [1, 1]} : vector<512x32xf32> to vector<8x32xf32>
    %c14_337 = arith.constant 14 : index
    %c0_338 = arith.constant 0 : index
    %c0_339 = arith.constant 0 : index
    %441 = vector.load %arg4[%c14_337, %c0_338, %c0_339] : memref<16x32x64xf32, #tpu.memory_space<vmem>>, vector<1x32x64xf32>
    %442 = vector.shape_cast %441 : vector<1x32x64xf32> to vector<32x64xf32>
    %cst_340 = arith.constant dense<0.000000e+00> : vector<8x64xf32>
    %443 = tpu.matmul %440, %442, %cst_340 {dimension_numbers = #tpu.dot_dimension_numbers<[1], [0], [0], [1], [0, 0, 1, 1], [], []>} : vector<8x32xf32>, vector<32x64xf32>, vector<8x64xf32> -> vector<8x64xf32>
    %444 = arith.addf %439, %443 : vector<8x64xf32>
    %445 = vector.extract_strided_slice %7 {offsets = [360, 0], sizes = [8, 32], strides = [1, 1]} : vector<512x32xf32> to vector<8x32xf32>
    %c15_341 = arith.constant 15 : index
    %c0_342 = arith.constant 0 : index
    %c0_343 = arith.constant 0 : index
    %446 = vector.load %arg4[%c15_341, %c0_342, %c0_343] : memref<16x32x64xf32, #tpu.memory_space<vmem>>, vector<1x32x64xf32>
    %447 = vector.shape_cast %446 : vector<1x32x64xf32> to vector<32x64xf32>
    %cst_344 = arith.constant dense<0.000000e+00> : vector<8x64xf32>
    %448 = tpu.matmul %445, %447, %cst_344 {dimension_numbers = #tpu.dot_dimension_numbers<[1], [0], [0], [1], [0, 0, 1, 1], [], []>} : vector<8x32xf32>, vector<32x64xf32>, vector<8x64xf32> -> vector<8x64xf32>
    %449 = arith.addf %444, %448 : vector<8x64xf32>
    %c0_345 = arith.constant 0 : index
    %c0_346 = arith.constant 0 : index
    %450 = vector.load %arg5[%c0_345, %c0_346] : memref<1x64xf32, #tpu.memory_space<vmem>>, vector<1x64xf32>
    %451 = vector.broadcast %450 : vector<1x64xf32> to vector<8x64xf32>
    %452 = arith.addf %449, %451 : vector<8x64xf32>
    %cst_347 = arith.constant 0.000000e+00 : f32
    %453 = vector.broadcast %cst_347 : f32 to vector<8x64xf32>
    %454 = arith.maximumf %452, %453 : vector<8x64xf32>
    %c4_348 = arith.constant 4 : index
    %c0_349 = arith.constant 0 : index
    %c0_350 = arith.constant 0 : index
    %455 = vector.load %arg6[%c4_348, %c0_349, %c0_350] : memref<9x64x64xf32, #tpu.memory_space<vmem>>, vector<1x64x64xf32>
    %456 = vector.shape_cast %455 : vector<1x64x64xf32> to vector<64x64xf32>
    %cst_351 = arith.constant dense<0.000000e+00> : vector<8x64xf32>
    %457 = tpu.matmul %454, %456, %cst_351 {dimension_numbers = #tpu.dot_dimension_numbers<[1], [0], [0], [1], [0, 0, 1, 1], [], []>} : vector<8x64xf32>, vector<64x64xf32>, vector<8x64xf32> -> vector<8x64xf32>
    %458 = arith.addf %368, %457 : vector<8x64xf32>
    %cst_352 = arith.constant 0.000000e+00 : f32
    %459 = vector.broadcast %cst_352 : f32 to vector<8x64xf32>
    %460 = vector.extract_strided_slice %7 {offsets = [160, 0], sizes = [8, 32], strides = [1, 1]} : vector<512x32xf32> to vector<8x32xf32>
    %c0_353 = arith.constant 0 : index
    %c0_354 = arith.constant 0 : index
    %c0_355 = arith.constant 0 : index
    %461 = vector.load %arg4[%c0_353, %c0_354, %c0_355] : memref<16x32x64xf32, #tpu.memory_space<vmem>>, vector<1x32x64xf32>
    %462 = vector.shape_cast %461 : vector<1x32x64xf32> to vector<32x64xf32>
    %cst_356 = arith.constant dense<0.000000e+00> : vector<8x64xf32>
    %463 = tpu.matmul %460, %462, %cst_356 {dimension_numbers = #tpu.dot_dimension_numbers<[1], [0], [0], [1], [0, 0, 1, 1], [], []>} : vector<8x32xf32>, vector<32x64xf32>, vector<8x64xf32> -> vector<8x64xf32>
    %464 = arith.addf %459, %463 : vector<8x64xf32>
    %465 = vector.extract_strided_slice %7 {offsets = [168, 0], sizes = [8, 32], strides = [1, 1]} : vector<512x32xf32> to vector<8x32xf32>
    %c1_357 = arith.constant 1 : index
    %c0_358 = arith.constant 0 : index
    %c0_359 = arith.constant 0 : index
    %466 = vector.load %arg4[%c1_357, %c0_358, %c0_359] : memref<16x32x64xf32, #tpu.memory_space<vmem>>, vector<1x32x64xf32>
    %467 = vector.shape_cast %466 : vector<1x32x64xf32> to vector<32x64xf32>
    %cst_360 = arith.constant dense<0.000000e+00> : vector<8x64xf32>
    %468 = tpu.matmul %465, %467, %cst_360 {dimension_numbers = #tpu.dot_dimension_numbers<[1], [0], [0], [1], [0, 0, 1, 1], [], []>} : vector<8x32xf32>, vector<32x64xf32>, vector<8x64xf32> -> vector<8x64xf32>
    %469 = arith.addf %464, %468 : vector<8x64xf32>
    %470 = vector.extract_strided_slice %7 {offsets = [176, 0], sizes = [8, 32], strides = [1, 1]} : vector<512x32xf32> to vector<8x32xf32>
    %c2_361 = arith.constant 2 : index
    %c0_362 = arith.constant 0 : index
    %c0_363 = arith.constant 0 : index
    %471 = vector.load %arg4[%c2_361, %c0_362, %c0_363] : memref<16x32x64xf32, #tpu.memory_space<vmem>>, vector<1x32x64xf32>
    %472 = vector.shape_cast %471 : vector<1x32x64xf32> to vector<32x64xf32>
    %cst_364 = arith.constant dense<0.000000e+00> : vector<8x64xf32>
    %473 = tpu.matmul %470, %472, %cst_364 {dimension_numbers = #tpu.dot_dimension_numbers<[1], [0], [0], [1], [0, 0, 1, 1], [], []>} : vector<8x32xf32>, vector<32x64xf32>, vector<8x64xf32> -> vector<8x64xf32>
    %474 = arith.addf %469, %473 : vector<8x64xf32>
    %475 = vector.extract_strided_slice %7 {offsets = [184, 0], sizes = [8, 32], strides = [1, 1]} : vector<512x32xf32> to vector<8x32xf32>
    %c3_365 = arith.constant 3 : index
    %c0_366 = arith.constant 0 : index
    %c0_367 = arith.constant 0 : index
    %476 = vector.load %arg4[%c3_365, %c0_366, %c0_367] : memref<16x32x64xf32, #tpu.memory_space<vmem>>, vector<1x32x64xf32>
    %477 = vector.shape_cast %476 : vector<1x32x64xf32> to vector<32x64xf32>
    %cst_368 = arith.constant dense<0.000000e+00> : vector<8x64xf32>
    %478 = tpu.matmul %475, %477, %cst_368 {dimension_numbers = #tpu.dot_dimension_numbers<[1], [0], [0], [1], [0, 0, 1, 1], [], []>} : vector<8x32xf32>, vector<32x64xf32>, vector<8x64xf32> -> vector<8x64xf32>
    %479 = arith.addf %474, %478 : vector<8x64xf32>
    %480 = vector.extract_strided_slice %7 {offsets = [224, 0], sizes = [8, 32], strides = [1, 1]} : vector<512x32xf32> to vector<8x32xf32>
    %c4_369 = arith.constant 4 : index
    %c0_370 = arith.constant 0 : index
    %c0_371 = arith.constant 0 : index
    %481 = vector.load %arg4[%c4_369, %c0_370, %c0_371] : memref<16x32x64xf32, #tpu.memory_space<vmem>>, vector<1x32x64xf32>
    %482 = vector.shape_cast %481 : vector<1x32x64xf32> to vector<32x64xf32>
    %cst_372 = arith.constant dense<0.000000e+00> : vector<8x64xf32>
    %483 = tpu.matmul %480, %482, %cst_372 {dimension_numbers = #tpu.dot_dimension_numbers<[1], [0], [0], [1], [0, 0, 1, 1], [], []>} : vector<8x32xf32>, vector<32x64xf32>, vector<8x64xf32> -> vector<8x64xf32>
    %484 = arith.addf %479, %483 : vector<8x64xf32>
    %485 = vector.extract_strided_slice %7 {offsets = [232, 0], sizes = [8, 32], strides = [1, 1]} : vector<512x32xf32> to vector<8x32xf32>
    %c5_373 = arith.constant 5 : index
    %c0_374 = arith.constant 0 : index
    %c0_375 = arith.constant 0 : index
    %486 = vector.load %arg4[%c5_373, %c0_374, %c0_375] : memref<16x32x64xf32, #tpu.memory_space<vmem>>, vector<1x32x64xf32>
    %487 = vector.shape_cast %486 : vector<1x32x64xf32> to vector<32x64xf32>
    %cst_376 = arith.constant dense<0.000000e+00> : vector<8x64xf32>
    %488 = tpu.matmul %485, %487, %cst_376 {dimension_numbers = #tpu.dot_dimension_numbers<[1], [0], [0], [1], [0, 0, 1, 1], [], []>} : vector<8x32xf32>, vector<32x64xf32>, vector<8x64xf32> -> vector<8x64xf32>
    %489 = arith.addf %484, %488 : vector<8x64xf32>
    %490 = vector.extract_strided_slice %7 {offsets = [240, 0], sizes = [8, 32], strides = [1, 1]} : vector<512x32xf32> to vector<8x32xf32>
    %c6_377 = arith.constant 6 : index
    %c0_378 = arith.constant 0 : index
    %c0_379 = arith.constant 0 : index
    %491 = vector.load %arg4[%c6_377, %c0_378, %c0_379] : memref<16x32x64xf32, #tpu.memory_space<vmem>>, vector<1x32x64xf32>
    %492 = vector.shape_cast %491 : vector<1x32x64xf32> to vector<32x64xf32>
    %cst_380 = arith.constant dense<0.000000e+00> : vector<8x64xf32>
    %493 = tpu.matmul %490, %492, %cst_380 {dimension_numbers = #tpu.dot_dimension_numbers<[1], [0], [0], [1], [0, 0, 1, 1], [], []>} : vector<8x32xf32>, vector<32x64xf32>, vector<8x64xf32> -> vector<8x64xf32>
    %494 = arith.addf %489, %493 : vector<8x64xf32>
    %495 = vector.extract_strided_slice %7 {offsets = [248, 0], sizes = [8, 32], strides = [1, 1]} : vector<512x32xf32> to vector<8x32xf32>
    %c7_381 = arith.constant 7 : index
    %c0_382 = arith.constant 0 : index
    %c0_383 = arith.constant 0 : index
    %496 = vector.load %arg4[%c7_381, %c0_382, %c0_383] : memref<16x32x64xf32, #tpu.memory_space<vmem>>, vector<1x32x64xf32>
    %497 = vector.shape_cast %496 : vector<1x32x64xf32> to vector<32x64xf32>
    %cst_384 = arith.constant dense<0.000000e+00> : vector<8x64xf32>
    %498 = tpu.matmul %495, %497, %cst_384 {dimension_numbers = #tpu.dot_dimension_numbers<[1], [0], [0], [1], [0, 0, 1, 1], [], []>} : vector<8x32xf32>, vector<32x64xf32>, vector<8x64xf32> -> vector<8x64xf32>
    %499 = arith.addf %494, %498 : vector<8x64xf32>
    %500 = vector.extract_strided_slice %7 {offsets = [288, 0], sizes = [8, 32], strides = [1, 1]} : vector<512x32xf32> to vector<8x32xf32>
    %c8_385 = arith.constant 8 : index
    %c0_386 = arith.constant 0 : index
    %c0_387 = arith.constant 0 : index
    %501 = vector.load %arg4[%c8_385, %c0_386, %c0_387] : memref<16x32x64xf32, #tpu.memory_space<vmem>>, vector<1x32x64xf32>
    %502 = vector.shape_cast %501 : vector<1x32x64xf32> to vector<32x64xf32>
    %cst_388 = arith.constant dense<0.000000e+00> : vector<8x64xf32>
    %503 = tpu.matmul %500, %502, %cst_388 {dimension_numbers = #tpu.dot_dimension_numbers<[1], [0], [0], [1], [0, 0, 1, 1], [], []>} : vector<8x32xf32>, vector<32x64xf32>, vector<8x64xf32> -> vector<8x64xf32>
    %504 = arith.addf %499, %503 : vector<8x64xf32>
    %505 = vector.extract_strided_slice %7 {offsets = [296, 0], sizes = [8, 32], strides = [1, 1]} : vector<512x32xf32> to vector<8x32xf32>
    %c9_389 = arith.constant 9 : index
    %c0_390 = arith.constant 0 : index
    %c0_391 = arith.constant 0 : index
    %506 = vector.load %arg4[%c9_389, %c0_390, %c0_391] : memref<16x32x64xf32, #tpu.memory_space<vmem>>, vector<1x32x64xf32>
    %507 = vector.shape_cast %506 : vector<1x32x64xf32> to vector<32x64xf32>
    %cst_392 = arith.constant dense<0.000000e+00> : vector<8x64xf32>
    %508 = tpu.matmul %505, %507, %cst_392 {dimension_numbers = #tpu.dot_dimension_numbers<[1], [0], [0], [1], [0, 0, 1, 1], [], []>} : vector<8x32xf32>, vector<32x64xf32>, vector<8x64xf32> -> vector<8x64xf32>
    %509 = arith.addf %504, %508 : vector<8x64xf32>
    %510 = vector.extract_strided_slice %7 {offsets = [304, 0], sizes = [8, 32], strides = [1, 1]} : vector<512x32xf32> to vector<8x32xf32>
    %c10_393 = arith.constant 10 : index
    %c0_394 = arith.constant 0 : index
    %c0_395 = arith.constant 0 : index
    %511 = vector.load %arg4[%c10_393, %c0_394, %c0_395] : memref<16x32x64xf32, #tpu.memory_space<vmem>>, vector<1x32x64xf32>
    %512 = vector.shape_cast %511 : vector<1x32x64xf32> to vector<32x64xf32>
    %cst_396 = arith.constant dense<0.000000e+00> : vector<8x64xf32>
    %513 = tpu.matmul %510, %512, %cst_396 {dimension_numbers = #tpu.dot_dimension_numbers<[1], [0], [0], [1], [0, 0, 1, 1], [], []>} : vector<8x32xf32>, vector<32x64xf32>, vector<8x64xf32> -> vector<8x64xf32>
    %514 = arith.addf %509, %513 : vector<8x64xf32>
    %515 = vector.extract_strided_slice %7 {offsets = [312, 0], sizes = [8, 32], strides = [1, 1]} : vector<512x32xf32> to vector<8x32xf32>
    %c11_397 = arith.constant 11 : index
    %c0_398 = arith.constant 0 : index
    %c0_399 = arith.constant 0 : index
    %516 = vector.load %arg4[%c11_397, %c0_398, %c0_399] : memref<16x32x64xf32, #tpu.memory_space<vmem>>, vector<1x32x64xf32>
    %517 = vector.shape_cast %516 : vector<1x32x64xf32> to vector<32x64xf32>
    %cst_400 = arith.constant dense<0.000000e+00> : vector<8x64xf32>
    %518 = tpu.matmul %515, %517, %cst_400 {dimension_numbers = #tpu.dot_dimension_numbers<[1], [0], [0], [1], [0, 0, 1, 1], [], []>} : vector<8x32xf32>, vector<32x64xf32>, vector<8x64xf32> -> vector<8x64xf32>
    %519 = arith.addf %514, %518 : vector<8x64xf32>
    %520 = vector.extract_strided_slice %7 {offsets = [352, 0], sizes = [8, 32], strides = [1, 1]} : vector<512x32xf32> to vector<8x32xf32>
    %c12_401 = arith.constant 12 : index
    %c0_402 = arith.constant 0 : index
    %c0_403 = arith.constant 0 : index
    %521 = vector.load %arg4[%c12_401, %c0_402, %c0_403] : memref<16x32x64xf32, #tpu.memory_space<vmem>>, vector<1x32x64xf32>
    %522 = vector.shape_cast %521 : vector<1x32x64xf32> to vector<32x64xf32>
    %cst_404 = arith.constant dense<0.000000e+00> : vector<8x64xf32>
    %523 = tpu.matmul %520, %522, %cst_404 {dimension_numbers = #tpu.dot_dimension_numbers<[1], [0], [0], [1], [0, 0, 1, 1], [], []>} : vector<8x32xf32>, vector<32x64xf32>, vector<8x64xf32> -> vector<8x64xf32>
    %524 = arith.addf %519, %523 : vector<8x64xf32>
    %525 = vector.extract_strided_slice %7 {offsets = [360, 0], sizes = [8, 32], strides = [1, 1]} : vector<512x32xf32> to vector<8x32xf32>
    %c13_405 = arith.constant 13 : index
    %c0_406 = arith.constant 0 : index
    %c0_407 = arith.constant 0 : index
    %526 = vector.load %arg4[%c13_405, %c0_406, %c0_407] : memref<16x32x64xf32, #tpu.memory_space<vmem>>, vector<1x32x64xf32>
    %527 = vector.shape_cast %526 : vector<1x32x64xf32> to vector<32x64xf32>
    %cst_408 = arith.constant dense<0.000000e+00> : vector<8x64xf32>
    %528 = tpu.matmul %525, %527, %cst_408 {dimension_numbers = #tpu.dot_dimension_numbers<[1], [0], [0], [1], [0, 0, 1, 1], [], []>} : vector<8x32xf32>, vector<32x64xf32>, vector<8x64xf32> -> vector<8x64xf32>
    %529 = arith.addf %524, %528 : vector<8x64xf32>
    %530 = vector.extract_strided_slice %7 {offsets = [368, 0], sizes = [8, 32], strides = [1, 1]} : vector<512x32xf32> to vector<8x32xf32>
    %c14_409 = arith.constant 14 : index
    %c0_410 = arith.constant 0 : index
    %c0_411 = arith.constant 0 : index
    %531 = vector.load %arg4[%c14_409, %c0_410, %c0_411] : memref<16x32x64xf32, #tpu.memory_space<vmem>>, vector<1x32x64xf32>
    %532 = vector.shape_cast %531 : vector<1x32x64xf32> to vector<32x64xf32>
    %cst_412 = arith.constant dense<0.000000e+00> : vector<8x64xf32>
    %533 = tpu.matmul %530, %532, %cst_412 {dimension_numbers = #tpu.dot_dimension_numbers<[1], [0], [0], [1], [0, 0, 1, 1], [], []>} : vector<8x32xf32>, vector<32x64xf32>, vector<8x64xf32> -> vector<8x64xf32>
    %534 = arith.addf %529, %533 : vector<8x64xf32>
    %535 = vector.extract_strided_slice %7 {offsets = [376, 0], sizes = [8, 32], strides = [1, 1]} : vector<512x32xf32> to vector<8x32xf32>
    %c15_413 = arith.constant 15 : index
    %c0_414 = arith.constant 0 : index
    %c0_415 = arith.constant 0 : index
    %536 = vector.load %arg4[%c15_413, %c0_414, %c0_415] : memref<16x32x64xf32, #tpu.memory_space<vmem>>, vector<1x32x64xf32>
    %537 = vector.shape_cast %536 : vector<1x32x64xf32> to vector<32x64xf32>
    %cst_416 = arith.constant dense<0.000000e+00> : vector<8x64xf32>
    %538 = tpu.matmul %535, %537, %cst_416 {dimension_numbers = #tpu.dot_dimension_numbers<[1], [0], [0], [1], [0, 0, 1, 1], [], []>} : vector<8x32xf32>, vector<32x64xf32>, vector<8x64xf32> -> vector<8x64xf32>
    %539 = arith.addf %534, %538 : vector<8x64xf32>
    %c0_417 = arith.constant 0 : index
    %c0_418 = arith.constant 0 : index
    %540 = vector.load %arg5[%c0_417, %c0_418] : memref<1x64xf32, #tpu.memory_space<vmem>>, vector<1x64xf32>
    %541 = vector.broadcast %540 : vector<1x64xf32> to vector<8x64xf32>
    %542 = arith.addf %539, %541 : vector<8x64xf32>
    %cst_419 = arith.constant 0.000000e+00 : f32
    %543 = vector.broadcast %cst_419 : f32 to vector<8x64xf32>
    %544 = arith.maximumf %542, %543 : vector<8x64xf32>
    %c5_420 = arith.constant 5 : index
    %c0_421 = arith.constant 0 : index
    %c0_422 = arith.constant 0 : index
    %545 = vector.load %arg6[%c5_420, %c0_421, %c0_422] : memref<9x64x64xf32, #tpu.memory_space<vmem>>, vector<1x64x64xf32>
    %546 = vector.shape_cast %545 : vector<1x64x64xf32> to vector<64x64xf32>
    %cst_423 = arith.constant dense<0.000000e+00> : vector<8x64xf32>
    %547 = tpu.matmul %544, %546, %cst_423 {dimension_numbers = #tpu.dot_dimension_numbers<[1], [0], [0], [1], [0, 0, 1, 1], [], []>} : vector<8x64xf32>, vector<64x64xf32>, vector<8x64xf32> -> vector<8x64xf32>
    %548 = arith.addf %458, %547 : vector<8x64xf32>
    %cst_424 = arith.constant 0.000000e+00 : f32
    %549 = vector.broadcast %cst_424 : f32 to vector<8x64xf32>
    %550 = vector.extract_strided_slice %7 {offsets = [256, 0], sizes = [8, 32], strides = [1, 1]} : vector<512x32xf32> to vector<8x32xf32>
    %c0_425 = arith.constant 0 : index
    %c0_426 = arith.constant 0 : index
    %c0_427 = arith.constant 0 : index
    %551 = vector.load %arg4[%c0_425, %c0_426, %c0_427] : memref<16x32x64xf32, #tpu.memory_space<vmem>>, vector<1x32x64xf32>
    %552 = vector.shape_cast %551 : vector<1x32x64xf32> to vector<32x64xf32>
    %cst_428 = arith.constant dense<0.000000e+00> : vector<8x64xf32>
    %553 = tpu.matmul %550, %552, %cst_428 {dimension_numbers = #tpu.dot_dimension_numbers<[1], [0], [0], [1], [0, 0, 1, 1], [], []>} : vector<8x32xf32>, vector<32x64xf32>, vector<8x64xf32> -> vector<8x64xf32>
    %554 = arith.addf %549, %553 : vector<8x64xf32>
    %555 = vector.extract_strided_slice %7 {offsets = [264, 0], sizes = [8, 32], strides = [1, 1]} : vector<512x32xf32> to vector<8x32xf32>
    %c1_429 = arith.constant 1 : index
    %c0_430 = arith.constant 0 : index
    %c0_431 = arith.constant 0 : index
    %556 = vector.load %arg4[%c1_429, %c0_430, %c0_431] : memref<16x32x64xf32, #tpu.memory_space<vmem>>, vector<1x32x64xf32>
    %557 = vector.shape_cast %556 : vector<1x32x64xf32> to vector<32x64xf32>
    %cst_432 = arith.constant dense<0.000000e+00> : vector<8x64xf32>
    %558 = tpu.matmul %555, %557, %cst_432 {dimension_numbers = #tpu.dot_dimension_numbers<[1], [0], [0], [1], [0, 0, 1, 1], [], []>} : vector<8x32xf32>, vector<32x64xf32>, vector<8x64xf32> -> vector<8x64xf32>
    %559 = arith.addf %554, %558 : vector<8x64xf32>
    %560 = vector.extract_strided_slice %7 {offsets = [272, 0], sizes = [8, 32], strides = [1, 1]} : vector<512x32xf32> to vector<8x32xf32>
    %c2_433 = arith.constant 2 : index
    %c0_434 = arith.constant 0 : index
    %c0_435 = arith.constant 0 : index
    %561 = vector.load %arg4[%c2_433, %c0_434, %c0_435] : memref<16x32x64xf32, #tpu.memory_space<vmem>>, vector<1x32x64xf32>
    %562 = vector.shape_cast %561 : vector<1x32x64xf32> to vector<32x64xf32>
    %cst_436 = arith.constant dense<0.000000e+00> : vector<8x64xf32>
    %563 = tpu.matmul %560, %562, %cst_436 {dimension_numbers = #tpu.dot_dimension_numbers<[1], [0], [0], [1], [0, 0, 1, 1], [], []>} : vector<8x32xf32>, vector<32x64xf32>, vector<8x64xf32> -> vector<8x64xf32>
    %564 = arith.addf %559, %563 : vector<8x64xf32>
    %565 = vector.extract_strided_slice %7 {offsets = [280, 0], sizes = [8, 32], strides = [1, 1]} : vector<512x32xf32> to vector<8x32xf32>
    %c3_437 = arith.constant 3 : index
    %c0_438 = arith.constant 0 : index
    %c0_439 = arith.constant 0 : index
    %566 = vector.load %arg4[%c3_437, %c0_438, %c0_439] : memref<16x32x64xf32, #tpu.memory_space<vmem>>, vector<1x32x64xf32>
    %567 = vector.shape_cast %566 : vector<1x32x64xf32> to vector<32x64xf32>
    %cst_440 = arith.constant dense<0.000000e+00> : vector<8x64xf32>
    %568 = tpu.matmul %565, %567, %cst_440 {dimension_numbers = #tpu.dot_dimension_numbers<[1], [0], [0], [1], [0, 0, 1, 1], [], []>} : vector<8x32xf32>, vector<32x64xf32>, vector<8x64xf32> -> vector<8x64xf32>
    %569 = arith.addf %564, %568 : vector<8x64xf32>
    %570 = vector.extract_strided_slice %7 {offsets = [320, 0], sizes = [8, 32], strides = [1, 1]} : vector<512x32xf32> to vector<8x32xf32>
    %c4_441 = arith.constant 4 : index
    %c0_442 = arith.constant 0 : index
    %c0_443 = arith.constant 0 : index
    %571 = vector.load %arg4[%c4_441, %c0_442, %c0_443] : memref<16x32x64xf32, #tpu.memory_space<vmem>>, vector<1x32x64xf32>
    %572 = vector.shape_cast %571 : vector<1x32x64xf32> to vector<32x64xf32>
    %cst_444 = arith.constant dense<0.000000e+00> : vector<8x64xf32>
    %573 = tpu.matmul %570, %572, %cst_444 {dimension_numbers = #tpu.dot_dimension_numbers<[1], [0], [0], [1], [0, 0, 1, 1], [], []>} : vector<8x32xf32>, vector<32x64xf32>, vector<8x64xf32> -> vector<8x64xf32>
    %574 = arith.addf %569, %573 : vector<8x64xf32>
    %575 = vector.extract_strided_slice %7 {offsets = [328, 0], sizes = [8, 32], strides = [1, 1]} : vector<512x32xf32> to vector<8x32xf32>
    %c5_445 = arith.constant 5 : index
    %c0_446 = arith.constant 0 : index
    %c0_447 = arith.constant 0 : index
    %576 = vector.load %arg4[%c5_445, %c0_446, %c0_447] : memref<16x32x64xf32, #tpu.memory_space<vmem>>, vector<1x32x64xf32>
    %577 = vector.shape_cast %576 : vector<1x32x64xf32> to vector<32x64xf32>
    %cst_448 = arith.constant dense<0.000000e+00> : vector<8x64xf32>
    %578 = tpu.matmul %575, %577, %cst_448 {dimension_numbers = #tpu.dot_dimension_numbers<[1], [0], [0], [1], [0, 0, 1, 1], [], []>} : vector<8x32xf32>, vector<32x64xf32>, vector<8x64xf32> -> vector<8x64xf32>
    %579 = arith.addf %574, %578 : vector<8x64xf32>
    %580 = vector.extract_strided_slice %7 {offsets = [336, 0], sizes = [8, 32], strides = [1, 1]} : vector<512x32xf32> to vector<8x32xf32>
    %c6_449 = arith.constant 6 : index
    %c0_450 = arith.constant 0 : index
    %c0_451 = arith.constant 0 : index
    %581 = vector.load %arg4[%c6_449, %c0_450, %c0_451] : memref<16x32x64xf32, #tpu.memory_space<vmem>>, vector<1x32x64xf32>
    %582 = vector.shape_cast %581 : vector<1x32x64xf32> to vector<32x64xf32>
    %cst_452 = arith.constant dense<0.000000e+00> : vector<8x64xf32>
    %583 = tpu.matmul %580, %582, %cst_452 {dimension_numbers = #tpu.dot_dimension_numbers<[1], [0], [0], [1], [0, 0, 1, 1], [], []>} : vector<8x32xf32>, vector<32x64xf32>, vector<8x64xf32> -> vector<8x64xf32>
    %584 = arith.addf %579, %583 : vector<8x64xf32>
    %585 = vector.extract_strided_slice %7 {offsets = [344, 0], sizes = [8, 32], strides = [1, 1]} : vector<512x32xf32> to vector<8x32xf32>
    %c7_453 = arith.constant 7 : index
    %c0_454 = arith.constant 0 : index
    %c0_455 = arith.constant 0 : index
    %586 = vector.load %arg4[%c7_453, %c0_454, %c0_455] : memref<16x32x64xf32, #tpu.memory_space<vmem>>, vector<1x32x64xf32>
    %587 = vector.shape_cast %586 : vector<1x32x64xf32> to vector<32x64xf32>
    %cst_456 = arith.constant dense<0.000000e+00> : vector<8x64xf32>
    %588 = tpu.matmul %585, %587, %cst_456 {dimension_numbers = #tpu.dot_dimension_numbers<[1], [0], [0], [1], [0, 0, 1, 1], [], []>} : vector<8x32xf32>, vector<32x64xf32>, vector<8x64xf32> -> vector<8x64xf32>
    %589 = arith.addf %584, %588 : vector<8x64xf32>
    %590 = vector.extract_strided_slice %7 {offsets = [384, 0], sizes = [8, 32], strides = [1, 1]} : vector<512x32xf32> to vector<8x32xf32>
    %c8_457 = arith.constant 8 : index
    %c0_458 = arith.constant 0 : index
    %c0_459 = arith.constant 0 : index
    %591 = vector.load %arg4[%c8_457, %c0_458, %c0_459] : memref<16x32x64xf32, #tpu.memory_space<vmem>>, vector<1x32x64xf32>
    %592 = vector.shape_cast %591 : vector<1x32x64xf32> to vector<32x64xf32>
    %cst_460 = arith.constant dense<0.000000e+00> : vector<8x64xf32>
    %593 = tpu.matmul %590, %592, %cst_460 {dimension_numbers = #tpu.dot_dimension_numbers<[1], [0], [0], [1], [0, 0, 1, 1], [], []>} : vector<8x32xf32>, vector<32x64xf32>, vector<8x64xf32> -> vector<8x64xf32>
    %594 = arith.addf %589, %593 : vector<8x64xf32>
    %595 = vector.extract_strided_slice %7 {offsets = [392, 0], sizes = [8, 32], strides = [1, 1]} : vector<512x32xf32> to vector<8x32xf32>
    %c9_461 = arith.constant 9 : index
    %c0_462 = arith.constant 0 : index
    %c0_463 = arith.constant 0 : index
    %596 = vector.load %arg4[%c9_461, %c0_462, %c0_463] : memref<16x32x64xf32, #tpu.memory_space<vmem>>, vector<1x32x64xf32>
    %597 = vector.shape_cast %596 : vector<1x32x64xf32> to vector<32x64xf32>
    %cst_464 = arith.constant dense<0.000000e+00> : vector<8x64xf32>
    %598 = tpu.matmul %595, %597, %cst_464 {dimension_numbers = #tpu.dot_dimension_numbers<[1], [0], [0], [1], [0, 0, 1, 1], [], []>} : vector<8x32xf32>, vector<32x64xf32>, vector<8x64xf32> -> vector<8x64xf32>
    %599 = arith.addf %594, %598 : vector<8x64xf32>
    %600 = vector.extract_strided_slice %7 {offsets = [400, 0], sizes = [8, 32], strides = [1, 1]} : vector<512x32xf32> to vector<8x32xf32>
    %c10_465 = arith.constant 10 : index
    %c0_466 = arith.constant 0 : index
    %c0_467 = arith.constant 0 : index
    %601 = vector.load %arg4[%c10_465, %c0_466, %c0_467] : memref<16x32x64xf32, #tpu.memory_space<vmem>>, vector<1x32x64xf32>
    %602 = vector.shape_cast %601 : vector<1x32x64xf32> to vector<32x64xf32>
    %cst_468 = arith.constant dense<0.000000e+00> : vector<8x64xf32>
    %603 = tpu.matmul %600, %602, %cst_468 {dimension_numbers = #tpu.dot_dimension_numbers<[1], [0], [0], [1], [0, 0, 1, 1], [], []>} : vector<8x32xf32>, vector<32x64xf32>, vector<8x64xf32> -> vector<8x64xf32>
    %604 = arith.addf %599, %603 : vector<8x64xf32>
    %605 = vector.extract_strided_slice %7 {offsets = [408, 0], sizes = [8, 32], strides = [1, 1]} : vector<512x32xf32> to vector<8x32xf32>
    %c11_469 = arith.constant 11 : index
    %c0_470 = arith.constant 0 : index
    %c0_471 = arith.constant 0 : index
    %606 = vector.load %arg4[%c11_469, %c0_470, %c0_471] : memref<16x32x64xf32, #tpu.memory_space<vmem>>, vector<1x32x64xf32>
    %607 = vector.shape_cast %606 : vector<1x32x64xf32> to vector<32x64xf32>
    %cst_472 = arith.constant dense<0.000000e+00> : vector<8x64xf32>
    %608 = tpu.matmul %605, %607, %cst_472 {dimension_numbers = #tpu.dot_dimension_numbers<[1], [0], [0], [1], [0, 0, 1, 1], [], []>} : vector<8x32xf32>, vector<32x64xf32>, vector<8x64xf32> -> vector<8x64xf32>
    %609 = arith.addf %604, %608 : vector<8x64xf32>
    %610 = vector.extract_strided_slice %7 {offsets = [448, 0], sizes = [8, 32], strides = [1, 1]} : vector<512x32xf32> to vector<8x32xf32>
    %c12_473 = arith.constant 12 : index
    %c0_474 = arith.constant 0 : index
    %c0_475 = arith.constant 0 : index
    %611 = vector.load %arg4[%c12_473, %c0_474, %c0_475] : memref<16x32x64xf32, #tpu.memory_space<vmem>>, vector<1x32x64xf32>
    %612 = vector.shape_cast %611 : vector<1x32x64xf32> to vector<32x64xf32>
    %cst_476 = arith.constant dense<0.000000e+00> : vector<8x64xf32>
    %613 = tpu.matmul %610, %612, %cst_476 {dimension_numbers = #tpu.dot_dimension_numbers<[1], [0], [0], [1], [0, 0, 1, 1], [], []>} : vector<8x32xf32>, vector<32x64xf32>, vector<8x64xf32> -> vector<8x64xf32>
    %614 = arith.addf %609, %613 : vector<8x64xf32>
    %615 = vector.extract_strided_slice %7 {offsets = [456, 0], sizes = [8, 32], strides = [1, 1]} : vector<512x32xf32> to vector<8x32xf32>
    %c13_477 = arith.constant 13 : index
    %c0_478 = arith.constant 0 : index
    %c0_479 = arith.constant 0 : index
    %616 = vector.load %arg4[%c13_477, %c0_478, %c0_479] : memref<16x32x64xf32, #tpu.memory_space<vmem>>, vector<1x32x64xf32>
    %617 = vector.shape_cast %616 : vector<1x32x64xf32> to vector<32x64xf32>
    %cst_480 = arith.constant dense<0.000000e+00> : vector<8x64xf32>
    %618 = tpu.matmul %615, %617, %cst_480 {dimension_numbers = #tpu.dot_dimension_numbers<[1], [0], [0], [1], [0, 0, 1, 1], [], []>} : vector<8x32xf32>, vector<32x64xf32>, vector<8x64xf32> -> vector<8x64xf32>
    %619 = arith.addf %614, %618 : vector<8x64xf32>
    %620 = vector.extract_strided_slice %7 {offsets = [464, 0], sizes = [8, 32], strides = [1, 1]} : vector<512x32xf32> to vector<8x32xf32>
    %c14_481 = arith.constant 14 : index
    %c0_482 = arith.constant 0 : index
    %c0_483 = arith.constant 0 : index
    %621 = vector.load %arg4[%c14_481, %c0_482, %c0_483] : memref<16x32x64xf32, #tpu.memory_space<vmem>>, vector<1x32x64xf32>
    %622 = vector.shape_cast %621 : vector<1x32x64xf32> to vector<32x64xf32>
    %cst_484 = arith.constant dense<0.000000e+00> : vector<8x64xf32>
    %623 = tpu.matmul %620, %622, %cst_484 {dimension_numbers = #tpu.dot_dimension_numbers<[1], [0], [0], [1], [0, 0, 1, 1], [], []>} : vector<8x32xf32>, vector<32x64xf32>, vector<8x64xf32> -> vector<8x64xf32>
    %624 = arith.addf %619, %623 : vector<8x64xf32>
    %625 = vector.extract_strided_slice %7 {offsets = [472, 0], sizes = [8, 32], strides = [1, 1]} : vector<512x32xf32> to vector<8x32xf32>
    %c15_485 = arith.constant 15 : index
    %c0_486 = arith.constant 0 : index
    %c0_487 = arith.constant 0 : index
    %626 = vector.load %arg4[%c15_485, %c0_486, %c0_487] : memref<16x32x64xf32, #tpu.memory_space<vmem>>, vector<1x32x64xf32>
    %627 = vector.shape_cast %626 : vector<1x32x64xf32> to vector<32x64xf32>
    %cst_488 = arith.constant dense<0.000000e+00> : vector<8x64xf32>
    %628 = tpu.matmul %625, %627, %cst_488 {dimension_numbers = #tpu.dot_dimension_numbers<[1], [0], [0], [1], [0, 0, 1, 1], [], []>} : vector<8x32xf32>, vector<32x64xf32>, vector<8x64xf32> -> vector<8x64xf32>
    %629 = arith.addf %624, %628 : vector<8x64xf32>
    %c0_489 = arith.constant 0 : index
    %c0_490 = arith.constant 0 : index
    %630 = vector.load %arg5[%c0_489, %c0_490] : memref<1x64xf32, #tpu.memory_space<vmem>>, vector<1x64xf32>
    %631 = vector.broadcast %630 : vector<1x64xf32> to vector<8x64xf32>
    %632 = arith.addf %629, %631 : vector<8x64xf32>
    %cst_491 = arith.constant 0.000000e+00 : f32
    %633 = vector.broadcast %cst_491 : f32 to vector<8x64xf32>
    %634 = arith.maximumf %632, %633 : vector<8x64xf32>
    %c6_492 = arith.constant 6 : index
    %c0_493 = arith.constant 0 : index
    %c0_494 = arith.constant 0 : index
    %635 = vector.load %arg6[%c6_492, %c0_493, %c0_494] : memref<9x64x64xf32, #tpu.memory_space<vmem>>, vector<1x64x64xf32>
    %636 = vector.shape_cast %635 : vector<1x64x64xf32> to vector<64x64xf32>
    %cst_495 = arith.constant dense<0.000000e+00> : vector<8x64xf32>
    %637 = tpu.matmul %634, %636, %cst_495 {dimension_numbers = #tpu.dot_dimension_numbers<[1], [0], [0], [1], [0, 0, 1, 1], [], []>} : vector<8x64xf32>, vector<64x64xf32>, vector<8x64xf32> -> vector<8x64xf32>
    %638 = arith.addf %548, %637 : vector<8x64xf32>
    %cst_496 = arith.constant 0.000000e+00 : f32
    %639 = vector.broadcast %cst_496 : f32 to vector<8x64xf32>
    %640 = vector.extract_strided_slice %7 {offsets = [272, 0], sizes = [8, 32], strides = [1, 1]} : vector<512x32xf32> to vector<8x32xf32>
    %c0_497 = arith.constant 0 : index
    %c0_498 = arith.constant 0 : index
    %c0_499 = arith.constant 0 : index
    %641 = vector.load %arg4[%c0_497, %c0_498, %c0_499] : memref<16x32x64xf32, #tpu.memory_space<vmem>>, vector<1x32x64xf32>
    %642 = vector.shape_cast %641 : vector<1x32x64xf32> to vector<32x64xf32>
    %cst_500 = arith.constant dense<0.000000e+00> : vector<8x64xf32>
    %643 = tpu.matmul %640, %642, %cst_500 {dimension_numbers = #tpu.dot_dimension_numbers<[1], [0], [0], [1], [0, 0, 1, 1], [], []>} : vector<8x32xf32>, vector<32x64xf32>, vector<8x64xf32> -> vector<8x64xf32>
    %644 = arith.addf %639, %643 : vector<8x64xf32>
    %645 = vector.extract_strided_slice %7 {offsets = [280, 0], sizes = [8, 32], strides = [1, 1]} : vector<512x32xf32> to vector<8x32xf32>
    %c1_501 = arith.constant 1 : index
    %c0_502 = arith.constant 0 : index
    %c0_503 = arith.constant 0 : index
    %646 = vector.load %arg4[%c1_501, %c0_502, %c0_503] : memref<16x32x64xf32, #tpu.memory_space<vmem>>, vector<1x32x64xf32>
    %647 = vector.shape_cast %646 : vector<1x32x64xf32> to vector<32x64xf32>
    %cst_504 = arith.constant dense<0.000000e+00> : vector<8x64xf32>
    %648 = tpu.matmul %645, %647, %cst_504 {dimension_numbers = #tpu.dot_dimension_numbers<[1], [0], [0], [1], [0, 0, 1, 1], [], []>} : vector<8x32xf32>, vector<32x64xf32>, vector<8x64xf32> -> vector<8x64xf32>
    %649 = arith.addf %644, %648 : vector<8x64xf32>
    %650 = vector.extract_strided_slice %7 {offsets = [288, 0], sizes = [8, 32], strides = [1, 1]} : vector<512x32xf32> to vector<8x32xf32>
    %c2_505 = arith.constant 2 : index
    %c0_506 = arith.constant 0 : index
    %c0_507 = arith.constant 0 : index
    %651 = vector.load %arg4[%c2_505, %c0_506, %c0_507] : memref<16x32x64xf32, #tpu.memory_space<vmem>>, vector<1x32x64xf32>
    %652 = vector.shape_cast %651 : vector<1x32x64xf32> to vector<32x64xf32>
    %cst_508 = arith.constant dense<0.000000e+00> : vector<8x64xf32>
    %653 = tpu.matmul %650, %652, %cst_508 {dimension_numbers = #tpu.dot_dimension_numbers<[1], [0], [0], [1], [0, 0, 1, 1], [], []>} : vector<8x32xf32>, vector<32x64xf32>, vector<8x64xf32> -> vector<8x64xf32>
    %654 = arith.addf %649, %653 : vector<8x64xf32>
    %655 = vector.extract_strided_slice %7 {offsets = [296, 0], sizes = [8, 32], strides = [1, 1]} : vector<512x32xf32> to vector<8x32xf32>
    %c3_509 = arith.constant 3 : index
    %c0_510 = arith.constant 0 : index
    %c0_511 = arith.constant 0 : index
    %656 = vector.load %arg4[%c3_509, %c0_510, %c0_511] : memref<16x32x64xf32, #tpu.memory_space<vmem>>, vector<1x32x64xf32>
    %657 = vector.shape_cast %656 : vector<1x32x64xf32> to vector<32x64xf32>
    %cst_512 = arith.constant dense<0.000000e+00> : vector<8x64xf32>
    %658 = tpu.matmul %655, %657, %cst_512 {dimension_numbers = #tpu.dot_dimension_numbers<[1], [0], [0], [1], [0, 0, 1, 1], [], []>} : vector<8x32xf32>, vector<32x64xf32>, vector<8x64xf32> -> vector<8x64xf32>
    %659 = arith.addf %654, %658 : vector<8x64xf32>
    %660 = vector.extract_strided_slice %7 {offsets = [336, 0], sizes = [8, 32], strides = [1, 1]} : vector<512x32xf32> to vector<8x32xf32>
    %c4_513 = arith.constant 4 : index
    %c0_514 = arith.constant 0 : index
    %c0_515 = arith.constant 0 : index
    %661 = vector.load %arg4[%c4_513, %c0_514, %c0_515] : memref<16x32x64xf32, #tpu.memory_space<vmem>>, vector<1x32x64xf32>
    %662 = vector.shape_cast %661 : vector<1x32x64xf32> to vector<32x64xf32>
    %cst_516 = arith.constant dense<0.000000e+00> : vector<8x64xf32>
    %663 = tpu.matmul %660, %662, %cst_516 {dimension_numbers = #tpu.dot_dimension_numbers<[1], [0], [0], [1], [0, 0, 1, 1], [], []>} : vector<8x32xf32>, vector<32x64xf32>, vector<8x64xf32> -> vector<8x64xf32>
    %664 = arith.addf %659, %663 : vector<8x64xf32>
    %665 = vector.extract_strided_slice %7 {offsets = [344, 0], sizes = [8, 32], strides = [1, 1]} : vector<512x32xf32> to vector<8x32xf32>
    %c5_517 = arith.constant 5 : index
    %c0_518 = arith.constant 0 : index
    %c0_519 = arith.constant 0 : index
    %666 = vector.load %arg4[%c5_517, %c0_518, %c0_519] : memref<16x32x64xf32, #tpu.memory_space<vmem>>, vector<1x32x64xf32>
    %667 = vector.shape_cast %666 : vector<1x32x64xf32> to vector<32x64xf32>
    %cst_520 = arith.constant dense<0.000000e+00> : vector<8x64xf32>
    %668 = tpu.matmul %665, %667, %cst_520 {dimension_numbers = #tpu.dot_dimension_numbers<[1], [0], [0], [1], [0, 0, 1, 1], [], []>} : vector<8x32xf32>, vector<32x64xf32>, vector<8x64xf32> -> vector<8x64xf32>
    %669 = arith.addf %664, %668 : vector<8x64xf32>
    %670 = vector.extract_strided_slice %7 {offsets = [352, 0], sizes = [8, 32], strides = [1, 1]} : vector<512x32xf32> to vector<8x32xf32>
    %c6_521 = arith.constant 6 : index
    %c0_522 = arith.constant 0 : index
    %c0_523 = arith.constant 0 : index
    %671 = vector.load %arg4[%c6_521, %c0_522, %c0_523] : memref<16x32x64xf32, #tpu.memory_space<vmem>>, vector<1x32x64xf32>
    %672 = vector.shape_cast %671 : vector<1x32x64xf32> to vector<32x64xf32>
    %cst_524 = arith.constant dense<0.000000e+00> : vector<8x64xf32>
    %673 = tpu.matmul %670, %672, %cst_524 {dimension_numbers = #tpu.dot_dimension_numbers<[1], [0], [0], [1], [0, 0, 1, 1], [], []>} : vector<8x32xf32>, vector<32x64xf32>, vector<8x64xf32> -> vector<8x64xf32>
    %674 = arith.addf %669, %673 : vector<8x64xf32>
    %675 = vector.extract_strided_slice %7 {offsets = [360, 0], sizes = [8, 32], strides = [1, 1]} : vector<512x32xf32> to vector<8x32xf32>
    %c7_525 = arith.constant 7 : index
    %c0_526 = arith.constant 0 : index
    %c0_527 = arith.constant 0 : index
    %676 = vector.load %arg4[%c7_525, %c0_526, %c0_527] : memref<16x32x64xf32, #tpu.memory_space<vmem>>, vector<1x32x64xf32>
    %677 = vector.shape_cast %676 : vector<1x32x64xf32> to vector<32x64xf32>
    %cst_528 = arith.constant dense<0.000000e+00> : vector<8x64xf32>
    %678 = tpu.matmul %675, %677, %cst_528 {dimension_numbers = #tpu.dot_dimension_numbers<[1], [0], [0], [1], [0, 0, 1, 1], [], []>} : vector<8x32xf32>, vector<32x64xf32>, vector<8x64xf32> -> vector<8x64xf32>
    %679 = arith.addf %674, %678 : vector<8x64xf32>
    %680 = vector.extract_strided_slice %7 {offsets = [400, 0], sizes = [8, 32], strides = [1, 1]} : vector<512x32xf32> to vector<8x32xf32>
    %c8_529 = arith.constant 8 : index
    %c0_530 = arith.constant 0 : index
    %c0_531 = arith.constant 0 : index
    %681 = vector.load %arg4[%c8_529, %c0_530, %c0_531] : memref<16x32x64xf32, #tpu.memory_space<vmem>>, vector<1x32x64xf32>
    %682 = vector.shape_cast %681 : vector<1x32x64xf32> to vector<32x64xf32>
    %cst_532 = arith.constant dense<0.000000e+00> : vector<8x64xf32>
    %683 = tpu.matmul %680, %682, %cst_532 {dimension_numbers = #tpu.dot_dimension_numbers<[1], [0], [0], [1], [0, 0, 1, 1], [], []>} : vector<8x32xf32>, vector<32x64xf32>, vector<8x64xf32> -> vector<8x64xf32>
    %684 = arith.addf %679, %683 : vector<8x64xf32>
    %685 = vector.extract_strided_slice %7 {offsets = [408, 0], sizes = [8, 32], strides = [1, 1]} : vector<512x32xf32> to vector<8x32xf32>
    %c9_533 = arith.constant 9 : index
    %c0_534 = arith.constant 0 : index
    %c0_535 = arith.constant 0 : index
    %686 = vector.load %arg4[%c9_533, %c0_534, %c0_535] : memref<16x32x64xf32, #tpu.memory_space<vmem>>, vector<1x32x64xf32>
    %687 = vector.shape_cast %686 : vector<1x32x64xf32> to vector<32x64xf32>
    %cst_536 = arith.constant dense<0.000000e+00> : vector<8x64xf32>
    %688 = tpu.matmul %685, %687, %cst_536 {dimension_numbers = #tpu.dot_dimension_numbers<[1], [0], [0], [1], [0, 0, 1, 1], [], []>} : vector<8x32xf32>, vector<32x64xf32>, vector<8x64xf32> -> vector<8x64xf32>
    %689 = arith.addf %684, %688 : vector<8x64xf32>
    %690 = vector.extract_strided_slice %7 {offsets = [416, 0], sizes = [8, 32], strides = [1, 1]} : vector<512x32xf32> to vector<8x32xf32>
    %c10_537 = arith.constant 10 : index
    %c0_538 = arith.constant 0 : index
    %c0_539 = arith.constant 0 : index
    %691 = vector.load %arg4[%c10_537, %c0_538, %c0_539] : memref<16x32x64xf32, #tpu.memory_space<vmem>>, vector<1x32x64xf32>
    %692 = vector.shape_cast %691 : vector<1x32x64xf32> to vector<32x64xf32>
    %cst_540 = arith.constant dense<0.000000e+00> : vector<8x64xf32>
    %693 = tpu.matmul %690, %692, %cst_540 {dimension_numbers = #tpu.dot_dimension_numbers<[1], [0], [0], [1], [0, 0, 1, 1], [], []>} : vector<8x32xf32>, vector<32x64xf32>, vector<8x64xf32> -> vector<8x64xf32>
    %694 = arith.addf %689, %693 : vector<8x64xf32>
    %695 = vector.extract_strided_slice %7 {offsets = [424, 0], sizes = [8, 32], strides = [1, 1]} : vector<512x32xf32> to vector<8x32xf32>
    %c11_541 = arith.constant 11 : index
    %c0_542 = arith.constant 0 : index
    %c0_543 = arith.constant 0 : index
    %696 = vector.load %arg4[%c11_541, %c0_542, %c0_543] : memref<16x32x64xf32, #tpu.memory_space<vmem>>, vector<1x32x64xf32>
    %697 = vector.shape_cast %696 : vector<1x32x64xf32> to vector<32x64xf32>
    %cst_544 = arith.constant dense<0.000000e+00> : vector<8x64xf32>
    %698 = tpu.matmul %695, %697, %cst_544 {dimension_numbers = #tpu.dot_dimension_numbers<[1], [0], [0], [1], [0, 0, 1, 1], [], []>} : vector<8x32xf32>, vector<32x64xf32>, vector<8x64xf32> -> vector<8x64xf32>
    %699 = arith.addf %694, %698 : vector<8x64xf32>
    %700 = vector.extract_strided_slice %7 {offsets = [464, 0], sizes = [8, 32], strides = [1, 1]} : vector<512x32xf32> to vector<8x32xf32>
    %c12_545 = arith.constant 12 : index
    %c0_546 = arith.constant 0 : index
    %c0_547 = arith.constant 0 : index
    %701 = vector.load %arg4[%c12_545, %c0_546, %c0_547] : memref<16x32x64xf32, #tpu.memory_space<vmem>>, vector<1x32x64xf32>
    %702 = vector.shape_cast %701 : vector<1x32x64xf32> to vector<32x64xf32>
    %cst_548 = arith.constant dense<0.000000e+00> : vector<8x64xf32>
    %703 = tpu.matmul %700, %702, %cst_548 {dimension_numbers = #tpu.dot_dimension_numbers<[1], [0], [0], [1], [0, 0, 1, 1], [], []>} : vector<8x32xf32>, vector<32x64xf32>, vector<8x64xf32> -> vector<8x64xf32>
    %704 = arith.addf %699, %703 : vector<8x64xf32>
    %705 = vector.extract_strided_slice %7 {offsets = [472, 0], sizes = [8, 32], strides = [1, 1]} : vector<512x32xf32> to vector<8x32xf32>
    %c13_549 = arith.constant 13 : index
    %c0_550 = arith.constant 0 : index
    %c0_551 = arith.constant 0 : index
    %706 = vector.load %arg4[%c13_549, %c0_550, %c0_551] : memref<16x32x64xf32, #tpu.memory_space<vmem>>, vector<1x32x64xf32>
    %707 = vector.shape_cast %706 : vector<1x32x64xf32> to vector<32x64xf32>
    %cst_552 = arith.constant dense<0.000000e+00> : vector<8x64xf32>
    %708 = tpu.matmul %705, %707, %cst_552 {dimension_numbers = #tpu.dot_dimension_numbers<[1], [0], [0], [1], [0, 0, 1, 1], [], []>} : vector<8x32xf32>, vector<32x64xf32>, vector<8x64xf32> -> vector<8x64xf32>
    %709 = arith.addf %704, %708 : vector<8x64xf32>
    %710 = vector.extract_strided_slice %7 {offsets = [480, 0], sizes = [8, 32], strides = [1, 1]} : vector<512x32xf32> to vector<8x32xf32>
    %c14_553 = arith.constant 14 : index
    %c0_554 = arith.constant 0 : index
    %c0_555 = arith.constant 0 : index
    %711 = vector.load %arg4[%c14_553, %c0_554, %c0_555] : memref<16x32x64xf32, #tpu.memory_space<vmem>>, vector<1x32x64xf32>
    %712 = vector.shape_cast %711 : vector<1x32x64xf32> to vector<32x64xf32>
    %cst_556 = arith.constant dense<0.000000e+00> : vector<8x64xf32>
    %713 = tpu.matmul %710, %712, %cst_556 {dimension_numbers = #tpu.dot_dimension_numbers<[1], [0], [0], [1], [0, 0, 1, 1], [], []>} : vector<8x32xf32>, vector<32x64xf32>, vector<8x64xf32> -> vector<8x64xf32>
    %714 = arith.addf %709, %713 : vector<8x64xf32>
    %715 = vector.extract_strided_slice %7 {offsets = [488, 0], sizes = [8, 32], strides = [1, 1]} : vector<512x32xf32> to vector<8x32xf32>
    %c15_557 = arith.constant 15 : index
    %c0_558 = arith.constant 0 : index
    %c0_559 = arith.constant 0 : index
    %716 = vector.load %arg4[%c15_557, %c0_558, %c0_559] : memref<16x32x64xf32, #tpu.memory_space<vmem>>, vector<1x32x64xf32>
    %717 = vector.shape_cast %716 : vector<1x32x64xf32> to vector<32x64xf32>
    %cst_560 = arith.constant dense<0.000000e+00> : vector<8x64xf32>
    %718 = tpu.matmul %715, %717, %cst_560 {dimension_numbers = #tpu.dot_dimension_numbers<[1], [0], [0], [1], [0, 0, 1, 1], [], []>} : vector<8x32xf32>, vector<32x64xf32>, vector<8x64xf32> -> vector<8x64xf32>
    %719 = arith.addf %714, %718 : vector<8x64xf32>
    %c0_561 = arith.constant 0 : index
    %c0_562 = arith.constant 0 : index
    %720 = vector.load %arg5[%c0_561, %c0_562] : memref<1x64xf32, #tpu.memory_space<vmem>>, vector<1x64xf32>
    %721 = vector.broadcast %720 : vector<1x64xf32> to vector<8x64xf32>
    %722 = arith.addf %719, %721 : vector<8x64xf32>
    %cst_563 = arith.constant 0.000000e+00 : f32
    %723 = vector.broadcast %cst_563 : f32 to vector<8x64xf32>
    %724 = arith.maximumf %722, %723 : vector<8x64xf32>
    %c7_564 = arith.constant 7 : index
    %c0_565 = arith.constant 0 : index
    %c0_566 = arith.constant 0 : index
    %725 = vector.load %arg6[%c7_564, %c0_565, %c0_566] : memref<9x64x64xf32, #tpu.memory_space<vmem>>, vector<1x64x64xf32>
    %726 = vector.shape_cast %725 : vector<1x64x64xf32> to vector<64x64xf32>
    %cst_567 = arith.constant dense<0.000000e+00> : vector<8x64xf32>
    %727 = tpu.matmul %724, %726, %cst_567 {dimension_numbers = #tpu.dot_dimension_numbers<[1], [0], [0], [1], [0, 0, 1, 1], [], []>} : vector<8x64xf32>, vector<64x64xf32>, vector<8x64xf32> -> vector<8x64xf32>
    %728 = arith.addf %638, %727 : vector<8x64xf32>
    %cst_568 = arith.constant 0.000000e+00 : f32
    %729 = vector.broadcast %cst_568 : f32 to vector<8x64xf32>
    %730 = vector.extract_strided_slice %7 {offsets = [288, 0], sizes = [8, 32], strides = [1, 1]} : vector<512x32xf32> to vector<8x32xf32>
    %c0_569 = arith.constant 0 : index
    %c0_570 = arith.constant 0 : index
    %c0_571 = arith.constant 0 : index
    %731 = vector.load %arg4[%c0_569, %c0_570, %c0_571] : memref<16x32x64xf32, #tpu.memory_space<vmem>>, vector<1x32x64xf32>
    %732 = vector.shape_cast %731 : vector<1x32x64xf32> to vector<32x64xf32>
    %cst_572 = arith.constant dense<0.000000e+00> : vector<8x64xf32>
    %733 = tpu.matmul %730, %732, %cst_572 {dimension_numbers = #tpu.dot_dimension_numbers<[1], [0], [0], [1], [0, 0, 1, 1], [], []>} : vector<8x32xf32>, vector<32x64xf32>, vector<8x64xf32> -> vector<8x64xf32>
    %734 = arith.addf %729, %733 : vector<8x64xf32>
    %735 = vector.extract_strided_slice %7 {offsets = [296, 0], sizes = [8, 32], strides = [1, 1]} : vector<512x32xf32> to vector<8x32xf32>
    %c1_573 = arith.constant 1 : index
    %c0_574 = arith.constant 0 : index
    %c0_575 = arith.constant 0 : index
    %736 = vector.load %arg4[%c1_573, %c0_574, %c0_575] : memref<16x32x64xf32, #tpu.memory_space<vmem>>, vector<1x32x64xf32>
    %737 = vector.shape_cast %736 : vector<1x32x64xf32> to vector<32x64xf32>
    %cst_576 = arith.constant dense<0.000000e+00> : vector<8x64xf32>
    %738 = tpu.matmul %735, %737, %cst_576 {dimension_numbers = #tpu.dot_dimension_numbers<[1], [0], [0], [1], [0, 0, 1, 1], [], []>} : vector<8x32xf32>, vector<32x64xf32>, vector<8x64xf32> -> vector<8x64xf32>
    %739 = arith.addf %734, %738 : vector<8x64xf32>
    %740 = vector.extract_strided_slice %7 {offsets = [304, 0], sizes = [8, 32], strides = [1, 1]} : vector<512x32xf32> to vector<8x32xf32>
    %c2_577 = arith.constant 2 : index
    %c0_578 = arith.constant 0 : index
    %c0_579 = arith.constant 0 : index
    %741 = vector.load %arg4[%c2_577, %c0_578, %c0_579] : memref<16x32x64xf32, #tpu.memory_space<vmem>>, vector<1x32x64xf32>
    %742 = vector.shape_cast %741 : vector<1x32x64xf32> to vector<32x64xf32>
    %cst_580 = arith.constant dense<0.000000e+00> : vector<8x64xf32>
    %743 = tpu.matmul %740, %742, %cst_580 {dimension_numbers = #tpu.dot_dimension_numbers<[1], [0], [0], [1], [0, 0, 1, 1], [], []>} : vector<8x32xf32>, vector<32x64xf32>, vector<8x64xf32> -> vector<8x64xf32>
    %744 = arith.addf %739, %743 : vector<8x64xf32>
    %745 = vector.extract_strided_slice %7 {offsets = [312, 0], sizes = [8, 32], strides = [1, 1]} : vector<512x32xf32> to vector<8x32xf32>
    %c3_581 = arith.constant 3 : index
    %c0_582 = arith.constant 0 : index
    %c0_583 = arith.constant 0 : index
    %746 = vector.load %arg4[%c3_581, %c0_582, %c0_583] : memref<16x32x64xf32, #tpu.memory_space<vmem>>, vector<1x32x64xf32>
    %747 = vector.shape_cast %746 : vector<1x32x64xf32> to vector<32x64xf32>
    %cst_584 = arith.constant dense<0.000000e+00> : vector<8x64xf32>
    %748 = tpu.matmul %745, %747, %cst_584 {dimension_numbers = #tpu.dot_dimension_numbers<[1], [0], [0], [1], [0, 0, 1, 1], [], []>} : vector<8x32xf32>, vector<32x64xf32>, vector<8x64xf32> -> vector<8x64xf32>
    %749 = arith.addf %744, %748 : vector<8x64xf32>
    %750 = vector.extract_strided_slice %7 {offsets = [352, 0], sizes = [8, 32], strides = [1, 1]} : vector<512x32xf32> to vector<8x32xf32>
    %c4_585 = arith.constant 4 : index
    %c0_586 = arith.constant 0 : index
    %c0_587 = arith.constant 0 : index
    %751 = vector.load %arg4[%c4_585, %c0_586, %c0_587] : memref<16x32x64xf32, #tpu.memory_space<vmem>>, vector<1x32x64xf32>
    %752 = vector.shape_cast %751 : vector<1x32x64xf32> to vector<32x64xf32>
    %cst_588 = arith.constant dense<0.000000e+00> : vector<8x64xf32>
    %753 = tpu.matmul %750, %752, %cst_588 {dimension_numbers = #tpu.dot_dimension_numbers<[1], [0], [0], [1], [0, 0, 1, 1], [], []>} : vector<8x32xf32>, vector<32x64xf32>, vector<8x64xf32> -> vector<8x64xf32>
    %754 = arith.addf %749, %753 : vector<8x64xf32>
    %755 = vector.extract_strided_slice %7 {offsets = [360, 0], sizes = [8, 32], strides = [1, 1]} : vector<512x32xf32> to vector<8x32xf32>
    %c5_589 = arith.constant 5 : index
    %c0_590 = arith.constant 0 : index
    %c0_591 = arith.constant 0 : index
    %756 = vector.load %arg4[%c5_589, %c0_590, %c0_591] : memref<16x32x64xf32, #tpu.memory_space<vmem>>, vector<1x32x64xf32>
    %757 = vector.shape_cast %756 : vector<1x32x64xf32> to vector<32x64xf32>
    %cst_592 = arith.constant dense<0.000000e+00> : vector<8x64xf32>
    %758 = tpu.matmul %755, %757, %cst_592 {dimension_numbers = #tpu.dot_dimension_numbers<[1], [0], [0], [1], [0, 0, 1, 1], [], []>} : vector<8x32xf32>, vector<32x64xf32>, vector<8x64xf32> -> vector<8x64xf32>
    %759 = arith.addf %754, %758 : vector<8x64xf32>
    %760 = vector.extract_strided_slice %7 {offsets = [368, 0], sizes = [8, 32], strides = [1, 1]} : vector<512x32xf32> to vector<8x32xf32>
    %c6_593 = arith.constant 6 : index
    %c0_594 = arith.constant 0 : index
    %c0_595 = arith.constant 0 : index
    %761 = vector.load %arg4[%c6_593, %c0_594, %c0_595] : memref<16x32x64xf32, #tpu.memory_space<vmem>>, vector<1x32x64xf32>
    %762 = vector.shape_cast %761 : vector<1x32x64xf32> to vector<32x64xf32>
    %cst_596 = arith.constant dense<0.000000e+00> : vector<8x64xf32>
    %763 = tpu.matmul %760, %762, %cst_596 {dimension_numbers = #tpu.dot_dimension_numbers<[1], [0], [0], [1], [0, 0, 1, 1], [], []>} : vector<8x32xf32>, vector<32x64xf32>, vector<8x64xf32> -> vector<8x64xf32>
    %764 = arith.addf %759, %763 : vector<8x64xf32>
    %765 = vector.extract_strided_slice %7 {offsets = [376, 0], sizes = [8, 32], strides = [1, 1]} : vector<512x32xf32> to vector<8x32xf32>
    %c7_597 = arith.constant 7 : index
    %c0_598 = arith.constant 0 : index
    %c0_599 = arith.constant 0 : index
    %766 = vector.load %arg4[%c7_597, %c0_598, %c0_599] : memref<16x32x64xf32, #tpu.memory_space<vmem>>, vector<1x32x64xf32>
    %767 = vector.shape_cast %766 : vector<1x32x64xf32> to vector<32x64xf32>
    %cst_600 = arith.constant dense<0.000000e+00> : vector<8x64xf32>
    %768 = tpu.matmul %765, %767, %cst_600 {dimension_numbers = #tpu.dot_dimension_numbers<[1], [0], [0], [1], [0, 0, 1, 1], [], []>} : vector<8x32xf32>, vector<32x64xf32>, vector<8x64xf32> -> vector<8x64xf32>
    %769 = arith.addf %764, %768 : vector<8x64xf32>
    %770 = vector.extract_strided_slice %7 {offsets = [416, 0], sizes = [8, 32], strides = [1, 1]} : vector<512x32xf32> to vector<8x32xf32>
    %c8_601 = arith.constant 8 : index
    %c0_602 = arith.constant 0 : index
    %c0_603 = arith.constant 0 : index
    %771 = vector.load %arg4[%c8_601, %c0_602, %c0_603] : memref<16x32x64xf32, #tpu.memory_space<vmem>>, vector<1x32x64xf32>
    %772 = vector.shape_cast %771 : vector<1x32x64xf32> to vector<32x64xf32>
    %cst_604 = arith.constant dense<0.000000e+00> : vector<8x64xf32>
    %773 = tpu.matmul %770, %772, %cst_604 {dimension_numbers = #tpu.dot_dimension_numbers<[1], [0], [0], [1], [0, 0, 1, 1], [], []>} : vector<8x32xf32>, vector<32x64xf32>, vector<8x64xf32> -> vector<8x64xf32>
    %774 = arith.addf %769, %773 : vector<8x64xf32>
    %775 = vector.extract_strided_slice %7 {offsets = [424, 0], sizes = [8, 32], strides = [1, 1]} : vector<512x32xf32> to vector<8x32xf32>
    %c9_605 = arith.constant 9 : index
    %c0_606 = arith.constant 0 : index
    %c0_607 = arith.constant 0 : index
    %776 = vector.load %arg4[%c9_605, %c0_606, %c0_607] : memref<16x32x64xf32, #tpu.memory_space<vmem>>, vector<1x32x64xf32>
    %777 = vector.shape_cast %776 : vector<1x32x64xf32> to vector<32x64xf32>
    %cst_608 = arith.constant dense<0.000000e+00> : vector<8x64xf32>
    %778 = tpu.matmul %775, %777, %cst_608 {dimension_numbers = #tpu.dot_dimension_numbers<[1], [0], [0], [1], [0, 0, 1, 1], [], []>} : vector<8x32xf32>, vector<32x64xf32>, vector<8x64xf32> -> vector<8x64xf32>
    %779 = arith.addf %774, %778 : vector<8x64xf32>
    %780 = vector.extract_strided_slice %7 {offsets = [432, 0], sizes = [8, 32], strides = [1, 1]} : vector<512x32xf32> to vector<8x32xf32>
    %c10_609 = arith.constant 10 : index
    %c0_610 = arith.constant 0 : index
    %c0_611 = arith.constant 0 : index
    %781 = vector.load %arg4[%c10_609, %c0_610, %c0_611] : memref<16x32x64xf32, #tpu.memory_space<vmem>>, vector<1x32x64xf32>
    %782 = vector.shape_cast %781 : vector<1x32x64xf32> to vector<32x64xf32>
    %cst_612 = arith.constant dense<0.000000e+00> : vector<8x64xf32>
    %783 = tpu.matmul %780, %782, %cst_612 {dimension_numbers = #tpu.dot_dimension_numbers<[1], [0], [0], [1], [0, 0, 1, 1], [], []>} : vector<8x32xf32>, vector<32x64xf32>, vector<8x64xf32> -> vector<8x64xf32>
    %784 = arith.addf %779, %783 : vector<8x64xf32>
    %785 = vector.extract_strided_slice %7 {offsets = [440, 0], sizes = [8, 32], strides = [1, 1]} : vector<512x32xf32> to vector<8x32xf32>
    %c11_613 = arith.constant 11 : index
    %c0_614 = arith.constant 0 : index
    %c0_615 = arith.constant 0 : index
    %786 = vector.load %arg4[%c11_613, %c0_614, %c0_615] : memref<16x32x64xf32, #tpu.memory_space<vmem>>, vector<1x32x64xf32>
    %787 = vector.shape_cast %786 : vector<1x32x64xf32> to vector<32x64xf32>
    %cst_616 = arith.constant dense<0.000000e+00> : vector<8x64xf32>
    %788 = tpu.matmul %785, %787, %cst_616 {dimension_numbers = #tpu.dot_dimension_numbers<[1], [0], [0], [1], [0, 0, 1, 1], [], []>} : vector<8x32xf32>, vector<32x64xf32>, vector<8x64xf32> -> vector<8x64xf32>
    %789 = arith.addf %784, %788 : vector<8x64xf32>
    %790 = vector.extract_strided_slice %7 {offsets = [480, 0], sizes = [8, 32], strides = [1, 1]} : vector<512x32xf32> to vector<8x32xf32>
    %c12_617 = arith.constant 12 : index
    %c0_618 = arith.constant 0 : index
    %c0_619 = arith.constant 0 : index
    %791 = vector.load %arg4[%c12_617, %c0_618, %c0_619] : memref<16x32x64xf32, #tpu.memory_space<vmem>>, vector<1x32x64xf32>
    %792 = vector.shape_cast %791 : vector<1x32x64xf32> to vector<32x64xf32>
    %cst_620 = arith.constant dense<0.000000e+00> : vector<8x64xf32>
    %793 = tpu.matmul %790, %792, %cst_620 {dimension_numbers = #tpu.dot_dimension_numbers<[1], [0], [0], [1], [0, 0, 1, 1], [], []>} : vector<8x32xf32>, vector<32x64xf32>, vector<8x64xf32> -> vector<8x64xf32>
    %794 = arith.addf %789, %793 : vector<8x64xf32>
    %795 = vector.extract_strided_slice %7 {offsets = [488, 0], sizes = [8, 32], strides = [1, 1]} : vector<512x32xf32> to vector<8x32xf32>
    %c13_621 = arith.constant 13 : index
    %c0_622 = arith.constant 0 : index
    %c0_623 = arith.constant 0 : index
    %796 = vector.load %arg4[%c13_621, %c0_622, %c0_623] : memref<16x32x64xf32, #tpu.memory_space<vmem>>, vector<1x32x64xf32>
    %797 = vector.shape_cast %796 : vector<1x32x64xf32> to vector<32x64xf32>
    %cst_624 = arith.constant dense<0.000000e+00> : vector<8x64xf32>
    %798 = tpu.matmul %795, %797, %cst_624 {dimension_numbers = #tpu.dot_dimension_numbers<[1], [0], [0], [1], [0, 0, 1, 1], [], []>} : vector<8x32xf32>, vector<32x64xf32>, vector<8x64xf32> -> vector<8x64xf32>
    %799 = arith.addf %794, %798 : vector<8x64xf32>
    %800 = vector.extract_strided_slice %7 {offsets = [496, 0], sizes = [8, 32], strides = [1, 1]} : vector<512x32xf32> to vector<8x32xf32>
    %c14_625 = arith.constant 14 : index
    %c0_626 = arith.constant 0 : index
    %c0_627 = arith.constant 0 : index
    %801 = vector.load %arg4[%c14_625, %c0_626, %c0_627] : memref<16x32x64xf32, #tpu.memory_space<vmem>>, vector<1x32x64xf32>
    %802 = vector.shape_cast %801 : vector<1x32x64xf32> to vector<32x64xf32>
    %cst_628 = arith.constant dense<0.000000e+00> : vector<8x64xf32>
    %803 = tpu.matmul %800, %802, %cst_628 {dimension_numbers = #tpu.dot_dimension_numbers<[1], [0], [0], [1], [0, 0, 1, 1], [], []>} : vector<8x32xf32>, vector<32x64xf32>, vector<8x64xf32> -> vector<8x64xf32>
    %804 = arith.addf %799, %803 : vector<8x64xf32>
    %805 = vector.extract_strided_slice %7 {offsets = [504, 0], sizes = [8, 32], strides = [1, 1]} : vector<512x32xf32> to vector<8x32xf32>
    %c15_629 = arith.constant 15 : index
    %c0_630 = arith.constant 0 : index
    %c0_631 = arith.constant 0 : index
    %806 = vector.load %arg4[%c15_629, %c0_630, %c0_631] : memref<16x32x64xf32, #tpu.memory_space<vmem>>, vector<1x32x64xf32>
    %807 = vector.shape_cast %806 : vector<1x32x64xf32> to vector<32x64xf32>
    %cst_632 = arith.constant dense<0.000000e+00> : vector<8x64xf32>
    %808 = tpu.matmul %805, %807, %cst_632 {dimension_numbers = #tpu.dot_dimension_numbers<[1], [0], [0], [1], [0, 0, 1, 1], [], []>} : vector<8x32xf32>, vector<32x64xf32>, vector<8x64xf32> -> vector<8x64xf32>
    %809 = arith.addf %804, %808 : vector<8x64xf32>
    %c0_633 = arith.constant 0 : index
    %c0_634 = arith.constant 0 : index
    %810 = vector.load %arg5[%c0_633, %c0_634] : memref<1x64xf32, #tpu.memory_space<vmem>>, vector<1x64xf32>
    %811 = vector.broadcast %810 : vector<1x64xf32> to vector<8x64xf32>
    %812 = arith.addf %809, %811 : vector<8x64xf32>
    %cst_635 = arith.constant 0.000000e+00 : f32
    %813 = vector.broadcast %cst_635 : f32 to vector<8x64xf32>
    %814 = arith.maximumf %812, %813 : vector<8x64xf32>
    %c8_636 = arith.constant 8 : index
    %c0_637 = arith.constant 0 : index
    %c0_638 = arith.constant 0 : index
    %815 = vector.load %arg6[%c8_636, %c0_637, %c0_638] : memref<9x64x64xf32, #tpu.memory_space<vmem>>, vector<1x64x64xf32>
    %816 = vector.shape_cast %815 : vector<1x64x64xf32> to vector<64x64xf32>
    %cst_639 = arith.constant dense<0.000000e+00> : vector<8x64xf32>
    %817 = tpu.matmul %814, %816, %cst_639 {dimension_numbers = #tpu.dot_dimension_numbers<[1], [0], [0], [1], [0, 0, 1, 1], [], []>} : vector<8x64xf32>, vector<64x64xf32>, vector<8x64xf32> -> vector<8x64xf32>
    %818 = arith.addf %728, %817 : vector<8x64xf32>
    %c0_640 = arith.constant 0 : index
    %c0_641 = arith.constant 0 : index
    %819 = vector.load %arg7[%c0_640, %c0_641] : memref<1x64xf32, #tpu.memory_space<vmem>>, vector<1x64xf32>
    %820 = vector.broadcast %819 : vector<1x64xf32> to vector<8x64xf32>
    %821 = arith.addf %818, %820 : vector<8x64xf32>
    %cst_642 = arith.constant 0.000000e+00 : f32
    %822 = vector.broadcast %cst_642 : f32 to vector<8x64xf32>
    %823 = arith.maximumf %821, %822 : vector<8x64xf32>
    %c0_643 = arith.constant 0 : index
    %c0_644 = arith.constant 0 : index
    %824 = vector.load %arg1[%c0_643, %c0_644] : memref<8x1xf32, #tpu.memory_space<vmem>>, vector<8x1xf32>
    %cst_645 = arith.constant 0.000000e+00 : f32
    %825 = vector.broadcast %cst_645 : f32 to vector<2x32xf32>
    %cst_646 = arith.constant 0.000000e+00 : f32
    %826 = vector.broadcast %cst_646 : f32 to vector<2x32xf32>
    %827 = vector.extract_strided_slice %823 {offsets = [0, 0], sizes = [2, 64], strides = [1, 1]} : vector<8x64xf32> to vector<2x64xf32>
    %828 = vector.extract_strided_slice %824 {offsets = [0, 0], sizes = [2, 1], strides = [1, 1]} : vector<8x1xf32> to vector<2x1xf32>
    %c0_647 = arith.constant 0 : index
    %c0_648 = arith.constant 0 : index
    %c0_649 = arith.constant 0 : index
    %829 = vector.load %arg8[%c0_647, %c0_648, %c0_649] : memref<4x64x32xf32, #tpu.memory_space<vmem>>, vector<1x64x32xf32>
    %830 = vector.shape_cast %829 : vector<1x64x32xf32> to vector<64x32xf32>
    %cst_650 = arith.constant dense<0.000000e+00> : vector<2x32xf32>
    %831 = tpu.matmul %827, %830, %cst_650 {dimension_numbers = #tpu.dot_dimension_numbers<[1], [0], [0], [1], [0, 0, 1, 1], [], []>} : vector<2x64xf32>, vector<64x32xf32>, vector<2x32xf32> -> vector<2x32xf32>
    %c0_651 = arith.constant 0 : index
    %c0_652 = arith.constant 0 : index
    %c0_653 = arith.constant 0 : index
    %832 = vector.load %arg9[%c0_651, %c0_652, %c0_653] : memref<4x1x32xf32, #tpu.memory_space<vmem>>, vector<1x1x32xf32>
    %833 = vector.shape_cast %832 : vector<1x1x32xf32> to vector<1x32xf32>
    %834 = vector.broadcast %828 : vector<2x1xf32> to vector<2x32xf32>
    %835 = vector.broadcast %833 : vector<1x32xf32> to vector<2x32xf32>
    %836 = arith.mulf %834, %835 : vector<2x32xf32>
    %837 = arith.addf %831, %836 : vector<2x32xf32>
    %c0_654 = arith.constant 0 : index
    %c0_655 = arith.constant 0 : index
    %c0_656 = arith.constant 0 : index
    %838 = vector.load %arg10[%c0_654, %c0_655, %c0_656] : memref<4x32x32xf32, #tpu.memory_space<vmem>>, vector<1x32x32xf32>
    %839 = vector.shape_cast %838 : vector<1x32x32xf32> to vector<32x32xf32>
    %cst_657 = arith.constant dense<0.000000e+00> : vector<2x32xf32>
    %840 = tpu.matmul %825, %839, %cst_657 {dimension_numbers = #tpu.dot_dimension_numbers<[1], [0], [0], [1], [0, 0, 1, 1], [], []>} : vector<2x32xf32>, vector<32x32xf32>, vector<2x32xf32> -> vector<2x32xf32>
    %841 = arith.addf %837, %840 : vector<2x32xf32>
    %c0_658 = arith.constant 0 : index
    %c0_659 = arith.constant 0 : index
    %c0_660 = arith.constant 0 : index
    %842 = vector.load %arg11[%c0_658, %c0_659, %c0_660] : memref<4x1x32xf32, #tpu.memory_space<vmem>>, vector<1x1x32xf32>
    %843 = vector.shape_cast %842 : vector<1x1x32xf32> to vector<1x32xf32>
    %844 = vector.broadcast %843 : vector<1x32xf32> to vector<2x32xf32>
    %845 = arith.addf %841, %844 : vector<2x32xf32>
    %c1_661 = arith.constant 1 : index
    %c0_662 = arith.constant 0 : index
    %c0_663 = arith.constant 0 : index
    %846 = vector.load %arg8[%c1_661, %c0_662, %c0_663] : memref<4x64x32xf32, #tpu.memory_space<vmem>>, vector<1x64x32xf32>
    %847 = vector.shape_cast %846 : vector<1x64x32xf32> to vector<64x32xf32>
    %cst_664 = arith.constant dense<0.000000e+00> : vector<2x32xf32>
    %848 = tpu.matmul %827, %847, %cst_664 {dimension_numbers = #tpu.dot_dimension_numbers<[1], [0], [0], [1], [0, 0, 1, 1], [], []>} : vector<2x64xf32>, vector<64x32xf32>, vector<2x32xf32> -> vector<2x32xf32>
    %c1_665 = arith.constant 1 : index
    %c0_666 = arith.constant 0 : index
    %c0_667 = arith.constant 0 : index
    %849 = vector.load %arg9[%c1_665, %c0_666, %c0_667] : memref<4x1x32xf32, #tpu.memory_space<vmem>>, vector<1x1x32xf32>
    %850 = vector.shape_cast %849 : vector<1x1x32xf32> to vector<1x32xf32>
    %851 = vector.broadcast %828 : vector<2x1xf32> to vector<2x32xf32>
    %852 = vector.broadcast %850 : vector<1x32xf32> to vector<2x32xf32>
    %853 = arith.mulf %851, %852 : vector<2x32xf32>
    %854 = arith.addf %848, %853 : vector<2x32xf32>
    %c1_668 = arith.constant 1 : index
    %c0_669 = arith.constant 0 : index
    %c0_670 = arith.constant 0 : index
    %855 = vector.load %arg10[%c1_668, %c0_669, %c0_670] : memref<4x32x32xf32, #tpu.memory_space<vmem>>, vector<1x32x32xf32>
    %856 = vector.shape_cast %855 : vector<1x32x32xf32> to vector<32x32xf32>
    %cst_671 = arith.constant dense<0.000000e+00> : vector<2x32xf32>
    %857 = tpu.matmul %825, %856, %cst_671 {dimension_numbers = #tpu.dot_dimension_numbers<[1], [0], [0], [1], [0, 0, 1, 1], [], []>} : vector<2x32xf32>, vector<32x32xf32>, vector<2x32xf32> -> vector<2x32xf32>
    %858 = arith.addf %854, %857 : vector<2x32xf32>
    %c1_672 = arith.constant 1 : index
    %c0_673 = arith.constant 0 : index
    %c0_674 = arith.constant 0 : index
    %859 = vector.load %arg11[%c1_672, %c0_673, %c0_674] : memref<4x1x32xf32, #tpu.memory_space<vmem>>, vector<1x1x32xf32>
    %860 = vector.shape_cast %859 : vector<1x1x32xf32> to vector<1x32xf32>
    %861 = vector.broadcast %860 : vector<1x32xf32> to vector<2x32xf32>
    %862 = arith.addf %858, %861 : vector<2x32xf32>
    %c2_675 = arith.constant 2 : index
    %c0_676 = arith.constant 0 : index
    %c0_677 = arith.constant 0 : index
    %863 = vector.load %arg8[%c2_675, %c0_676, %c0_677] : memref<4x64x32xf32, #tpu.memory_space<vmem>>, vector<1x64x32xf32>
    %864 = vector.shape_cast %863 : vector<1x64x32xf32> to vector<64x32xf32>
    %cst_678 = arith.constant dense<0.000000e+00> : vector<2x32xf32>
    %865 = tpu.matmul %827, %864, %cst_678 {dimension_numbers = #tpu.dot_dimension_numbers<[1], [0], [0], [1], [0, 0, 1, 1], [], []>} : vector<2x64xf32>, vector<64x32xf32>, vector<2x32xf32> -> vector<2x32xf32>
    %c2_679 = arith.constant 2 : index
    %c0_680 = arith.constant 0 : index
    %c0_681 = arith.constant 0 : index
    %866 = vector.load %arg9[%c2_679, %c0_680, %c0_681] : memref<4x1x32xf32, #tpu.memory_space<vmem>>, vector<1x1x32xf32>
    %867 = vector.shape_cast %866 : vector<1x1x32xf32> to vector<1x32xf32>
    %868 = vector.broadcast %828 : vector<2x1xf32> to vector<2x32xf32>
    %869 = vector.broadcast %867 : vector<1x32xf32> to vector<2x32xf32>
    %870 = arith.mulf %868, %869 : vector<2x32xf32>
    %871 = arith.addf %865, %870 : vector<2x32xf32>
    %c2_682 = arith.constant 2 : index
    %c0_683 = arith.constant 0 : index
    %c0_684 = arith.constant 0 : index
    %872 = vector.load %arg10[%c2_682, %c0_683, %c0_684] : memref<4x32x32xf32, #tpu.memory_space<vmem>>, vector<1x32x32xf32>
    %873 = vector.shape_cast %872 : vector<1x32x32xf32> to vector<32x32xf32>
    %cst_685 = arith.constant dense<0.000000e+00> : vector<2x32xf32>
    %874 = tpu.matmul %825, %873, %cst_685 {dimension_numbers = #tpu.dot_dimension_numbers<[1], [0], [0], [1], [0, 0, 1, 1], [], []>} : vector<2x32xf32>, vector<32x32xf32>, vector<2x32xf32> -> vector<2x32xf32>
    %875 = arith.addf %871, %874 : vector<2x32xf32>
    %c2_686 = arith.constant 2 : index
    %c0_687 = arith.constant 0 : index
    %c0_688 = arith.constant 0 : index
    %876 = vector.load %arg11[%c2_686, %c0_687, %c0_688] : memref<4x1x32xf32, #tpu.memory_space<vmem>>, vector<1x1x32xf32>
    %877 = vector.shape_cast %876 : vector<1x1x32xf32> to vector<1x32xf32>
    %878 = vector.broadcast %877 : vector<1x32xf32> to vector<2x32xf32>
    %879 = arith.addf %875, %878 : vector<2x32xf32>
    %c3_689 = arith.constant 3 : index
    %c0_690 = arith.constant 0 : index
    %c0_691 = arith.constant 0 : index
    %880 = vector.load %arg8[%c3_689, %c0_690, %c0_691] : memref<4x64x32xf32, #tpu.memory_space<vmem>>, vector<1x64x32xf32>
    %881 = vector.shape_cast %880 : vector<1x64x32xf32> to vector<64x32xf32>
    %cst_692 = arith.constant dense<0.000000e+00> : vector<2x32xf32>
    %882 = tpu.matmul %827, %881, %cst_692 {dimension_numbers = #tpu.dot_dimension_numbers<[1], [0], [0], [1], [0, 0, 1, 1], [], []>} : vector<2x64xf32>, vector<64x32xf32>, vector<2x32xf32> -> vector<2x32xf32>
    %c3_693 = arith.constant 3 : index
    %c0_694 = arith.constant 0 : index
    %c0_695 = arith.constant 0 : index
    %883 = vector.load %arg9[%c3_693, %c0_694, %c0_695] : memref<4x1x32xf32, #tpu.memory_space<vmem>>, vector<1x1x32xf32>
    %884 = vector.shape_cast %883 : vector<1x1x32xf32> to vector<1x32xf32>
    %885 = vector.broadcast %828 : vector<2x1xf32> to vector<2x32xf32>
    %886 = vector.broadcast %884 : vector<1x32xf32> to vector<2x32xf32>
    %887 = arith.mulf %885, %886 : vector<2x32xf32>
    %888 = arith.addf %882, %887 : vector<2x32xf32>
    %c3_696 = arith.constant 3 : index
    %c0_697 = arith.constant 0 : index
    %c0_698 = arith.constant 0 : index
    %889 = vector.load %arg10[%c3_696, %c0_697, %c0_698] : memref<4x32x32xf32, #tpu.memory_space<vmem>>, vector<1x32x32xf32>
    %890 = vector.shape_cast %889 : vector<1x32x32xf32> to vector<32x32xf32>
    %cst_699 = arith.constant dense<0.000000e+00> : vector<2x32xf32>
    %891 = tpu.matmul %825, %890, %cst_699 {dimension_numbers = #tpu.dot_dimension_numbers<[1], [0], [0], [1], [0, 0, 1, 1], [], []>} : vector<2x32xf32>, vector<32x32xf32>, vector<2x32xf32> -> vector<2x32xf32>
    %892 = arith.addf %888, %891 : vector<2x32xf32>
    %c3_700 = arith.constant 3 : index
    %c0_701 = arith.constant 0 : index
    %c0_702 = arith.constant 0 : index
    %893 = vector.load %arg11[%c3_700, %c0_701, %c0_702] : memref<4x1x32xf32, #tpu.memory_space<vmem>>, vector<1x1x32xf32>
    %894 = vector.shape_cast %893 : vector<1x1x32xf32> to vector<1x32xf32>
    %895 = vector.broadcast %894 : vector<1x32xf32> to vector<2x32xf32>
    %896 = arith.addf %892, %895 : vector<2x32xf32>
    %897 = arith.negf %845 : vector<2x32xf32>
    %898 = math.exp %897 : vector<2x32xf32>
    %cst_703 = arith.constant 1.000000e+00 : f32
    %899 = vector.broadcast %cst_703 : f32 to vector<2x32xf32>
    %900 = arith.addf %899, %898 : vector<2x32xf32>
    %901 = arith.divf %899, %900 : vector<2x32xf32>
    %902 = arith.negf %862 : vector<2x32xf32>
    %903 = math.exp %902 : vector<2x32xf32>
    %cst_704 = arith.constant 1.000000e+00 : f32
    %904 = vector.broadcast %cst_704 : f32 to vector<2x32xf32>
    %905 = arith.addf %904, %903 : vector<2x32xf32>
    %906 = arith.divf %904, %905 : vector<2x32xf32>
    %907 = math.tanh %879 : vector<2x32xf32>
    %908 = arith.negf %896 : vector<2x32xf32>
    %909 = math.exp %908 : vector<2x32xf32>
    %cst_705 = arith.constant 1.000000e+00 : f32
    %910 = vector.broadcast %cst_705 : f32 to vector<2x32xf32>
    %911 = arith.addf %910, %909 : vector<2x32xf32>
    %912 = arith.divf %910, %911 : vector<2x32xf32>
    %913 = arith.mulf %906, %826 : vector<2x32xf32>
    %914 = arith.mulf %901, %907 : vector<2x32xf32>
    %915 = arith.addf %913, %914 : vector<2x32xf32>
    %916 = math.tanh %915 : vector<2x32xf32>
    %917 = arith.mulf %912, %916 : vector<2x32xf32>
    %918 = vector.extract_strided_slice %823 {offsets = [2, 0], sizes = [2, 64], strides = [1, 1]} : vector<8x64xf32> to vector<2x64xf32>
    %919 = vector.extract_strided_slice %824 {offsets = [2, 0], sizes = [2, 1], strides = [1, 1]} : vector<8x1xf32> to vector<2x1xf32>
    %c0_706 = arith.constant 0 : index
    %c0_707 = arith.constant 0 : index
    %c0_708 = arith.constant 0 : index
    %920 = vector.load %arg8[%c0_706, %c0_707, %c0_708] : memref<4x64x32xf32, #tpu.memory_space<vmem>>, vector<1x64x32xf32>
    %921 = vector.shape_cast %920 : vector<1x64x32xf32> to vector<64x32xf32>
    %cst_709 = arith.constant dense<0.000000e+00> : vector<2x32xf32>
    %922 = tpu.matmul %918, %921, %cst_709 {dimension_numbers = #tpu.dot_dimension_numbers<[1], [0], [0], [1], [0, 0, 1, 1], [], []>} : vector<2x64xf32>, vector<64x32xf32>, vector<2x32xf32> -> vector<2x32xf32>
    %c0_710 = arith.constant 0 : index
    %c0_711 = arith.constant 0 : index
    %c0_712 = arith.constant 0 : index
    %923 = vector.load %arg9[%c0_710, %c0_711, %c0_712] : memref<4x1x32xf32, #tpu.memory_space<vmem>>, vector<1x1x32xf32>
    %924 = vector.shape_cast %923 : vector<1x1x32xf32> to vector<1x32xf32>
    %925 = vector.broadcast %919 : vector<2x1xf32> to vector<2x32xf32>
    %926 = vector.broadcast %924 : vector<1x32xf32> to vector<2x32xf32>
    %927 = arith.mulf %925, %926 : vector<2x32xf32>
    %928 = arith.addf %922, %927 : vector<2x32xf32>
    %c0_713 = arith.constant 0 : index
    %c0_714 = arith.constant 0 : index
    %c0_715 = arith.constant 0 : index
    %929 = vector.load %arg10[%c0_713, %c0_714, %c0_715] : memref<4x32x32xf32, #tpu.memory_space<vmem>>, vector<1x32x32xf32>
    %930 = vector.shape_cast %929 : vector<1x32x32xf32> to vector<32x32xf32>
    %cst_716 = arith.constant dense<0.000000e+00> : vector<2x32xf32>
    %931 = tpu.matmul %917, %930, %cst_716 {dimension_numbers = #tpu.dot_dimension_numbers<[1], [0], [0], [1], [0, 0, 1, 1], [], []>} : vector<2x32xf32>, vector<32x32xf32>, vector<2x32xf32> -> vector<2x32xf32>
    %932 = arith.addf %928, %931 : vector<2x32xf32>
    %c0_717 = arith.constant 0 : index
    %c0_718 = arith.constant 0 : index
    %c0_719 = arith.constant 0 : index
    %933 = vector.load %arg11[%c0_717, %c0_718, %c0_719] : memref<4x1x32xf32, #tpu.memory_space<vmem>>, vector<1x1x32xf32>
    %934 = vector.shape_cast %933 : vector<1x1x32xf32> to vector<1x32xf32>
    %935 = vector.broadcast %934 : vector<1x32xf32> to vector<2x32xf32>
    %936 = arith.addf %932, %935 : vector<2x32xf32>
    %c1_720 = arith.constant 1 : index
    %c0_721 = arith.constant 0 : index
    %c0_722 = arith.constant 0 : index
    %937 = vector.load %arg8[%c1_720, %c0_721, %c0_722] : memref<4x64x32xf32, #tpu.memory_space<vmem>>, vector<1x64x32xf32>
    %938 = vector.shape_cast %937 : vector<1x64x32xf32> to vector<64x32xf32>
    %cst_723 = arith.constant dense<0.000000e+00> : vector<2x32xf32>
    %939 = tpu.matmul %918, %938, %cst_723 {dimension_numbers = #tpu.dot_dimension_numbers<[1], [0], [0], [1], [0, 0, 1, 1], [], []>} : vector<2x64xf32>, vector<64x32xf32>, vector<2x32xf32> -> vector<2x32xf32>
    %c1_724 = arith.constant 1 : index
    %c0_725 = arith.constant 0 : index
    %c0_726 = arith.constant 0 : index
    %940 = vector.load %arg9[%c1_724, %c0_725, %c0_726] : memref<4x1x32xf32, #tpu.memory_space<vmem>>, vector<1x1x32xf32>
    %941 = vector.shape_cast %940 : vector<1x1x32xf32> to vector<1x32xf32>
    %942 = vector.broadcast %919 : vector<2x1xf32> to vector<2x32xf32>
    %943 = vector.broadcast %941 : vector<1x32xf32> to vector<2x32xf32>
    %944 = arith.mulf %942, %943 : vector<2x32xf32>
    %945 = arith.addf %939, %944 : vector<2x32xf32>
    %c1_727 = arith.constant 1 : index
    %c0_728 = arith.constant 0 : index
    %c0_729 = arith.constant 0 : index
    %946 = vector.load %arg10[%c1_727, %c0_728, %c0_729] : memref<4x32x32xf32, #tpu.memory_space<vmem>>, vector<1x32x32xf32>
    %947 = vector.shape_cast %946 : vector<1x32x32xf32> to vector<32x32xf32>
    %cst_730 = arith.constant dense<0.000000e+00> : vector<2x32xf32>
    %948 = tpu.matmul %917, %947, %cst_730 {dimension_numbers = #tpu.dot_dimension_numbers<[1], [0], [0], [1], [0, 0, 1, 1], [], []>} : vector<2x32xf32>, vector<32x32xf32>, vector<2x32xf32> -> vector<2x32xf32>
    %949 = arith.addf %945, %948 : vector<2x32xf32>
    %c1_731 = arith.constant 1 : index
    %c0_732 = arith.constant 0 : index
    %c0_733 = arith.constant 0 : index
    %950 = vector.load %arg11[%c1_731, %c0_732, %c0_733] : memref<4x1x32xf32, #tpu.memory_space<vmem>>, vector<1x1x32xf32>
    %951 = vector.shape_cast %950 : vector<1x1x32xf32> to vector<1x32xf32>
    %952 = vector.broadcast %951 : vector<1x32xf32> to vector<2x32xf32>
    %953 = arith.addf %949, %952 : vector<2x32xf32>
    %c2_734 = arith.constant 2 : index
    %c0_735 = arith.constant 0 : index
    %c0_736 = arith.constant 0 : index
    %954 = vector.load %arg8[%c2_734, %c0_735, %c0_736] : memref<4x64x32xf32, #tpu.memory_space<vmem>>, vector<1x64x32xf32>
    %955 = vector.shape_cast %954 : vector<1x64x32xf32> to vector<64x32xf32>
    %cst_737 = arith.constant dense<0.000000e+00> : vector<2x32xf32>
    %956 = tpu.matmul %918, %955, %cst_737 {dimension_numbers = #tpu.dot_dimension_numbers<[1], [0], [0], [1], [0, 0, 1, 1], [], []>} : vector<2x64xf32>, vector<64x32xf32>, vector<2x32xf32> -> vector<2x32xf32>
    %c2_738 = arith.constant 2 : index
    %c0_739 = arith.constant 0 : index
    %c0_740 = arith.constant 0 : index
    %957 = vector.load %arg9[%c2_738, %c0_739, %c0_740] : memref<4x1x32xf32, #tpu.memory_space<vmem>>, vector<1x1x32xf32>
    %958 = vector.shape_cast %957 : vector<1x1x32xf32> to vector<1x32xf32>
    %959 = vector.broadcast %919 : vector<2x1xf32> to vector<2x32xf32>
    %960 = vector.broadcast %958 : vector<1x32xf32> to vector<2x32xf32>
    %961 = arith.mulf %959, %960 : vector<2x32xf32>
    %962 = arith.addf %956, %961 : vector<2x32xf32>
    %c2_741 = arith.constant 2 : index
    %c0_742 = arith.constant 0 : index
    %c0_743 = arith.constant 0 : index
    %963 = vector.load %arg10[%c2_741, %c0_742, %c0_743] : memref<4x32x32xf32, #tpu.memory_space<vmem>>, vector<1x32x32xf32>
    %964 = vector.shape_cast %963 : vector<1x32x32xf32> to vector<32x32xf32>
    %cst_744 = arith.constant dense<0.000000e+00> : vector<2x32xf32>
    %965 = tpu.matmul %917, %964, %cst_744 {dimension_numbers = #tpu.dot_dimension_numbers<[1], [0], [0], [1], [0, 0, 1, 1], [], []>} : vector<2x32xf32>, vector<32x32xf32>, vector<2x32xf32> -> vector<2x32xf32>
    %966 = arith.addf %962, %965 : vector<2x32xf32>
    %c2_745 = arith.constant 2 : index
    %c0_746 = arith.constant 0 : index
    %c0_747 = arith.constant 0 : index
    %967 = vector.load %arg11[%c2_745, %c0_746, %c0_747] : memref<4x1x32xf32, #tpu.memory_space<vmem>>, vector<1x1x32xf32>
    %968 = vector.shape_cast %967 : vector<1x1x32xf32> to vector<1x32xf32>
    %969 = vector.broadcast %968 : vector<1x32xf32> to vector<2x32xf32>
    %970 = arith.addf %966, %969 : vector<2x32xf32>
    %c3_748 = arith.constant 3 : index
    %c0_749 = arith.constant 0 : index
    %c0_750 = arith.constant 0 : index
    %971 = vector.load %arg8[%c3_748, %c0_749, %c0_750] : memref<4x64x32xf32, #tpu.memory_space<vmem>>, vector<1x64x32xf32>
    %972 = vector.shape_cast %971 : vector<1x64x32xf32> to vector<64x32xf32>
    %cst_751 = arith.constant dense<0.000000e+00> : vector<2x32xf32>
    %973 = tpu.matmul %918, %972, %cst_751 {dimension_numbers = #tpu.dot_dimension_numbers<[1], [0], [0], [1], [0, 0, 1, 1], [], []>} : vector<2x64xf32>, vector<64x32xf32>, vector<2x32xf32> -> vector<2x32xf32>
    %c3_752 = arith.constant 3 : index
    %c0_753 = arith.constant 0 : index
    %c0_754 = arith.constant 0 : index
    %974 = vector.load %arg9[%c3_752, %c0_753, %c0_754] : memref<4x1x32xf32, #tpu.memory_space<vmem>>, vector<1x1x32xf32>
    %975 = vector.shape_cast %974 : vector<1x1x32xf32> to vector<1x32xf32>
    %976 = vector.broadcast %919 : vector<2x1xf32> to vector<2x32xf32>
    %977 = vector.broadcast %975 : vector<1x32xf32> to vector<2x32xf32>
    %978 = arith.mulf %976, %977 : vector<2x32xf32>
    %979 = arith.addf %973, %978 : vector<2x32xf32>
    %c3_755 = arith.constant 3 : index
    %c0_756 = arith.constant 0 : index
    %c0_757 = arith.constant 0 : index
    %980 = vector.load %arg10[%c3_755, %c0_756, %c0_757] : memref<4x32x32xf32, #tpu.memory_space<vmem>>, vector<1x32x32xf32>
    %981 = vector.shape_cast %980 : vector<1x32x32xf32> to vector<32x32xf32>
    %cst_758 = arith.constant dense<0.000000e+00> : vector<2x32xf32>
    %982 = tpu.matmul %917, %981, %cst_758 {dimension_numbers = #tpu.dot_dimension_numbers<[1], [0], [0], [1], [0, 0, 1, 1], [], []>} : vector<2x32xf32>, vector<32x32xf32>, vector<2x32xf32> -> vector<2x32xf32>
    %983 = arith.addf %979, %982 : vector<2x32xf32>
    %c3_759 = arith.constant 3 : index
    %c0_760 = arith.constant 0 : index
    %c0_761 = arith.constant 0 : index
    %984 = vector.load %arg11[%c3_759, %c0_760, %c0_761] : memref<4x1x32xf32, #tpu.memory_space<vmem>>, vector<1x1x32xf32>
    %985 = vector.shape_cast %984 : vector<1x1x32xf32> to vector<1x32xf32>
    %986 = vector.broadcast %985 : vector<1x32xf32> to vector<2x32xf32>
    %987 = arith.addf %983, %986 : vector<2x32xf32>
    %988 = arith.negf %936 : vector<2x32xf32>
    %989 = math.exp %988 : vector<2x32xf32>
    %cst_762 = arith.constant 1.000000e+00 : f32
    %990 = vector.broadcast %cst_762 : f32 to vector<2x32xf32>
    %991 = arith.addf %990, %989 : vector<2x32xf32>
    %992 = arith.divf %990, %991 : vector<2x32xf32>
    %993 = arith.negf %953 : vector<2x32xf32>
    %994 = math.exp %993 : vector<2x32xf32>
    %cst_763 = arith.constant 1.000000e+00 : f32
    %995 = vector.broadcast %cst_763 : f32 to vector<2x32xf32>
    %996 = arith.addf %995, %994 : vector<2x32xf32>
    %997 = arith.divf %995, %996 : vector<2x32xf32>
    %998 = math.tanh %970 : vector<2x32xf32>
    %999 = arith.negf %987 : vector<2x32xf32>
    %1000 = math.exp %999 : vector<2x32xf32>
    %cst_764 = arith.constant 1.000000e+00 : f32
    %1001 = vector.broadcast %cst_764 : f32 to vector<2x32xf32>
    %1002 = arith.addf %1001, %1000 : vector<2x32xf32>
    %1003 = arith.divf %1001, %1002 : vector<2x32xf32>
    %1004 = arith.mulf %997, %915 : vector<2x32xf32>
    %1005 = arith.mulf %992, %998 : vector<2x32xf32>
    %1006 = arith.addf %1004, %1005 : vector<2x32xf32>
    %1007 = math.tanh %1006 : vector<2x32xf32>
    %1008 = arith.mulf %1003, %1007 : vector<2x32xf32>
    %1009 = vector.extract_strided_slice %823 {offsets = [4, 0], sizes = [2, 64], strides = [1, 1]} : vector<8x64xf32> to vector<2x64xf32>
    %1010 = vector.extract_strided_slice %824 {offsets = [4, 0], sizes = [2, 1], strides = [1, 1]} : vector<8x1xf32> to vector<2x1xf32>
    %c0_765 = arith.constant 0 : index
    %c0_766 = arith.constant 0 : index
    %c0_767 = arith.constant 0 : index
    %1011 = vector.load %arg8[%c0_765, %c0_766, %c0_767] : memref<4x64x32xf32, #tpu.memory_space<vmem>>, vector<1x64x32xf32>
    %1012 = vector.shape_cast %1011 : vector<1x64x32xf32> to vector<64x32xf32>
    %cst_768 = arith.constant dense<0.000000e+00> : vector<2x32xf32>
    %1013 = tpu.matmul %1009, %1012, %cst_768 {dimension_numbers = #tpu.dot_dimension_numbers<[1], [0], [0], [1], [0, 0, 1, 1], [], []>} : vector<2x64xf32>, vector<64x32xf32>, vector<2x32xf32> -> vector<2x32xf32>
    %c0_769 = arith.constant 0 : index
    %c0_770 = arith.constant 0 : index
    %c0_771 = arith.constant 0 : index
    %1014 = vector.load %arg9[%c0_769, %c0_770, %c0_771] : memref<4x1x32xf32, #tpu.memory_space<vmem>>, vector<1x1x32xf32>
    %1015 = vector.shape_cast %1014 : vector<1x1x32xf32> to vector<1x32xf32>
    %1016 = vector.broadcast %1010 : vector<2x1xf32> to vector<2x32xf32>
    %1017 = vector.broadcast %1015 : vector<1x32xf32> to vector<2x32xf32>
    %1018 = arith.mulf %1016, %1017 : vector<2x32xf32>
    %1019 = arith.addf %1013, %1018 : vector<2x32xf32>
    %c0_772 = arith.constant 0 : index
    %c0_773 = arith.constant 0 : index
    %c0_774 = arith.constant 0 : index
    %1020 = vector.load %arg10[%c0_772, %c0_773, %c0_774] : memref<4x32x32xf32, #tpu.memory_space<vmem>>, vector<1x32x32xf32>
    %1021 = vector.shape_cast %1020 : vector<1x32x32xf32> to vector<32x32xf32>
    %cst_775 = arith.constant dense<0.000000e+00> : vector<2x32xf32>
    %1022 = tpu.matmul %1008, %1021, %cst_775 {dimension_numbers = #tpu.dot_dimension_numbers<[1], [0], [0], [1], [0, 0, 1, 1], [], []>} : vector<2x32xf32>, vector<32x32xf32>, vector<2x32xf32> -> vector<2x32xf32>
    %1023 = arith.addf %1019, %1022 : vector<2x32xf32>
    %c0_776 = arith.constant 0 : index
    %c0_777 = arith.constant 0 : index
    %c0_778 = arith.constant 0 : index
    %1024 = vector.load %arg11[%c0_776, %c0_777, %c0_778] : memref<4x1x32xf32, #tpu.memory_space<vmem>>, vector<1x1x32xf32>
    %1025 = vector.shape_cast %1024 : vector<1x1x32xf32> to vector<1x32xf32>
    %1026 = vector.broadcast %1025 : vector<1x32xf32> to vector<2x32xf32>
    %1027 = arith.addf %1023, %1026 : vector<2x32xf32>
    %c1_779 = arith.constant 1 : index
    %c0_780 = arith.constant 0 : index
    %c0_781 = arith.constant 0 : index
    %1028 = vector.load %arg8[%c1_779, %c0_780, %c0_781] : memref<4x64x32xf32, #tpu.memory_space<vmem>>, vector<1x64x32xf32>
    %1029 = vector.shape_cast %1028 : vector<1x64x32xf32> to vector<64x32xf32>
    %cst_782 = arith.constant dense<0.000000e+00> : vector<2x32xf32>
    %1030 = tpu.matmul %1009, %1029, %cst_782 {dimension_numbers = #tpu.dot_dimension_numbers<[1], [0], [0], [1], [0, 0, 1, 1], [], []>} : vector<2x64xf32>, vector<64x32xf32>, vector<2x32xf32> -> vector<2x32xf32>
    %c1_783 = arith.constant 1 : index
    %c0_784 = arith.constant 0 : index
    %c0_785 = arith.constant 0 : index
    %1031 = vector.load %arg9[%c1_783, %c0_784, %c0_785] : memref<4x1x32xf32, #tpu.memory_space<vmem>>, vector<1x1x32xf32>
    %1032 = vector.shape_cast %1031 : vector<1x1x32xf32> to vector<1x32xf32>
    %1033 = vector.broadcast %1010 : vector<2x1xf32> to vector<2x32xf32>
    %1034 = vector.broadcast %1032 : vector<1x32xf32> to vector<2x32xf32>
    %1035 = arith.mulf %1033, %1034 : vector<2x32xf32>
    %1036 = arith.addf %1030, %1035 : vector<2x32xf32>
    %c1_786 = arith.constant 1 : index
    %c0_787 = arith.constant 0 : index
    %c0_788 = arith.constant 0 : index
    %1037 = vector.load %arg10[%c1_786, %c0_787, %c0_788] : memref<4x32x32xf32, #tpu.memory_space<vmem>>, vector<1x32x32xf32>
    %1038 = vector.shape_cast %1037 : vector<1x32x32xf32> to vector<32x32xf32>
    %cst_789 = arith.constant dense<0.000000e+00> : vector<2x32xf32>
    %1039 = tpu.matmul %1008, %1038, %cst_789 {dimension_numbers = #tpu.dot_dimension_numbers<[1], [0], [0], [1], [0, 0, 1, 1], [], []>} : vector<2x32xf32>, vector<32x32xf32>, vector<2x32xf32> -> vector<2x32xf32>
    %1040 = arith.addf %1036, %1039 : vector<2x32xf32>
    %c1_790 = arith.constant 1 : index
    %c0_791 = arith.constant 0 : index
    %c0_792 = arith.constant 0 : index
    %1041 = vector.load %arg11[%c1_790, %c0_791, %c0_792] : memref<4x1x32xf32, #tpu.memory_space<vmem>>, vector<1x1x32xf32>
    %1042 = vector.shape_cast %1041 : vector<1x1x32xf32> to vector<1x32xf32>
    %1043 = vector.broadcast %1042 : vector<1x32xf32> to vector<2x32xf32>
    %1044 = arith.addf %1040, %1043 : vector<2x32xf32>
    %c2_793 = arith.constant 2 : index
    %c0_794 = arith.constant 0 : index
    %c0_795 = arith.constant 0 : index
    %1045 = vector.load %arg8[%c2_793, %c0_794, %c0_795] : memref<4x64x32xf32, #tpu.memory_space<vmem>>, vector<1x64x32xf32>
    %1046 = vector.shape_cast %1045 : vector<1x64x32xf32> to vector<64x32xf32>
    %cst_796 = arith.constant dense<0.000000e+00> : vector<2x32xf32>
    %1047 = tpu.matmul %1009, %1046, %cst_796 {dimension_numbers = #tpu.dot_dimension_numbers<[1], [0], [0], [1], [0, 0, 1, 1], [], []>} : vector<2x64xf32>, vector<64x32xf32>, vector<2x32xf32> -> vector<2x32xf32>
    %c2_797 = arith.constant 2 : index
    %c0_798 = arith.constant 0 : index
    %c0_799 = arith.constant 0 : index
    %1048 = vector.load %arg9[%c2_797, %c0_798, %c0_799] : memref<4x1x32xf32, #tpu.memory_space<vmem>>, vector<1x1x32xf32>
    %1049 = vector.shape_cast %1048 : vector<1x1x32xf32> to vector<1x32xf32>
    %1050 = vector.broadcast %1010 : vector<2x1xf32> to vector<2x32xf32>
    %1051 = vector.broadcast %1049 : vector<1x32xf32> to vector<2x32xf32>
    %1052 = arith.mulf %1050, %1051 : vector<2x32xf32>
    %1053 = arith.addf %1047, %1052 : vector<2x32xf32>
    %c2_800 = arith.constant 2 : index
    %c0_801 = arith.constant 0 : index
    %c0_802 = arith.constant 0 : index
    %1054 = vector.load %arg10[%c2_800, %c0_801, %c0_802] : memref<4x32x32xf32, #tpu.memory_space<vmem>>, vector<1x32x32xf32>
    %1055 = vector.shape_cast %1054 : vector<1x32x32xf32> to vector<32x32xf32>
    %cst_803 = arith.constant dense<0.000000e+00> : vector<2x32xf32>
    %1056 = tpu.matmul %1008, %1055, %cst_803 {dimension_numbers = #tpu.dot_dimension_numbers<[1], [0], [0], [1], [0, 0, 1, 1], [], []>} : vector<2x32xf32>, vector<32x32xf32>, vector<2x32xf32> -> vector<2x32xf32>
    %1057 = arith.addf %1053, %1056 : vector<2x32xf32>
    %c2_804 = arith.constant 2 : index
    %c0_805 = arith.constant 0 : index
    %c0_806 = arith.constant 0 : index
    %1058 = vector.load %arg11[%c2_804, %c0_805, %c0_806] : memref<4x1x32xf32, #tpu.memory_space<vmem>>, vector<1x1x32xf32>
    %1059 = vector.shape_cast %1058 : vector<1x1x32xf32> to vector<1x32xf32>
    %1060 = vector.broadcast %1059 : vector<1x32xf32> to vector<2x32xf32>
    %1061 = arith.addf %1057, %1060 : vector<2x32xf32>
    %c3_807 = arith.constant 3 : index
    %c0_808 = arith.constant 0 : index
    %c0_809 = arith.constant 0 : index
    %1062 = vector.load %arg8[%c3_807, %c0_808, %c0_809] : memref<4x64x32xf32, #tpu.memory_space<vmem>>, vector<1x64x32xf32>
    %1063 = vector.shape_cast %1062 : vector<1x64x32xf32> to vector<64x32xf32>
    %cst_810 = arith.constant dense<0.000000e+00> : vector<2x32xf32>
    %1064 = tpu.matmul %1009, %1063, %cst_810 {dimension_numbers = #tpu.dot_dimension_numbers<[1], [0], [0], [1], [0, 0, 1, 1], [], []>} : vector<2x64xf32>, vector<64x32xf32>, vector<2x32xf32> -> vector<2x32xf32>
    %c3_811 = arith.constant 3 : index
    %c0_812 = arith.constant 0 : index
    %c0_813 = arith.constant 0 : index
    %1065 = vector.load %arg9[%c3_811, %c0_812, %c0_813] : memref<4x1x32xf32, #tpu.memory_space<vmem>>, vector<1x1x32xf32>
    %1066 = vector.shape_cast %1065 : vector<1x1x32xf32> to vector<1x32xf32>
    %1067 = vector.broadcast %1010 : vector<2x1xf32> to vector<2x32xf32>
    %1068 = vector.broadcast %1066 : vector<1x32xf32> to vector<2x32xf32>
    %1069 = arith.mulf %1067, %1068 : vector<2x32xf32>
    %1070 = arith.addf %1064, %1069 : vector<2x32xf32>
    %c3_814 = arith.constant 3 : index
    %c0_815 = arith.constant 0 : index
    %c0_816 = arith.constant 0 : index
    %1071 = vector.load %arg10[%c3_814, %c0_815, %c0_816] : memref<4x32x32xf32, #tpu.memory_space<vmem>>, vector<1x32x32xf32>
    %1072 = vector.shape_cast %1071 : vector<1x32x32xf32> to vector<32x32xf32>
    %cst_817 = arith.constant dense<0.000000e+00> : vector<2x32xf32>
    %1073 = tpu.matmul %1008, %1072, %cst_817 {dimension_numbers = #tpu.dot_dimension_numbers<[1], [0], [0], [1], [0, 0, 1, 1], [], []>} : vector<2x32xf32>, vector<32x32xf32>, vector<2x32xf32> -> vector<2x32xf32>
    %1074 = arith.addf %1070, %1073 : vector<2x32xf32>
    %c3_818 = arith.constant 3 : index
    %c0_819 = arith.constant 0 : index
    %c0_820 = arith.constant 0 : index
    %1075 = vector.load %arg11[%c3_818, %c0_819, %c0_820] : memref<4x1x32xf32, #tpu.memory_space<vmem>>, vector<1x1x32xf32>
    %1076 = vector.shape_cast %1075 : vector<1x1x32xf32> to vector<1x32xf32>
    %1077 = vector.broadcast %1076 : vector<1x32xf32> to vector<2x32xf32>
    %1078 = arith.addf %1074, %1077 : vector<2x32xf32>
    %1079 = arith.negf %1027 : vector<2x32xf32>
    %1080 = math.exp %1079 : vector<2x32xf32>
    %cst_821 = arith.constant 1.000000e+00 : f32
    %1081 = vector.broadcast %cst_821 : f32 to vector<2x32xf32>
    %1082 = arith.addf %1081, %1080 : vector<2x32xf32>
    %1083 = arith.divf %1081, %1082 : vector<2x32xf32>
    %1084 = arith.negf %1044 : vector<2x32xf32>
    %1085 = math.exp %1084 : vector<2x32xf32>
    %cst_822 = arith.constant 1.000000e+00 : f32
    %1086 = vector.broadcast %cst_822 : f32 to vector<2x32xf32>
    %1087 = arith.addf %1086, %1085 : vector<2x32xf32>
    %1088 = arith.divf %1086, %1087 : vector<2x32xf32>
    %1089 = math.tanh %1061 : vector<2x32xf32>
    %1090 = arith.negf %1078 : vector<2x32xf32>
    %1091 = math.exp %1090 : vector<2x32xf32>
    %cst_823 = arith.constant 1.000000e+00 : f32
    %1092 = vector.broadcast %cst_823 : f32 to vector<2x32xf32>
    %1093 = arith.addf %1092, %1091 : vector<2x32xf32>
    %1094 = arith.divf %1092, %1093 : vector<2x32xf32>
    %1095 = arith.mulf %1088, %1006 : vector<2x32xf32>
    %1096 = arith.mulf %1083, %1089 : vector<2x32xf32>
    %1097 = arith.addf %1095, %1096 : vector<2x32xf32>
    %1098 = math.tanh %1097 : vector<2x32xf32>
    %1099 = arith.mulf %1094, %1098 : vector<2x32xf32>
    %1100 = vector.extract_strided_slice %823 {offsets = [6, 0], sizes = [2, 64], strides = [1, 1]} : vector<8x64xf32> to vector<2x64xf32>
    %1101 = vector.extract_strided_slice %824 {offsets = [6, 0], sizes = [2, 1], strides = [1, 1]} : vector<8x1xf32> to vector<2x1xf32>
    %c0_824 = arith.constant 0 : index
    %c0_825 = arith.constant 0 : index
    %c0_826 = arith.constant 0 : index
    %1102 = vector.load %arg8[%c0_824, %c0_825, %c0_826] : memref<4x64x32xf32, #tpu.memory_space<vmem>>, vector<1x64x32xf32>
    %1103 = vector.shape_cast %1102 : vector<1x64x32xf32> to vector<64x32xf32>
    %cst_827 = arith.constant dense<0.000000e+00> : vector<2x32xf32>
    %1104 = tpu.matmul %1100, %1103, %cst_827 {dimension_numbers = #tpu.dot_dimension_numbers<[1], [0], [0], [1], [0, 0, 1, 1], [], []>} : vector<2x64xf32>, vector<64x32xf32>, vector<2x32xf32> -> vector<2x32xf32>
    %c0_828 = arith.constant 0 : index
    %c0_829 = arith.constant 0 : index
    %c0_830 = arith.constant 0 : index
    %1105 = vector.load %arg9[%c0_828, %c0_829, %c0_830] : memref<4x1x32xf32, #tpu.memory_space<vmem>>, vector<1x1x32xf32>
    %1106 = vector.shape_cast %1105 : vector<1x1x32xf32> to vector<1x32xf32>
    %1107 = vector.broadcast %1101 : vector<2x1xf32> to vector<2x32xf32>
    %1108 = vector.broadcast %1106 : vector<1x32xf32> to vector<2x32xf32>
    %1109 = arith.mulf %1107, %1108 : vector<2x32xf32>
    %1110 = arith.addf %1104, %1109 : vector<2x32xf32>
    %c0_831 = arith.constant 0 : index
    %c0_832 = arith.constant 0 : index
    %c0_833 = arith.constant 0 : index
    %1111 = vector.load %arg10[%c0_831, %c0_832, %c0_833] : memref<4x32x32xf32, #tpu.memory_space<vmem>>, vector<1x32x32xf32>
    %1112 = vector.shape_cast %1111 : vector<1x32x32xf32> to vector<32x32xf32>
    %cst_834 = arith.constant dense<0.000000e+00> : vector<2x32xf32>
    %1113 = tpu.matmul %1099, %1112, %cst_834 {dimension_numbers = #tpu.dot_dimension_numbers<[1], [0], [0], [1], [0, 0, 1, 1], [], []>} : vector<2x32xf32>, vector<32x32xf32>, vector<2x32xf32> -> vector<2x32xf32>
    %1114 = arith.addf %1110, %1113 : vector<2x32xf32>
    %c0_835 = arith.constant 0 : index
    %c0_836 = arith.constant 0 : index
    %c0_837 = arith.constant 0 : index
    %1115 = vector.load %arg11[%c0_835, %c0_836, %c0_837] : memref<4x1x32xf32, #tpu.memory_space<vmem>>, vector<1x1x32xf32>
    %1116 = vector.shape_cast %1115 : vector<1x1x32xf32> to vector<1x32xf32>
    %1117 = vector.broadcast %1116 : vector<1x32xf32> to vector<2x32xf32>
    %1118 = arith.addf %1114, %1117 : vector<2x32xf32>
    %c1_838 = arith.constant 1 : index
    %c0_839 = arith.constant 0 : index
    %c0_840 = arith.constant 0 : index
    %1119 = vector.load %arg8[%c1_838, %c0_839, %c0_840] : memref<4x64x32xf32, #tpu.memory_space<vmem>>, vector<1x64x32xf32>
    %1120 = vector.shape_cast %1119 : vector<1x64x32xf32> to vector<64x32xf32>
    %cst_841 = arith.constant dense<0.000000e+00> : vector<2x32xf32>
    %1121 = tpu.matmul %1100, %1120, %cst_841 {dimension_numbers = #tpu.dot_dimension_numbers<[1], [0], [0], [1], [0, 0, 1, 1], [], []>} : vector<2x64xf32>, vector<64x32xf32>, vector<2x32xf32> -> vector<2x32xf32>
    %c1_842 = arith.constant 1 : index
    %c0_843 = arith.constant 0 : index
    %c0_844 = arith.constant 0 : index
    %1122 = vector.load %arg9[%c1_842, %c0_843, %c0_844] : memref<4x1x32xf32, #tpu.memory_space<vmem>>, vector<1x1x32xf32>
    %1123 = vector.shape_cast %1122 : vector<1x1x32xf32> to vector<1x32xf32>
    %1124 = vector.broadcast %1101 : vector<2x1xf32> to vector<2x32xf32>
    %1125 = vector.broadcast %1123 : vector<1x32xf32> to vector<2x32xf32>
    %1126 = arith.mulf %1124, %1125 : vector<2x32xf32>
    %1127 = arith.addf %1121, %1126 : vector<2x32xf32>
    %c1_845 = arith.constant 1 : index
    %c0_846 = arith.constant 0 : index
    %c0_847 = arith.constant 0 : index
    %1128 = vector.load %arg10[%c1_845, %c0_846, %c0_847] : memref<4x32x32xf32, #tpu.memory_space<vmem>>, vector<1x32x32xf32>
    %1129 = vector.shape_cast %1128 : vector<1x32x32xf32> to vector<32x32xf32>
    %cst_848 = arith.constant dense<0.000000e+00> : vector<2x32xf32>
    %1130 = tpu.matmul %1099, %1129, %cst_848 {dimension_numbers = #tpu.dot_dimension_numbers<[1], [0], [0], [1], [0, 0, 1, 1], [], []>} : vector<2x32xf32>, vector<32x32xf32>, vector<2x32xf32> -> vector<2x32xf32>
    %1131 = arith.addf %1127, %1130 : vector<2x32xf32>
    %c1_849 = arith.constant 1 : index
    %c0_850 = arith.constant 0 : index
    %c0_851 = arith.constant 0 : index
    %1132 = vector.load %arg11[%c1_849, %c0_850, %c0_851] : memref<4x1x32xf32, #tpu.memory_space<vmem>>, vector<1x1x32xf32>
    %1133 = vector.shape_cast %1132 : vector<1x1x32xf32> to vector<1x32xf32>
    %1134 = vector.broadcast %1133 : vector<1x32xf32> to vector<2x32xf32>
    %1135 = arith.addf %1131, %1134 : vector<2x32xf32>
    %c2_852 = arith.constant 2 : index
    %c0_853 = arith.constant 0 : index
    %c0_854 = arith.constant 0 : index
    %1136 = vector.load %arg8[%c2_852, %c0_853, %c0_854] : memref<4x64x32xf32, #tpu.memory_space<vmem>>, vector<1x64x32xf32>
    %1137 = vector.shape_cast %1136 : vector<1x64x32xf32> to vector<64x32xf32>
    %cst_855 = arith.constant dense<0.000000e+00> : vector<2x32xf32>
    %1138 = tpu.matmul %1100, %1137, %cst_855 {dimension_numbers = #tpu.dot_dimension_numbers<[1], [0], [0], [1], [0, 0, 1, 1], [], []>} : vector<2x64xf32>, vector<64x32xf32>, vector<2x32xf32> -> vector<2x32xf32>
    %c2_856 = arith.constant 2 : index
    %c0_857 = arith.constant 0 : index
    %c0_858 = arith.constant 0 : index
    %1139 = vector.load %arg9[%c2_856, %c0_857, %c0_858] : memref<4x1x32xf32, #tpu.memory_space<vmem>>, vector<1x1x32xf32>
    %1140 = vector.shape_cast %1139 : vector<1x1x32xf32> to vector<1x32xf32>
    %1141 = vector.broadcast %1101 : vector<2x1xf32> to vector<2x32xf32>
    %1142 = vector.broadcast %1140 : vector<1x32xf32> to vector<2x32xf32>
    %1143 = arith.mulf %1141, %1142 : vector<2x32xf32>
    %1144 = arith.addf %1138, %1143 : vector<2x32xf32>
    %c2_859 = arith.constant 2 : index
    %c0_860 = arith.constant 0 : index
    %c0_861 = arith.constant 0 : index
    %1145 = vector.load %arg10[%c2_859, %c0_860, %c0_861] : memref<4x32x32xf32, #tpu.memory_space<vmem>>, vector<1x32x32xf32>
    %1146 = vector.shape_cast %1145 : vector<1x32x32xf32> to vector<32x32xf32>
    %cst_862 = arith.constant dense<0.000000e+00> : vector<2x32xf32>
    %1147 = tpu.matmul %1099, %1146, %cst_862 {dimension_numbers = #tpu.dot_dimension_numbers<[1], [0], [0], [1], [0, 0, 1, 1], [], []>} : vector<2x32xf32>, vector<32x32xf32>, vector<2x32xf32> -> vector<2x32xf32>
    %1148 = arith.addf %1144, %1147 : vector<2x32xf32>
    %c2_863 = arith.constant 2 : index
    %c0_864 = arith.constant 0 : index
    %c0_865 = arith.constant 0 : index
    %1149 = vector.load %arg11[%c2_863, %c0_864, %c0_865] : memref<4x1x32xf32, #tpu.memory_space<vmem>>, vector<1x1x32xf32>
    %1150 = vector.shape_cast %1149 : vector<1x1x32xf32> to vector<1x32xf32>
    %1151 = vector.broadcast %1150 : vector<1x32xf32> to vector<2x32xf32>
    %1152 = arith.addf %1148, %1151 : vector<2x32xf32>
    %c3_866 = arith.constant 3 : index
    %c0_867 = arith.constant 0 : index
    %c0_868 = arith.constant 0 : index
    %1153 = vector.load %arg8[%c3_866, %c0_867, %c0_868] : memref<4x64x32xf32, #tpu.memory_space<vmem>>, vector<1x64x32xf32>
    %1154 = vector.shape_cast %1153 : vector<1x64x32xf32> to vector<64x32xf32>
    %cst_869 = arith.constant dense<0.000000e+00> : vector<2x32xf32>
    %1155 = tpu.matmul %1100, %1154, %cst_869 {dimension_numbers = #tpu.dot_dimension_numbers<[1], [0], [0], [1], [0, 0, 1, 1], [], []>} : vector<2x64xf32>, vector<64x32xf32>, vector<2x32xf32> -> vector<2x32xf32>
    %c3_870 = arith.constant 3 : index
    %c0_871 = arith.constant 0 : index
    %c0_872 = arith.constant 0 : index
    %1156 = vector.load %arg9[%c3_870, %c0_871, %c0_872] : memref<4x1x32xf32, #tpu.memory_space<vmem>>, vector<1x1x32xf32>
    %1157 = vector.shape_cast %1156 : vector<1x1x32xf32> to vector<1x32xf32>
    %1158 = vector.broadcast %1101 : vector<2x1xf32> to vector<2x32xf32>
    %1159 = vector.broadcast %1157 : vector<1x32xf32> to vector<2x32xf32>
    %1160 = arith.mulf %1158, %1159 : vector<2x32xf32>
    %1161 = arith.addf %1155, %1160 : vector<2x32xf32>
    %c3_873 = arith.constant 3 : index
    %c0_874 = arith.constant 0 : index
    %c0_875 = arith.constant 0 : index
    %1162 = vector.load %arg10[%c3_873, %c0_874, %c0_875] : memref<4x32x32xf32, #tpu.memory_space<vmem>>, vector<1x32x32xf32>
    %1163 = vector.shape_cast %1162 : vector<1x32x32xf32> to vector<32x32xf32>
    %cst_876 = arith.constant dense<0.000000e+00> : vector<2x32xf32>
    %1164 = tpu.matmul %1099, %1163, %cst_876 {dimension_numbers = #tpu.dot_dimension_numbers<[1], [0], [0], [1], [0, 0, 1, 1], [], []>} : vector<2x32xf32>, vector<32x32xf32>, vector<2x32xf32> -> vector<2x32xf32>
    %1165 = arith.addf %1161, %1164 : vector<2x32xf32>
    %c3_877 = arith.constant 3 : index
    %c0_878 = arith.constant 0 : index
    %c0_879 = arith.constant 0 : index
    %1166 = vector.load %arg11[%c3_877, %c0_878, %c0_879] : memref<4x1x32xf32, #tpu.memory_space<vmem>>, vector<1x1x32xf32>
    %1167 = vector.shape_cast %1166 : vector<1x1x32xf32> to vector<1x32xf32>
    %1168 = vector.broadcast %1167 : vector<1x32xf32> to vector<2x32xf32>
    %1169 = arith.addf %1165, %1168 : vector<2x32xf32>
    %1170 = arith.negf %1118 : vector<2x32xf32>
    %1171 = math.exp %1170 : vector<2x32xf32>
    %cst_880 = arith.constant 1.000000e+00 : f32
    %1172 = vector.broadcast %cst_880 : f32 to vector<2x32xf32>
    %1173 = arith.addf %1172, %1171 : vector<2x32xf32>
    %1174 = arith.divf %1172, %1173 : vector<2x32xf32>
    %1175 = arith.negf %1135 : vector<2x32xf32>
    %1176 = math.exp %1175 : vector<2x32xf32>
    %cst_881 = arith.constant 1.000000e+00 : f32
    %1177 = vector.broadcast %cst_881 : f32 to vector<2x32xf32>
    %1178 = arith.addf %1177, %1176 : vector<2x32xf32>
    %1179 = arith.divf %1177, %1178 : vector<2x32xf32>
    %1180 = math.tanh %1152 : vector<2x32xf32>
    %1181 = arith.negf %1169 : vector<2x32xf32>
    %1182 = math.exp %1181 : vector<2x32xf32>
    %cst_882 = arith.constant 1.000000e+00 : f32
    %1183 = vector.broadcast %cst_882 : f32 to vector<2x32xf32>
    %1184 = arith.addf %1183, %1182 : vector<2x32xf32>
    %1185 = arith.divf %1183, %1184 : vector<2x32xf32>
    %1186 = arith.mulf %1179, %1097 : vector<2x32xf32>
    %1187 = arith.mulf %1174, %1180 : vector<2x32xf32>
    %1188 = arith.addf %1186, %1187 : vector<2x32xf32>
    %1189 = math.tanh %1188 : vector<2x32xf32>
    %1190 = arith.mulf %1185, %1189 : vector<2x32xf32>
    %c0_883 = arith.constant 0 : index
    %c0_884 = arith.constant 0 : index
    %1191 = vector.load %arg12[%c0_883, %c0_884] : memref<2x32xf32, #tpu.memory_space<vmem>>, vector<2x32xf32>
    tpu.vector_store %arg12[%c0_883, %c0_884], %1190 {strides = array<i32>} : memref<2x32xf32, #tpu.memory_space<vmem>>, vector<2x32xf32>,
    return
  }
}

</mosaic_0001>

<bundles_post_ra>
// kernel: rollout_encoder_forward.1
= control target key start
LH: loop header
LB: loop body
LE: loop exit
PB: predicated region body
PF: predicated region fallthrough
CT: control target
= control target key end

     0   :  { %v22957_v0 = vmov 0.0|0.0   ;;  %vm19478_vm0 = vmmov 0   ;;  %vm666_vm1 = vcmask 261120   ;;  %vm3105_vm2 = vcmask 523264   ;;  %s22926_s2 = inlined_call_operand.vmem [shape: f32[256,32], index: 2, kind: input, shape index: {}]   ;;  %s22927_s0 = inlined_call_operand.vmem [shape: f32[512,256], index: 0, kind: input, shape index: {}]   ;;  %s22928_s4 = inlined_call_operand.vmem [shape: f32[16,32,64], index: 4, kind: input, shape index: {}]   ;;  %s22929_s3 = inlined_call_operand.vmem [shape: f32[1,32], index: 3, kind: input, shape index: {}]   ;;  %s22930_s6 = inlined_call_operand.vmem [shape: f32[9,64,64], index: 6, kind: input, shape index: {}]   ;;  %s22931_s5 = inlined_call_operand.vmem [shape: f32[1,64], index: 5, kind: input, shape index: {}]   ;;  %s22932_s8 = inlined_call_operand.vmem [shape: f32[4,64,32], index: 8, kind: input, shape index: {}]   ;;  %s22933_s10 = inlined_call_operand.vmem [shape: f32[4,32,32], index: 10, kind: input, shape index: {}]   ;;  %s22934_s1 = inlined_call_operand.vmem [shape: f32[8,1], index: 1, kind: input, shape index: {}]   ;;  %s22935_s7 = inlined_call_operand.vmem [shape: f32[1,64], index: 7, kind: input, shape index: {}]   ;;  %s22936_s9 = inlined_call_operand.vmem [shape: f32[4,1,32], index: 9, kind: input, shape index: {}]   ;;  %s22937_s11 = inlined_call_operand.vmem [shape: f32[4,1,32], index: 11, kind: input, shape index: {}]   ;;  %s22938_s12 = inlined_call_operand.vmem [shape: f32[2,32], index: 12, kind: output, shape index: {}]  }
   0x1   :  { %18096 = vmatprep.subr.bf16.mxu0 %v22957_v0  ;;  %v169_v1 = vld [vmem:[%s22926_s2] sm:$0xff]  ;;  %v170_v2 = vld [vmem:[%s22926_s2 + $0x8] sm:$0xff]  ;;  %v171_v3 = vld [vmem:[%s22926_s2 + $0x10] sm:$0xff]  ;;  %18144 = vmatprep.subr.bf16.mxu1 %v22957_v0  ;;  %vm14460_vm3 = vcmask 254976  }
   0x2   :  { %v18097_v4 = vpack.c.bf16 %v170_v2, %v169_v1  ;;  %v172_v5 = vld [vmem:[%s22926_s2 + $0x18] sm:$0xff]  ;;  %v173_v7 = vld [vmem:[%s22926_s2 + $0x20] sm:$0xff]  ;;  %v174_v8 = vld [vmem:[%s22926_s2 + $0x28] sm:$0xff] }
   0x3   :  { %v18100_v6 = vpack.c.bf16 %v172_v5, %v171_v3  ;;  %v18103_v9 = vpack.c.bf16 %v174_v8, %v173_v7  ;;  %v175_v10 = vld [vmem:[%s22926_s2 + $0x30] sm:$0xff]  ;;  %v176_v11 = vld [vmem:[%s22926_s2 + $0x38] sm:$0xff]  ;;  %v42_v12 = vld [vmem:[%s22927_s0 + $0x8] sm:$0xff] }
   0x4   :  { %18098 = vmatpush1.bf16.msra.mxu0 %v18097_v4  ;;  %v18106_v13 = vpack.c.bf16 %v176_v11, %v175_v10  ;;  %272 = vmatprep.mubr.f32.mxu0 %v42_v12  ;;  %v177_v14 = vld [vmem:[%s22926_s2 + $0x40] sm:$0xff]  ;;  %v178_v15 = vld [vmem:[%s22926_s2 + $0x48] sm:$0xff]  ;;  %v179_v17 = vld [vmem:[%s22926_s2 + $0x50] sm:$0xff] }
   0x5   :  { %18099 = vmatprep.subr.bf16.mxu0 %v22957_v0  ;;  %v18109_v16 = vpack.c.bf16 %v178_v15, %v177_v14  ;;  %v180_v18 = vld [vmem:[%s22926_s2 + $0x58] sm:$0xff]  ;;  %v181_v20 = vld [vmem:[%s22926_s2 + $0x60] sm:$0xff]  ;;  %v182_v21 = vld [vmem:[%s22926_s2 + $0x68] sm:$0xff] }
   0x6   :  { %v18112_v19 = vpack.c.bf16 %v180_v18, %v179_v17  ;;  %v18115_v22 = vpack.c.bf16 %v182_v21, %v181_v20  ;;  %v183_v23 = vld [vmem:[%s22926_s2 + $0x70] sm:$0xff]  ;;  %v184_v24 = vld [vmem:[%s22926_s2 + $0x78] sm:$0xff]  ;;  %v185_v26 = vld [vmem:[%s22926_s2 + $0x80] sm:$0xff] }
   0x7   :  { %v18118_v25 = vpack.c.bf16 %v184_v24, %v183_v23  ;;  %v186_v27 = vld [vmem:[%s22926_s2 + $0x88] sm:$0xff]  ;;  %v187_v29 = vld [vmem:[%s22926_s2 + $0x90] sm:$0xff]  ;;  %v188_v30 = vld [vmem:[%s22926_s2 + $0x98] sm:$0xff] }
   0x8   :  { %18101 = vmatpush1.bf16.msra.mxu0 %v18100_v6  ;;  %v18121_v28 = vpack.c.bf16 %v186_v27, %v185_v26  ;;  %v18124_v31 = vpack.c.bf16 %v188_v30, %v187_v29  ;;  %v189_v32 = vld [vmem:[%s22926_s2 + $0xa0] sm:$0xff]  ;;  %v190_v33 = vld [vmem:[%s22926_s2 + $0xa8] sm:$0xff]  ;;  %v191_v35 = vld [vmem:[%s22926_s2 + $0xb0] sm:$0xff] }
   0x9   :  { %18102 = vmatprep.subr.bf16.mxu0 %v22957_v0  ;;  %v18127_v34 = vpack.c.bf16 %v190_v33, %v189_v32  ;;  %v192_v36 = vld [vmem:[%s22926_s2 + $0xb8] sm:$0xff]  ;;  %v193_v38 = vld [vmem:[%s22926_s2 + $0xc0] sm:$0xff]  ;;  %v194_v39 = vld [vmem:[%s22926_s2 + $0xc8] sm:$0xff] }
   0xa   :  { %v18130_v37 = vpack.c.bf16 %v192_v36, %v191_v35  ;;  %v18133_v40 = vpack.c.bf16 %v194_v39, %v193_v38  ;;  %v195_v41 = vld [vmem:[%s22926_s2 + $0xd0] sm:$0xff]  ;;  %v196_v42 = vld [vmem:[%s22926_s2 + $0xd8] sm:$0xff]  ;;  %v197_v44 = vld [vmem:[%s22926_s2 + $0xe0] sm:$0xff] }
   0xb   :  { %v18136_v43 = vpack.c.bf16 %v196_v42, %v195_v41  ;;  %v198_v45 = vld [vmem:[%s22926_s2 + $0xe8] sm:$0xff]  ;;  %v199_v47 = vld [vmem:[%s22926_s2 + $0xf0] sm:$0xff]  ;;  %v200_v48 = vld [vmem:[%s22926_s2 + $0xf8] sm:$0xff]  ;;  %v22949_v41 = vmov 0.0  }
   0xc   :  { %18104 = vmatpush1.bf16.msra.mxu0 %v18103_v9  ;;  %v18139_v46 = vpack.c.bf16 %v198_v45, %v197_v44  ;;  %v18142_v49 = vpack.c.bf16 %v200_v48, %v199_v47  ;;  %v41_v50 = vld [vmem:[%s22927_s0] sm:$0xff]  ;;  %v44_v51 = vld [vmem:[%s22927_s0 + $0x18] sm:$0xff]  ;;  %v43_v52 = vld [vmem:[%s22927_s0 + $0x10] sm:$0xff]  ;;  %15869 = vmatprep.mubr.msk.f32.mxu1 %vm19478_vm0, %v22949_v41 }
   0xd   :  { %18105 = vmatprep.subr.bf16.mxu0 %v22957_v0  ;;  %v46_v53 = vld [vmem:[%s22927_s0 + $0x28] sm:$0xff]  ;;  %v45_v54 = vld [vmem:[%s22927_s0 + $0x20] sm:$0xff]  ;;  %v48_v55 = vld [vmem:[%s22927_s0 + $0x38] sm:$0xff] }
   0xe   :  { %v47_v56 = vld [vmem:[%s22927_s0 + $0x30] sm:$0xff]  ;;  %v50_v57 = vld [vmem:[%s22927_s0 + $0x48] sm:$0xff]  ;;  %v49_v58 = vld [vmem:[%s22927_s0 + $0x40] sm:$0xff] }
   0xf   :  { %v52_v59 = vld [vmem:[%s22927_s0 + $0x58] sm:$0xff]  ;;  %v51_v60 = vld [vmem:[%s22927_s0 + $0x50] sm:$0xff]  ;;  %v54_v61 = vld [vmem:[%s22927_s0 + $0x68] sm:$0xff] }
  0x10   :  { %18107 = vmatpush1.bf16.msra.mxu0 %v18106_v13  ;;  %v53_v62 = vld [vmem:[%s22927_s0 + $0x60] sm:$0xff]  ;;  %v56_v63 = vld [vmem:[%s22927_s0 + $0x78] sm:$0xff]  ;;  %v55_v1 = vld [vmem:[%s22927_s0 + $0x70] sm:$0xff] }
  0x11   :  { %18108 = vmatprep.subr.bf16.mxu0 %v22957_v0  ;;  %v58_v2 = vld [vmem:[%s22927_s0 + $0x88] sm:$0xff]  ;;  %v57_v3 = vld [vmem:[%s22927_s0 + $0x80] sm:$0xff]  ;;  %v60_v4 = vld [vmem:[%s22927_s0 + $0x98] sm:$0xff] }
  0x12   :  { %v59_v5 = vld [vmem:[%s22927_s0 + $0x90] sm:$0xff]  ;;  %v62_v6 = vld [vmem:[%s22927_s0 + $0xa8] sm:$0xff]  ;;  %v61_v7 = vld [vmem:[%s22927_s0 + $0xa0] sm:$0xff] }
  0x13   :  { %v64_v8 = vld [vmem:[%s22927_s0 + $0xb8] sm:$0xff]  ;;  %v63_v9 = vld [vmem:[%s22927_s0 + $0xb0] sm:$0xff]  ;;  %v66_v10 = vld [vmem:[%s22927_s0 + $0xc8] sm:$0xff] }
  0x14   :  { %18110 = vmatpush1.bf16.msra.mxu0 %v18109_v16  ;;  %v65_v11 = vld [vmem:[%s22927_s0 + $0xc0] sm:$0xff]  ;;  %v68_v12 = vld [vmem:[%s22927_s0 + $0xd8] sm:$0xff]  ;;  %v67_v13 = vld [vmem:[%s22927_s0 + $0xd0] sm:$0xff] }
  0x15   :  { %18111 = vmatprep.subr.bf16.mxu0 %v22957_v0  ;;  %v70_v14 = vld [vmem:[%s22927_s0 + $0xe8] sm:$0xff]  ;;  %v69_v15 = vld [vmem:[%s22927_s0 + $0xe0] sm:$0xff]  ;;  %v72_v16 = vld [vmem:[%s22927_s0 + $0xf8] sm:$0xff] }
  0x16   :  { %v71_v17 = vld [vmem:[%s22927_s0 + $0xf0] sm:$0xff]  ;;  %v74_v18 = vld [vmem:[%s22927_s0 + $0x108] sm:$0xff]  ;;  %v76_v20 = vld [vmem:[%s22927_s0 + $0x118] sm:$0xff] }
  0x17   :  { %v75_v21 = vld [vmem:[%s22927_s0 + $0x110] sm:$0xff]  ;;  %v77_v23 = vld [vmem:[%s22927_s0 + $0x120] sm:$0xff]  ;;  %v80_v24 = vld [vmem:[%s22927_s0 + $0x138] sm:$0xff] }
  0x18   :  { %18113 = vmatpush1.bf16.msra.mxu0 %v18112_v19  ;;  %v73_v19 = vld [vmem:[%s22927_s0 + $0x100] sm:$0xff]  ;;  %v82_v26 = vld [vmem:[%s22927_s0 + $0x148] sm:$0xff]  ;;  %v83_v29 = vld [vmem:[%s22927_s0 + $0x150] sm:$0xff] }
  0x19   :  { %18114 = vmatprep.subr.bf16.mxu0 %v22957_v0  ;;  %v81_v27 = vld [vmem:[%s22927_s0 + $0x140] sm:$0xff]  ;;  %v86_v32 = vld [vmem:[%s22927_s0 + $0x168] sm:$0xff]  ;;  %v14469_v35 = vld [vmem:[%s22928_s4 + $0x30] sm:$0xff] }
  0x1a   :  { %v14467_v30 = vld [vmem:[%s22928_s4 + $0x20] sm:$0xff]  ;;  %v14470_v36 = vld [vmem:[%s22928_s4 + $0x38] sm:$0xff]  ;;  %v87_v39 = vld [vmem:[%s22927_s0 + $0x170] sm:$0xff] }
  0x1b   :  { %v19817_v38 = vpack.c.bf16 %v14470_v36, %v14469_v35  ;;  %v89_v42 = vld [vmem:[%s22927_s0 + $0x180] sm:$0xff]  ;;  %v91_v44 = vld [vmem:[%s22927_s0 + $0x190] sm:$0xff]  ;;  %v94_v45 = vld [vmem:[%s22927_s0 + $0x1a8] sm:$0xff] }
  0x1c   :  { %18116 = vmatpush1.bf16.msra.mxu0 %v18115_v22  ;;  %v78_v22 = vld [vmem:[%s22927_s0 + $0x128] sm:$0xff]  ;;  %v96_v47 = vld [vmem:[%s22927_s0 + $0x1b8] sm:$0xff]  ;;  %v95_v48 = vld [vmem:[%s22927_s0 + $0x1b0] sm:$0xff] }
  0x1d   :  { %18117 = vmatprep.subr.bf16.mxu0 %v22957_v0  ;;  %v140_v35 = vld [vmem:[%s22927_s0 + $0x318] sm:$0xff]  ;;  %v139_v36 = vld [vmem:[%s22927_s0 + $0x310] sm:$0xff] }
  0x20   :  { %18119 = vmatpush1.bf16.msra.mxu0 %v18118_v25  ;;  %v79_v25 = vld [vmem:[%s22927_s0 + $0x130] sm:$0xff] }
  0x21   :  { %18120 = vmatprep.subr.bf16.mxu0 %v22957_v0 }
  0x24   :  { %18122 = vmatpush1.bf16.msra.mxu0 %v18121_v28  ;;  %v84_v28 = vld [vmem:[%s22927_s0 + $0x158] sm:$0xff] }
  0x25   :  { %18123 = vmatprep.subr.bf16.mxu0 %v22957_v0 }
  0x28   :  { %18125 = vmatpush1.bf16.msra.mxu0 %v18124_v31  ;;  %v14468_v31 = vld [vmem:[%s22928_s4 + $0x28] sm:$0xff] }
  0x29   :  { %18126 = vmatprep.subr.bf16.mxu0 %v22957_v0  ;;  %v19801_v33 = vpack.c.bf16 %v14468_v31, %v14467_v30  ;;  %v136_v30 = vld [vmem:[%s22927_s0 + $0x2f8] sm:$0xff]  ;;  %v135_v31 = vld [vmem:[%s22927_s0 + $0x2f0] sm:$0xff] }
  0x2b   :  { %18146 = vmatpush3.bf16.msra.mxu1 %v19801_v33 }
  0x2c   :  { %18128 = vmatpush1.bf16.msra.mxu0 %v18127_v34  ;;  %v85_v34 = vld [vmem:[%s22927_s0 + $0x160] sm:$0xff]  ;;  %18147 = vmatprep.subr.bf16.mxu1 %v22957_v0 }
  0x2d   :  { %18129 = vmatprep.subr.bf16.mxu0 %v22957_v0 }
  0x2f   :  { %18149 = vmatpush3.bf16.msra.mxu1 %v19817_v38 }
  0x30   :  { %18131 = vmatpush1.bf16.msra.mxu0 %v18130_v37  ;;  %v88_v37 = vld [vmem:[%s22927_s0 + $0x178] sm:$0xff]  ;;  %18150 = vmatprep.subr.bf16.mxu1 %v22957_v0 }
  0x31   :  { %18132 = vmatprep.subr.bf16.mxu0 %v22957_v0 }
  0x34   :  { %18134 = vmatpush1.bf16.msra.mxu0 %v18133_v40  ;;  %v90_v40 = vld [vmem:[%s22927_s0 + $0x188] sm:$0xff] }
  0x35   :  { %18135 = vmatprep.subr.bf16.mxu0 %v22957_v0 }
  0x38   :  { %18137 = vmatpush1.bf16.msra.mxu0 %v18136_v43  ;;  %v92_v43 = vld [vmem:[%s22927_s0 + $0x198] sm:$0xff] }
  0x39   :  { %18138 = vmatprep.subr.bf16.mxu0 %v22957_v0 }
  0x3c   :  { %18140 = vmatpush1.bf16.msra.mxu0 %v18139_v46  ;;  %v93_v46 = vld [vmem:[%s22927_s0 + $0x1a0] sm:$0xff] }
  0x3d   :  { %18141 = vmatprep.subr.bf16.mxu0 %v22957_v0 }
  0x40   :  { %18143 = vmatpush1.bf16.msra.mxu0 %v18142_v49  ;;  %v98_v49 = vld [vmem:[%s22927_s0 + $0x1c8] sm:$0xff] }
  0x41   :  { %18378 = vmatprep.subr.bf16.mxu0 %v22957_v0 }
  0x43   :  { %273 = vmatmul.mubr.f32.vlgmr.msra.gmra.mrb[0].mxu0 %v41_v50  ;;  %v14478_v50 = vld [vmem:[%s22928_s4 + $0x60] sm:$0xff] }
  0x44   :  { %277 = vmatprep.mubr.f32.mxu0 %v44_v51  ;;  %v14479_v51 = vld [vmem:[%s22928_s4 + $0x68] sm:$0xff] }
  0x47   :  { %278 = vmatmul.mubr.f32.gmra.mrb[2].mxu0 %v43_v52  ;;  %v19859_v52 = vpack.c.bf16 %v14479_v51, %v14478_v50  ;;  %v149_v50 = vld [vmem:[%s22927_s0 + $0x360] sm:$0xff]  ;;  %v152_v51 = vld [vmem:[%s22927_s0 + $0x378] sm:$0xff] }
  0x48   :  { %282 = vmatprep.mubr.f32.mxu0 %v46_v53  ;;  %v97_v53 = vld [vmem:[%s22927_s0 + $0x1c0] sm:$0xff] }
  0x49   :  { %18380 = vmatpush3.bf16.msra.mxu0 %v19859_v52 }
  0x4a   :  { %18381 = vmatprep.subr.bf16.mxu0 %v22957_v0 }
  0x4b   :  { %283 = vmatmul.mubr.f32.gmra.mrb[4].mxu0 %v45_v54  ;;  %v100_v54 = vld [vmem:[%s22927_s0 + $0x1d8] sm:$0xff] }
  0x4c   :  { %287 = vmatprep.mubr.f32.mxu0 %v48_v55  ;;  %v14480_v55 = vld [vmem:[%s22928_s4 + $0x70] sm:$0xff] }
  0x4f   :  { %288 = vmatmul.mubr.f32.gmra.mrb[6].mxu0 %v47_v56  ;;  %v14481_v56 = vld [vmem:[%s22928_s4 + $0x78] sm:$0xff] }
  0x50   :  { %292 = vmatprep.mubr.f32.mxu0 %v50_v57  ;;  %v19875_v57 = vpack.c.bf16 %v14481_v56, %v14480_v55  ;;  %v20044_v55 = vld [vmem:[%s22929_s3] ss:$0 sm:$0xff] }
  0x52   :  { %18383 = vmatpush3.bf16.msra.mxu0 %v19875_v57 }
  0x53   :  { %293 = vmatmul.mubr.f32.gmra.mrb[8].mxu0 %v49_v58  ;;  %v99_v58 = vld [vmem:[%s22927_s0 + $0x1d0] sm:$0xff]  ;;  %18390 = vmatprep.subr.bf16.mxu0 %v22957_v0 }
  0x54   :  { %297 = vmatprep.mubr.f32.mxu0 %v52_v59  ;;  %v102_v59 = vld [vmem:[%s22927_s0 + $0x1e8] sm:$0xff] }
  0x57   :  { %298 = vmatmul.mubr.f32.gmra.mrb[10].mxu0 %v51_v60  ;;  %v101_v60 = vld [vmem:[%s22927_s0 + $0x1e0] sm:$0xff] }
  0x58   :  { %302 = vmatprep.mubr.f32.mxu0 %v54_v61  ;;  %v104_v61 = vld [vmem:[%s22927_s0 + $0x1f8] sm:$0xff] }
  0x5b   :  { %303 = vmatmul.mubr.f32.gmra.mrb[12].mxu0 %v53_v62  ;;  %v103_v62 = vld [vmem:[%s22927_s0 + $0x1f0] sm:$0xff] }
  0x5c   :  { %307 = vmatprep.mubr.f32.mxu0 %v56_v63  ;;  %v106_v63 = vld [vmem:[%s22927_s0 + $0x208] sm:$0xff] }
  0x5f   :  { %308 = vmatmul.mubr.f32.gmra.mrb[14].mxu0 %v55_v1  ;;  %v105_v1 = vld [vmem:[%s22927_s0 + $0x200] sm:$0xff] }
  0x60   :  { %312 = vmatprep.mubr.f32.mxu0 %v58_v2  ;;  %v108_v2 = vld [vmem:[%s22927_s0 + $0x218] sm:$0xff] }
  0x63   :  { %313 = vmatmul.mubr.f32.gmra.mrb[16].mxu0 %v57_v3  ;;  %v107_v3 = vld [vmem:[%s22927_s0 + $0x210] sm:$0xff] }
  0x64   :  { %317 = vmatprep.mubr.f32.mxu0 %v60_v4  ;;  %v110_v4 = vld [vmem:[%s22927_s0 + $0x228] sm:$0xff] }
  0x67   :  { %318 = vmatmul.mubr.f32.gmra.mrb[18].mxu0 %v59_v5  ;;  %v109_v5 = vld [vmem:[%s22927_s0 + $0x220] sm:$0xff] }
  0x68   :  { %322 = vmatprep.mubr.f32.mxu0 %v62_v6  ;;  %v112_v6 = vld [vmem:[%s22927_s0 + $0x238] sm:$0xff] }
  0x6b   :  { %323 = vmatmul.mubr.f32.gmra.mrb[20].mxu0 %v61_v7  ;;  %v111_v7 = vld [vmem:[%s22927_s0 + $0x230] sm:$0xff] }
  0x6c   :  { %327 = vmatprep.mubr.f32.mxu0 %v64_v8  ;;  %v114_v8 = vld [vmem:[%s22927_s0 + $0x248] sm:$0xff] }
  0x6f   :  { %328 = vmatmul.mubr.f32.gmra.mrb[22].mxu0 %v63_v9  ;;  %v113_v9 = vld [vmem:[%s22927_s0 + $0x240] sm:$0xff] }
  0x70   :  { %332 = vmatprep.mubr.f32.mxu0 %v66_v10  ;;  %v116_v10 = vld [vmem:[%s22927_s0 + $0x258] sm:$0xff] }
  0x73   :  { %333 = vmatmul.mubr.f32.gmra.mrb[24].mxu0 %v65_v11  ;;  %v115_v11 = vld [vmem:[%s22927_s0 + $0x250] sm:$0xff] }
  0x74   :  { %337 = vmatprep.mubr.f32.mxu0 %v68_v12  ;;  %v118_v12 = vld [vmem:[%s22927_s0 + $0x268] sm:$0xff] }
  0x77   :  { %338 = vmatmul.mubr.f32.gmra.mrb[26].mxu0 %v67_v13  ;;  %v117_v13 = vld [vmem:[%s22927_s0 + $0x260] sm:$0xff] }
  0x78   :  { %342 = vmatprep.mubr.f32.mxu0 %v70_v14  ;;  %v120_v14 = vld [vmem:[%s22927_s0 + $0x278] sm:$0xff] }
  0x7b   :  { %343 = vmatmul.mubr.f32.gmra.mrb[28].mxu0 %v69_v15  ;;  %v119_v15 = vld [vmem:[%s22927_s0 + $0x270] sm:$0xff] }
  0x7c   :  { %347 = vmatprep.mubr.f32.mxu0 %v72_v16  ;;  %v122_v16 = vld [vmem:[%s22927_s0 + $0x288] sm:$0xff] }
  0x7f   :  { %348 = vmatmul.mubr.f32.gmra.mrb[30].mxu0 %v71_v17  ;;  %v121_v17 = vld [vmem:[%s22927_s0 + $0x280] sm:$0xff] }
  0x80   :  { %352 = vmatprep.mubr.f32.mxu0 %v74_v18  ;;  %v124_v18 = vld [vmem:[%s22927_s0 + $0x298] sm:$0xff] }
  0x83   :  { %353 = vmatmul.mubr.f32.gmra.mrb[32].mxu0 %v73_v19  ;;  %v123_v19 = vld [vmem:[%s22927_s0 + $0x290] sm:$0xff] }
  0x84   :  { %357 = vmatprep.mubr.f32.mxu0 %v76_v20  ;;  %v126_v20 = vld [vmem:[%s22927_s0 + $0x2a8] sm:$0xff] }
  0x87   :  { %358 = vmatmul.mubr.f32.gmra.mrb[34].mxu0 %v75_v21  ;;  %v125_v21 = vld [vmem:[%s22927_s0 + $0x2a0] sm:$0xff] }
  0x88   :  { %362 = vmatprep.mubr.f32.mxu0 %v78_v22  ;;  %v128_v22 = vld [vmem:[%s22927_s0 + $0x2b8] sm:$0xff] }
  0x8b   :  { %363 = vmatmul.mubr.f32.gmra.mrb[36].mxu0 %v77_v23  ;;  %v127_v23 = vld [vmem:[%s22927_s0 + $0x2b0] sm:$0xff] }
  0x8c   :  { %367 = vmatprep.mubr.f32.mxu0 %v80_v24  ;;  %v130_v24 = vld [vmem:[%s22927_s0 + $0x2c8] sm:$0xff] }
  0x8f   :  { %368 = vmatmul.mubr.f32.gmra.mrb[38].mxu0 %v79_v25  ;;  %v129_v25 = vld [vmem:[%s22927_s0 + $0x2c0] sm:$0xff] }
  0x90   :  { %372 = vmatprep.mubr.f32.mxu0 %v82_v26  ;;  %v132_v26 = vld [vmem:[%s22927_s0 + $0x2d8] sm:$0xff] }
  0x93   :  { %373 = vmatmul.mubr.f32.gmra.mrb[40].mxu0 %v81_v27  ;;  %v131_v27 = vld [vmem:[%s22927_s0 + $0x2d0] sm:$0xff] }
  0x94   :  { %377 = vmatprep.mubr.f32.mxu0 %v84_v28  ;;  %v134_v28 = vld [vmem:[%s22927_s0 + $0x2e8] sm:$0xff] }
  0x97   :  { %378 = vmatmul.mubr.f32.gmra.mrb[42].mxu0 %v83_v29  ;;  %v133_v29 = vld [vmem:[%s22927_s0 + $0x2e0] sm:$0xff] }
  0x98   :  { %382 = vmatprep.mubr.f32.mxu0 %v86_v32  ;;  %v138_v32 = vld [vmem:[%s22927_s0 + $0x308] sm:$0xff] }
  0x9b   :  { %383 = vmatmul.mubr.f32.gmra.mrb[44].mxu0 %v85_v34  ;;  %v137_v34 = vld [vmem:[%s22927_s0 + $0x300] sm:$0xff] }
  0x9c   :  { %387 = vmatprep.mubr.f32.mxu0 %v88_v37  ;;  %v142_v37 = vld [vmem:[%s22927_s0 + $0x328] sm:$0xff] }
  0x9f   :  { %388 = vmatmul.mubr.f32.gmra.mrb[46].mxu0 %v87_v39  ;;  %v141_v39 = vld [vmem:[%s22927_s0 + $0x320] sm:$0xff] }
  0xa0   :  { %392 = vmatprep.mubr.f32.mxu0 %v90_v40  ;;  %v144_v40 = vld [vmem:[%s22927_s0 + $0x338] sm:$0xff] }
  0xa3   :  { %393 = vmatmul.mubr.f32.gmra.mrb[48].mxu0 %v89_v42  ;;  %v143_v42 = vld [vmem:[%s22927_s0 + $0x330] sm:$0xff] }
  0xa4   :  { %397 = vmatprep.mubr.f32.mxu0 %v92_v43  ;;  %v146_v43 = vld [vmem:[%s22927_s0 + $0x348] sm:$0xff] }
  0xa7   :  { %398 = vmatmul.mubr.f32.gmra.mrb[50].mxu0 %v91_v44  ;;  %v145_v44 = vld [vmem:[%s22927_s0 + $0x340] sm:$0xff] }
  0xa8   :  { %402 = vmatprep.mubr.f32.mxu0 %v94_v45  ;;  %v148_v45 = vld [vmem:[%s22927_s0 + $0x358] sm:$0xff] }
  0xab   :  { %403 = vmatmul.mubr.f32.gmra.mrb[52].mxu0 %v93_v46  ;;  %v147_v46 = vld [vmem:[%s22927_s0 + $0x350] sm:$0xff] }
  0xac   :  { %407 = vmatprep.mubr.f32.mxu0 %v96_v47  ;;  %v150_v47 = vld [vmem:[%s22927_s0 + $0x368] sm:$0xff] }
  0xaf   :  { %408 = vmatmul.mubr.f32.gmra.mrb[54].mxu0 %v95_v48 }
  0xb0   :  { %412 = vmatprep.mubr.f32.mxu0 %v98_v49 }
  0xb3   :  { %413 = vmatmul.mubr.f32.gmra.mrb[56].mxu0 %v97_v53  ;;  %v657_v53 = vld [vmem:[%s22928_s4] sm:$0xff] }
  0xb4   :  { %417 = vmatprep.mubr.f32.mxu0 %v100_v54  ;;  %v658_v54 = vld [vmem:[%s22928_s4 + $0x8] sm:$0xff] }
  0xb7   :  { %418 = vmatmul.mubr.f32.gmra.mrb[58].mxu0 %v99_v58 }
  0xb8   :  { %422 = vmatprep.mubr.f32.mxu0 %v102_v59 }
  0xbb   :  { %423 = vmatmul.mubr.f32.gmra.mrb[60].mxu0 %v101_v60  ;;  %v151_v60 = vld [vmem:[%s22927_s0 + $0x370] sm:$0xff] }
  0xbc   :  { %427 = vmatprep.mubr.f32.mxu0 %v104_v61  ;;  %v20050_v61 = vpack.c.bf16 %v658_v54, %v657_v53  ;;  %v168_v54 = vld [vmem:[%s22927_s0 + $0x3f8] sm:$0xff] }
  0xbf   :  { %428 = vmatmul.mubr.f32.gmra.mrb[62].mxu0 %v103_v62 }
  0xc0   :  { %432 = vmatprep.mubr.f32.mxu0 %v106_v63  ;;  %v154_v63 = vld [vmem:[%s22927_s0 + $0x388] sm:$0xff] }
  0xc3   :  { %433 = vmatmul.mubr.f32.gmra.mrb[64].mxu0 %v105_v1  ;;  %v659_v1 = vld [vmem:[%s22928_s4 + $0x10] sm:$0xff] }
  0xc4   :  { %437 = vmatprep.mubr.f32.mxu0 %v108_v2  ;;  %v660_v2 = vld [vmem:[%s22928_s4 + $0x18] sm:$0xff] }
  0xc7   :  { %438 = vmatmul.mubr.f32.gmra.mrb[66].mxu0 %v107_v3 }
  0xc8   :  { %442 = vmatprep.mubr.f32.mxu0 %v110_v4 }
  0xcb   :  { %443 = vmatmul.mubr.f32.gmra.mrb[68].mxu0 %v109_v5  ;;  %v153_v5 = vld [vmem:[%s22927_s0 + $0x380] sm:$0xff] }
  0xcc   :  { %447 = vmatprep.mubr.f32.mxu0 %v112_v6  ;;  %v20066_v6 = vpack.c.bf16 %v660_v2, %v659_v1 }
  0xcf   :  { %448 = vmatmul.mubr.f32.gmra.mrb[70].mxu0 %v111_v7 }
  0xd0   :  { %452 = vmatprep.mubr.f32.mxu0 %v114_v8  ;;  %v156_v8 = vld [vmem:[%s22927_s0 + $0x398] sm:$0xff] }
  0xd3   :  { %453 = vmatmul.mubr.f32.gmra.mrb[72].mxu0 %v113_v9  ;;  %v14473_v9 = vld [vmem:[%s22928_s4 + $0x40] sm:$0xff] }
  0xd4   :  { %457 = vmatprep.mubr.f32.mxu0 %v116_v10  ;;  %v14474_v10 = vld [vmem:[%s22928_s4 + $0x48] sm:$0xff] }
  0xd7   :  { %458 = vmatmul.mubr.f32.gmra.mrb[74].mxu0 %v115_v11 }
  0xd8   :  { %462 = vmatprep.mubr.f32.mxu0 %v118_v12 }
  0xdb   :  { %463 = vmatmul.mubr.f32.gmra.mrb[76].mxu0 %v117_v13  ;;  %v155_v13 = vld [vmem:[%s22927_s0 + $0x390] sm:$0xff] }
  0xdc   :  { %467 = vmatprep.mubr.f32.mxu0 %v120_v14  ;;  %v20085_v14 = vpack.c.bf16 %v14474_v10, %v14473_v9 }
  0xdf   :  { %468 = vmatmul.mubr.f32.gmra.mrb[78].mxu0 %v119_v15 }
  0xe0   :  { %472 = vmatprep.mubr.f32.mxu0 %v122_v16  ;;  %v158_v16 = vld [vmem:[%s22927_s0 + $0x3a8] sm:$0xff] }
  0xe3   :  { %473 = vmatmul.mubr.f32.gmra.mrb[80].mxu0 %v121_v17  ;;  %v14475_v17 = vld [vmem:[%s22928_s4 + $0x50] sm:$0xff] }
  0xe4   :  { %477 = vmatprep.mubr.f32.mxu0 %v124_v18  ;;  %v14476_v18 = vld [vmem:[%s22928_s4 + $0x58] sm:$0xff] }
  0xe7   :  { %478 = vmatmul.mubr.f32.gmra.mrb[82].mxu0 %v123_v19 }
  0xe8   :  { %482 = vmatprep.mubr.f32.mxu0 %v126_v20 }
  0xeb   :  { %483 = vmatmul.mubr.f32.gmra.mrb[84].mxu0 %v125_v21  ;;  %v157_v21 = vld [vmem:[%s22927_s0 + $0x3a0] sm:$0xff] }
  0xec   :  { %487 = vmatprep.mubr.f32.mxu0 %v128_v22  ;;  %v20104_v22 = vpack.c.bf16 %v14476_v18, %v14475_v17  ;;  %v14495_v18 = vld [vmem:[%s22928_s4 + $0xd0] sm:$0xff] }
  0xef   :  { %488 = vmatmul.mubr.f32.gmra.mrb[86].mxu0 %v127_v23 }
  0xf0   :  { %492 = vmatprep.mubr.f32.mxu0 %v130_v24  ;;  %v160_v24 = vld [vmem:[%s22927_s0 + $0x3b8] sm:$0xff] }
  0xf3   :  { %493 = vmatmul.mubr.f32.gmra.mrb[88].mxu0 %v129_v25 }
  0xf4   :  { %497 = vmatprep.mubr.f32.mxu0 %v132_v26 }
  0xf7   :  { %498 = vmatmul.mubr.f32.gmra.mrb[90].mxu0 %v131_v27  ;;  %v159_v27 = vld [vmem:[%s22927_s0 + $0x3b0] sm:$0xff] }
  0xf8   :  { %502 = vmatprep.mubr.f32.mxu0 %v134_v28 }
  0xfb   :  { %503 = vmatmul.mubr.f32.gmra.mrb[92].mxu0 %v133_v29  ;;  %v162_v29 = vld [vmem:[%s22927_s0 + $0x3c8] sm:$0xff] }
  0xfc   :  { %507 = vmatprep.mubr.f32.mxu0 %v136_v30 }
  0xff   :  { %508 = vmatmul.mubr.f32.gmra.mrb[94].mxu0 %v135_v31 }
 0x100   :  { %512 = vmatprep.mubr.f32.mxu0 %v138_v32  ;;  %v161_v32 = vld [vmem:[%s22927_s0 + $0x3c0] sm:$0xff] }
 0x103   :  { %513 = vmatmul.mubr.f32.gmra.mrb[96].mxu0 %v137_v34 }
 0x104   :  { %517 = vmatprep.mubr.f32.mxu0 %v140_v35  ;;  %v164_v35 = vld [vmem:[%s22927_s0 + $0x3d8] sm:$0xff] }
 0x107   :  { %518 = vmatmul.mubr.f32.gmra.mrb[98].mxu0 %v139_v36  ;;  %v14483_v36 = vld [vmem:[%s22928_s4 + $0x80] sm:$0xff] }
 0x108   :  { %522 = vmatprep.mubr.f32.mxu0 %v142_v37  ;;  %v14484_v37 = vld [vmem:[%s22928_s4 + $0x88] sm:$0xff] }
 0x10b   :  { %523 = vmatmul.mubr.f32.gmra.mrb[100].mxu0 %v141_v39 }
 0x10c   :  { %527 = vmatprep.mubr.f32.mxu0 %v144_v40 }
 0x10f   :  { %528 = vmatmul.mubr.f32.gmra.mrb[102].mxu0 %v143_v42  ;;  %v163_v42 = vld [vmem:[%s22927_s0 + $0x3d0] sm:$0xff] }
 0x110   :  { %532 = vmatprep.mubr.f32.mxu0 %v146_v43  ;;  %v20154_v43 = vpack.c.bf16 %v14484_v37, %v14483_v36 }
 0x113   :  { %533 = vmatmul.mubr.f32.gmra.mrb[104].mxu0 %v145_v44 }
 0x114   :  { %537 = vmatprep.mubr.f32.mxu0 %v148_v45  ;;  %v166_v45 = vld [vmem:[%s22927_s0 + $0x3e8] sm:$0xff] }
 0x116   :  { %v274_v48 = vpop.f32.mrb[0].mxu0 }
 0x117   :  { %v276_v49 = vpop.f32.mrb[1].mxu0  ;;  %538 = vmatmul.mubr.f32.gmra.mrb[106].mxu0 %v147_v46  ;;  %v275_v7 = vadd.f32 %v20044_v55, %v274_v48  ;;  %v14485_v46 = vld [vmem:[%s22928_s4 + $0x90] sm:$0xff] }
 0x118   :  { %542 = vmatprep.mubr.f32.mxu0 %v150_v47  ;;  %v14486_v47 = vld [vmem:[%s22928_s4 + $0x98] sm:$0xff] }
 0x119   :  { %v593_v15 = vmax.f32 %v275_v7, 0.0  ;;  %v20175_v53 = vpack.c.bf16 %v14486_v47, %v14485_v46 }
 0x11a   :  { %v279_v56 = vpop.f32.mrb[2].mxu0 }
 0x11b   :  { %v280_v58 = vadd.f32 %v20044_v55, %v279_v56  ;;  %v281_v59 = vpop.f32.mrb[3].mxu0  ;;  %543 = vmatmul.mubr.f32.gmra.mrb[108].mxu0 %v149_v50  ;;  %22985 = vst [vmem:[#allocation2_spill] sm:$0xff] %v20175_v53  ;;  %v14488_v56 = vld [vmem:[%s22928_s4 + $0xa0] sm:$0xff] }
 0x11c   :  { %547 = vmatprep.mubr.f32.mxu0 %v152_v51  ;;  %v165_v51 = vld [vmem:[%s22927_s0 + $0x3e0] sm:$0xff] }
 0x11d   :  { %v594_v62 = vmax.f32 %v280_v58, 0.0  ;;  %v14489_v58 = vld [vmem:[%s22928_s4 + $0xa8] sm:$0xff] }
 0x11e   :  { %v284_v3 = vpop.f32.mrb[4].mxu0  ;;  %v20193_v1 = vpack.c.bf16 %v14489_v58, %v14488_v56 }
 0x11f   :  { %548 = vmatmul.mubr.f32.gmra.mrb[110].mxu0 %v151_v60  ;;  %15870 = vmatmul.mubr.msk.f32.vlgmr.msra.gmra.mrb[0].mxu1 %vm666_vm1, %v594_v62  ;;  %v286_v4 = vpop.f32.mrb[5].mxu0  ;;  %v20107_v23 = vadd.f32 %v20044_v55, %v284_v3  ;;  %v14490_v3 = vld [vmem:[%s22928_s4 + $0xb0] sm:$0xff] }
 0x120   :  { %18152 = vmatpush3.bf16.msra.mxu1 %v20050_v61  ;;  %552 = vmatprep.mubr.f32.mxu0 %v154_v63  ;;  %v167_v63 = vld [vmem:[%s22927_s0 + $0x3f0] sm:$0xff]  ;;  %v14491_v4 = vld [vmem:[%s22928_s4 + $0xb8] sm:$0xff] }
 0x121   :  { %18153 = vmatprep.subr.bf16.mxu1 %v22957_v0  ;;  %15880 = vmatprep.mubr.msk.f32.mxu1 %vm19478_vm0, %v22949_v41  ;;  %v22945_v28 = vmax.f32 %v20107_v23, 0.0 }
 0x122   :  { %v289_v11 = vpop.f32.mrb[6].mxu0 }
 0x123   :  { %553 = vmatmul.mubr.f32.gmra.mrb[112].mxu0 %v153_v5  ;;  %v291_v12 = vpop.f32.mrb[7].mxu0  ;;  %v20136_v34 = vadd.f32 %v20044_v55, %v289_v11  ;;  %v14493_v11 = vld [vmem:[%s22928_s4 + $0xc0] sm:$0xff] }
 0x124   :  { %18155 = vmatpush3.bf16.msra.mxu1 %v20066_v6  ;;  %557 = vmatprep.mubr.f32.mxu0 %v156_v8  ;;  %v20207_v8 = vpack.c.bf16 %v14491_v4, %v14490_v3  ;;  %v14494_v12 = vld [vmem:[%s22928_s4 + $0xc8] sm:$0xff]  ;;  %v14505_v3 = vld [vmem:[%s22928_s4 + $0x110] sm:$0xff]  ;;  %v14506_v4 = vld [vmem:[%s22928_s4 + $0x118] sm:$0xff] }
 0x125   :  { %18156 = vmatprep.subr.bf16.mxu1 %v22957_v0  ;;  %v22948_v44 = vmax.f32 %v20136_v34, 0.0 }
 0x126   :  { %v20097_v19 = vpop.f32.mrb[8].mxu0 }
 0x127   :  { %15881 = vmatmul.mubr.msk.f32.vlgmr.msra.gmra.mrb[2].mxu1 %vm666_vm1, %v593_v15  ;;  %558 = vmatmul.mubr.f32.gmra.mrb[114].mxu0 %v155_v13  ;;  %v296_v20 = vpop.f32.mrb[9].mxu0 }
 0x128   :  { %18158 = vmatpush3.bf16.msra.mxu1 %v20085_v14  ;;  %562 = vmatprep.mubr.f32.mxu0 %v158_v16  ;;  %v20221_v16 = vpack.c.bf16 %v14494_v12, %v14493_v11  ;;  %v14496_v20 = vld [vmem:[%s22928_s4 + $0xd8] sm:$0xff]  ;;  %v20326_v11 = vpack.c.bf16 %v14506_v4, %v14505_v3  ;;  %v14510_v12 = vld [vmem:[%s22928_s4 + $0x130] sm:$0xff]  ;;  %v14519_v3 = vld [vmem:[%s22928_s4 + $0x168] sm:$0xff] }
 0x129   :  { %18159 = vmatprep.subr.bf16.mxu1 %v22957_v0  ;;  %15891 = vmatprep.mubr.msk.f32.mxu1 %vm19478_vm0, %v22949_v41 }
 0x12a   :  { %v20115_v25 = vpop.f32.mrb[10].mxu0 }
 0x12b   :  { %563 = vmatmul.mubr.f32.gmra.mrb[116].mxu0 %v157_v21  ;;  %v301_v26 = vpop.f32.mrb[11].mxu0 }
 0x12c   :  { %18161 = vmatpush3.bf16.msra.mxu1 %v20104_v22  ;;  %567 = vmatprep.mubr.f32.mxu0 %v160_v24  ;;  %v20238_v26 = vpack.c.bf16 %v14496_v20, %v14495_v18 }
 0x12d   :  { %18162 = vmatprep.subr.bf16.mxu1 %v22957_v0 }
 0x12e   :  { %v20126_v30 = vpop.f32.mrb[12].mxu0  ;;  %22986 = vst [vmem:[#allocation3_spill] sm:$0xff] %v20238_v26 }
 0x12f   :  { %15892 = vmatmul.mubr.msk.f32.vlgmr.msra.gmra.mrb[4].mxu1 %vm666_vm1, %v22945_v28  ;;  %568 = vmatmul.mubr.f32.gmra.mrb[118].mxu0 %v159_v27  ;;  %v306_v31 = vpop.f32.mrb[13].mxu0 }
 0x130   :  { %18164 = vmatpush3.bf16.msra.mxu1 %v19859_v52  ;;  %572 = vmatprep.mubr.f32.mxu0 %v162_v29  ;;  %v14498_v29 = vld [vmem:[%s22928_s4 + $0xe0] sm:$0xff]  ;;  %v14499_v31 = vld [vmem:[%s22928_s4 + $0xe8] sm:$0xff] }
 0x131   :  { %18165 = vmatprep.subr.bf16.mxu1 %v22957_v0  ;;  %15902 = vmatprep.mubr.msk.f32.mxu1 %vm19478_vm0, %v22949_v41  ;;  %v20258_v37 = vpack.c.bf16 %v14499_v31, %v14498_v29 }
 0x132   :  { %v309_v39 = vpop.f32.mrb[14].mxu0 }
 0x133   :  { %573 = vmatmul.mubr.f32.gmra.mrb[120].mxu0 %v161_v32  ;;  %v311_v40 = vpop.f32.mrb[15].mxu0  ;;  %v310_v2 = vadd.f32 %v20044_v55, %v309_v39 }
 0x134   :  { %18167 = vmatpush3.bf16.msra.mxu1 %v19875_v57  ;;  %577 = vmatprep.mubr.f32.mxu0 %v164_v35 }
 0x135   :  { %18168 = vmatprep.subr.bf16.mxu1 %v22957_v0  ;;  %v600_v9 = vmax.f32 %v310_v2, 0.0 }
 0x136   :  { %v314_v48 = vpop.f32.mrb[16].mxu0 }
 0x137   :  { %15903 = vmatmul.mubr.msk.f32.vlgmr.msra.gmra.mrb[6].mxu1 %vm666_vm1, %v22948_v44  ;;  %578 = vmatmul.mubr.f32.gmra.mrb[122].mxu0 %v163_v42  ;;  %v315_v49 = vadd.f32 %v20044_v55, %v314_v48  ;;  %v316_v50 = vpop.f32.mrb[17].mxu0  ;;  %v14500_v42 = vld [vmem:[%s22928_s4 + $0xf0] sm:$0xff] }
 0x138   :  { %18170 = vmatpush3.bf16.msra.mxu1 %v20154_v43  ;;  %582 = vmatprep.mubr.f32.mxu0 %v166_v45  ;;  %v14501_v45 = vld [vmem:[%s22928_s4 + $0xf8] sm:$0xff]  ;;  %v14503_v50 = vld [vmem:[%s22928_s4 + $0x100] sm:$0xff] }
 0x139   :  { %18171 = vmatprep.subr.bf16.mxu1 %v22957_v0  ;;  %15913 = vmatprep.mubr.msk.f32.mxu1 %vm19478_vm0, %v22949_v41  ;;  %v601_v60 = vmax.f32 %v315_v49, 0.0  ;;  %v20278_v48 = vpack.c.bf16 %v14501_v45, %v14500_v42 }
 0x13a   :  { %v319_v59 = vpop.f32.mrb[18].mxu0 }
 0x13b   :  { %583 = vmatmul.mubr.f32.gmra.mrb[124].mxu0 %v165_v51  ;;  %v321_v62 = vpop.f32.mrb[19].mxu0  ;;  %v320_v10 = vadd.f32 %v20044_v55, %v319_v59  ;;  %v14504_v51 = vld [vmem:[%s22928_s4 + $0x108] sm:$0xff] }
 0x13c   :  { %18173 = vmatpush3.bf16.msra.mxu1 %v20175_v53  ;;  %587 = vmatprep.mubr.f32.mxu0 %v168_v54  ;;  %v20298_v59 = vpack.c.bf16 %v14504_v51, %v14503_v50  ;;  %v14509_v62 = vld [vmem:[%s22928_s4 + $0x128] sm:$0xff]  ;;  %v14515_v51 = vld [vmem:[%s22928_s4 + $0x150] sm:$0xff] }
 0x13d   :  { %18174 = vmatprep.subr.bf16.mxu1 %v22957_v0  ;;  %v602_v17 = vmax.f32 %v320_v10, 0.0 }
 0x13e   :  { %v324_v5 = vpop.f32.mrb[20].mxu0 }
 0x13f   :  { %15914 = vmatmul.mubr.msk.f32.vlgmr.msra.gmra.mrb[8].mxu1 %vm666_vm1, %v601_v60  ;;  %588 = vmatmul.mubr.f32.gmra.mrb[126].mxu0 %v167_v63  ;;  %v326_v7 = vpop.f32.mrb[21].mxu0  ;;  %v20243_v27 = vadd.f32 %v20044_v55, %v324_v5  ;;  %v14508_v60 = vld [vmem:[%s22928_s4 + $0x120] sm:$0xff] }
 0x140   :  { %18176 = vmatpush3.bf16.msra.mxu1 %v20193_v1  ;;  %16292 = vmatprep.mubr.msk.f32.mxu0 %vm19478_vm0, %v22949_v41  ;;  %v20323_v10 = vpack.c.bf16 %v14509_v62, %v14508_v60 }
 0x141   :  { %18177 = vmatprep.subr.bf16.mxu1 %v22957_v0  ;;  %15924 = vmatprep.mubr.msk.f32.mxu1 %vm19478_vm0, %v22949_v41  ;;  %v22943_v39 = vmax.f32 %v20243_v27, 0.0 }
 0x142   :  { %v329_v13 = vpop.f32.mrb[22].mxu0 }
 0x143   :  { %16293 = vmatmul.mubr.msk.f32.vlgmr.msra.gmra.mrb[128].mxu0 %vm666_vm1, %v600_v9  ;;  %v331_v15 = vpop.f32.mrb[23].mxu0  ;;  %v20282_v49 = vadd.f32 %v20044_v55, %v329_v13  ;;  %v14511_v13 = vld [vmem:[%s22928_s4 + $0x138] sm:$0xff] }
 0x144   :  { %18179 = vmatpush3.bf16.msra.mxu1 %v20207_v8  ;;  %18392 = vmatpush3.bf16.msra.mxu0 %v20193_v1  ;;  %v20342_v20 = vpack.c.bf16 %v14511_v13, %v14510_v12 }
 0x145   :  { %18180 = vmatprep.subr.bf16.mxu1 %v22957_v0  ;;  %18393 = vmatprep.subr.bf16.mxu0 %v22957_v0  ;;  %v22942_v63 = vmax.f32 %v20282_v49, 0.0 }
 0x146   :  { %v20232_v21 = vpop.f32.mrb[24].mxu0  ;;  %16314 = vmatprep.mubr.msk.f32.mxu0 %vm19478_vm0, %v22949_v41 }
 0x147   :  { %15925 = vmatmul.mubr.msk.f32.vlgmr.msra.gmra.mrb[10].mxu1 %vm666_vm1, %v602_v17  ;;  %v336_v24 = vpop.f32.mrb[25].mxu0 }
 0x148   :  { %18182 = vmatpush3.bf16.msra.mxu1 %v20221_v16  ;;  %15935 = vmatprep.mubr.msk.f32.mxu1 %vm19478_vm0, %v22949_v41 }
 0x149   :  { %18183 = vmatprep.subr.bf16.mxu1 %v22957_v0  ;;  %18395 = vmatpush3.bf16.msra.mxu0 %v20207_v8 }
 0x14a   :  { %v339_v32 = vpop.f32.mrb[26].mxu0  ;;  %18402 = vmatprep.subr.bf16.mxu0 %v22957_v0 }
 0x14b   :  { %v20255_v35 = vadd.f32 %v20044_v55, %v339_v32  ;;  %v341_v36 = vpop.f32.mrb[27].mxu0  ;;  %v14513_v32 = vld [vmem:[%s22928_s4 + $0x140] sm:$0xff] }
 0x14c   :  { %18185 = vmatpush3.bf16.msra.mxu1 %v20238_v26  ;;  %v14514_v36 = vld [vmem:[%s22928_s4 + $0x148] sm:$0xff] }
 0x14d   :  { %v22940_v40 = vmax.f32 %v20255_v35, 0.0  ;;  %18186 = vmatprep.subr.bf16.mxu1 %v22957_v0 }
 0x14e   :  { %v20269_v46 = vpop.f32.mrb[28].mxu0 }
 0x14f   :  { %22987 = vst [vmem:[#allocation4_spill] sm:$0xff] %v20269_v46  ;;  %15936 = vmatmul.mubr.msk.f32.vlgmr.msra.gmra.mrb[12].mxu1 %vm666_vm1, %v22943_v39  ;;  %v346_v47 = vpop.f32.mrb[29].mxu0  ;;  %16315 = vmatmul.mubr.msk.f32.vlgmr.msra.gmra.mrb[130].mxu0 %vm666_vm1, %v22940_v40  ;;  %v14536_v39 = vld [vmem:[%s22928_s4 + $0x1d8] sm:$0xff] }
 0x150   :  { %18188 = vmatpush3.bf16.msra.mxu1 %v20258_v37  ;;  %18404 = vmatpush3.bf16.msra.mxu0 %v20258_v37  ;;  %v20365_v47 = vpack.c.bf16 %v14514_v36, %v14513_v32 }
 0x151   :  { %18189 = vmatprep.subr.bf16.mxu1 %v22957_v0  ;;  %15946 = vmatprep.mubr.msk.f32.mxu1 %vm19478_vm0, %v22949_v41 }
 0x152   :  { %v349_v54 = vpop.f32.mrb[30].mxu0  ;;  %18405 = vmatprep.subr.bf16.mxu0 %v22957_v0  ;;  %16336 = vmatprep.mubr.msk.f32.mxu0 %vm19478_vm0, %v22949_v41  ;;  %22988 = vst [vmem:[#allocation5_spill] sm:$0xff] %v20365_v47 }
 0x153   :  { %v350_v56 = vadd.f32 %v20044_v55, %v349_v54  ;;  %v351_v58 = vpop.f32.mrb[31].mxu0  ;;  %v14516_v54 = vld [vmem:[%s22928_s4 + $0x158] sm:$0xff] }
 0x154   :  { %18191 = vmatpush3.bf16.msra.mxu1 %v20278_v48  ;;  %18407 = vmatpush3.bf16.msra.mxu0 %v20278_v48  ;;  %v20381_v60 = vpack.c.bf16 %v14516_v54, %v14515_v51  ;;  %v14523_v51 = vld [vmem:[%s22928_s4 + $0x180] sm:$0xff]  ;;  %v14524_v54 = vld [vmem:[%s22928_s4 + $0x188] sm:$0xff] }
 0x155   :  { %v608_v2 = vmax.f32 %v350_v56, 0.0  ;;  %18192 = vmatprep.subr.bf16.mxu1 %v22957_v0  ;;  %18414 = vmatprep.subr.bf16.mxu0 %v22957_v0 }
 0x156   :  { %v354_v5 = vpop.f32.mrb[32].mxu0  ;;  %22989 = vst [vmem:[#allocation6_spill] sm:$0xff] %v20381_v60 }
 0x157   :  { %15947 = vmatmul.mubr.msk.f32.vlgmr.msra.gmra.mrb[14].mxu1 %vm666_vm1, %v22942_v63  ;;  %v20320_v7 = vadd.f32 %v20044_v55, %v354_v5  ;;  %v356_v9 = vpop.f32.mrb[33].mxu0  ;;  %16337 = vmatmul.mubr.msk.f32.vlgmr.msra.gmra.mrb[132].mxu0 %vm666_vm1, %v608_v2  ;;  %v14518_v2 = vld [vmem:[%s22928_s4 + $0x160] sm:$0xff]  ;;  %v14535_v63 = vld [vmem:[%s22928_s4 + $0x1d0] sm:$0xff] }
 0x158   :  { %18194 = vmatpush3.bf16.msra.mxu1 %v20298_v59  ;;  %15957 = vmatprep.mubr.msk.f32.mxu1 %vm19478_vm0, %v22949_v41  ;;  %v20395_v12 = vpack.c.bf16 %v14519_v3, %v14518_v2  ;;  %v20435_v2 = vpack.c.bf16 %v14524_v54, %v14523_v51  ;;  %v14528_v3 = vld [vmem:[%s22928_s4 + $0x1a0] sm:$0xff] }
 0x159   :  { %18195 = vmatprep.subr.bf16.mxu1 %v22957_v0  ;;  %18416 = vmatpush3.bf16.msra.mxu0 %v20323_v10  ;;  %v22944_v17 = vmax.f32 %v20320_v7, 0.0 }
 0x15a   :  { %v359_v15 = vpop.f32.mrb[34].mxu0  ;;  %18417 = vmatprep.subr.bf16.mxu0 %v22957_v0  ;;  %16358 = vmatprep.mubr.msk.f32.mxu0 %vm19478_vm0, %v22949_v41  ;;  %22992 = vst [vmem:[#allocation9_spill] sm:$0xff] %v20435_v2 }
 0x15b   :  { %v361_v18 = vpop.f32.mrb[35].mxu0  ;;  %v20355_v31 = vadd.f32 %v20044_v55, %v359_v15 }
 0x15c   :  { %18197 = vmatpush3.bf16.msra.mxu1 %v20326_v11  ;;  %v14520_v18 = vld [vmem:[%s22928_s4 + $0x170] sm:$0xff] }
 0x15d   :  { %18198 = vmatprep.subr.bf16.mxu1 %v22957_v0  ;;  %18419 = vmatpush3.bf16.msra.mxu0 %v20342_v20  ;;  %v22946_v50 = vmax.f32 %v20355_v31, 0.0 }
 0x15e   :  { %v364_v24 = vpop.f32.mrb[36].mxu0  ;;  %18426 = vmatprep.subr.bf16.mxu0 %v22957_v0 }
 0x15f   :  { %15958 = vmatmul.mubr.msk.f32.vlgmr.msra.gmra.mrb[16].mxu1 %vm666_vm1, %v22944_v17  ;;  %v366_v29 = vpop.f32.mrb[37].mxu0  ;;  %v365_v62 = vadd.f32 %v20044_v55, %v364_v24  ;;  %v14521_v24 = vld [vmem:[%s22928_s4 + $0x178] sm:$0xff] }
 0x160   :  { %18200 = vmatpush3.bf16.msra.mxu1 %v20323_v10  ;;  %15968 = vmatprep.mubr.msk.f32.mxu1 %vm19478_vm0, %v22949_v41  ;;  %v20415_v36 = vpack.c.bf16 %v14521_v24, %v14520_v18  ;;  %v14525_v18 = vld [vmem:[%s22928_s4 + $0x190] sm:$0xff]  ;;  %v14526_v24 = vld [vmem:[%s22928_s4 + $0x198] sm:$0xff] }
 0x161   :  { %18201 = vmatprep.subr.bf16.mxu1 %v22957_v0  ;;  %v20397_v13 = vmax.f32 %v365_v62, 0.0 }
 0x162   :  { %v369_v42 = vpop.f32.mrb[38].mxu0 }
 0x163   :  { %v371_v45 = vpop.f32.mrb[39].mxu0  ;;  %22990 = vst [vmem:[#allocation7_spill] sm:$0xff] %v20397_v13 }
 0x164   :  { %18203 = vmatpush3.bf16.msra.mxu1 %v20342_v20  ;;  %v370_v45 = vadd.f32 %v20044_v55, %v369_v42 }
 0x165   :  { %18204 = vmatprep.subr.bf16.mxu1 %v22957_v0 }
 0x166   :  { %v20375_v56 = vpop.f32.mrb[40].mxu0 }
 0x167   :  { %15969 = vmatmul.mubr.msk.f32.vlgmr.msra.gmra.mrb[18].mxu1 %vm666_vm1, %v22946_v50  ;;  %v376_v58 = vpop.f32.mrb[41].mxu0 }
 0x168   :  { %18206 = vmatpush3.bf16.msra.mxu1 %v20365_v47  ;;  %15979 = vmatprep.mubr.msk.f32.mxu1 %vm19478_vm0, %v22949_v41 }
 0x169   :  { %18207 = vmatprep.subr.bf16.mxu1 %v22957_v0 }
 0x16a   :  { %v379_v4 = vpop.f32.mrb[42].mxu0 }
 0x16b   :  { %v380_v5 = vadd.f32 %v20044_v55, %v379_v4  ;;  %v381_v9 = vpop.f32.mrb[43].mxu0  ;;  %v14529_v4 = vld [vmem:[%s22928_s4 + $0x1a8] sm:$0xff] }
 0x16c   :  { %18209 = vmatpush3.bf16.msra.mxu1 %v20381_v60  ;;  %v20463_v54 = vpack.c.bf16 %v14529_v4, %v14528_v3 }
 0x16d   :  { %v20399_v15 = vmax.f32 %v380_v5, 0.0  ;;  %18210 = vmatprep.subr.bf16.mxu1 %v22957_v0  ;;  %v20444_v5 = vmax.f32 %v370_v45, 0.0 }
 0x16e   :  { %v20408_v29 = vpop.f32.mrb[44].mxu0 }
 0x16f   :  { %22991 = vst [vmem:[#allocation8_spill] sm:$0xff] %v20408_v29  ;;  %15980 = vmatmul.mubr.msk.f32.vlgmr.msra.gmra.mrb[20].mxu1 %vm666_vm1, %v20397_v13  ;;  %v386_v32 = vpop.f32.mrb[45].mxu0  ;;  %16359 = vmatmul.mubr.msk.f32.vlgmr.msra.gmra.mrb[134].mxu0 %vm666_vm1, %v20399_v15  ;;  %v23000_v29 = vmax.f32 %v20355_v31, 0.0 }
 0x170   :  { %18212 = vmatpush3.bf16.msra.mxu1 %v20395_v12  ;;  %18428 = vmatpush3.bf16.msra.mxu0 %v20395_v12 }
 0x171   :  { %18213 = vmatprep.subr.bf16.mxu1 %v22957_v0  ;;  %15990 = vmatprep.mubr.msk.f32.mxu1 %vm19478_vm0, %v22949_v41 }
 0x172   :  { %v389_v58 = vpop.f32.mrb[46].mxu0  ;;  %18429 = vmatprep.subr.bf16.mxu0 %v22957_v0  ;;  %16380 = vmatprep.mubr.msk.f32.mxu0 %vm19478_vm0, %v22949_v41 }
 0x173   :  { %v20432_v42 = vadd.f32 %v20044_v55, %v389_v58  ;;  %v391_v62 = vpop.f32.mrb[47].mxu0  ;;  %v20466_v58 = vpack.c.bf16 %v14526_v24, %v14525_v18 }
 0x174   :  { %18215 = vmatpush3.bf16.msra.mxu1 %v20415_v36  ;;  %18431 = vmatpush3.bf16.msra.mxu0 %v20415_v36  ;;  %v14530_v62 = vld [vmem:[%s22928_s4 + $0x1b0] sm:$0xff] }
 0x175   :  { %v22939_v9 = vmax.f32 %v20432_v42, 0.0  ;;  %18216 = vmatprep.subr.bf16.mxu1 %v22957_v0  ;;  %18438 = vmatprep.subr.bf16.mxu0 %v22957_v0 }
 0x176   :  { %v394_v32 = vpop.f32.mrb[48].mxu0 }
 0x177   :  { %15991 = vmatmul.mubr.msk.f32.vlgmr.msra.gmra.mrb[22].mxu1 %vm666_vm1, %v20444_v5  ;;  %v20458_v45 = vadd.f32 %v20044_v55, %v394_v32  ;;  %v396_v51 = vpop.f32.mrb[49].mxu0  ;;  %16381 = vmatmul.mubr.msk.f32.vlgmr.msra.gmra.mrb[136].mxu0 %vm666_vm1, %v22939_v9  ;;  %v14531_v32 = vld [vmem:[%s22928_s4 + $0x1b8] sm:$0xff] }
 0x178   :  { %18218 = vmatpush3.bf16.msra.mxu1 %v20435_v2  ;;  %16001 = vmatprep.mubr.msk.f32.mxu1 %vm19478_vm0, %v22949_v41  ;;  %v20482_v24 = vpack.c.bf16 %v14531_v32, %v14530_v62  ;;  %v14533_v62 = vld [vmem:[%s22928_s4 + $0x1c0] sm:$0xff]  ;;  %v14534_v32 = vld [vmem:[%s22928_s4 + $0x1c8] sm:$0xff] }
 0x179   :  { %22993 = vst [vmem:[#allocation10_spill] sm:$0xff] %v20458_v45  ;;  %18219 = vmatprep.subr.bf16.mxu1 %v22957_v0  ;;  %18440 = vmatpush3.bf16.msra.mxu0 %v20463_v54  ;;  %v22941_v4 = vmax.f32 %v20458_v45, 0.0 }
 0x17a   :  { %v399_v3 = vpop.f32.mrb[50].mxu0  ;;  %18441 = vmatprep.subr.bf16.mxu0 %v22957_v0  ;;  %16402 = vmatprep.mubr.msk.f32.mxu0 %vm19478_vm0, %v22949_v41 }
 0x17b   :  { %v401_v18 = vpop.f32.mrb[51].mxu0  ;;  %v20492_v9 = vadd.f32 %v20044_v55, %v399_v3 }
 0x17c   :  { %18221 = vmatpush3.bf16.msra.mxu1 %v20466_v58 }
 0x17d   :  { %18222 = vmatprep.subr.bf16.mxu1 %v22957_v0  ;;  %18443 = vmatpush3.bf16.msra.mxu0 %v20482_v24  ;;  %v22947_v3 = vmax.f32 %v20492_v9, 0.0 }
 0x17e   :  { %v404_v51 = vpop.f32.mrb[52].mxu0  ;;  %18450 = vmatprep.subr.bf16.mxu0 %v22957_v0 }
 0x17f   :  { %16002 = vmatmul.mubr.msk.f32.vlgmr.msra.gmra.mrb[24].mxu1 %vm666_vm1, %v22941_v4  ;;  %v406_v40 = vpop.f32.mrb[53].mxu0  ;;  %v405_v28 = vadd.f32 %v20044_v55, %v404_v51  ;;  %v14539_v51 = vld [vmem:[%s22928_s4 + $0x1e8] sm:$0xff] }
 0x180   :  { %18224 = vmatpush3.bf16.msra.mxu1 %v20463_v54  ;;  %16012 = vmatprep.mubr.msk.f32.mxu1 %vm19478_vm0, %v22949_v41  ;;  %v20506_v40 = vpack.c.bf16 %v14534_v32, %v14533_v62  ;;  %v20522_v62 = vpack.c.bf16 %v14536_v39, %v14535_v63  ;;  %v14538_v32 = vld [vmem:[%s22928_s4 + $0x1e0] sm:$0xff] }
 0x181   :  { %18225 = vmatprep.subr.bf16.mxu1 %v22957_v0  ;;  %v20537_v63 = vpack.c.bf16 %v14539_v51, %v14538_v32 }
 0x182   :  { %v409_v18 = vpop.f32.mrb[54].mxu0  ;;  %22994 = vst [vmem:[#allocation11_spill] sm:$0xff] %v20506_v40  ;;  %22995 = vst [vmem:[#allocation12_spill] sm:$0xff] %v20522_v62 }
 0x183   :  { %v411_v4 = vpop.f32.mrb[55].mxu0 }
 0x184   :  { %18227 = vmatpush3.bf16.msra.mxu1 %v20482_v24 }
 0x185   :  { %18228 = vmatprep.subr.bf16.mxu1 %v22957_v0 }
 0x186   :  { %v20515_v17 = vpop.f32.mrb[56].mxu0 }
 0x187   :  { %16013 = vmatmul.mubr.msk.f32.vlgmr.msra.gmra.mrb[26].mxu1 %vm666_vm1, %v22947_v3  ;;  %v416_v4 = vpop.f32.mrb[57].mxu0  ;;  %v20533_v3 = vmax.f32 %v405_v28, 0.0  ;;  %v14541_v28 = vld [vmem:[%s22928_s4 + $0x1f8] sm:$0xff] }
 0x188   :  { %18230 = vmatpush3.bf16.msra.mxu1 %v20506_v40  ;;  %16023 = vmatprep.mubr.msk.f32.mxu1 %vm19478_vm0, %v22949_v41  ;;  %v14540_v41 = vld [vmem:[%s22928_s4 + $0x1f0] sm:$0xff] }
 0x189   :  { %18231 = vmatprep.subr.bf16.mxu1 %v22957_v0  ;;  %22996 = vst [vmem:[#allocation13_spill] sm:$0xff] %v20533_v3  ;;  %v20557_v51 = vpack.c.bf16 %v14541_v28, %v14540_v41 }
 0x18a   :  { %v419_v50 = vpop.f32.mrb[58].mxu0 }
 0x18b   :  { %v420_v4 = vadd.f32 %v20044_v55, %v419_v50  ;;  %v421_v39 = vpop.f32.mrb[59].mxu0  ;;  %v410_v50 = vadd.f32 %v20044_v55, %v409_v18 }
 0x18c   :  { %18233 = vmatpush3.bf16.msra.mxu1 %v20522_v62  ;;  %v22998_v39 = vmov 0.0  }
 0x18d   :  { %v20539_v44 = vmax.f32 %v420_v4, 0.0  ;;  %18234 = vmatprep.subr.bf16.mxu1 %v22957_v0  ;;  %v20565_v18 = vmax.f32 %v410_v50, 0.0 }
 0x18e   :  { %v20548_v45 = vpop.f32.mrb[60].mxu0 }
 0x18f   :  { %22997 = vst [vmem:[#allocation14_spill] sm:$0xff] %v20548_v45  ;;  %16024 = vmatmul.mubr.msk.f32.vlgmr.msra.gmra.mrb[28].mxu1 %vm666_vm1, %v20533_v3  ;;  %16403 = vmatmul.mubr.msk.f32.vlgmr.msra.gmra.mrb[138].mxu0 %vm666_vm1, %v20539_v44  ;;  %v426_v32 = vpop.f32.mrb[61].mxu0 }
 0x190   :  { %18236 = vmatpush3.bf16.msra.mxu1 %v20537_v63  ;;  %18452 = vmatpush3.bf16.msra.mxu0 %v20537_v63 }
 0x191   :  { %18237 = vmatprep.subr.bf16.mxu1 %v22957_v0  ;;  %18453 = vmatprep.subr.bf16.mxu0 %v22957_v0 }
 0x192   :  { %v429_v4 = vpop.f32.mrb[62].mxu0  ;;  %16034 = vmatprep.mubr.msk.f32.mxu1 %vm19478_vm0, %v22998_v39  ;;  %16424 = vmatprep.mubr.msk.f32.mxu0 %vm19478_vm0, %v22998_v39 }
 0x193   :  { %v20568_v32 = vadd.f32 %v20044_v55, %v429_v4  ;;  %v431_v45 = vpop.f32.mrb[63].mxu0 }
 0x194   :  { %18239 = vmatpush3.bf16.msra.mxu1 %v20557_v51  ;;  %18455 = vmatpush3.bf16.msra.mxu0 %v20557_v51 }
 0x195   :  { %v22952_v41 = vmax.f32 %v20568_v32, 0.0  ;;  %18240 = vmatprep.subr.bf16.mxu1 %v22957_v0  ;;  %18468 = vmatprep.subr.bf16.mxu0 %v22957_v0 }
 0x196   :  { %v20575_v28 = vpop.f32.mrb[64].mxu0 }
 0x197   :  { %16035 = vmatmul.mubr.msk.f32.vlgmr.msra.gmra.mrb[30].mxu1 %vm666_vm1, %v20565_v18  ;;  %16425 = vmatmul.mubr.msk.f32.vlgmr.msra.gmra.mrb[140].mxu0 %vm666_vm1, %v22952_v41  ;;  %v436_v45 = vpop.f32.mrb[65].mxu0  ;;  %v22999_v41 = vmax.f32 %v20136_v34, 0.0 }
 0x198   :  { %18242 = vmatpush3.bf16.msra.mxu1 %v19801_v33  ;;  %18470 = vmatpush3.bf16.msra.mxu0 %v19801_v33 }
 0x199   :  { %18243 = vmatprep.subr.bf16.mxu1 %v22957_v0  ;;  %18471 = vmatprep.subr.bf16.mxu0 %v22957_v0 }
 0x19a   :  { %16045 = vmatprep.mubr.msk.f32.mxu1 %vm19478_vm0, %v22998_v39  ;;  %16454 = vmatprep.mubr.msk.f32.mxu0 %vm19478_vm0, %v22998_v39  ;;  %v20590_v50 = vpop.f32.mrb[66].mxu0 }
 0x19b   :  { %v441_v4 = vpop.f32.mrb[67].mxu0 }
 0x19c   :  { %18245 = vmatpush3.bf16.msra.mxu1 %v19817_v38  ;;  %18473 = vmatpush3.bf16.msra.mxu0 %v19817_v38 }
 0x19d   :  { %18246 = vmatprep.subr.bf16.mxu1 %v22957_v0  ;;  %18474 = vmatprep.subr.bf16.mxu0 %v22957_v0 }
 0x19e   :  { %v20596_v45 = vpop.f32.mrb[68].mxu0 }
 0x19f   :  { %16046 = vmatmul.mubr.msk.f32.vlgmr.msra.gmra.mrb[32].mxu1 %vm666_vm1, %v22999_v41  ;;  %16455 = vmatmul.mubr.msk.f32.vlgmr.msra.gmra.mrb[142].mxu0 %vm666_vm1, %v23000_v29  ;;  %v446_v46 = vpop.f32.mrb[69].mxu0  ;;  %v23001_v29 = vmax.f32 %v20107_v23, 0.0  ;;  %v23002_v41 = vmax.f32 %v20320_v7, 0.0 }
 0x1a0   :  { %18248 = vmatpush3.bf16.msra.mxu1 %v20050_v61  ;;  %18476 = vmatpush3.bf16.msra.mxu0 %v20050_v61 }
 0x1a1   :  { %18249 = vmatprep.subr.bf16.mxu1 %v22957_v0  ;;  %18477 = vmatprep.subr.bf16.mxu0 %v22957_v0 }
 0x1a2   :  { %16056 = vmatprep.mubr.msk.f32.mxu1 %vm19478_vm0, %v22998_v39  ;;  %16465 = vmatprep.mubr.msk.f32.mxu0 %vm19478_vm0, %v22998_v39  ;;  %v20612_v34 = vpop.f32.mrb[70].mxu0 }
 0x1a3   :  { %v451_v31 = vpop.f32.mrb[71].mxu0 }
 0x1a4   :  { %18251 = vmatpush3.bf16.msra.mxu1 %v20066_v6  ;;  %18479 = vmatpush3.bf16.msra.mxu0 %v20066_v6  ;;  %v20630_v31 = vadd.f32 %v20044_v55, %v20097_v19 }
 0x1a5   :  { %18252 = vmatprep.subr.bf16.mxu1 %v22957_v0  ;;  %18486 = vmatprep.subr.bf16.mxu0 %v22957_v0 }
 0x1a6   :  { %v20618_v46 = vpop.f32.mrb[72].mxu0  ;;  %v22953_v19 = vmax.f32 %v20630_v31, 0.0 }
 0x1a7   :  { %16057 = vmatmul.mubr.msk.f32.vlgmr.msra.gmra.mrb[34].mxu1 %vm666_vm1, %v23001_v29  ;;  %16466 = vmatmul.mubr.msk.f32.vlgmr.msra.gmra.mrb[144].mxu0 %vm666_vm1, %v23002_v41  ;;  %v456_v4 = vpop.f32.mrb[73].mxu0 }
 0x1a8   :  { %18254 = vmatpush3.bf16.msra.mxu1 %v20085_v14  ;;  %18488 = vmatpush3.bf16.msra.mxu0 %v19859_v52  ;;  %v20656_v4 = vadd.f32 %v20044_v55, %v20115_v25 }
 0x1a9   :  { %18255 = vmatprep.subr.bf16.mxu1 %v22957_v0  ;;  %18489 = vmatprep.subr.bf16.mxu0 %v22957_v0 }
 0x1aa   :  { %16067 = vmatprep.mubr.msk.f32.mxu1 %vm19478_vm0, %v22998_v39  ;;  %16487 = vmatprep.mubr.msk.f32.mxu0 %vm19478_vm0, %v22998_v39  ;;  %v20638_v23 = vpop.f32.mrb[74].mxu0  ;;  %v22954_v25 = vmax.f32 %v20656_v4, 0.0 }
 0x1ab   :  { %v461_v7 = vpop.f32.mrb[75].mxu0 }
 0x1ac   :  { %18257 = vmatpush3.bf16.msra.mxu1 %v20104_v22  ;;  %18491 = vmatpush3.bf16.msra.mxu0 %v19875_v57 }
 0x1ad   :  { %18258 = vmatprep.subr.bf16.mxu1 %v22957_v0  ;;  %18498 = vmatprep.subr.bf16.mxu0 %v22957_v0 }
 0x1ae   :  { %v20645_v29 = vpop.f32.mrb[76].mxu0 }
 0x1af   :  { %23003 = vst [vmem:[#allocation15_spill] sm:$0xff] %v20645_v29  ;;  %16068 = vmatmul.mubr.msk.f32.vlgmr.msra.gmra.mrb[36].mxu1 %vm666_vm1, %v22953_v19  ;;  %16488 = vmatmul.mubr.msk.f32.vlgmr.msra.gmra.mrb[146].mxu0 %vm666_vm1, %v20444_v5  ;;  %v466_v41 = vpop.f32.mrb[77].mxu0  ;;  %v23005_v29 = vmax.f32 %v20492_v9, 0.0 }
 0x1b0   :  { %18260 = vmatpush3.bf16.msra.mxu1 %v19859_v52  ;;  %18500 = vmatpush3.bf16.msra.mxu0 %v20193_v1 }
 0x1b1   :  { %18261 = vmatprep.subr.bf16.mxu1 %v22957_v0  ;;  %18501 = vmatprep.subr.bf16.mxu0 %v22957_v0 }
 0x1b2   :  { %16078 = vmatprep.mubr.msk.f32.mxu1 %vm19478_vm0, %v22998_v39  ;;  %16509 = vmatprep.mubr.msk.f32.mxu0 %vm19478_vm0, %v22998_v39  ;;  %v20664_v7 = vpop.f32.mrb[78].mxu0 }
 0x1b3   :  { %v471_v41 = vpop.f32.mrb[79].mxu0 }
 0x1b4   :  { %18263 = vmatpush3.bf16.msra.mxu1 %v19875_v57  ;;  %18503 = vmatpush3.bf16.msra.mxu0 %v20207_v8 }
 0x1b5   :  { %18264 = vmatprep.subr.bf16.mxu1 %v22957_v0  ;;  %18510 = vmatprep.subr.bf16.mxu0 %v22957_v0 }
 0x1b6   :  { %v20671_v19 = vpop.f32.mrb[80].mxu0 }
 0x1b7   :  { %23004 = vst [vmem:[#allocation16_spill] sm:$0xff] %v20671_v19  ;;  %16079 = vmatmul.mubr.msk.f32.vlgmr.msra.gmra.mrb[38].mxu1 %vm666_vm1, %v22954_v25  ;;  %16510 = vmatmul.mubr.msk.f32.vlgmr.msra.gmra.mrb[148].mxu0 %vm666_vm1, %v23005_v29  ;;  %v476_v41 = vpop.f32.mrb[81].mxu0  ;;  %v23007_v29 = vmax.f32 %v20243_v27, 0.0 }
 0x1b8   :  { %18266 = vmatpush3.bf16.msra.mxu1 %v20154_v43  ;;  %18512 = vmatpush3.bf16.msra.mxu0 %v20258_v37 }
 0x1b9   :  { %18267 = vmatprep.subr.bf16.mxu1 %v22957_v0  ;;  %18513 = vmatprep.subr.bf16.mxu0 %v22957_v0 }
 0x1ba   :  { %16089 = vmatprep.mubr.msk.f32.mxu1 %vm19478_vm0, %v22998_v39  ;;  %16531 = vmatprep.mubr.msk.f32.mxu0 %vm19478_vm0, %v22998_v39  ;;  %v479_v25 = vpop.f32.mrb[82].mxu0 }
 0x1bb   :  { %v481_v19 = vpop.f32.mrb[83].mxu0 }
 0x1bc   :  { %18269 = vmatpush3.bf16.msra.mxu1 %v20175_v53  ;;  %18515 = vmatpush3.bf16.msra.mxu0 %v20278_v48  ;;  %v20700_v19 = vadd.f32 %v20044_v55, %v20590_v50  ;;  %v23009_v53 = vmax.f32 %v20282_v49, 0.0 }
 0x1bd   :  { %18270 = vmatprep.subr.bf16.mxu1 %v22957_v0  ;;  %18522 = vmatprep.subr.bf16.mxu0 %v22957_v0 }
 0x1be   :  { %v20691_v9 = vpop.f32.mrb[84].mxu0 }
 0x1bf   :  { %23006 = vst [vmem:[#allocation17_spill] sm:$0xff] %v20691_v9  ;;  %16090 = vmatmul.mubr.msk.f32.vlgmr.msra.gmra.mrb[40].mxu1 %vm666_vm1, %v23007_v29  ;;  %16532 = vmatmul.mubr.msk.f32.vlgmr.msra.gmra.mrb[150].mxu0 %vm666_vm1, %v20565_v18  ;;  %v486_v41 = vpop.f32.mrb[85].mxu0  ;;  %v22960_v29 = vmax.f32 %v20700_v19, 0.0  ;;  %v450_v9 = vadd.f32 %v20044_v55, %v20612_v34 }
 0x1c0   :  { %18272 = vmatpush3.bf16.msra.mxu1 %v20193_v1  ;;  %18524 = vmatpush3.bf16.msra.mxu0 %v20323_v10 }
 0x1c1   :  { %18273 = vmatprep.subr.bf16.mxu1 %v22957_v0  ;;  %18525 = vmatprep.subr.bf16.mxu0 %v22957_v0  ;;  %v20739_v49 = vmax.f32 %v450_v9, 0.0  ;;  %v20754_v9 = vadd.f32 %v20044_v55, %v479_v25 }
 0x1c2   :  { %16100 = vmatprep.mubr.msk.f32.mxu1 %vm19478_vm0, %v22998_v39  ;;  %16553 = vmatprep.mubr.msk.f32.mxu0 %vm19478_vm0, %v22998_v39  ;;  %v489_v27 = vpop.f32.mrb[86].mxu0 }
 0x1c3   :  { %v491_v50 = vpop.f32.mrb[87].mxu0  ;;  %v22963_v25 = vmax.f32 %v20754_v9, 0.0 }
 0x1c4   :  { %18275 = vmatpush3.bf16.msra.mxu1 %v20207_v8  ;;  %18527 = vmatpush3.bf16.msra.mxu0 %v20342_v20 }
 0x1c5   :  { %18276 = vmatprep.subr.bf16.mxu1 %v22957_v0  ;;  %18534 = vmatprep.subr.bf16.mxu0 %v22957_v0  ;;  %v20729_v0 = vadd.f32 %v20044_v55, %v20232_v21 }
 0x1c6   :  { %v20715_v41 = vpop.f32.mrb[88].mxu0 }
 0x1c7   :  { %23008 = vst [vmem:[#allocation18_spill] sm:$0xff] %v20715_v41  ;;  %16101 = vmatmul.mubr.msk.f32.vlgmr.msra.gmra.mrb[42].mxu1 %vm666_vm1, %v23009_v53  ;;  %16554 = vmatmul.mubr.msk.f32.vlgmr.msra.gmra.mrb[152].mxu0 %vm666_vm1, %v22960_v29  ;;  %v496_v50 = vpop.f32.mrb[89].mxu0  ;;  %v23010_v41 = vmov 0.0|0.0   ;;  %v22959_v21 = vmax.f32 %v20729_v0, 0.0 }
 0x1c8   :  { %18278 = vmatpush3.bf16.msra.mxu1 %v20221_v16  ;;  %18536 = vmatpush3.bf16.msra.mxu0 %v20395_v12 }
 0x1c9   :  { %18279 = vmatprep.subr.bf16.mxu1 %v23010_v41  ;;  %18537 = vmatprep.subr.bf16.mxu0 %v23010_v41 }
 0x1ca   :  { %16111 = vmatprep.mubr.msk.f32.mxu1 %vm19478_vm0, %v22998_v39  ;;  %16575 = vmatprep.mubr.msk.f32.mxu0 %vm19478_vm0, %v22998_v39  ;;  %v20737_v53 = vpop.f32.mrb[90].mxu0 }
 0x1cb   :  { %v501_v34 = vpop.f32.mrb[91].mxu0 }
 0x1cc   :  { %18281 = vmatpush3.bf16.msra.mxu1 %v20238_v26  ;;  %18539 = vmatpush3.bf16.msra.mxu0 %v20415_v36 }
 0x1cd   :  { %18282 = vmatprep.subr.bf16.mxu1 %v23010_v41  ;;  %18546 = vmatprep.subr.bf16.mxu0 %v23010_v41 }
 0x1ce   :  { %v20746_v50 = vpop.f32.mrb[92].mxu0 }
 0x1cf   :  { %23011 = vst [vmem:[#allocation19_spill] sm:$0xff] %v20746_v50  ;;  %16112 = vmatmul.mubr.msk.f32.vlgmr.msra.gmra.mrb[44].mxu1 %vm666_vm1, %v22959_v21  ;;  %16576 = vmatmul.mubr.msk.f32.vlgmr.msra.gmra.mrb[154].mxu0 %vm666_vm1, %v20739_v49  ;;  %v506_v34 = vpop.f32.mrb[93].mxu0  ;;  %v23013_v50 = vmax.f32 %v20255_v35, 0.0 }
 0x1d0   :  { %18284 = vmatpush3.bf16.msra.mxu1 %v20258_v37  ;;  %18548 = vmatpush3.bf16.msra.mxu0 %v20463_v54 }
 0x1d1   :  { %18285 = vmatprep.subr.bf16.mxu1 %v23010_v41  ;;  %18549 = vmatprep.subr.bf16.mxu0 %v23010_v41 }
 0x1d2   :  { %16122 = vmatprep.mubr.msk.f32.mxu1 %vm19478_vm0, %v22998_v39  ;;  %16597 = vmatprep.mubr.msk.f32.mxu0 %vm19478_vm0, %v22998_v39  ;;  %v20764_v21 = vpop.f32.mrb[94].mxu0 }
 0x1d3   :  { %v511_v29 = vpop.f32.mrb[95].mxu0 }
 0x1d4   :  { %18287 = vmatpush3.bf16.msra.mxu1 %v20278_v48  ;;  %18551 = vmatpush3.bf16.msra.mxu0 %v20482_v24  ;;  %v490_v29 = vadd.f32 %v20044_v55, %v489_v27 }
 0x1d5   :  { %18288 = vmatprep.subr.bf16.mxu1 %v23010_v41  ;;  %18558 = vmatprep.subr.bf16.mxu0 %v23010_v41 }
 0x1d6   :  { %v20771_v34 = vpop.f32.mrb[96].mxu0 }
 0x1d7   :  { %23012 = vst [vmem:[#allocation20_spill] sm:$0xff] %v20771_v34  ;;  %16123 = vmatmul.mubr.msk.f32.vlgmr.msra.gmra.mrb[46].mxu1 %vm666_vm1, %v23013_v50  ;;  %16598 = vmatmul.mubr.msk.f32.vlgmr.msra.gmra.mrb[156].mxu0 %vm666_vm1, %v22963_v25  ;;  %v516_v26 = vpop.f32.mrb[97].mxu0  ;;  %v20790_v50 = vmax.f32 %v490_v29, 0.0 }
 0x1d8   :  { %18290 = vmatpush3.bf16.msra.mxu1 %v20298_v59  ;;  %18560 = vmatpush3.bf16.msra.mxu0 %v20537_v63 }
 0x1d9   :  { %18291 = vmatprep.subr.bf16.mxu1 %v23010_v41  ;;  %18561 = vmatprep.subr.bf16.mxu0 %v23010_v41 }
 0x1da   :  { %16133 = vmatprep.mubr.msk.f32.mxu1 %vm19478_vm0, %v22998_v39  ;;  %16619 = vmatprep.mubr.msk.f32.mxu0 %vm19478_vm0, %v22998_v39  ;;  %v20788_v35 = vpop.f32.mrb[98].mxu0 }
 0x1db   :  { %v521_v55 = vpop.f32.mrb[99].mxu0 }
 0x1dc   :  { %18293 = vmatpush3.bf16.msra.mxu1 %v20326_v11  ;;  %18563 = vmatpush3.bf16.msra.mxu0 %v20557_v51 }
 0x1dd   :  { %18294 = vmatprep.subr.bf16.mxu1 %v23010_v41  ;;  %18576 = vmatprep.subr.bf16.mxu0 %v23010_v41 }
 0x1de   :  { %v20796_v26 = vpop.f32.mrb[100].mxu0 }
 0x1df   :  { %23014 = vst [vmem:[#allocation21_spill] sm:$0xff] %v20796_v26  ;;  %16134 = vmatmul.mubr.msk.f32.vlgmr.msra.gmra.mrb[48].mxu1 %vm666_vm1, %v20397_v13  ;;  %16620 = vmatmul.mubr.msk.f32.vlgmr.msra.gmra.mrb[158].mxu0 %vm666_vm1, %v20790_v50  ;;  %v526_v27 = vpop.f32.mrb[101].mxu0 }
 0x1e0   :  { %18296 = vmatpush3.bf16.msra.mxu1 %v20323_v10  ;;  %18578 = vmatpush3.bf16.msra.mxu0 %v19801_v33 }
 0x1e1   :  { %18297 = vmatprep.subr.bf16.mxu1 %v23010_v41  ;;  %18579 = vmatprep.subr.bf16.mxu0 %v23010_v41 }
 0x1e2   :  { %16144 = vmatprep.mubr.msk.f32.mxu1 %vm19478_vm0, %v22998_v39  ;;  %16649 = vmatprep.mubr.msk.f32.mxu0 %vm19478_vm0, %v22998_v39  ;;  %v20810_v29 = vpop.f32.mrb[102].mxu0 }
 0x1e3   :  { %v531_v55 = vpop.f32.mrb[103].mxu0 }
 0x1e4   :  { %18299 = vmatpush3.bf16.msra.mxu1 %v20342_v20  ;;  %18581 = vmatpush3.bf16.msra.mxu0 %v19817_v38  ;;  %v20827_v55 = vld [vmem:[%s22929_s3] ss:$0 sm:$0xff] }
 0x1e5   :  { %18300 = vmatprep.subr.bf16.mxu1 %v23010_v41  ;;  %18582 = vmatprep.subr.bf16.mxu0 %v23010_v41  ;;  %v375_v26 = vadd.f32 %v20827_v55, %v20375_v56 }
 0x1e6   :  { %v20816_v27 = vpop.f32.mrb[104].mxu0 }
 0x1e7   :  { %23015 = vst [vmem:[#allocation22_spill] sm:$0xff] %v20816_v27  ;;  %16145 = vmatmul.mubr.msk.f32.vlgmr.msra.gmra.mrb[50].mxu1 %vm666_vm1, %v20444_v5  ;;  %16650 = vmatmul.mubr.msk.f32.vlgmr.msra.gmra.mrb[160].mxu0 %vm666_vm1, %v20444_v5  ;;  %v536_v25 = vpop.f32.mrb[105].mxu0  ;;  %v20841_v27 = vmax.f32 %v375_v26, 0.0 }
 0x1e8   :  { %18302 = vmatpush3.bf16.msra.mxu1 %v20365_v47  ;;  %18584 = vmatpush3.bf16.msra.mxu0 %v20050_v61 }
 0x1e9   :  { %18303 = vmatprep.subr.bf16.mxu1 %v23010_v41  ;;  %18585 = vmatprep.subr.bf16.mxu0 %v23010_v41 }
 0x1ea   :  { %16155 = vmatprep.mubr.msk.f32.mxu1 %vm19478_vm0, %v22998_v39  ;;  %16660 = vmatprep.mubr.msk.f32.mxu0 %vm19478_vm0, %v22998_v39  ;;  %v20837_v5 = vpop.f32.mrb[106].mxu0 }
 0x1eb   :  { %v541_v25 = vpop.f32.mrb[107].mxu0 }
 0x1ec   :  { %18305 = vmatpush3.bf16.msra.mxu1 %v20381_v60  ;;  %18587 = vmatpush3.bf16.msra.mxu0 %v20066_v6 }
 0x1ed   :  { %18306 = vmatprep.subr.bf16.mxu1 %v23010_v41  ;;  %18594 = vmatprep.subr.bf16.mxu0 %v23010_v41 }
 0x1ee   :  { %v20845_v56 = vpop.f32.mrb[108].mxu0 }
 0x1ef   :  { %23016 = vst [vmem:[#allocation23_spill] sm:$0xff] %v20845_v56  ;;  %16156 = vmatmul.mubr.msk.f32.vlgmr.msra.gmra.mrb[52].mxu1 %vm666_vm1, %v20841_v27  ;;  %16661 = vmatmul.mubr.msk.f32.vlgmr.msra.gmra.mrb[162].mxu0 %vm666_vm1, %v20397_v13  ;;  %v546_v34 = vpop.f32.mrb[109].mxu0 }
 0x1f0   :  { %18308 = vmatpush3.bf16.msra.mxu1 %v20395_v12  ;;  %18596 = vmatpush3.bf16.msra.mxu0 %v19859_v52 }
 0x1f1   :  { %18309 = vmatprep.subr.bf16.mxu1 %v23010_v41  ;;  %18597 = vmatprep.subr.bf16.mxu0 %v23010_v41 }
 0x1f2   :  { %v736_v26 = vpop.f32.mrb[0].mxu1  ;;  %16166 = vmatprep.mubr.msk.f32.mxu1 %vm19478_vm0, %v22998_v39  ;;  %16682 = vmatprep.mubr.msk.f32.mxu0 %vm19478_vm0, %v22998_v39  ;;  %v20859_v25 = vpop.f32.mrb[110].mxu0 }
 0x1f3   :  { %23017 = vst [vmem:[#allocation24_spill] sm:$0xff] %v20859_v25  ;;  %v15871_v56 = vpop.f32.mrb[1].mxu1  ;;  %v551_v13 = vpop.f32.mrb[111].mxu0 }
 0x1f4   :  { %18311 = vmatpush3.bf16.msra.mxu1 %v20415_v36  ;;  %18599 = vmatpush3.bf16.msra.mxu0 %v19875_v57 }
 0x1f5   :  { %18312 = vmatprep.subr.bf16.mxu1 %v23010_v41  ;;  %18606 = vmatprep.subr.bf16.mxu0 %v23010_v41 }
 0x1f6   :  { %v20865_v34 = vpop.f32.mrb[112].mxu0 }
 0x1f7   :  { %23018 = vst [vmem:[#allocation25_spill] sm:$0xff] %v20865_v34  ;;  %16167 = vmatmul.mubr.msk.f32.vlgmr.msra.gmra.mrb[54].mxu1 %vm666_vm1, %v20399_v15  ;;  %16683 = vmatmul.mubr.msk.f32.vlgmr.msra.gmra.mrb[164].mxu0 %vm666_vm1, %v20399_v15  ;;  %v556_v60 = vpop.f32.mrb[113].mxu0 }
 0x1f8   :  { %18314 = vmatpush3.bf16.msra.mxu1 %v20435_v2  ;;  %18608 = vmatpush3.bf16.msra.mxu0 %v20193_v1 }
 0x1f9   :  { %18315 = vmatprep.subr.bf16.mxu1 %v23010_v41  ;;  %18609 = vmatprep.subr.bf16.mxu0 %v23010_v41 }
 0x1fa   :  { %v809_v13 = vpop.f32.mrb[2].mxu1  ;;  %16177 = vmatprep.mubr.msk.f32.mxu1 %vm19478_vm0, %v22998_v39  ;;  %16704 = vmatprep.mubr.msk.f32.mxu0 %vm19478_vm0, %v22998_v39  ;;  %v20879_v56 = vpop.f32.mrb[114].mxu0 }
 0x1fb   :  { %v810_v34 = vadd.f32 %v809_v13, %v736_v26  ;;  %v15882_v47 = vpop.f32.mrb[3].mxu1  ;;  %v561_v60 = vpop.f32.mrb[115].mxu0 }
 0x1fc   :  { %18317 = vmatpush3.bf16.msra.mxu1 %v20466_v58  ;;  %18611 = vmatpush3.bf16.msra.mxu0 %v20207_v8 }
 0x1fd   :  { %18318 = vmatprep.subr.bf16.mxu1 %v23010_v41  ;;  %18618 = vmatprep.subr.bf16.mxu0 %v23010_v41 }
 0x1fe   :  { %v20885_v2 = vpop.f32.mrb[116].mxu0 }
 0x1ff   :  { %23019 = vst [vmem:[#allocation26_spill] sm:$0xff] %v20885_v2  ;;  %16178 = vmatmul.mubr.msk.f32.vlgmr.msra.gmra.mrb[56].mxu1 %vm666_vm1, %v20533_v3  ;;  %16705 = vmatmul.mubr.msk.f32.vlgmr.msra.gmra.mrb[166].mxu0 %vm666_vm1, %v20565_v18  ;;  %v566_v25 = vpop.f32.mrb[117].mxu0  ;;  %v415_v3 = vadd.f32 %v20827_v55, %v20515_v17 }
 0x200   :  { %18320 = vmatpush3.bf16.msra.mxu1 %v20463_v54  ;;  %18620 = vmatpush3.bf16.msra.mxu0 %v20258_v37 }
 0x201   :  { %18321 = vmatprep.subr.bf16.mxu1 %v23010_v41  ;;  %18621 = vmatprep.subr.bf16.mxu0 %v23010_v41 }
 0x202   :  { %v887_v47 = vpop.f32.mrb[4].mxu1  ;;  %16188 = vmatprep.mubr.msk.f32.mxu1 %vm19478_vm0, %v22998_v39  ;;  %16726 = vmatprep.mubr.msk.f32.mxu0 %vm19478_vm0, %v22998_v39  ;;  %v20899_v26 = vpop.f32.mrb[118].mxu0 }
 0x203   :  { %v891_v13 = vadd.f32 %v887_v47, %v810_v34  ;;  %v15893_v60 = vpop.f32.mrb[5].mxu1  ;;  %v571_v25 = vpop.f32.mrb[119].mxu0 }
 0x204   :  { %18323 = vmatpush3.bf16.msra.mxu1 %v20482_v24  ;;  %18623 = vmatpush3.bf16.msra.mxu0 %v20278_v48 }
 0x205   :  { %18324 = vmatprep.subr.bf16.mxu1 %v23010_v41  ;;  %18630 = vmatprep.subr.bf16.mxu0 %v23010_v41 }
 0x206   :  { %v20905_v2 = vpop.f32.mrb[120].mxu0 }
 0x207   :  { %23020 = vst [vmem:[#allocation27_spill] sm:$0xff] %v20905_v2  ;;  %16189 = vmatmul.mubr.msk.f32.vlgmr.msra.gmra.mrb[58].mxu1 %vm666_vm1, %v20565_v18  ;;  %16727 = vmatmul.mubr.msk.f32.vlgmr.msra.gmra.mrb[168].mxu0 %vm666_vm1, %v20539_v44  ;;  %v576_v34 = vpop.f32.mrb[121].mxu0  ;;  %v20923_v18 = vmax.f32 %v415_v3, 0.0 }
 0x208   :  { %18326 = vmatpush3.bf16.msra.mxu1 %v20506_v40  ;;  %18632 = vmatpush3.bf16.msra.mxu0 %v20323_v10  ;;  %v460_v40 = vadd.f32 %v20827_v55, %v20638_v23 }
 0x209   :  { %18327 = vmatprep.subr.bf16.mxu1 %v23010_v41  ;;  %18633 = vmatprep.subr.bf16.mxu0 %v23010_v41 }
 0x20a   :  { %v966_v47 = vpop.f32.mrb[6].mxu1  ;;  %16199 = vmatprep.mubr.msk.f32.mxu1 %vm19478_vm0, %v22998_v39  ;;  %16748 = vmatprep.mubr.msk.f32.mxu0 %vm19478_vm0, %v22998_v39  ;;  %v20921_v17 = vpop.f32.mrb[122].mxu0  ;;  %v20947_v23 = vmax.f32 %v460_v40, 0.0 }
 0x20b   :  { %v970_v60 = vadd.f32 %v966_v47, %v891_v13  ;;  %v15904_v25 = vpop.f32.mrb[7].mxu1  ;;  %v581_v34 = vpop.f32.mrb[123].mxu0 }
 0x20c   :  { %18329 = vmatpush3.bf16.msra.mxu1 %v20522_v62  ;;  %18635 = vmatpush3.bf16.msra.mxu0 %v20342_v20 }
 0x20d   :  { %18330 = vmatprep.subr.bf16.mxu1 %v23010_v41  ;;  %18642 = vmatprep.subr.bf16.mxu0 %v23010_v41 }
 0x20e   :  { %v20929_v2 = vpop.f32.mrb[124].mxu0 }
 0x20f   :  { %23021 = vst [vmem:[#allocation28_spill] sm:$0xff] %v20929_v2  ;;  %16200 = vmatmul.mubr.msk.f32.vlgmr.msra.gmra.mrb[60].mxu1 %vm666_vm1, %v20923_v18  ;;  %16749 = vmatmul.mubr.msk.f32.vlgmr.msra.gmra.mrb[170].mxu0 %vm666_vm1, %v20739_v49  ;;  %v586_v3 = vpop.f32.mrb[125].mxu0 }
 0x210   :  { %18332 = vmatpush3.bf16.msra.mxu1 %v20537_v63  ;;  %18644 = vmatpush3.bf16.msra.mxu0 %v20395_v12 }
 0x211   :  { %18333 = vmatprep.subr.bf16.mxu1 %v23010_v41  ;;  %18645 = vmatprep.subr.bf16.mxu0 %v23010_v41 }
 0x212   :  { %v1045_v13 = vpop.f32.mrb[8].mxu1  ;;  %v20941_v47 = vpop.f32.mrb[126].mxu0  ;;  %16210 = vmatprep.mubr.msk.f32.mxu1 %vm19478_vm0, %v22998_v39  ;;  %16770 = vmatprep.mubr.msk.f32.mxu0 %vm19478_vm0, %v22998_v39 }
 0x213   :  { %v1049_v25 = vadd.f32 %v1045_v13, %v970_v60  ;;  %v15915_v34 = vpop.f32.mrb[9].mxu1  ;;  %v591_v3 = vpop.f32.mrb[127].mxu0 }
 0x214   :  { %18335 = vmatpush3.bf16.msra.mxu1 %v20557_v51  ;;  %18647 = vmatpush3.bf16.msra.mxu0 %v20415_v36 }
 0x215   :  { %18654 = vmatprep.subr.bf16.mxu0 %v23010_v41  ;;  %18336 = vmatprep.subr.bf16.mxu1 %v23010_v41 }
 0x216   :  { %v20953_v2 = vpop.f32.mrb[128].mxu0 }
 0x217   :  { %23022 = vst [vmem:[#allocation29_spill] sm:$0xff] %v20953_v2  ;;  %16211 = vmatmul.mubr.msk.f32.vlgmr.msra.gmra.mrb[62].mxu1 %vm666_vm1, %v20539_v44  ;;  %v16294_v62 = vpop.f32.mrb[129].mxu0  ;;  %16771 = vmatmul.mubr.msk.f32.vlgmr.msra.gmra.mrb[172].mxu0 %vm666_vm1, %v20947_v23 }
 0x218   :  { %18656 = vmatpush3.bf16.msra.mxu0 %v20463_v54  ;;  %16792 = vmatprep.mubr.msk.f32.mxu0 %vm19478_vm0, %v22998_v39  ;;  %v500_v62 = vadd.f32 %v20827_v55, %v20737_v53 }
 0x219   :  { %18657 = vmatprep.subr.bf16.mxu0 %v23010_v41  ;;  %16229 = vmatprep.mubr.msk.f32.mxu1 %vm19478_vm0, %v22998_v39 }
 0x21a   :  { %v1124_v40 = vpop.f32.mrb[10].mxu1  ;;  %v20977_v3 = vmax.f32 %v500_v62, 0.0 }
 0x21b   :  { %v1128_v60 = vadd.f32 %v1124_v40, %v1049_v25  ;;  %v15926_v13 = vpop.f32.mrb[11].mxu1 }
 0x21c   :  { %18659 = vmatpush3.bf16.msra.mxu0 %v20482_v24 }
 0x21d   :  { %18666 = vmatprep.subr.bf16.mxu0 %v23010_v41 }
 0x21f   :  { %16793 = vmatmul.mubr.msk.f32.vlgmr.msra.gmra.mrb[174].mxu0 %vm666_vm1, %v20790_v50 }
 0x220   :  { %18668 = vmatpush3.bf16.msra.mxu0 %v20537_v63  ;;  %16814 = vmatprep.mubr.msk.f32.mxu0 %vm19478_vm0, %v22998_v39 }
 0x221   :  { %18669 = vmatprep.subr.bf16.mxu0 %v23010_v41 }
 0x222   :  { %v1203_v34 = vpop.f32.mrb[12].mxu1  ;;  %v20975_v25 = vpop.f32.mrb[130].mxu0 }
 0x223   :  { %23023 = vst [vmem:[#allocation30_spill] sm:$0xff] %v20975_v25  ;;  %v1207_v40 = vadd.f32 %v1203_v34, %v1128_v60  ;;  %v15937_v13 = vpop.f32.mrb[13].mxu1  ;;  %v16316_v2 = vpop.f32.mrb[131].mxu0 }
 0x224   :  { %18671 = vmatpush3.bf16.msra.mxu0 %v20557_v51 }
 0x225   :  { %18684 = vmatprep.subr.bf16.mxu0 %v23010_v41 }
 0x227   :  { %16815 = vmatmul.mubr.msk.f32.vlgmr.msra.gmra.mrb[176].mxu0 %vm666_vm1, %v20977_v3 }
 0x228   :  { %18686 = vmatpush3.bf16.msra.mxu0 %v19801_v33  ;;  %16844 = vmatprep.mubr.msk.f32.mxu0 %vm19478_vm0, %v22998_v39 }
 0x229   :  { %18687 = vmatprep.subr.bf16.mxu0 %v23010_v41 }
 0x22a   :  { %v1282_v53 = vpop.f32.mrb[14].mxu1  ;;  %v20987_v62 = vpop.f32.mrb[132].mxu0 }
 0x22b   :  { %23024 = vst [vmem:[#allocation31_spill] sm:$0xff] %v20987_v62  ;;  %v1286_v60 = vadd.f32 %v1282_v53, %v1207_v40  ;;  %v15948_v34 = vpop.f32.mrb[15].mxu1  ;;  %v16338_v2 = vpop.f32.mrb[133].mxu0 }
 0x22c   :  { %18689 = vmatpush3.bf16.msra.mxu0 %v19817_v38 }
 0x22d   :  { %18690 = vmatprep.subr.bf16.mxu0 %v23010_v41 }
 0x22f   :  { %16845 = vmatmul.mubr.msk.f32.vlgmr.msra.gmra.mrb[178].mxu0 %vm666_vm1, %v20399_v15 }
 0x230   :  { %18692 = vmatpush3.bf16.msra.mxu0 %v20050_v61  ;;  %16855 = vmatprep.mubr.msk.f32.mxu0 %vm19478_vm0, %v22998_v39 }
 0x231   :  { %18693 = vmatprep.subr.bf16.mxu0 %v23010_v41 }
 0x232   :  { %v1361_v13 = vpop.f32.mrb[16].mxu1 }
 0x233   :  { %v1365_v25 = vadd.f32 %v1361_v13, %v1286_v60  ;;  %v15959_v62 = vpop.f32.mrb[17].mxu1 }
 0x234   :  { %18695 = vmatpush3.bf16.msra.mxu0 %v20066_v6  ;;  %v23025_v62 = vmax.f32 %v20432_v42, 0.0 }
 0x235   :  { %18702 = vmatprep.subr.bf16.mxu0 %v23010_v41 }
 0x237   :  { %16856 = vmatmul.mubr.msk.f32.vlgmr.msra.gmra.mrb[180].mxu0 %vm666_vm1, %v20841_v27 }
 0x238   :  { %18704 = vmatpush3.bf16.msra.mxu0 %v19859_v52  ;;  %16877 = vmatprep.mubr.msk.f32.mxu0 %vm19478_vm0, %v22998_v39 }
 0x239   :  { %18705 = vmatprep.subr.bf16.mxu0 %v23010_v41 }
 0x23a   :  { %v1440_v15 = vpop.f32.mrb[18].mxu1 }
 0x23b   :  { %v1444_v40 = vadd.f32 %v1440_v15, %v1365_v25  ;;  %v15970_v53 = vpop.f32.mrb[19].mxu1 }
 0x23c   :  { %18707 = vmatpush3.bf16.msra.mxu0 %v19875_v57 }
 0x23d   :  { %18714 = vmatprep.subr.bf16.mxu0 %v23010_v41 }
 0x23f   :  { %16878 = vmatmul.mubr.msk.f32.vlgmr.msra.gmra.mrb[182].mxu0 %vm666_vm1, %v23025_v62 }
 0x240   :  { %18716 = vmatpush3.bf16.msra.mxu0 %v20193_v1  ;;  %16899 = vmatprep.mubr.msk.f32.mxu0 %vm19478_vm0, %v22998_v39 }
 0x241   :  { %18717 = vmatprep.subr.bf16.mxu0 %v23010_v41 }
 0x242   :  { %v1519_v60 = vpop.f32.mrb[20].mxu1  ;;  %v21014_v34 = vpop.f32.mrb[134].mxu0 }
 0x243   :  { %v1523_v25 = vadd.f32 %v1519_v60, %v1444_v40  ;;  %v15981_v2 = vpop.f32.mrb[21].mxu1  ;;  %v16360_v13 = vpop.f32.mrb[135].mxu0  ;;  %v23027_v60 = vmax.f32 %v20568_v32, 0.0 }
 0x244   :  { %18719 = vmatpush3.bf16.msra.mxu0 %v20207_v8  ;;  %v21039_v13 = vadd.f32 %v20827_v55, %v20664_v7  ;;  %v14560_v7 = vld [vmem:[%s22930_s6 + $0x40] sm:$0xff] }
 0x245   :  { %18726 = vmatprep.subr.bf16.mxu0 %v23010_v41 }
 0x247   :  { %16900 = vmatmul.mubr.msk.f32.vlgmr.msra.gmra.mrb[184].mxu0 %vm666_vm1, %v20539_v44 }
 0x248   :  { %18728 = vmatpush3.bf16.msra.mxu0 %v20258_v37  ;;  %16921 = vmatprep.mubr.msk.f32.mxu0 %vm19478_vm0, %v22998_v39 }
 0x249   :  { %18729 = vmatprep.subr.bf16.mxu0 %v23010_v41 }
 0x24a   :  { %v1598_v42 = vpop.f32.mrb[22].mxu1  ;;  %v21024_v15 = vpop.f32.mrb[136].mxu0 }
 0x24b   :  { %23026 = vst [vmem:[#allocation32_spill] sm:$0xff] %v21024_v15  ;;  %v1602_v40 = vadd.f32 %v1598_v42, %v1523_v25  ;;  %v15992_v53 = vpop.f32.mrb[23].mxu1  ;;  %v16382_v62 = vpop.f32.mrb[137].mxu0  ;;  %v22977_v42 = vmax.f32 %v21039_v13, 0.0 }
 0x24c   :  { %18731 = vmatpush3.bf16.msra.mxu0 %v20278_v48  ;;  %v14561_v62 = vld [vmem:[%s22930_s6 + $0x48] sm:$0xff] }
 0x24d   :  { %18738 = vmatprep.subr.bf16.mxu0 %v23010_v41 }
 0x24f   :  { %16922 = vmatmul.mubr.msk.f32.vlgmr.msra.gmra.mrb[186].mxu0 %vm666_vm1, %v23027_v60  ;;  %v18337_v60 = vpack.c.bf16 %v14561_v62, %v14560_v7 }
 0x250   :  { %18740 = vmatpush3.bf16.msra.mxu0 %v20323_v10  ;;  %16943 = vmatprep.mubr.msk.f32.mxu0 %vm19478_vm0, %v22998_v39 }
 0x251   :  { %18741 = vmatprep.subr.bf16.mxu0 %v23010_v41  ;;  %18338 = vmatpush3.bf16.msra.mxu1 %v18337_v60 }
 0x252   :  { %v1677_v44 = vpop.f32.mrb[24].mxu1  ;;  %18339 = vmatprep.subr.bf16.mxu1 %v23010_v41 }
 0x253   :  { %v1681_v2 = vadd.f32 %v1677_v44, %v1602_v40  ;;  %v16003_v25 = vpop.f32.mrb[25].mxu1 }
 0x254   :  { %18743 = vmatpush3.bf16.msra.mxu0 %v20342_v20  ;;  %v14562_v25 = vld [vmem:[%s22930_s6 + $0x50] sm:$0xff] }
 0x255   :  { %18750 = vmatprep.subr.bf16.mxu0 %v23010_v41 }
 0x257   :  { %16944 = vmatmul.mubr.msk.f32.vlgmr.msra.gmra.mrb[188].mxu0 %vm666_vm1, %v20947_v23 }
 0x258   :  { %18752 = vmatpush3.bf16.msra.mxu0 %v20395_v12  ;;  %16965 = vmatprep.mubr.msk.f32.mxu0 %vm19478_vm0, %v22998_v39 }
 0x259   :  { %18753 = vmatprep.subr.bf16.mxu0 %v23010_v41 }
 0x25a   :  { %v1756_v32 = vpop.f32.mrb[26].mxu1 }
 0x25b   :  { %v1760_v40 = vadd.f32 %v1756_v32, %v1681_v2  ;;  %v16014_v53 = vpop.f32.mrb[27].mxu1  ;;  %v14563_v32 = vld [vmem:[%s22930_s6 + $0x58] sm:$0xff] }
 0x25c   :  { %18755 = vmatpush3.bf16.msra.mxu0 %v20415_v36  ;;  %v18340_v60 = vpack.c.bf16 %v14563_v32, %v14562_v25 }
 0x25d   :  { %18762 = vmatprep.subr.bf16.mxu0 %v23010_v41 }
 0x25e   :  { %18341 = vmatpush3.bf16.msra.mxu1 %v18340_v60 }
 0x25f   :  { %16966 = vmatmul.mubr.msk.f32.vlgmr.msra.gmra.mrb[190].mxu0 %vm666_vm1, %v22977_v42  ;;  %v14564_v42 = vld [vmem:[%s22930_s6 + $0x60] sm:$0xff]  ;;  %18342 = vmatprep.subr.bf16.mxu1 %v23010_v41 }
 0x260   :  { %18764 = vmatpush3.bf16.msra.mxu0 %v20463_v54  ;;  %16987 = vmatprep.mubr.msk.f32.mxu0 %vm19478_vm0, %v22998_v39 }
 0x261   :  { %18765 = vmatprep.subr.bf16.mxu0 %v23010_v41 }
 0x262   :  { %v1835_v44 = vpop.f32.mrb[28].mxu1  ;;  %v21064_v2 = vpop.f32.mrb[138].mxu0 }
 0x263   :  { %23028 = vst [vmem:[#allocation33_spill] sm:$0xff] %v21064_v2  ;;  %v1839_v53 = vadd.f32 %v1835_v44, %v1760_v40  ;;  %v16025_v7 = vpop.f32.mrb[29].mxu1  ;;  %v16404_v62 = vpop.f32.mrb[139].mxu0  ;;  %v14565_v2 = vld [vmem:[%s22930_s6 + $0x68] sm:$0xff]  ;;  %v21083_v40 = vadd.f32 %v20827_v55, %v20764_v21  ;;  %v14566_v21 = vld [vmem:[%s22930_s6 + $0x70] sm:$0xff] }
 0x264   :  { %18767 = vmatpush3.bf16.msra.mxu0 %v20482_v24  ;;  %v18343_v15 = vpack.c.bf16 %v14565_v2, %v14564_v42  ;;  %v14567_v42 = vld [vmem:[%s22930_s6 + $0x78] sm:$0xff] }
 0x265   :  { %18774 = vmatprep.subr.bf16.mxu0 %v23010_v41  ;;  %v22978_v2 = vmax.f32 %v21083_v40, 0.0 }
 0x266   :  { %18344 = vmatpush3.bf16.msra.mxu1 %v18343_v15  ;;  %v18346_v15 = vpack.c.bf16 %v14567_v42, %v14566_v21  ;;  %v21117_v42 = vadd.f32 %v20827_v55, %v20575_v28 }
 0x267   :  { %16988 = vmatmul.mubr.msk.f32.vlgmr.msra.gmra.mrb[192].mxu0 %vm666_vm1, %v20977_v3  ;;  %18345 = vmatprep.subr.bf16.mxu1 %v23010_v41 }
 0x268   :  { %18776 = vmatpush3.bf16.msra.mxu0 %v20537_v63  ;;  %17009 = vmatprep.mubr.msk.f32.mxu0 %vm19478_vm0, %v22998_v39 }
 0x269   :  { %18777 = vmatprep.subr.bf16.mxu0 %v23010_v41 }
 0x26a   :  { %v1914_v44 = vpop.f32.mrb[30].mxu1  ;;  %v21091_v25 = vpop.f32.mrb[140].mxu0  ;;  %18347 = vmatpush3.bf16.msra.mxu1 %v18346_v15 }
 0x26b   :  { %23029 = vst [vmem:[#allocation34_spill] sm:$0xff] %v21091_v25  ;;  %v21101_v32 = vadd.f32 %v1914_v44, %v1839_v53  ;;  %v16036_v7 = vpop.f32.mrb[31].mxu1  ;;  %v16426_v62 = vpop.f32.mrb[141].mxu0  ;;  %18348 = vmatprep.subr.bf16.mxu1 %v23010_v41 }
 0x26c   :  { %18779 = vmatpush3.bf16.msra.mxu0 %v20557_v51  ;;  %v23030_v7 = vmax.f32 %v20700_v19, 0.0 }
 0x26d   :  { %18792 = vmatprep.subr.bf16.mxu0 %v23010_v41 }
 0x26f   :  { %17010 = vmatmul.mubr.msk.f32.vlgmr.msra.gmra.mrb[194].mxu0 %vm666_vm1, %v22978_v2 }
 0x270   :  { %18794 = vmatpush3.bf16.msra.mxu0 %v19801_v33  ;;  %17039 = vmatprep.mubr.msk.f32.mxu0 %vm19478_vm0, %v22998_v39 }
 0x271   :  { %18795 = vmatprep.subr.bf16.mxu0 %v23010_v41 }
 0x272   :  { %v2002_v53 = vpop.f32.mrb[32].mxu1  ;;  %v4561_v60 = vpop.f32.mrb[142].mxu0 }
 0x273   :  { %v16047_v44 = vpop.f32.mrb[33].mxu1  ;;  %v16456_v21 = vpop.f32.mrb[143].mxu0 }
 0x274   :  { %18797 = vmatpush3.bf16.msra.mxu0 %v19817_v38  ;;  %v22979_v44 = vmax.f32 %v21117_v42, 0.0 }
 0x275   :  { %18798 = vmatprep.subr.bf16.mxu0 %v23010_v41 }
 0x277   :  { %17040 = vmatmul.mubr.msk.f32.vlgmr.msra.gmra.mrb[196].mxu0 %vm666_vm1, %v23030_v7 }
 0x278   :  { %18800 = vmatpush3.bf16.msra.mxu0 %v20050_v61  ;;  %17050 = vmatprep.mubr.msk.f32.mxu0 %vm19478_vm0, %v22998_v39 }
 0x279   :  { %18801 = vmatprep.subr.bf16.mxu0 %v23010_v41 }
 0x27a   :  { %v2072_v62 = vpop.f32.mrb[34].mxu1  ;;  %v4631_v15 = vpop.f32.mrb[144].mxu0 }
 0x27b   :  { %v2073_v21 = vadd.f32 %v2072_v62, %v2002_v53  ;;  %v21127_v2 = vadd.f32 %v4631_v15, %v4561_v60  ;;  %v16058_v28 = vpop.f32.mrb[35].mxu1  ;;  %v16467_v25 = vpop.f32.mrb[145].mxu0 }
 0x27c   :  { %18803 = vmatpush3.bf16.msra.mxu0 %v20066_v6 }
 0x27d   :  { %18810 = vmatprep.subr.bf16.mxu0 %v23010_v41 }
 0x27f   :  { %17051 = vmatmul.mubr.msk.f32.vlgmr.msra.gmra.mrb[198].mxu0 %vm666_vm1, %v22979_v44 }
 0x280   :  { %18812 = vmatpush3.bf16.msra.mxu0 %v19859_v52  ;;  %17072 = vmatprep.mubr.msk.f32.mxu0 %vm19478_vm0, %v22998_v39 }
 0x281   :  { %18813 = vmatprep.subr.bf16.mxu0 %v23010_v41 }
 0x282   :  { %v2145_v19 = vpop.f32.mrb[36].mxu1  ;;  %v21138_v53 = vpop.f32.mrb[146].mxu0 }
 0x283   :  { %v2149_v60 = vadd.f32 %v2145_v19, %v2073_v21  ;;  %v16069_v25 = vpop.f32.mrb[37].mxu1  ;;  %v16489_v7 = vpop.f32.mrb[147].mxu0 }
 0x284   :  { %18815 = vmatpush3.bf16.msra.mxu0 %v19875_v57  ;;  %v23031_v25 = vmax.f32 %v20754_v9, 0.0  ;;  %v520_v9 = vadd.f32 %v20827_v55, %v20788_v35  ;;  %v21177_v35 = vadd.f32 %v20827_v55, %v20810_v29  ;;  %v560_v29 = vadd.f32 %v20827_v55, %v20879_v56 }
 0x285   :  { %18822 = vmatprep.subr.bf16.mxu0 %v23010_v41  ;;  %v21204_v56 = vadd.f32 %v20827_v55, %v20899_v26 }
 0x287   :  { %17073 = vmatmul.mubr.msk.f32.vlgmr.msra.gmra.mrb[200].mxu0 %vm666_vm1, %v20739_v49 }
 0x288   :  { %18824 = vmatpush3.bf16.msra.mxu0 %v20193_v1  ;;  %17094 = vmatprep.mubr.msk.f32.mxu0 %vm19478_vm0, %v22998_v39 }
 0x289   :  { %18825 = vmatprep.subr.bf16.mxu0 %v23010_v41 }
 0x28a   :  { %v2219_v62 = vpop.f32.mrb[38].mxu1  ;;  %v21148_v15 = vpop.f32.mrb[148].mxu0 }
 0x28b   :  { %v2223_v21 = vadd.f32 %v2219_v62, %v2149_v60  ;;  %v16080_v28 = vpop.f32.mrb[39].mxu1  ;;  %v16511_v19 = vpop.f32.mrb[149].mxu0 }
 0x28c   :  { %18827 = vmatpush3.bf16.msra.mxu0 %v20207_v8 }
 0x28d   :  { %18834 = vmatprep.subr.bf16.mxu0 %v23010_v41 }
 0x28f   :  { %17095 = vmatmul.mubr.msk.f32.vlgmr.msra.gmra.mrb[202].mxu0 %vm666_vm1, %v23031_v25  ;;  %v642_v25 = vmax.f32 %v520_v9, 0.0 }
 0x290   :  { %18836 = vmatpush3.bf16.msra.mxu0 %v20258_v37  ;;  %17116 = vmatprep.mubr.msk.f32.mxu0 %vm19478_vm0, %v22998_v39 }
 0x291   :  { %18837 = vmatprep.subr.bf16.mxu0 %v23010_v41 }
 0x292   :  { %v2290_v7 = vpop.f32.mrb[40].mxu1  ;;  %v21159_v44 = vpop.f32.mrb[150].mxu0 }
 0x293   :  { %v2294_v60 = vadd.f32 %v2290_v7, %v2223_v21  ;;  %v16091_v62 = vpop.f32.mrb[41].mxu1  ;;  %v16533_v28 = vpop.f32.mrb[151].mxu0 }
 0x294   :  { %18839 = vmatpush3.bf16.msra.mxu0 %v20278_v48 }
 0x295   :  { %18846 = vmatprep.subr.bf16.mxu0 %v23010_v41 }
 0x297   :  { %17117 = vmatmul.mubr.msk.f32.vlgmr.msra.gmra.mrb[204].mxu0 %vm666_vm1, %v20790_v50 }
 0x298   :  { %18848 = vmatpush3.bf16.msra.mxu0 %v20323_v10  ;;  %17138 = vmatprep.mubr.msk.f32.mxu0 %vm19478_vm0, %v22998_v39 }
 0x299   :  { %18849 = vmatprep.subr.bf16.mxu0 %v23010_v41 }
 0x29a   :  { %v2361_v21 = vpop.f32.mrb[42].mxu1  ;;  %v21171_v19 = vpop.f32.mrb[152].mxu0 }
 0x29b   :  { %23032 = vst [vmem:[#allocation35_spill] sm:$0xff] %v21171_v19  ;;  %v2365_v7 = vadd.f32 %v2361_v21, %v2294_v60  ;;  %v16102_v62 = vpop.f32.mrb[43].mxu1  ;;  %v16555_v28 = vpop.f32.mrb[153].mxu0  ;;  %v22980_v21 = vmax.f32 %v21177_v35, 0.0 }
 0x29c   :  { %18851 = vmatpush3.bf16.msra.mxu0 %v20342_v20 }
 0x29d   :  { %18858 = vmatprep.subr.bf16.mxu0 %v23010_v41 }
 0x29f   :  { %17139 = vmatmul.mubr.msk.f32.vlgmr.msra.gmra.mrb[206].mxu0 %vm666_vm1, %v642_v25 }
 0x2a0   :  { %18860 = vmatpush3.bf16.msra.mxu0 %v20395_v12  ;;  %17160 = vmatprep.mubr.msk.f32.mxu0 %vm19478_vm0, %v22998_v39 }
 0x2a1   :  { %18861 = vmatprep.subr.bf16.mxu0 %v23010_v41 }
 0x2a2   :  { %v2435_v60 = vpop.f32.mrb[44].mxu1  ;;  %v21184_v9 = vpop.f32.mrb[154].mxu0 }
 0x2a3   :  { %23033 = vst [vmem:[#allocation36_spill] sm:$0xff] %v21184_v9  ;;  %v2439_v62 = vadd.f32 %v2435_v60, %v2365_v7  ;;  %v16113_v28 = vpop.f32.mrb[45].mxu1  ;;  %v16577_v19 = vpop.f32.mrb[155].mxu0  ;;  %v650_v7 = vmax.f32 %v560_v29, 0.0 }
 0x2a4   :  { %18863 = vmatpush3.bf16.msra.mxu0 %v20415_v36 }
 0x2a5   :  { %18870 = vmatprep.subr.bf16.mxu0 %v23010_v41 }
 0x2a7   :  { %17161 = vmatmul.mubr.msk.f32.vlgmr.msra.gmra.mrb[208].mxu0 %vm666_vm1, %v22980_v21 }
 0x2a8   :  { %18872 = vmatpush3.bf16.msra.mxu0 %v20463_v54  ;;  %17182 = vmatprep.mubr.msk.f32.mxu0 %vm19478_vm0, %v22998_v39 }
 0x2a9   :  { %18873 = vmatprep.subr.bf16.mxu0 %v23010_v41 }
 0x2aa   :  { %v2509_v25 = vpop.f32.mrb[46].mxu1  ;;  %v21198_v19 = vpop.f32.mrb[156].mxu0 }
 0x2ab   :  { %23034 = vst [vmem:[#allocation37_spill] sm:$0xff] %v21198_v19  ;;  %v2513_v60 = vadd.f32 %v2509_v25, %v2439_v62  ;;  %v16124_v28 = vpop.f32.mrb[47].mxu1  ;;  %v16599_v9 = vpop.f32.mrb[157].mxu0 }
 0x2ac   :  { %18875 = vmatpush3.bf16.msra.mxu0 %v20482_v24  ;;  %v22981_v9 = vmax.f32 %v21204_v56, 0.0 }
 0x2ad   :  { %18882 = vmatprep.subr.bf16.mxu0 %v23010_v41 }
 0x2af   :  { %17183 = vmatmul.mubr.msk.f32.vlgmr.msra.gmra.mrb[210].mxu0 %vm666_vm1, %v650_v7 }
 0x2b0   :  { %18884 = vmatpush3.bf16.msra.mxu0 %v20537_v63  ;;  %17204 = vmatprep.mubr.msk.f32.mxu0 %vm19478_vm0, %v22998_v39 }
 0x2b1   :  { %18885 = vmatprep.subr.bf16.mxu0 %v23010_v41 }
 0x2b2   :  { %v2580_v62 = vpop.f32.mrb[48].mxu1  ;;  %v21211_v29 = vpop.f32.mrb[158].mxu0 }
 0x2b3   :  { %23035 = vst [vmem:[#allocation38_spill] sm:$0xff] %v21211_v29  ;;  %v2584_v25 = vadd.f32 %v2580_v62, %v2513_v60  ;;  %v16135_v28 = vpop.f32.mrb[49].mxu1  ;;  %v16621_v21 = vpop.f32.mrb[159].mxu0 }
 0x2b4   :  { %18887 = vmatpush3.bf16.msra.mxu0 %v20557_v51  ;;  %v445_v28 = vadd.f32 %v20827_v55, %v20596_v45 }
 0x2b5   :  { %18900 = vmatprep.subr.bf16.mxu0 %v23010_v41 }
 0x2b7   :  { %17205 = vmatmul.mubr.msk.f32.vlgmr.msra.gmra.mrb[212].mxu0 %vm666_vm1, %v22981_v9 }
 0x2b8   :  { %18902 = vmatpush3.bf16.msra.mxu0 %v19801_v33  ;;  %17234 = vmatprep.mubr.msk.f32.mxu0 %vm19478_vm0, %v22998_v39 }
 0x2b9   :  { %18903 = vmatprep.subr.bf16.mxu0 %v23010_v41 }
 0x2ba   :  { %v2651_v26 = vpop.f32.mrb[50].mxu1  ;;  %v5804_v7 = vpop.f32.mrb[160].mxu0 }
 0x2bb   :  { %v2655_v60 = vadd.f32 %v2651_v26, %v2584_v25  ;;  %v16146_v62 = vpop.f32.mrb[51].mxu1  ;;  %v16651_v21 = vpop.f32.mrb[161].mxu0 }
 0x2bc   :  { %18905 = vmatpush3.bf16.msra.mxu0 %v19817_v38  ;;  %v21233_v62 = vmax.f32 %v445_v28, 0.0 }
 0x2bd   :  { %18906 = vmatprep.subr.bf16.mxu0 %v23010_v41 }
 0x2bf   :  { %17235 = vmatmul.mubr.msk.f32.vlgmr.msra.gmra.mrb[214].mxu0 %vm666_vm1, %v20739_v49 }
 0x2c0   :  { %18908 = vmatpush3.bf16.msra.mxu0 %v20050_v61  ;;  %17245 = vmatprep.mubr.msk.f32.mxu0 %vm19478_vm0, %v22998_v39 }
 0x2c1   :  { %18909 = vmatprep.subr.bf16.mxu0 %v23010_v41 }
 0x2c2   :  { %v2725_v25 = vpop.f32.mrb[52].mxu1  ;;  %v5874_v26 = vpop.f32.mrb[162].mxu0 }
 0x2c3   :  { %v2729_v21 = vadd.f32 %v2725_v25, %v2655_v60  ;;  %v21235_v9 = vadd.f32 %v5874_v26, %v5804_v7  ;;  %v16157_v29 = vpop.f32.mrb[53].mxu1  ;;  %v16662_v19 = vpop.f32.mrb[163].mxu0 }
 0x2c4   :  { %18911 = vmatpush3.bf16.msra.mxu0 %v20066_v6 }
 0x2c5   :  { %18918 = vmatprep.subr.bf16.mxu0 %v23010_v41 }
 0x2c7   :  { %17246 = vmatmul.mubr.msk.f32.vlgmr.msra.gmra.mrb[216].mxu0 %vm666_vm1, %v21233_v62 }
 0x2c8   :  { %18920 = vmatpush3.bf16.msra.mxu0 %v19859_v52  ;;  %17267 = vmatprep.mubr.msk.f32.mxu0 %vm19478_vm0, %v22998_v39 }
 0x2c9   :  { %18921 = vmatprep.subr.bf16.mxu0 %v23010_v41 }
 0x2ca   :  { %v2799_v45 = vpop.f32.mrb[54].mxu1  ;;  %v21245_v49 = vpop.f32.mrb[164].mxu0 }
 0x2cb   :  { %v2803_v7 = vadd.f32 %v2799_v45, %v2729_v21  ;;  %v16168_v29 = vpop.f32.mrb[55].mxu1  ;;  %v16684_v19 = vpop.f32.mrb[165].mxu0 }
 0x2cc   :  { %18923 = vmatpush3.bf16.msra.mxu0 %v19875_v57 }
 0x2cd   :  { %18930 = vmatprep.subr.bf16.mxu0 %v23010_v41 }
 0x2cf   :  { %17268 = vmatmul.mubr.msk.f32.vlgmr.msra.gmra.mrb[218].mxu0 %vm666_vm1, %v20947_v23 }
 0x2d0   :  { %18932 = vmatpush3.bf16.msra.mxu0 %v20193_v1  ;;  %17289 = vmatprep.mubr.msk.f32.mxu0 %vm19478_vm0, %v22998_v39 }
 0x2d1   :  { %18933 = vmatprep.subr.bf16.mxu0 %v23010_v41 }
 0x2d2   :  { %v2870_v60 = vpop.f32.mrb[56].mxu1  ;;  %v21255_v28 = vpop.f32.mrb[166].mxu0 }
 0x2d3   :  { %v2874_v25 = vadd.f32 %v2870_v60, %v2803_v7  ;;  %v16179_v26 = vpop.f32.mrb[57].mxu1  ;;  %v16706_v21 = vpop.f32.mrb[167].mxu0 }
 0x2d4   :  { %18935 = vmatpush3.bf16.msra.mxu0 %v20207_v8 }
 0x2d5   :  { %18942 = vmatprep.subr.bf16.mxu0 %v23010_v41 }
 0x2d7   :  { %17290 = vmatmul.mubr.msk.f32.vlgmr.msra.gmra.mrb[220].mxu0 %vm666_vm1, %v20790_v50 }
 0x2d8   :  { %18944 = vmatpush3.bf16.msra.mxu0 %v20258_v37  ;;  %17311 = vmatprep.mubr.msk.f32.mxu0 %vm19478_vm0, %v22998_v39 }
 0x2d9   :  { %18945 = vmatprep.subr.bf16.mxu0 %v23010_v41 }
 0x2da   :  { %v2941_v45 = vpop.f32.mrb[58].mxu1  ;;  %v21265_v29 = vpop.f32.mrb[168].mxu0 }
 0x2db   :  { %23036 = vst [vmem:[#allocation39_spill] sm:$0xff] %v21265_v29  ;;  %v2945_v7 = vadd.f32 %v2941_v45, %v2874_v25  ;;  %v16190_v19 = vpop.f32.mrb[59].mxu1  ;;  %v16728_v60 = vpop.f32.mrb[169].mxu0  ;;  %v21302_v29 = vld [vmem:[%s22931_s5] ss:$0 sm:$0xff] }
 0x2dc   :  { %18947 = vmatpush3.bf16.msra.mxu0 %v20278_v48  ;;  %v21281_v19 = vadd.f32 %v20827_v55, %v20837_v5  ;;  %v23038_v60 = vmax.f32 %v21177_v35, 0.0  ;;  %v1928_v5 = vld [vmem:[%s22930_s6] sm:$0xff]  ;;  %v1929_v35 = vld [vmem:[%s22930_s6 + $0x8] sm:$0xff] }
 0x2dd   :  { %18954 = vmatprep.subr.bf16.mxu0 %v23010_v41 }
 0x2df   :  { %17312 = vmatmul.mubr.msk.f32.vlgmr.msra.gmra.mrb[222].mxu0 %vm666_vm1, %v20977_v3 }
 0x2e0   :  { %18956 = vmatpush3.bf16.msra.mxu0 %v20323_v10  ;;  %17333 = vmatprep.mubr.msk.f32.mxu0 %vm19478_vm0, %v22998_v39 }
 0x2e1   :  { %18957 = vmatprep.subr.bf16.mxu0 %v23010_v41 }
 0x2e2   :  { %v3015_v50 = vpop.f32.mrb[60].mxu1  ;;  %v21275_v26 = vpop.f32.mrb[170].mxu0 }
 0x2e3   :  { %23037 = vst [vmem:[#allocation40_spill] sm:$0xff] %v21275_v26  ;;  %v3019_v25 = vadd.f32 %v3015_v50, %v2945_v7  ;;  %v16201_v21 = vpop.f32.mrb[61].mxu1  ;;  %v16750_v45 = vpop.f32.mrb[171].mxu0 }
 0x2e4   :  { %18959 = vmatpush3.bf16.msra.mxu0 %v20342_v20 }
 0x2e5   :  { %18966 = vmatprep.subr.bf16.mxu0 %v23010_v41 }
 0x2e7   :  { %17334 = vmatmul.mubr.msk.f32.vlgmr.msra.gmra.mrb[224].mxu0 %vm666_vm1, %v23038_v60 }
 0x2e8   :  { %18968 = vmatpush3.bf16.msra.mxu0 %v20395_v12  ;;  %17355 = vmatprep.mubr.msk.f32.mxu0 %vm19478_vm0, %v22998_v39 }
 0x2e9   :  { %18969 = vmatprep.subr.bf16.mxu0 %v23010_v41 }
 0x2ea   :  { %v3089_v7 = vpop.f32.mrb[62].mxu1  ;;  %v21290_v50 = vpop.f32.mrb[172].mxu0 }
 0x2eb   :  { %23039 = vst [vmem:[#allocation41_spill] sm:$0xff] %v21290_v50  ;;  %v3093_v45 = vadd.f32 %v3089_v7, %v3019_v25  ;;  %v16212_v26 = vpop.f32.mrb[63].mxu1  ;;  %v16772_v60 = vpop.f32.mrb[173].mxu0  ;;  %v1930_v7 = vld [vmem:[%s22930_s6 + $0x10] sm:$0xff]  ;;  %v23040_v50 = vmax.f32 %v21281_v19, 0.0 }
 0x2ec   :  { %18971 = vmatpush3.bf16.msra.mxu0 %v20415_v36  ;;  %v18349_v26 = vpack.c.bf16 %v1929_v35, %v1928_v5  ;;  %v1931_v60 = vld [vmem:[%s22930_s6 + $0x18] sm:$0xff]  ;;  %v1933_v5 = vld [vmem:[%s22930_s6 + $0x28] sm:$0xff] }
 0x2ed   :  { %v3094_v21 = vadd.f32 %v21302_v29, %v3093_v45  ;;  %18978 = vmatprep.subr.bf16.mxu0 %v23010_v41 }
 0x2ef   :  { %v3095_v25 = vmax.f32 %v3094_v21, 0.0  ;;  %17356 = vmatmul.mubr.msk.f32.vlgmr.msra.gmra.mrb[226].mxu0 %vm666_vm1, %v23040_v50  ;;  %v18352_v21 = vpack.c.bf16 %v1931_v60, %v1930_v7  ;;  %v1932_v50 = vld [vmem:[%s22930_s6 + $0x20] sm:$0xff]  ;;  %v1934_v7 = vld [vmem:[%s22930_s6 + $0x30] sm:$0xff]  ;;  %v1935_v60 = vld [vmem:[%s22930_s6 + $0x38] sm:$0xff] }
 0x2f0   :  { %18980 = vmatpush3.bf16.msra.mxu0 %v20463_v54  ;;  %17377 = vmatprep.mubr.msk.f32.mxu0 %vm19478_vm0, %v22998_v39 }
 0x2f1   :  { %16230 = vmatmul.mubr.msk.f32.vlgmr.msra.gmra.mrb[64].mxu1 %vm3105_vm2, %v3095_v25  ;;  %18981 = vmatprep.subr.bf16.mxu0 %v23010_v41  ;;  %v21336_v25 = vadd.f32 %v20827_v55, %v20921_v17  ;;  %v18358_v17 = vpack.c.bf16 %v1935_v60, %v1934_v7  ;;  %v455_v7 = vadd.f32 %v20827_v55, %v20618_v46 }
 0x2f2   :  { %18350 = vmatpush3.bf16.msra.mxu1 %v18349_v26  ;;  %v21321_v45 = vpop.f32.mrb[174].mxu0  ;;  %16248 = vmatprep.mubr.msk.f32.mxu1 %vm19478_vm0, %v22998_v39  ;;  %v18355_v26 = vpack.c.bf16 %v1933_v5, %v1932_v50  ;;  %v1926_v5 = vadd.f32 %v21302_v29, %v21101_v32 }
 0x2f3   :  { %18351 = vmatprep.subr.bf16.mxu1 %v23010_v41  ;;  %v16794_v35 = vpop.f32.mrb[175].mxu0  ;;  %v654_v50 = vmax.f32 %v21336_v25, 0.0  ;;  %v21391_v46 = vmax.f32 %v455_v7, 0.0  ;;  %v14587_v7 = vld [vmem:[%s22930_s6 + $0x88] sm:$0xff] }
 0x2f4   :  { %18983 = vmatpush3.bf16.msra.mxu0 %v20482_v24  ;;  %v23041_v35 = vmax.f32 %v21204_v56, 0.0 }
 0x2f5   :  { %18990 = vmatprep.subr.bf16.mxu0 %v23010_v41 }
 0x2f6   :  { %18353 = vmatpush3.bf16.msra.mxu1 %v18352_v21 }
 0x2f7   :  { %18354 = vmatprep.subr.bf16.mxu1 %v23010_v41  ;;  %17378 = vmatmul.mubr.msk.f32.vlgmr.msra.gmra.mrb[228].mxu0 %vm666_vm1, %v23041_v35  ;;  %v1927_v35 = vmax.f32 %v1926_v5, 0.0 }
 0x2f8   :  { %18992 = vmatpush3.bf16.msra.mxu0 %v20537_v63  ;;  %17399 = vmatprep.mubr.msk.f32.mxu0 %vm19478_vm0, %v22998_v39 }
 0x2f9   :  { %18993 = vmatprep.subr.bf16.mxu0 %v23010_v41 }
 0x2fa   :  { %18356 = vmatpush3.bf16.msra.mxu1 %v18355_v26  ;;  %v21352_v21 = vpop.f32.mrb[176].mxu0 }
 0x2fb   :  { %18357 = vmatprep.subr.bf16.mxu1 %v23010_v41  ;;  %v16816_v56 = vpop.f32.mrb[177].mxu0 }
 0x2fc   :  { %18995 = vmatpush3.bf16.msra.mxu0 %v20557_v51  ;;  %v23053_v56 = vld [vmem:[#allocation8_spill] sm:$0xff] }
 0x2fd   :  { %19008 = vmatprep.subr.bf16.mxu0 %v23010_v41 }
 0x2fe   :  { %18359 = vmatpush3.bf16.msra.mxu1 %v18358_v17  ;;  %v23044_v17 = vmax.f32 %v21039_v13, 0.0  ;;  %v23046_v13 = vmax.f32 %v20729_v0, 0.0 }
 0x2ff   :  { %18360 = vmatprep.subr.bf16.mxu1 %v23010_v41  ;;  %17400 = vmatmul.mubr.msk.f32.vlgmr.msra.gmra.mrb[230].mxu0 %vm666_vm1, %v654_v50 }
 0x300   :  { %19010 = vmatpush3.bf16.msra.mxu0 %v19801_v33  ;;  %17429 = vmatprep.mubr.msk.f32.mxu0 %vm19478_vm0, %v22998_v39 }
 0x301   :  { %16249 = vmatmul.mubr.msk.f32.vlgmr.msra.gmra.mrb[66].mxu1 %vm3105_vm2, %v1927_v35  ;;  %19011 = vmatprep.subr.bf16.mxu0 %v23010_v41 }
 0x302   :  { %18362 = vmatpush3.bf16.msra.mxu1 %v19801_v33  ;;  %v7035_v32 = vpop.f32.mrb[178].mxu0  ;;  %16259 = vmatprep.mubr.msk.f32.mxu1 %vm19478_vm0, %v22998_v39  ;;  %v23042_v33 = vmax.f32 %v20656_v4, 0.0 }
 0x303   :  { %v16846_v26 = vpop.f32.mrb[179].mxu0  ;;  %18363 = vmatprep.subr.bf16.mxu1 %v23010_v41 }
 0x304   :  { %19013 = vmatpush3.bf16.msra.mxu0 %v19817_v38 }
 0x305   :  { %19014 = vmatprep.subr.bf16.mxu0 %v23010_v41 }
 0x306   :  { %18365 = vmatpush3.bf16.msra.mxu1 %v19817_v38 }
 0x307   :  { %18366 = vmatprep.subr.bf16.mxu1 %v23010_v41  ;;  %17430 = vmatmul.mubr.msk.f32.vlgmr.msra.gmra.mrb[232].mxu0 %vm666_vm1, %v20947_v23 }
 0x308   :  { %19016 = vmatpush3.bf16.msra.mxu0 %v20050_v61  ;;  %17440 = vmatprep.mubr.msk.f32.mxu0 %vm19478_vm0, %v22998_v39 }
 0x309   :  { %16260 = vmatmul.mubr.msk.f32.vlgmr.msra.gmra.mrb[68].mxu1 %vm666_vm1, %v23042_v33  ;;  %19017 = vmatprep.subr.bf16.mxu0 %v23010_v41 }
 0x30a   :  { %18368 = vmatpush3.bf16.msra.mxu1 %v20050_v61  ;;  %v7105_v38 = vpop.f32.mrb[180].mxu0  ;;  %16270 = vmatprep.mubr.msk.f32.mxu1 %vm19478_vm0, %v22998_v39  ;;  %v23043_v61 = vmax.f32 %v20630_v31, 0.0 }
 0x30b   :  { %v21393_v55 = vadd.f32 %v7105_v38, %v7035_v32  ;;  %v16857_v23 = vpop.f32.mrb[181].mxu0  ;;  %18369 = vmatprep.subr.bf16.mxu1 %v23010_v41  ;;  %v14588_v38 = vld [vmem:[%s22930_s6 + $0x90] sm:$0xff] }
 0x30c   :  { %19019 = vmatpush3.bf16.msra.mxu0 %v20066_v6  ;;  %v14589_v23 = vld [vmem:[%s22930_s6 + $0x98] sm:$0xff] }
 0x30d   :  { %19026 = vmatprep.subr.bf16.mxu0 %v23010_v41 }
 0x30e   :  { %18371 = vmatpush3.bf16.msra.mxu1 %v20066_v6 }
 0x30f   :  { %18372 = vmatprep.subr.bf16.mxu1 %v23010_v41  ;;  %17441 = vmatmul.mubr.msk.f32.vlgmr.msra.gmra.mrb[234].mxu0 %vm666_vm1, %v21391_v46 }
 0x310   :  { %19028 = vmatpush3.bf16.msra.mxu0 %v19859_v52  ;;  %17462 = vmatprep.mubr.msk.f32.mxu0 %vm19478_vm0, %v22998_v39  ;;  %v21417_v52 = vld [vmem:[%s22929_s3] ss:$0 sm:$0xff] }
 0x311   :  { %16271 = vmatmul.mubr.msk.f32.vlgmr.msra.gmra.mrb[70].mxu1 %vm666_vm1, %v23043_v61  ;;  %19029 = vmatprep.subr.bf16.mxu0 %v23010_v41  ;;  %v305_v6 = vadd.f32 %v21417_v52, %v20126_v30  ;;  %v18460_v61 = vpack.c.bf16 %v14589_v23, %v14588_v38 }
 0x312   :  { %18374 = vmatpush3.bf16.msra.mxu1 %v20085_v14  ;;  %v21410_v4 = vpop.f32.mrb[182].mxu0  ;;  %16281 = vmatprep.mubr.msk.f32.mxu1 %vm19478_vm0, %v22998_v39 }
 0x313   :  { %v16879_v31 = vpop.f32.mrb[183].mxu0  ;;  %18375 = vmatprep.subr.bf16.mxu1 %v23010_v41  ;;  %v599_v60 = vmax.f32 %v305_v6, 0.0  ;;  %v14590_v6 = vld [vmem:[%s22930_s6 + $0xa0] sm:$0xff] }
 0x314   :  { %19031 = vmatpush3.bf16.msra.mxu0 %v19875_v57  ;;  %v14591_v31 = vld [vmem:[%s22930_s6 + $0xa8] sm:$0xff] }
 0x315   :  { %19038 = vmatprep.subr.bf16.mxu0 %v23010_v41 }
 0x316   :  { %18377 = vmatpush3.bf16.msra.mxu1 %v20104_v22 }
 0x317   :  { %18384 = vmatprep.subr.bf16.mxu1 %v23010_v41  ;;  %17463 = vmatmul.mubr.msk.f32.vlgmr.msra.gmra.mrb[236].mxu0 %vm666_vm1, %v23044_v17 }
 0x318   :  { %19040 = vmatpush3.bf16.msra.mxu0 %v20193_v1  ;;  %17484 = vmatprep.mubr.msk.f32.mxu0 %vm19478_vm0, %v22998_v39  ;;  %v23045_v1 = vld [vmem:[#allocation2_spill] sm:$0xff] }
 0x319   :  { %16282 = vmatmul.mubr.msk.f32.vlgmr.msra.gmra.mrb[72].mxu1 %vm666_vm1, %v599_v60  ;;  %19041 = vmatprep.subr.bf16.mxu0 %v23010_v41  ;;  %v18463_v60 = vpack.c.bf16 %v14591_v31, %v14590_v6 }
 0x31a   :  { %18386 = vmatpush3.bf16.msra.mxu1 %v20154_v43  ;;  %v21435_v57 = vpop.f32.mrb[184].mxu0  ;;  %16303 = vmatprep.mubr.msk.f32.mxu1 %vm19478_vm0, %v22998_v39 }
 0x31b   :  { %v16901_v30 = vpop.f32.mrb[185].mxu0  ;;  %18387 = vmatprep.subr.bf16.mxu1 %v23010_v41 }
 0x31c   :  { %19043 = vmatpush3.bf16.msra.mxu0 %v20207_v8  ;;  %v23047_v8 = vld [vmem:[#allocation4_spill] sm:$0xff] }
 0x31d   :  { %19050 = vmatprep.subr.bf16.mxu0 %v23010_v41  ;;  %v345_v5 = vadd.f32 %v21417_v52, %v23047_v8  ;;  %v14593_v8 = vld [vmem:[%s22930_s6 + $0xb8] sm:$0xff] }
 0x31e   :  { %18389 = vmatpush3.bf16.msra.mxu1 %v23045_v1 }
 0x31f   :  { %18396 = vmatprep.subr.bf16.mxu1 %v23010_v41  ;;  %17485 = vmatmul.mubr.msk.f32.vlgmr.msra.gmra.mrb[238].mxu0 %vm666_vm1, %v20977_v3  ;;  %v607_v0 = vmax.f32 %v345_v5, 0.0  ;;  %v23049_v3 = vmax.f32 %v21083_v40, 0.0  ;;  %v23051_v40 = vmax.f32 %v21281_v19, 0.0  ;;  %v21495_v19 = vadd.f32 %v21417_v52, %v23053_v56 }
 0x320   :  { %19052 = vmatpush3.bf16.msra.mxu0 %v20258_v37  ;;  %17506 = vmatprep.mubr.msk.f32.mxu0 %vm19478_vm0, %v22998_v39  ;;  %v23048_v37 = vld [vmem:[#allocation3_spill] sm:$0xff] }
 0x321   :  { %16304 = vmatmul.mubr.msk.f32.vlgmr.msra.gmra.mrb[74].mxu1 %vm666_vm1, %v23046_v13  ;;  %19053 = vmatprep.subr.bf16.mxu0 %v23010_v41  ;;  %v22983_v32 = vmax.f32 %v21495_v19, 0.0  ;;  %v14592_v13 = vld [vmem:[%s22930_s6 + $0xb0] sm:$0xff] }
 0x322   :  { %18398 = vmatpush3.bf16.msra.mxu1 %v20221_v16  ;;  %16325 = vmatprep.mubr.msk.f32.mxu1 %vm19478_vm0, %v22998_v39  ;;  %v21571_v17 = vpop.f32.mrb[186].mxu0  ;;  %v18466_v5 = vpack.c.bf16 %v14593_v8, %v14592_v13 }
 0x323   :  { %18399 = vmatprep.subr.bf16.mxu1 %v23010_v41  ;;  %v16923_v30 = vpop.f32.mrb[187].mxu0 }
 0x324   :  { %19055 = vmatpush3.bf16.msra.mxu0 %v20278_v48  ;;  %v23050_v48 = vld [vmem:[#allocation24_spill] sm:$0xff] }
 0x325   :  { %19062 = vmatprep.subr.bf16.mxu0 %v23010_v41 }
 0x326   :  { %18401 = vmatpush3.bf16.msra.mxu1 %v23048_v37 }
 0x327   :  { %18408 = vmatprep.subr.bf16.mxu1 %v23010_v41  ;;  %17507 = vmatmul.mubr.msk.f32.vlgmr.msra.gmra.mrb[240].mxu0 %vm666_vm1, %v23049_v3 }
 0x328   :  { %19064 = vmatpush3.bf16.msra.mxu0 %v20323_v10  ;;  %17528 = vmatprep.mubr.msk.f32.mxu0 %vm19478_vm0, %v22998_v39  ;;  %v550_v10 = vadd.f32 %v21417_v52, %v23050_v48 }
 0x329   :  { %16326 = vmatmul.mubr.msk.f32.vlgmr.msra.gmra.mrb[76].mxu1 %vm666_vm1, %v607_v0  ;;  %19065 = vmatprep.subr.bf16.mxu0 %v23010_v41 }
 0x32a   :  { %18410 = vmatpush3.bf16.msra.mxu1 %v20298_v59  ;;  %16347 = vmatprep.mubr.msk.f32.mxu1 %vm19478_vm0, %v22998_v39  ;;  %v648_v35 = vmax.f32 %v550_v10, 0.0  ;;  %v21581_v0 = vpop.f32.mrb[188].mxu0 }
 0x32b   :  { %18411 = vmatprep.subr.bf16.mxu1 %v23010_v41  ;;  %v16945_v3 = vpop.f32.mrb[189].mxu0 }
 0x32c   :  { %19067 = vmatpush3.bf16.msra.mxu0 %v20342_v20  ;;  %v23052_v20 = vld [vmem:[#allocation5_spill] sm:$0xff] }
 0x32d   :  { %19074 = vmatprep.subr.bf16.mxu0 %v23010_v41 }
 0x32e   :  { %18413 = vmatpush3.bf16.msra.mxu1 %v20326_v11 }
 0x32f   :  { %18420 = vmatprep.subr.bf16.mxu1 %v23010_v41  ;;  %17529 = vmatmul.mubr.msk.f32.vlgmr.msra.gmra.mrb[242].mxu0 %vm666_vm1, %v23051_v40 }
 0x330   :  { %19076 = vmatpush3.bf16.msra.mxu0 %v20395_v12  ;;  %17550 = vmatprep.mubr.msk.f32.mxu0 %vm19478_vm0, %v22998_v39  ;;  %v23054_v12 = vld [vmem:[#allocation6_spill] sm:$0xff] }
 0x331   :  { %16348 = vmatmul.mubr.msk.f32.vlgmr.msra.gmra.mrb[78].mxu1 %vm666_vm1, %v20841_v27  ;;  %19077 = vmatprep.subr.bf16.mxu0 %v23010_v41 }
 0x332   :  { %18422 = vmatpush3.bf16.msra.mxu1 %v23052_v20  ;;  %16369 = vmatprep.mubr.msk.f32.mxu1 %vm19478_vm0, %v22998_v39  ;;  %v21583_v48 = vpop.f32.mrb[190].mxu0 }
 0x333   :  { %18423 = vmatprep.subr.bf16.mxu1 %v23010_v41  ;;  %v16967_v10 = vpop.f32.mrb[191].mxu0 }
 0x334   :  { %19079 = vmatpush3.bf16.msra.mxu0 %v20415_v36  ;;  %v23055_v36 = vld [vmem:[#allocation9_spill] sm:$0xff] }
 0x335   :  { %19086 = vmatprep.subr.bf16.mxu0 %v23010_v41 }
 0x336   :  { %18425 = vmatpush3.bf16.msra.mxu1 %v23054_v12 }
 0x337   :  { %18432 = vmatprep.subr.bf16.mxu1 %v23010_v41  ;;  %17551 = vmatmul.mubr.msk.f32.vlgmr.msra.gmra.mrb[244].mxu0 %vm666_vm1, %v648_v35 }
 0x338   :  { %19088 = vmatpush3.bf16.msra.mxu0 %v20463_v54  ;;  %17572 = vmatprep.mubr.msk.f32.mxu0 %vm19478_vm0, %v22998_v39  ;;  %v590_v54 = vadd.f32 %v21417_v52, %v20941_v47  ;;  %v23057_v47 = vld [vmem:[#allocation14_spill] sm:$0xff] }
 0x339   :  { %16370 = vmatmul.mubr.msk.f32.vlgmr.msra.gmra.mrb[80].mxu1 %vm666_vm1, %v22983_v32  ;;  %19089 = vmatprep.subr.bf16.mxu0 %v23010_v41  ;;  %v21535_v25 = vadd.f32 %v21417_v52, %v23057_v47 }
 0x33a   :  { %18434 = vmatpush3.bf16.msra.mxu1 %v23055_v36  ;;  %16391 = vmatprep.mubr.msk.f32.mxu1 %vm19478_vm0, %v22998_v39  ;;  %v21585_v40 = vpop.f32.mrb[192].mxu0 }
 0x33b   :  { %18435 = vmatprep.subr.bf16.mxu1 %v23010_v41  ;;  %v22982_v26 = vmax.f32 %v21535_v25, 0.0  ;;  %v16989_v56 = vpop.f32.mrb[193].mxu0 }
 0x33c   :  { %19091 = vmatpush3.bf16.msra.mxu0 %v20482_v24  ;;  %v23056_v24 = vld [vmem:[#allocation11_spill] sm:$0xff] }
 0x33d   :  { %19098 = vmatprep.subr.bf16.mxu0 %v23010_v41 }
 0x33e   :  { %18437 = vmatpush3.bf16.msra.mxu1 %v20466_v58 }
 0x33f   :  { %18444 = vmatprep.subr.bf16.mxu1 %v23010_v41  ;;  %17573 = vmatmul.mubr.msk.f32.vlgmr.msra.gmra.mrb[246].mxu0 %vm666_vm1, %v654_v50  ;;  %v656_v50 = vmax.f32 %v590_v54, 0.0 }
 0x340   :  { %19100 = vmatpush3.bf16.msra.mxu0 %v20537_v63  ;;  %17594 = vmatprep.mubr.msk.f32.mxu0 %vm19478_vm0, %v22998_v39  ;;  %v23058_v63 = vld [vmem:[#allocation12_spill] sm:$0xff] }
 0x341   :  { %16392 = vmatmul.mubr.msk.f32.vlgmr.msra.gmra.mrb[82].mxu1 %vm666_vm1, %v20923_v18  ;;  %19101 = vmatprep.subr.bf16.mxu0 %v23010_v41 }
 0x342   :  { %18446 = vmatpush3.bf16.msra.mxu1 %v23056_v24  ;;  %16413 = vmatprep.mubr.msk.f32.mxu1 %vm19478_vm0, %v22998_v39  ;;  %v21587_v35 = vpop.f32.mrb[194].mxu0 }
 0x343   :  { %18447 = vmatprep.subr.bf16.mxu1 %v23010_v41  ;;  %v17011_v54 = vpop.f32.mrb[195].mxu0 }
 0x344   :  { %19103 = vmatpush3.bf16.msra.mxu0 %v20557_v51  ;;  %v14586_v51 = vld [vmem:[%s22930_s6 + $0x80] sm:$0xff] }
 0x345   :  { %19116 = vmatprep.subr.bf16.mxu0 %v23010_v41  ;;  %v18457_v33 = vpack.c.bf16 %v14587_v7, %v14586_v51 }
 0x346   :  { %18449 = vmatpush3.bf16.msra.mxu1 %v23058_v63 }
 0x347   :  { %17595 = vmatmul.mubr.msk.f32.vlgmr.msra.gmra.mrb[248].mxu0 %vm666_vm1, %v656_v50  ;;  %18456 = vmatprep.subr.bf16.mxu1 %v23010_v41 }
 0x348   :  { %17632 = vmatprep.mubr.msk.f32.mxu0 %vm19478_vm0, %v22998_v39 }
 0x349   :  { %16414 = vmatmul.mubr.msk.f32.vlgmr.msra.gmra.mrb[84].mxu1 %vm666_vm1, %v22982_v26 }
 0x34a   :  { %16443 = vmatprep.mubr.msk.f32.mxu1 %vm19478_vm0, %v22998_v39  ;;  %18458 = vmatpush3.bf16.msra.mxu1 %v18457_v33  ;;  %v8266_v47 = vpop.f32.mrb[196].mxu0 }
 0x34b   :  { %18459 = vmatprep.subr.bf16.mxu1 %v23010_v41  ;;  %v17041_v50 = vpop.f32.mrb[197].mxu0 }
 0x34e   :  { %18461 = vmatpush3.bf16.msra.mxu1 %v18460_v61 }
 0x34f   :  { %18462 = vmatprep.subr.bf16.mxu1 %v23010_v41 }
 0x352   :  { %18464 = vmatpush3.bf16.msra.mxu1 %v18463_v60  ;;  %v8336_v51 = vpop.f32.mrb[198].mxu0 }
 0x353   :  { %18465 = vmatprep.subr.bf16.mxu1 %v23010_v41  ;;  %v21589_v7 = vadd.f32 %v8336_v51, %v8266_v47  ;;  %v17052_v33 = vpop.f32.mrb[199].mxu0 }
 0x355   :  { %23059 = vst [vmem:[#allocation2_spill] sm:$0xff] %v21589_v7 }
 0x356   :  { %18467 = vmatpush3.bf16.msra.mxu1 %v18466_v5 }
 0x357   :  { %18480 = vmatprep.subr.bf16.mxu1 %v23010_v41 }
 0x35a   :  { %v21591_v38 = vpop.f32.mrb[200].mxu0 }
 0x35b   :  { %23060 = vst [vmem:[#allocation4_spill] sm:$0xff] %v21591_v38  ;;  %v17074_v23 = vpop.f32.mrb[201].mxu0 }
 0x362   :  { %v21593_v61 = vpop.f32.mrb[202].mxu0 }
 0x363   :  { %23061 = vst [vmem:[#allocation3_spill] sm:$0xff] %v21593_v61  ;;  %v17096_v6 = vpop.f32.mrb[203].mxu0 }
 0x36a   :  { %v21595_v31 = vpop.f32.mrb[204].mxu0 }
 0x36b   :  { %23062 = vst [vmem:[#allocation24_spill] sm:$0xff] %v21595_v31  ;;  %v17118_v60 = vpop.f32.mrb[205].mxu0 }
 0x372   :  { %v21597_v30 = vpop.f32.mrb[206].mxu0 }
 0x373   :  { %23063 = vst [vmem:[#allocation5_spill] sm:$0xff] %v21597_v30  ;;  %v17140_v13 = vpop.f32.mrb[207].mxu0 }
 0x37a   :  { %v21599_v8 = vpop.f32.mrb[208].mxu0 }
 0x37b   :  { %23064 = vst [vmem:[#allocation8_spill] sm:$0xff] %v21599_v8  ;;  %v17162_v5 = vpop.f32.mrb[209].mxu0 }
 0x382   :  { %v21601_v3 = vpop.f32.mrb[210].mxu0 }
 0x383   :  { %23065 = vst [vmem:[#allocation6_spill] sm:$0xff] %v21601_v3  ;;  %v17184_v10 = vpop.f32.mrb[211].mxu0 }
 0x38a   :  { %v21603_v56 = vpop.f32.mrb[212].mxu0 }
 0x38b   :  { %23066 = vst [vmem:[#allocation9_spill] sm:$0xff] %v21603_v56  ;;  %v17206_v54 = vpop.f32.mrb[213].mxu0 }
 0x392   :  { %v9509_v47 = vpop.f32.mrb[214].mxu0 }
 0x393   :  { %v17236_v51 = vpop.f32.mrb[215].mxu0 }
 0x39a   :  { %v9579_v23 = vpop.f32.mrb[216].mxu0 }
 0x39b   :  { %v21605_v6 = vadd.f32 %v9579_v23, %v9509_v47  ;;  %v17247_v60 = vpop.f32.mrb[217].mxu0 }
 0x39d   :  { %23067 = vst [vmem:[#allocation11_spill] sm:$0xff] %v21605_v6 }
 0x3a2   :  { %v21607_v26 = vpop.f32.mrb[218].mxu0 }
 0x3a3   :  { %23068 = vst [vmem:[#allocation14_spill] sm:$0xff] %v21607_v26  ;;  %v17269_v13 = vpop.f32.mrb[219].mxu0 }
 0x3aa   :  { %v21609_v32 = vpop.f32.mrb[220].mxu0 }
 0x3ab   :  { %23069 = vst [vmem:[#allocation12_spill] sm:$0xff] %v21609_v32  ;;  %v17291_v5 = vpop.f32.mrb[221].mxu0 }
 0x3b2   :  { %v21611_v8 = vpop.f32.mrb[222].mxu0 }
 0x3b3   :  { %23070 = vst [vmem:[#allocation42_spill] sm:$0xff] %v21611_v8  ;;  %v17313_v10 = vpop.f32.mrb[223].mxu0 }
 0x3ba   :  { %v21613_v3 = vpop.f32.mrb[224].mxu0 }
 0x3bb   :  { %23071 = vst [vmem:[#allocation43_spill] sm:$0xff] %v21613_v3  ;;  %v17335_v54 = vpop.f32.mrb[225].mxu0 }
 0x3c2   :  { %v21615_v56 = vpop.f32.mrb[226].mxu0 }
 0x3c3   :  { %23072 = vst [vmem:[#allocation44_spill] sm:$0xff] %v21615_v56  ;;  %v17357_v51 = vpop.f32.mrb[227].mxu0 }
 0x3c4   :  { %v3175_v50 = vpop.f32.mrb[64].mxu1 }
 0x3c5   :  { %v16231_v33 = vpop.f32.mrb[65].mxu1 }
 0x3ca   :  { %v21617_v33 = vpop.f32.mrb[228].mxu0 }
 0x3cb   :  { %23073 = vst [vmem:[#allocation45_spill] sm:$0xff] %v21617_v33  ;;  %v17379_v47 = vpop.f32.mrb[229].mxu0 }
 0x3d2   :  { %v21619_v23 = vpop.f32.mrb[230].mxu0 }
 0x3d3   :  { %23074 = vst [vmem:[#allocation46_spill] sm:$0xff] %v21619_v23  ;;  %v17401_v26 = vpop.f32.mrb[231].mxu0 }
 0x3d4   :  { %v3248_v60 = vpop.f32.mrb[66].mxu1 }
 0x3d5   :  { %v21621_v13 = vadd.f32 %v3248_v60, %v3175_v50  ;;  %v16250_v32 = vpop.f32.mrb[67].mxu1  ;;  %v23077_v50 = vld [vmem:[#allocation29_spill] sm:$0xff] }
 0x3da   :  { %v10740_v5 = vpop.f32.mrb[232].mxu0 }
 0x3db   :  { %v17431_v6 = vpop.f32.mrb[233].mxu0 }
 0x3dc   :  { %v3318_v8 = vpop.f32.mrb[68].mxu1 }
 0x3dd   :  { %v16261_v10 = vpop.f32.mrb[69].mxu1 }
 0x3e2   :  { %v10810_v30 = vpop.f32.mrb[234].mxu0 }
 0x3e3   :  { %v21623_v3 = vadd.f32 %v10810_v30, %v10740_v5  ;;  %v17442_v54 = vpop.f32.mrb[235].mxu0  ;;  %v23078_v30 = vld [vmem:[#allocation30_spill] sm:$0xff] }
 0x3e4   :  { %v3388_v56 = vpop.f32.mrb[70].mxu1 }
 0x3e5   :  { %23075 = vst [vmem:[#allocation47_spill] sm:$0xff] %v21623_v3  ;;  %v3389_v51 = vadd.f32 %v3388_v56, %v3318_v8  ;;  %v16272_v31 = vpop.f32.mrb[71].mxu1 }
 0x3ea   :  { %v21625_v33 = vpop.f32.mrb[236].mxu0 }
 0x3eb   :  { %23076 = vst [vmem:[#allocation48_spill] sm:$0xff] %v21625_v33  ;;  %v17464_v47 = vpop.f32.mrb[237].mxu0 }
 0x3ec   :  { %v3461_v23 = vpop.f32.mrb[72].mxu1  ;;  %v23080_v47 = vld [vmem:[#allocation31_spill] sm:$0xff] }
 0x3ed   :  { %v3465_v61 = vadd.f32 %v3461_v23, %v3389_v51  ;;  %v16283_v26 = vpop.f32.mrb[73].mxu1 }
 0x3ef   :  { %v3539_v60 = vadd.f32 %v23077_v50, %v3465_v61 }
 0x3f2   :  { %v21628_v32 = vpop.f32.mrb[238].mxu0 }
 0x3f3   :  { %v17486_v6 = vpop.f32.mrb[239].mxu0 }
 0x3f4   :  { %v3606_v38 = vpop.f32.mrb[74].mxu1 }
 0x3f5   :  { %v3610_v10 = vadd.f32 %v3606_v38, %v3539_v60  ;;  %v16305_v7 = vpop.f32.mrb[75].mxu1 }
 0x3f7   :  { %v3681_v5 = vadd.f32 %v23078_v30, %v3610_v10 }
 0x3fa   :  { %v21631_v54 = vpop.f32.mrb[240].mxu0 }
 0x3fb   :  { %23079 = vst [vmem:[#allocation29_spill] sm:$0xff] %v21631_v54  ;;  %v17508_v8 = vpop.f32.mrb[241].mxu0 }
 0x3fc   :  { %v3751_v31 = vpop.f32.mrb[76].mxu1  ;;  %v23083_v8 = vld [vmem:[#allocation32_spill] sm:$0xff] }
 0x3fd   :  { %v3755_v56 = vadd.f32 %v3751_v31, %v3681_v5  ;;  %v16327_v33 = vpop.f32.mrb[77].mxu1 }
 0x3ff   :  { %v3829_v3 = vadd.f32 %v23080_v47, %v3755_v56 }
 0x402   :  { %v21634_v23 = vpop.f32.mrb[242].mxu0 }
 0x403   :  { %23081 = vst [vmem:[#allocation30_spill] sm:$0xff] %v21634_v23  ;;  %v17530_v51 = vpop.f32.mrb[243].mxu0 }
 0x404   :  { %v3896_v61 = vpop.f32.mrb[78].mxu1  ;;  %v23085_v51 = vld [vmem:[#allocation33_spill] sm:$0xff] }
 0x405   :  { %v3900_v26 = vadd.f32 %v3896_v61, %v3829_v3  ;;  %v16349_v50 = vpop.f32.mrb[79].mxu1 }
 0x407   :  { %v3971_v6 = vadd.f32 %v21014_v34, %v3900_v26 }
 0x40a   :  { %v21637_v38 = vpop.f32.mrb[244].mxu0 }
 0x40b   :  { %23082 = vst [vmem:[#allocation31_spill] sm:$0xff] %v21637_v38  ;;  %v17552_v7 = vpop.f32.mrb[245].mxu0 }
 0x40c   :  { %v4041_v60 = vpop.f32.mrb[80].mxu1  ;;  %v23087_v7 = vld [vmem:[#allocation34_spill] sm:$0xff] }
 0x40d   :  { %v4045_v10 = vadd.f32 %v4041_v60, %v3971_v6  ;;  %v16371_v30 = vpop.f32.mrb[81].mxu1 }
 0x40e   :  { %v23092_v30 = vmax.f32 %v21117_v42, 0.0  ;;  %v23093_v42 = vld [vmem:[#allocation16_spill] sm:$0xff] }
 0x40f   :  { %v4119_v54 = vadd.f32 %v23083_v8, %v4045_v10  ;;  %v23091_v10 = vld [vmem:[#allocation13_spill] sm:$0xff]  ;;  %v21695_v8 = vadd.f32 %v21417_v52, %v23093_v42 }
 0x412   :  { %v21640_v5 = vpop.f32.mrb[246].mxu0 }
 0x413   :  { %23084 = vst [vmem:[#allocation32_spill] sm:$0xff] %v21640_v5  ;;  %v17574_v33 = vpop.f32.mrb[247].mxu0 }
 0x414   :  { %v4186_v31 = vpop.f32.mrb[82].mxu1  ;;  %v22984_v33 = vmax.f32 %v21695_v8, 0.0 }
 0x415   :  { %v4190_v56 = vadd.f32 %v4186_v31, %v4119_v54  ;;  %v16393_v47 = vpop.f32.mrb[83].mxu1  ;;  %v23088_v54 = vld [vmem:[#allocation7_spill] sm:$0xff]  ;;  %v23094_v31 = vld [vmem:[#allocation17_spill] sm:$0xff] }
 0x417   :  { %v4261_v23 = vadd.f32 %v23085_v51, %v4190_v56  ;;  %v485_v56 = vadd.f32 %v21417_v52, %v23094_v31  ;;  %v14611_v51 = vld [vmem:[%s22930_s6 + $0xc0] sm:$0xff] }
 0x419   :  { %v21711_v47 = vmax.f32 %v485_v56, 0.0 }
 0x41a   :  { %v21643_v3 = vpop.f32.mrb[248].mxu0 }
 0x41b   :  { %23086 = vst [vmem:[#allocation33_spill] sm:$0xff] %v21643_v3  ;;  %v17596_v61 = vpop.f32.mrb[249].mxu0 }
 0x41c   :  { %v4331_v34 = vpop.f32.mrb[84].mxu1  ;;  %v14612_v61 = vld [vmem:[%s22930_s6 + $0xc8] sm:$0xff] }
 0x41d   :  { %v4335_v26 = vadd.f32 %v4331_v34, %v4261_v23  ;;  %v16415_v50 = vpop.f32.mrb[85].mxu1  ;;  %v23089_v23 = vld [vmem:[#allocation10_spill] sm:$0xff]  ;;  %v18565_v34 = vpack.c.bf16 %v14612_v61, %v14611_v51 }
 0x41e   :  { %v14614_v50 = vld [vmem:[%s22930_s6 + $0xd8] sm:$0xff] }
 0x41f   :  { %v4409_v38 = vadd.f32 %v23087_v7, %v4335_v26  ;;  %v14613_v26 = vld [vmem:[%s22930_s6 + $0xd0] sm:$0xff] }
 0x420   :  { %v18568_v7 = vpack.c.bf16 %v14614_v50, %v14613_v26 }
 0x421   :  { %v4410_v6 = vadd.f32 %v21302_v29, %v4409_v38  ;;  %v23090_v38 = vmax.f32 %v23089_v23, 0.0  ;;  %v14617_v23 = vld [vmem:[%s22930_s6 + $0xf0] sm:$0xff] }
 0x423   :  { %v4411_v60 = vmax.f32 %v4410_v6, 0.0  ;;  %v14615_v6 = vld [vmem:[%s22930_s6 + $0xe0] sm:$0xff] }
 0x425   :  { %16444 = vmatmul.mubr.msk.f32.vlgmr.msra.gmra.mrb[86].mxu1 %vm3105_vm2, %v4411_v60  ;;  %v14616_v60 = vld [vmem:[%s22930_s6 + $0xe8] sm:$0xff] }
 0x426   :  { %18482 = vmatpush3.bf16.msra.mxu1 %v20085_v14  ;;  %16476 = vmatprep.mubr.msk.f32.mxu1 %vm19478_vm0, %v22998_v39 }
 0x427   :  { %18483 = vmatprep.subr.bf16.mxu1 %v23010_v41 }
 0x42a   :  { %18485 = vmatpush3.bf16.msra.mxu1 %v20104_v22 }
 0x42b   :  { %18492 = vmatprep.subr.bf16.mxu1 %v23010_v41 }
 0x42d   :  { %16477 = vmatmul.mubr.msk.f32.vlgmr.msra.gmra.mrb[88].mxu1 %vm666_vm1, %v23088_v54  ;;  %v18571_v54 = vpack.c.bf16 %v14616_v60, %v14615_v6 }
 0x42e   :  { %18494 = vmatpush3.bf16.msra.mxu1 %v20154_v43  ;;  %16498 = vmatprep.mubr.msk.f32.mxu1 %vm19478_vm0, %v22998_v39 }
 0x42f   :  { %18495 = vmatprep.subr.bf16.mxu1 %v23010_v41 }
 0x432   :  { %18497 = vmatpush3.bf16.msra.mxu1 %v23045_v1 }
 0x433   :  { %18504 = vmatprep.subr.bf16.mxu1 %v23010_v41 }
 0x435   :  { %16499 = vmatmul.mubr.msk.f32.vlgmr.msra.gmra.mrb[90].mxu1 %vm666_vm1, %v23090_v38  ;;  %v14618_v38 = vld [vmem:[%s22930_s6 + $0xf8] sm:$0xff] }
 0x436   :  { %18506 = vmatpush3.bf16.msra.mxu1 %v20221_v16  ;;  %16520 = vmatprep.mubr.msk.f32.mxu1 %vm19478_vm0, %v22998_v39 }
 0x437   :  { %18507 = vmatprep.subr.bf16.mxu1 %v23010_v41 }
 0x43a   :  { %18509 = vmatpush3.bf16.msra.mxu1 %v23048_v37 }
 0x43b   :  { %18516 = vmatprep.subr.bf16.mxu1 %v23010_v41 }
 0x43d   :  { %16521 = vmatmul.mubr.msk.f32.vlgmr.msra.gmra.mrb[92].mxu1 %vm666_vm1, %v23091_v10 }
 0x43e   :  { %18518 = vmatpush3.bf16.msra.mxu1 %v20298_v59  ;;  %16542 = vmatprep.mubr.msk.f32.mxu1 %vm19478_vm0, %v22998_v39 }
 0x43f   :  { %18519 = vmatprep.subr.bf16.mxu1 %v23010_v41 }
 0x442   :  { %18521 = vmatpush3.bf16.msra.mxu1 %v20326_v11 }
 0x443   :  { %18528 = vmatprep.subr.bf16.mxu1 %v23010_v41 }
 0x445   :  { %16543 = vmatmul.mubr.msk.f32.vlgmr.msra.gmra.mrb[94].mxu1 %vm666_vm1, %v23092_v30  ;;  %v18574_v30 = vpack.c.bf16 %v14618_v38, %v14617_v23 }
 0x446   :  { %18530 = vmatpush3.bf16.msra.mxu1 %v23052_v20  ;;  %16564 = vmatprep.mubr.msk.f32.mxu1 %vm19478_vm0, %v22998_v39 }
 0x447   :  { %18531 = vmatprep.subr.bf16.mxu1 %v23010_v41 }
 0x44a   :  { %18533 = vmatpush3.bf16.msra.mxu1 %v23054_v12 }
 0x44b   :  { %18540 = vmatprep.subr.bf16.mxu1 %v23010_v41 }
 0x44d   :  { %16565 = vmatmul.mubr.msk.f32.vlgmr.msra.gmra.mrb[96].mxu1 %vm666_vm1, %v21233_v62 }
 0x44e   :  { %18542 = vmatpush3.bf16.msra.mxu1 %v23055_v36  ;;  %16586 = vmatprep.mubr.msk.f32.mxu1 %vm19478_vm0, %v22998_v39 }
 0x44f   :  { %18543 = vmatprep.subr.bf16.mxu1 %v23010_v41 }
 0x452   :  { %18545 = vmatpush3.bf16.msra.mxu1 %v20466_v58 }
 0x453   :  { %18552 = vmatprep.subr.bf16.mxu1 %v23010_v41 }
 0x455   :  { %16587 = vmatmul.mubr.msk.f32.vlgmr.msra.gmra.mrb[98].mxu1 %vm666_vm1, %v22984_v33 }
 0x456   :  { %18554 = vmatpush3.bf16.msra.mxu1 %v23056_v24  ;;  %16608 = vmatprep.mubr.msk.f32.mxu1 %vm19478_vm0, %v22998_v39 }
 0x457   :  { %18555 = vmatprep.subr.bf16.mxu1 %v23010_v41 }
 0x45a   :  { %18557 = vmatpush3.bf16.msra.mxu1 %v23058_v63 }
 0x45b   :  { %18564 = vmatprep.subr.bf16.mxu1 %v23010_v41 }
 0x45d   :  { %16609 = vmatmul.mubr.msk.f32.vlgmr.msra.gmra.mrb[100].mxu1 %vm666_vm1, %v21711_v47 }
 0x45e   :  { %16638 = vmatprep.mubr.msk.f32.mxu1 %vm19478_vm0, %v22998_v39  ;;  %18566 = vmatpush3.bf16.msra.mxu1 %v18565_v34 }
 0x45f   :  { %18567 = vmatprep.subr.bf16.mxu1 %v23010_v41 }
 0x462   :  { %18569 = vmatpush3.bf16.msra.mxu1 %v18568_v7 }
 0x463   :  { %18570 = vmatprep.subr.bf16.mxu1 %v23010_v41 }
 0x466   :  { %18572 = vmatpush3.bf16.msra.mxu1 %v18571_v54 }
 0x467   :  { %18573 = vmatprep.subr.bf16.mxu1 %v23010_v41 }
 0x46a   :  { %18575 = vmatpush3.bf16.msra.mxu1 %v18574_v30 }
 0x46b   :  { %18588 = vmatprep.subr.bf16.mxu1 %v23010_v41 }
 0x4f8   :  { %v4490_v42 = vpop.f32.mrb[86].mxu1 }
 0x4f9   :  { %v21747_v31 = vadd.f32 %v4490_v42, %v21621_v13  ;;  %v16445_v56 = vpop.f32.mrb[87].mxu1 }
 0x4fa   :  { %v23095_v56 = vld [vmem:[#allocation35_spill] sm:$0xff] }
 0x500   :  { %v4701_v51 = vpop.f32.mrb[88].mxu1 }
 0x501   :  { %v4705_v61 = vadd.f32 %v4701_v51, %v21127_v2  ;;  %v16478_v34 = vpop.f32.mrb[89].mxu1 }
 0x502   :  { %v23096_v34 = vld [vmem:[#allocation36_spill] sm:$0xff] }
 0x503   :  { %v4776_v26 = vadd.f32 %v21138_v53, %v4705_v61 }
 0x508   :  { %v4843_v50 = vpop.f32.mrb[90].mxu1 }
 0x509   :  { %v4847_v7 = vadd.f32 %v4843_v50, %v4776_v26  ;;  %v16500_v6 = vpop.f32.mrb[91].mxu1 }
 0x50a   :  { %v23097_v6 = vld [vmem:[#allocation37_spill] sm:$0xff] }
 0x50b   :  { %v4918_v60 = vadd.f32 %v21148_v15, %v4847_v7 }
 0x510   :  { %v4985_v54 = vpop.f32.mrb[92].mxu1 }
 0x511   :  { %v4989_v23 = vadd.f32 %v4985_v54, %v4918_v60  ;;  %v16522_v38 = vpop.f32.mrb[93].mxu1 }
 0x512   :  { %v23098_v38 = vld [vmem:[#allocation38_spill] sm:$0xff] }
 0x513   :  { %v5060_v30 = vadd.f32 %v21159_v44, %v4989_v23 }
 0x518   :  { %v5130_v33 = vpop.f32.mrb[94].mxu1 }
 0x519   :  { %v5134_v13 = vadd.f32 %v5130_v33, %v5060_v30  ;;  %v16544_v42 = vpop.f32.mrb[95].mxu1  ;;  %v14637_v30 = vld [vmem:[%s22930_s6 + $0x108] sm:$0xff] }
 0x51a   :  { %v14638_v42 = vld [vmem:[%s22930_s6 + $0x110] sm:$0xff] }
 0x51b   :  { %v5208_v3 = vadd.f32 %v23095_v56, %v5134_v13  ;;  %v14639_v56 = vld [vmem:[%s22930_s6 + $0x118] sm:$0xff] }
 0x520   :  { %v5278_v5 = vpop.f32.mrb[96].mxu1 }
 0x521   :  { %v5282_v2 = vadd.f32 %v5278_v5, %v5208_v3  ;;  %v16566_v51 = vpop.f32.mrb[97].mxu1 }
 0x522   :  { %v14640_v51 = vld [vmem:[%s22930_s6 + $0x120] sm:$0xff] }
 0x523   :  { %v5356_v53 = vadd.f32 %v23096_v34, %v5282_v2  ;;  %v18676_v2 = vpack.c.bf16 %v14639_v56, %v14638_v42  ;;  %v14641_v34 = vld [vmem:[%s22930_s6 + $0x128] sm:$0xff] }
 0x524   :  { %v23100_v42 = vld [vmem:[#allocation39_spill] sm:$0xff] }
 0x528   :  { %v5426_v61 = vpop.f32.mrb[98].mxu1 }
 0x529   :  { %v5430_v26 = vadd.f32 %v5426_v61, %v5356_v53  ;;  %v16588_v50 = vpop.f32.mrb[99].mxu1  ;;  %v18679_v53 = vpack.c.bf16 %v14641_v34, %v14640_v51  ;;  %v14642_v61 = vld [vmem:[%s22930_s6 + $0x130] sm:$0xff] }
 0x52a   :  { %v23101_v34 = vld [vmem:[#allocation40_spill] sm:$0xff] }
 0x52b   :  { %v5504_v15 = vadd.f32 %v23097_v6, %v5430_v26  ;;  %v14643_v26 = vld [vmem:[%s22930_s6 + $0x138] sm:$0xff] }
 0x52c   :  { %v18682_v50 = vpack.c.bf16 %v14643_v26, %v14642_v61 }
 0x530   :  { %v5574_v7 = vpop.f32.mrb[100].mxu1 }
 0x531   :  { %v5578_v60 = vadd.f32 %v5574_v7, %v5504_v15  ;;  %v16610_v54 = vpop.f32.mrb[101].mxu1 }
 0x533   :  { %v5652_v44 = vadd.f32 %v23098_v38, %v5578_v60 }
 0x535   :  { %v5653_v33 = vadd.f32 %v21302_v29, %v5652_v44 }
 0x537   :  { %v5654_v23 = vmax.f32 %v5653_v33, 0.0 }
 0x539   :  { %16639 = vmatmul.mubr.msk.f32.vlgmr.msra.gmra.mrb[102].mxu1 %vm3105_vm2, %v5654_v23 }
 0x53a   :  { %18590 = vmatpush3.bf16.msra.mxu1 %v20085_v14  ;;  %16671 = vmatprep.mubr.msk.f32.mxu1 %vm19478_vm0, %v22998_v39 }
 0x53b   :  { %18591 = vmatprep.subr.bf16.mxu1 %v23010_v41 }
 0x53e   :  { %18593 = vmatpush3.bf16.msra.mxu1 %v20104_v22 }
 0x53f   :  { %18600 = vmatprep.subr.bf16.mxu1 %v23010_v41 }
 0x541   :  { %16672 = vmatmul.mubr.msk.f32.vlgmr.msra.gmra.mrb[104].mxu1 %vm666_vm1, %v20841_v27  ;;  %v23099_v27 = vld [vmem:[#allocation18_spill] sm:$0xff] }
 0x542   :  { %18602 = vmatpush3.bf16.msra.mxu1 %v20154_v43  ;;  %16693 = vmatprep.mubr.msk.f32.mxu1 %vm19478_vm0, %v22998_v39  ;;  %v495_v5 = vadd.f32 %v21417_v52, %v23099_v27 }
 0x543   :  { %18603 = vmatprep.subr.bf16.mxu1 %v23010_v41 }
 0x544   :  { %v21814_v3 = vmax.f32 %v495_v5, 0.0 }
 0x546   :  { %18605 = vmatpush3.bf16.msra.mxu1 %v23045_v1 }
 0x547   :  { %18612 = vmatprep.subr.bf16.mxu1 %v23010_v41 }
 0x549   :  { %16694 = vmatmul.mubr.msk.f32.vlgmr.msra.gmra.mrb[106].mxu1 %vm666_vm1, %v23091_v10  ;;  %v14636_v10 = vld [vmem:[%s22930_s6 + $0x100] sm:$0xff] }
 0x54a   :  { %18614 = vmatpush3.bf16.msra.mxu1 %v20221_v16  ;;  %16715 = vmatprep.mubr.msk.f32.mxu1 %vm19478_vm0, %v22998_v39  ;;  %v18673_v13 = vpack.c.bf16 %v14637_v30, %v14636_v10 }
 0x54b   :  { %18615 = vmatprep.subr.bf16.mxu1 %v23010_v41 }
 0x54e   :  { %18617 = vmatpush3.bf16.msra.mxu1 %v23048_v37 }
 0x54f   :  { %18624 = vmatprep.subr.bf16.mxu1 %v23010_v41 }
 0x551   :  { %16716 = vmatmul.mubr.msk.f32.vlgmr.msra.gmra.mrb[108].mxu1 %vm666_vm1, %v20923_v18 }
 0x552   :  { %18626 = vmatpush3.bf16.msra.mxu1 %v20298_v59  ;;  %16737 = vmatprep.mubr.msk.f32.mxu1 %vm19478_vm0, %v22998_v39 }
 0x553   :  { %18627 = vmatprep.subr.bf16.mxu1 %v23010_v41 }
 0x556   :  { %18629 = vmatpush3.bf16.msra.mxu1 %v20326_v11 }
 0x557   :  { %18636 = vmatprep.subr.bf16.mxu1 %v23010_v41 }
 0x559   :  { %16738 = vmatmul.mubr.msk.f32.vlgmr.msra.gmra.mrb[110].mxu1 %vm666_vm1, %v21233_v62 }
 0x55a   :  { %18638 = vmatpush3.bf16.msra.mxu1 %v23052_v20  ;;  %16759 = vmatprep.mubr.msk.f32.mxu1 %vm19478_vm0, %v22998_v39 }
 0x55b   :  { %18639 = vmatprep.subr.bf16.mxu1 %v23010_v41 }
 0x55e   :  { %18641 = vmatpush3.bf16.msra.mxu1 %v23054_v12 }
 0x55f   :  { %18648 = vmatprep.subr.bf16.mxu1 %v23010_v41 }
 0x561   :  { %16760 = vmatmul.mubr.msk.f32.vlgmr.msra.gmra.mrb[112].mxu1 %vm666_vm1, %v21391_v46 }
 0x562   :  { %18650 = vmatpush3.bf16.msra.mxu1 %v23055_v36  ;;  %16781 = vmatprep.mubr.msk.f32.mxu1 %vm19478_vm0, %v22998_v39 }
 0x563   :  { %18651 = vmatprep.subr.bf16.mxu1 %v23010_v41 }
 0x566   :  { %18653 = vmatpush3.bf16.msra.mxu1 %v20466_v58 }
 0x567   :  { %18660 = vmatprep.subr.bf16.mxu1 %v23010_v41 }
 0x569   :  { %16782 = vmatmul.mubr.msk.f32.vlgmr.msra.gmra.mrb[114].mxu1 %vm666_vm1, %v21711_v47 }
 0x56a   :  { %18662 = vmatpush3.bf16.msra.mxu1 %v23056_v24  ;;  %16803 = vmatprep.mubr.msk.f32.mxu1 %vm19478_vm0, %v22998_v39 }
 0x56b   :  { %18663 = vmatprep.subr.bf16.mxu1 %v23010_v41 }
 0x56e   :  { %18665 = vmatpush3.bf16.msra.mxu1 %v23058_v63 }
 0x56f   :  { %18672 = vmatprep.subr.bf16.mxu1 %v23010_v41 }
 0x571   :  { %16804 = vmatmul.mubr.msk.f32.vlgmr.msra.gmra.mrb[116].mxu1 %vm666_vm1, %v21814_v3 }
 0x572   :  { %16833 = vmatprep.mubr.msk.f32.mxu1 %vm19478_vm0, %v22998_v39  ;;  %18674 = vmatpush3.bf16.msra.mxu1 %v18673_v13 }
 0x573   :  { %18675 = vmatprep.subr.bf16.mxu1 %v23010_v41 }
 0x576   :  { %18677 = vmatpush3.bf16.msra.mxu1 %v18676_v2 }
 0x577   :  { %18678 = vmatprep.subr.bf16.mxu1 %v23010_v41 }
 0x57a   :  { %18680 = vmatpush3.bf16.msra.mxu1 %v18679_v53 }
 0x57b   :  { %18681 = vmatprep.subr.bf16.mxu1 %v23010_v41 }
 0x57e   :  { %18683 = vmatpush3.bf16.msra.mxu1 %v18682_v50  ;;  %v23102_v50 = vld [vmem:[#allocation41_spill] sm:$0xff] }
 0x57f   :  { %18696 = vmatprep.subr.bf16.mxu1 %v23010_v41 }
 0x60c   :  { %v5733_v6 = vpop.f32.mrb[102].mxu1 }
 0x60d   :  { %v21850_v15 = vadd.f32 %v5733_v6, %v21747_v31  ;;  %v16640_v7 = vpop.f32.mrb[103].mxu1 }
 0x614   :  { %v5944_v60 = vpop.f32.mrb[104].mxu1 }
 0x615   :  { %v5948_v54 = vadd.f32 %v5944_v60, %v21235_v9  ;;  %v16673_v38 = vpop.f32.mrb[105].mxu1 }
 0x617   :  { %v6019_v44 = vadd.f32 %v21245_v49, %v5948_v54 }
 0x61c   :  { %v6086_v33 = vpop.f32.mrb[106].mxu1 }
 0x61d   :  { %v6090_v23 = vadd.f32 %v6086_v33, %v6019_v44  ;;  %v16695_v27 = vpop.f32.mrb[107].mxu1 }
 0x61f   :  { %v6161_v5 = vadd.f32 %v21255_v28, %v6090_v23 }
 0x624   :  { %v6228_v10 = vpop.f32.mrb[108].mxu1 }
 0x625   :  { %v6232_v30 = vadd.f32 %v6228_v10, %v6161_v5  ;;  %v16717_v13 = vpop.f32.mrb[109].mxu1 }
 0x627   :  { %v6303_v56 = vadd.f32 %v23100_v42, %v6232_v30  ;;  %v14662_v30 = vld [vmem:[%s22930_s6 + $0x148] sm:$0xff]  ;;  %v14663_v42 = vld [vmem:[%s22930_s6 + $0x150] sm:$0xff] }
 0x62c   :  { %v6370_v2 = vpop.f32.mrb[110].mxu1 }
 0x62d   :  { %v6374_v31 = vadd.f32 %v6370_v2, %v6303_v56  ;;  %v16739_v51 = vpop.f32.mrb[111].mxu1  ;;  %v14664_v56 = vld [vmem:[%s22930_s6 + $0x158] sm:$0xff] }
 0x62e   :  { %v18784_v2 = vpack.c.bf16 %v14664_v56, %v14663_v42  ;;  %v14666_v51 = vld [vmem:[%s22930_s6 + $0x168] sm:$0xff] }
 0x62f   :  { %v6445_v53 = vadd.f32 %v23101_v34, %v6374_v31  ;;  %v14665_v31 = vld [vmem:[%s22930_s6 + $0x160] sm:$0xff] }
 0x630   :  { %v18787_v34 = vpack.c.bf16 %v14666_v51, %v14665_v31 }
 0x634   :  { %v6515_v61 = vpop.f32.mrb[112].mxu1 }
 0x635   :  { %v6519_v9 = vadd.f32 %v6515_v61, %v6445_v53  ;;  %v16761_v26 = vpop.f32.mrb[113].mxu1  ;;  %v14667_v53 = vld [vmem:[%s22930_s6 + $0x170] sm:$0xff]  ;;  %v14668_v61 = vld [vmem:[%s22930_s6 + $0x178] sm:$0xff] }
 0x637   :  { %v6593_v49 = vadd.f32 %v23102_v50, %v6519_v9  ;;  %v18790_v9 = vpack.c.bf16 %v14668_v61, %v14667_v53  ;;  %v21976_v53 = vld [vmem:[%s22931_s5] ss:$0 sm:$0xff] }
 0x63c   :  { %v6660_v6 = vpop.f32.mrb[114].mxu1 }
 0x63d   :  { %v6664_v7 = vadd.f32 %v6660_v6, %v6593_v49  ;;  %v16783_v60 = vpop.f32.mrb[115].mxu1 }
 0x63f   :  { %v6735_v28 = vadd.f32 %v21321_v45, %v6664_v7  ;;  %v23103_v45 = vmax.f32 %v21495_v19, 0.0 }
 0x644   :  { %v6805_v54 = vpop.f32.mrb[116].mxu1 }
 0x645   :  { %v6809_v38 = vadd.f32 %v6805_v54, %v6735_v28  ;;  %v16805_v44 = vpop.f32.mrb[117].mxu1 }
 0x647   :  { %v6883_v33 = vadd.f32 %v21352_v21, %v6809_v38 }
 0x649   :  { %v6884_v23 = vadd.f32 %v21302_v29, %v6883_v33  ;;  %v23104_v29 = vmax.f32 %v21535_v25, 0.0  ;;  %v23106_v25 = vld [vmem:[#allocation19_spill] sm:$0xff] }
 0x64a   :  { %v21923_v5 = vadd.f32 %v21417_v52, %v23106_v25 }
 0x64b   :  { %v6885_v27 = vmax.f32 %v6884_v23, 0.0 }
 0x64c   :  { %v639_v10 = vmax.f32 %v21923_v5, 0.0 }
 0x64d   :  { %16834 = vmatmul.mubr.msk.f32.vlgmr.msra.gmra.mrb[118].mxu1 %vm3105_vm2, %v6885_v27 }
 0x64e   :  { %18698 = vmatpush3.bf16.msra.mxu1 %v20085_v14  ;;  %16866 = vmatprep.mubr.msk.f32.mxu1 %vm19478_vm0, %v22998_v39 }
 0x64f   :  { %18699 = vmatprep.subr.bf16.mxu1 %v23010_v41 }
 0x652   :  { %18701 = vmatpush3.bf16.msra.mxu1 %v20104_v22 }
 0x653   :  { %18708 = vmatprep.subr.bf16.mxu1 %v23010_v41 }
 0x655   :  { %16867 = vmatmul.mubr.msk.f32.vlgmr.msra.gmra.mrb[120].mxu1 %vm666_vm1, %v23103_v45 }
 0x656   :  { %18710 = vmatpush3.bf16.msra.mxu1 %v20154_v43  ;;  %16888 = vmatprep.mubr.msk.f32.mxu1 %vm19478_vm0, %v22998_v39 }
 0x657   :  { %18711 = vmatprep.subr.bf16.mxu1 %v23010_v41 }
 0x65a   :  { %18713 = vmatpush3.bf16.msra.mxu1 %v23045_v1 }
 0x65b   :  { %18720 = vmatprep.subr.bf16.mxu1 %v23010_v41 }
 0x65d   :  { %16889 = vmatmul.mubr.msk.f32.vlgmr.msra.gmra.mrb[122].mxu1 %vm666_vm1, %v20923_v18  ;;  %v23105_v18 = vld [vmem:[#allocation15_spill] sm:$0xff] }
 0x65e   :  { %18722 = vmatpush3.bf16.msra.mxu1 %v20221_v16  ;;  %16910 = vmatprep.mubr.msk.f32.mxu1 %vm19478_vm0, %v22998_v39  ;;  %v21901_v21 = vadd.f32 %v21417_v52, %v23105_v18  ;;  %v14661_v52 = vld [vmem:[%s22930_s6 + $0x140] sm:$0xff] }
 0x65f   :  { %18723 = vmatprep.subr.bf16.mxu1 %v23010_v41  ;;  %v18781_v13 = vpack.c.bf16 %v14662_v30, %v14661_v52 }
 0x660   :  { %v631_v19 = vmax.f32 %v21901_v21, 0.0  ;;  %v14742_v21 = vld [vmem:[%s22930_s6 + $0x230] sm:$0xff] }
 0x662   :  { %18725 = vmatpush3.bf16.msra.mxu1 %v23048_v37 }
 0x663   :  { %18732 = vmatprep.subr.bf16.mxu1 %v23010_v41 }
 0x665   :  { %16911 = vmatmul.mubr.msk.f32.vlgmr.msra.gmra.mrb[124].mxu1 %vm666_vm1, %v23104_v29 }
 0x666   :  { %18734 = vmatpush3.bf16.msra.mxu1 %v20298_v59  ;;  %16932 = vmatprep.mubr.msk.f32.mxu1 %vm19478_vm0, %v22998_v39 }
 0x667   :  { %18735 = vmatprep.subr.bf16.mxu1 %v23010_v41 }
 0x66a   :  { %18737 = vmatpush3.bf16.msra.mxu1 %v20326_v11 }
 0x66b   :  { %18744 = vmatprep.subr.bf16.mxu1 %v23010_v41 }
 0x66d   :  { %16933 = vmatmul.mubr.msk.f32.vlgmr.msra.gmra.mrb[126].mxu1 %vm666_vm1, %v21391_v46 }
 0x66e   :  { %18746 = vmatpush3.bf16.msra.mxu1 %v23052_v20  ;;  %16954 = vmatprep.mubr.msk.f32.mxu1 %vm19478_vm0, %v22998_v39 }
 0x66f   :  { %18747 = vmatprep.subr.bf16.mxu1 %v23010_v41 }
 0x672   :  { %18749 = vmatpush3.bf16.msra.mxu1 %v23054_v12 }
 0x673   :  { %18756 = vmatprep.subr.bf16.mxu1 %v23010_v41 }
 0x675   :  { %16955 = vmatmul.mubr.msk.f32.vlgmr.msra.gmra.mrb[128].mxu1 %vm666_vm1, %v631_v19 }
 0x676   :  { %18758 = vmatpush3.bf16.msra.mxu1 %v23055_v36  ;;  %16976 = vmatprep.mubr.msk.f32.mxu1 %vm19478_vm0, %v22998_v39 }
 0x677   :  { %18759 = vmatprep.subr.bf16.mxu1 %v23010_v41 }
 0x67a   :  { %18761 = vmatpush3.bf16.msra.mxu1 %v20466_v58 }
 0x67b   :  { %18768 = vmatprep.subr.bf16.mxu1 %v23010_v41 }
 0x67d   :  { %16977 = vmatmul.mubr.msk.f32.vlgmr.msra.gmra.mrb[130].mxu1 %vm666_vm1, %v21814_v3 }
 0x67e   :  { %18770 = vmatpush3.bf16.msra.mxu1 %v23056_v24  ;;  %16998 = vmatprep.mubr.msk.f32.mxu1 %vm19478_vm0, %v22998_v39 }
 0x67f   :  { %18771 = vmatprep.subr.bf16.mxu1 %v23010_v41 }
 0x682   :  { %18773 = vmatpush3.bf16.msra.mxu1 %v23058_v63 }
 0x683   :  { %18780 = vmatprep.subr.bf16.mxu1 %v23010_v41 }
 0x685   :  { %16999 = vmatmul.mubr.msk.f32.vlgmr.msra.gmra.mrb[132].mxu1 %vm666_vm1, %v639_v10 }
 0x686   :  { %17028 = vmatprep.mubr.msk.f32.mxu1 %vm19478_vm0, %v22998_v39  ;;  %18782 = vmatpush3.bf16.msra.mxu1 %v18781_v13 }
 0x687   :  { %18783 = vmatprep.subr.bf16.mxu1 %v23010_v41 }
 0x68a   :  { %18785 = vmatpush3.bf16.msra.mxu1 %v18784_v2 }
 0x68b   :  { %18786 = vmatprep.subr.bf16.mxu1 %v23010_v41 }
 0x68e   :  { %18788 = vmatpush3.bf16.msra.mxu1 %v18787_v34 }
 0x68f   :  { %18789 = vmatprep.subr.bf16.mxu1 %v23010_v41 }
 0x692   :  { %18791 = vmatpush3.bf16.msra.mxu1 %v18790_v9  ;;  %v23109_v9 = vld [vmem:[#allocation21_spill] sm:$0xff] }
 0x693   :  { %18804 = vmatprep.subr.bf16.mxu1 %v23010_v41 }
 0x720   :  { %v6964_v26 = vpop.f32.mrb[118].mxu1 }
 0x721   :  { %v21963_v50 = vadd.f32 %v6964_v26, %v21850_v15  ;;  %v16835_v49 = vpop.f32.mrb[119].mxu1 }
 0x728   :  { %v7175_v6 = vpop.f32.mrb[120].mxu1 }
 0x729   :  { %v7179_v7 = vadd.f32 %v7175_v6, %v21393_v55  ;;  %v16868_v60 = vpop.f32.mrb[121].mxu1  ;;  %v23110_v6 = vld [vmem:[#allocation25_spill] sm:$0xff] }
 0x72b   :  { %v7250_v28 = vadd.f32 %v21410_v4, %v7179_v7 }
 0x730   :  { %v7317_v54 = vpop.f32.mrb[122].mxu1 }
 0x731   :  { %v7321_v38 = vadd.f32 %v7317_v54, %v7250_v28  ;;  %v16890_v44 = vpop.f32.mrb[123].mxu1  ;;  %v23111_v28 = vld [vmem:[#allocation26_spill] sm:$0xff] }
 0x732   :  { %v14686_v44 = vld [vmem:[%s22930_s6 + $0x180] sm:$0xff] }
 0x733   :  { %v7392_v33 = vadd.f32 %v21435_v57, %v7321_v38 }
 0x738   :  { %v7459_v23 = vpop.f32.mrb[124].mxu1 }
 0x739   :  { %v7463_v27 = vadd.f32 %v7459_v23, %v7392_v33  ;;  %v16912_v45 = vpop.f32.mrb[125].mxu1  ;;  %v14687_v33 = vld [vmem:[%s22930_s6 + $0x188] sm:$0xff] }
 0x73a   :  { %v18889_v23 = vpack.c.bf16 %v14687_v33, %v14686_v44  ;;  %v14689_v45 = vld [vmem:[%s22930_s6 + $0x198] sm:$0xff] }
 0x73b   :  { %v7534_v29 = vadd.f32 %v21571_v17, %v7463_v27  ;;  %v14688_v27 = vld [vmem:[%s22930_s6 + $0x190] sm:$0xff]  ;;  %v23116_v44 = vld [vmem:[#allocation5_spill] sm:$0xff] }
 0x740   :  { %v7601_v18 = vpop.f32.mrb[126].mxu1 }
 0x741   :  { %v7605_v15 = vadd.f32 %v7601_v18, %v7534_v29  ;;  %v16934_v25 = vpop.f32.mrb[127].mxu1  ;;  %v18892_v29 = vpack.c.bf16 %v14689_v45, %v14688_v27  ;;  %v14690_v18 = vld [vmem:[%s22930_s6 + $0x1a0] sm:$0xff] }
 0x743   :  { %v7676_v52 = vadd.f32 %v21581_v0, %v7605_v15  ;;  %v14691_v15 = vld [vmem:[%s22930_s6 + $0x1a8] sm:$0xff] }
 0x744   :  { %v18895_v25 = vpack.c.bf16 %v14691_v15, %v14690_v18 }
 0x748   :  { %v7746_v30 = vpop.f32.mrb[128].mxu1 }
 0x749   :  { %v7750_v55 = vadd.f32 %v7746_v30, %v7676_v52  ;;  %v16956_v13 = vpop.f32.mrb[129].mxu1  ;;  %v14692_v52 = vld [vmem:[%s22930_s6 + $0x1b0] sm:$0xff]  ;;  %v14693_v30 = vld [vmem:[%s22930_s6 + $0x1b8] sm:$0xff] }
 0x74b   :  { %v7824_v4 = vadd.f32 %v21583_v48, %v7750_v55  ;;  %v23107_v48 = vmax.f32 %v21695_v8, 0.0  ;;  %v18898_v55 = vpack.c.bf16 %v14693_v30, %v14692_v52  ;;  %v23118_v30 = vld [vmem:[#allocation6_spill] sm:$0xff] }
 0x750   :  { %v7891_v42 = vpop.f32.mrb[130].mxu1 }
 0x751   :  { %v7895_v56 = vadd.f32 %v7891_v42, %v7824_v4  ;;  %v16978_v2 = vpop.f32.mrb[131].mxu1 }
 0x752   :  { %v23112_v2 = vld [vmem:[#allocation2_spill] sm:$0xff] }
 0x753   :  { %v7966_v57 = vadd.f32 %v21585_v40, %v7895_v56  ;;  %v23108_v40 = vld [vmem:[#allocation20_spill] sm:$0xff] }
 0x758   :  { %v8036_v31 = vpop.f32.mrb[132].mxu1 }
 0x759   :  { %v8040_v51 = vadd.f32 %v8036_v31, %v7966_v57  ;;  %v17000_v34 = vpop.f32.mrb[133].mxu1 }
 0x75b   :  { %v8114_v17 = vadd.f32 %v21587_v35, %v8040_v51  ;;  %v23113_v51 = vld [vmem:[#allocation4_spill] sm:$0xff] }
 0x75d   :  { %v8115_v0 = vadd.f32 %v21976_v53, %v8114_v17 }
 0x75f   :  { %v8116_v61 = vmax.f32 %v8115_v0, 0.0 }
 0x761   :  { %17029 = vmatmul.mubr.msk.f32.vlgmr.msra.gmra.mrb[134].mxu1 %vm3105_vm2, %v8116_v61 }
 0x762   :  { %18806 = vmatpush3.bf16.msra.mxu1 %v20085_v14  ;;  %17061 = vmatprep.mubr.msk.f32.mxu1 %vm19478_vm0, %v22998_v39 }
 0x763   :  { %18807 = vmatprep.subr.bf16.mxu1 %v23010_v41 }
 0x766   :  { %18809 = vmatpush3.bf16.msra.mxu1 %v20104_v22 }
 0x767   :  { %18816 = vmatprep.subr.bf16.mxu1 %v23010_v41 }
 0x769   :  { %17062 = vmatmul.mubr.msk.f32.vlgmr.msra.gmra.mrb[136].mxu1 %vm666_vm1, %v21233_v62  ;;  %v22011_v62 = vld [vmem:[%s22929_s3] ss:$0 sm:$0xff] }
 0x76a   :  { %18818 = vmatpush3.bf16.msra.mxu1 %v20154_v43  ;;  %17083 = vmatprep.mubr.msk.f32.mxu1 %vm19478_vm0, %v22998_v39  ;;  %v515_v35 = vadd.f32 %v22011_v62, %v23108_v40  ;;  %v22024_v26 = vadd.f32 %v22011_v62, %v23109_v9  ;;  %v555_v7 = vadd.f32 %v22011_v62, %v23110_v6  ;;  %v23115_v6 = vld [vmem:[#allocation24_spill] sm:$0xff] }
 0x76b   :  { %18819 = vmatprep.subr.bf16.mxu1 %v23010_v41  ;;  %v22047_v54 = vadd.f32 %v22011_v62, %v23111_v28 }
 0x76c   :  { %v641_v8 = vmax.f32 %v515_v35, 0.0  ;;  %v643_v49 = vmax.f32 %v22024_v26, 0.0  ;;  %v649_v60 = vmax.f32 %v555_v7, 0.0  ;;  %v23121_v26 = vld [vmem:[#allocation27_spill] sm:$0xff] }
 0x76d   :  { %v651_v38 = vmax.f32 %v22047_v54, 0.0  ;;  %v14711_v54 = vld [vmem:[%s22930_s6 + $0x1c0] sm:$0xff] }
 0x76e   :  { %18821 = vmatpush3.bf16.msra.mxu1 %v23045_v1 }
 0x76f   :  { %18828 = vmatprep.subr.bf16.mxu1 %v23010_v41 }
 0x771   :  { %17084 = vmatmul.mubr.msk.f32.vlgmr.msra.gmra.mrb[138].mxu1 %vm666_vm1, %v23107_v48  ;;  %v23114_v48 = vld [vmem:[#allocation3_spill] sm:$0xff] }
 0x772   :  { %18830 = vmatpush3.bf16.msra.mxu1 %v20221_v16  ;;  %17105 = vmatprep.mubr.msk.f32.mxu1 %vm19478_vm0, %v22998_v39 }
 0x773   :  { %18831 = vmatprep.subr.bf16.mxu1 %v23010_v41 }
 0x776   :  { %18833 = vmatpush3.bf16.msra.mxu1 %v23048_v37 }
 0x777   :  { %18840 = vmatprep.subr.bf16.mxu1 %v23010_v41 }
 0x779   :  { %17106 = vmatmul.mubr.msk.f32.vlgmr.msra.gmra.mrb[140].mxu1 %vm666_vm1, %v21711_v47 }
 0x77a   :  { %18842 = vmatpush3.bf16.msra.mxu1 %v20298_v59  ;;  %17127 = vmatprep.mubr.msk.f32.mxu1 %vm19478_vm0, %v22998_v39 }
 0x77b   :  { %18843 = vmatprep.subr.bf16.mxu1 %v23010_v41 }
 0x77e   :  { %18845 = vmatpush3.bf16.msra.mxu1 %v20326_v11 }
 0x77f   :  { %18852 = vmatprep.subr.bf16.mxu1 %v23010_v41 }
 0x781   :  { %17128 = vmatmul.mubr.msk.f32.vlgmr.msra.gmra.mrb[142].mxu1 %vm666_vm1, %v641_v8 }
 0x782   :  { %18854 = vmatpush3.bf16.msra.mxu1 %v23052_v20  ;;  %17149 = vmatprep.mubr.msk.f32.mxu1 %vm19478_vm0, %v22998_v39 }
 0x783   :  { %18855 = vmatprep.subr.bf16.mxu1 %v23010_v41 }
 0x786   :  { %18857 = vmatpush3.bf16.msra.mxu1 %v23054_v12 }
 0x787   :  { %18864 = vmatprep.subr.bf16.mxu1 %v23010_v41 }
 0x789   :  { %17150 = vmatmul.mubr.msk.f32.vlgmr.msra.gmra.mrb[144].mxu1 %vm666_vm1, %v643_v49 }
 0x78a   :  { %18866 = vmatpush3.bf16.msra.mxu1 %v23055_v36  ;;  %17171 = vmatprep.mubr.msk.f32.mxu1 %vm19478_vm0, %v22998_v39 }
 0x78b   :  { %18867 = vmatprep.subr.bf16.mxu1 %v23010_v41 }
 0x78e   :  { %18869 = vmatpush3.bf16.msra.mxu1 %v20466_v58 }
 0x78f   :  { %18876 = vmatprep.subr.bf16.mxu1 %v23010_v41 }
 0x791   :  { %17172 = vmatmul.mubr.msk.f32.vlgmr.msra.gmra.mrb[146].mxu1 %vm666_vm1, %v649_v60 }
 0x792   :  { %18878 = vmatpush3.bf16.msra.mxu1 %v23056_v24  ;;  %17193 = vmatprep.mubr.msk.f32.mxu1 %vm19478_vm0, %v22998_v39 }
 0x793   :  { %18879 = vmatprep.subr.bf16.mxu1 %v23010_v41 }
 0x796   :  { %18881 = vmatpush3.bf16.msra.mxu1 %v23058_v63 }
 0x797   :  { %18888 = vmatprep.subr.bf16.mxu1 %v23010_v41 }
 0x799   :  { %17194 = vmatmul.mubr.msk.f32.vlgmr.msra.gmra.mrb[148].mxu1 %vm666_vm1, %v651_v38 }
 0x79a   :  { %17223 = vmatprep.mubr.msk.f32.mxu1 %vm19478_vm0, %v22998_v39  ;;  %18890 = vmatpush3.bf16.msra.mxu1 %v18889_v23 }
 0x79b   :  { %18891 = vmatprep.subr.bf16.mxu1 %v23010_v41 }
 0x79e   :  { %18893 = vmatpush3.bf16.msra.mxu1 %v18892_v29  ;;  %v23117_v29 = vld [vmem:[#allocation8_spill] sm:$0xff] }
 0x79f   :  { %18894 = vmatprep.subr.bf16.mxu1 %v23010_v41 }
 0x7a2   :  { %18896 = vmatpush3.bf16.msra.mxu1 %v18895_v25 }
 0x7a3   :  { %18897 = vmatprep.subr.bf16.mxu1 %v23010_v41 }
 0x7a6   :  { %18899 = vmatpush3.bf16.msra.mxu1 %v18898_v55 }
 0x7a7   :  { %18912 = vmatprep.subr.bf16.mxu1 %v23010_v41 }
 0x834   :  { %v8195_v13 = vpop.f32.mrb[134].mxu1 }
 0x835   :  { %v22087_v4 = vadd.f32 %v8195_v13, %v21963_v50  ;;  %v17030_v42 = vpop.f32.mrb[135].mxu1 }
 0x83c   :  { %v8406_v56 = vpop.f32.mrb[136].mxu1 }
 0x83d   :  { %v8410_v57 = vadd.f32 %v8406_v56, %v23112_v2  ;;  %v17063_v31 = vpop.f32.mrb[137].mxu1  ;;  %v23119_v2 = vld [vmem:[#allocation9_spill] sm:$0xff] }
 0x83f   :  { %v8481_v34 = vadd.f32 %v23113_v51, %v8410_v57 }
 0x844   :  { %v8548_v17 = vpop.f32.mrb[138].mxu1 }
 0x845   :  { %v8552_v0 = vadd.f32 %v8548_v17, %v8481_v34  ;;  %v17085_v61 = vpop.f32.mrb[139].mxu1 }
 0x846   :  { %v14713_v61 = vld [vmem:[%s22930_s6 + $0x1d0] sm:$0xff] }
 0x847   :  { %v8623_v40 = vadd.f32 %v23114_v48, %v8552_v0  ;;  %v14714_v48 = vld [vmem:[%s22930_s6 + $0x1d8] sm:$0xff] }
 0x84c   :  { %v8690_v35 = vpop.f32.mrb[140].mxu1 }
 0x84d   :  { %v8694_v8 = vadd.f32 %v8690_v35, %v8623_v40  ;;  %v17107_v9 = vpop.f32.mrb[141].mxu1  ;;  %v19000_v40 = vpack.c.bf16 %v14714_v48, %v14713_v61  ;;  %v14715_v35 = vld [vmem:[%s22930_s6 + $0x1e0] sm:$0xff]  ;;  %v23127_v61 = vld [vmem:[#allocation44_spill] sm:$0xff] }
 0x84f   :  { %v8765_v7 = vadd.f32 %v23115_v6, %v8694_v8  ;;  %v14716_v8 = vld [vmem:[%s22930_s6 + $0x1e8] sm:$0xff]  ;;  %v14717_v6 = vld [vmem:[%s22930_s6 + $0x1f0] sm:$0xff] }
 0x850   :  { %v19003_v9 = vpack.c.bf16 %v14716_v8, %v14715_v35 }
 0x854   :  { %v8835_v60 = vpop.f32.mrb[142].mxu1 }
 0x855   :  { %v8839_v50 = vadd.f32 %v8835_v60, %v8765_v7  ;;  %v17129_v28 = vpop.f32.mrb[143].mxu1  ;;  %v14718_v7 = vld [vmem:[%s22930_s6 + $0x1f8] sm:$0xff] }
 0x856   :  { %v19006_v60 = vpack.c.bf16 %v14718_v7, %v14717_v6 }
 0x857   :  { %v8913_v33 = vadd.f32 %v23116_v44, %v8839_v50 }
 0x85c   :  { %v8983_v23 = vpop.f32.mrb[144].mxu1 }
 0x85d   :  { %v8987_v27 = vadd.f32 %v8983_v23, %v8913_v33  ;;  %v17151_v45 = vpop.f32.mrb[145].mxu1  ;;  %v23122_v23 = vld [vmem:[#allocation11_spill] sm:$0xff] }
 0x85f   :  { %v9061_v18 = vadd.f32 %v23117_v29, %v8987_v27  ;;  %v23123_v29 = vld [vmem:[#allocation14_spill] sm:$0xff] }
 0x864   :  { %v9131_v15 = vpop.f32.mrb[146].mxu1 }
 0x865   :  { %v9135_v25 = vadd.f32 %v9131_v15, %v9061_v18  ;;  %v17173_v52 = vpop.f32.mrb[147].mxu1 }
 0x867   :  { %v9209_v55 = vadd.f32 %v23118_v30, %v9135_v25  ;;  %v23124_v30 = vld [vmem:[#allocation12_spill] sm:$0xff] }
 0x86c   :  { %v9279_v13 = vpop.f32.mrb[148].mxu1 }
 0x86d   :  { %v9283_v42 = vadd.f32 %v9279_v13, %v9209_v55  ;;  %v17195_v56 = vpop.f32.mrb[149].mxu1 }
 0x86f   :  { %v9357_v57 = vadd.f32 %v23119_v2, %v9283_v42  ;;  %v23125_v2 = vld [vmem:[#allocation42_spill] sm:$0xff] }
 0x871   :  { %v9358_v31 = vadd.f32 %v21976_v53, %v9357_v57 }
 0x873   :  { %v9359_v51 = vmax.f32 %v9358_v31, 0.0 }
 0x875   :  { %17224 = vmatmul.mubr.msk.f32.vlgmr.msra.gmra.mrb[150].mxu1 %vm3105_vm2, %v9359_v51 }
 0x876   :  { %18914 = vmatpush3.bf16.msra.mxu1 %v20085_v14  ;;  %17256 = vmatprep.mubr.msk.f32.mxu1 %vm19478_vm0, %v22998_v39 }
 0x877   :  { %18915 = vmatprep.subr.bf16.mxu1 %v23010_v41 }
 0x87a   :  { %18917 = vmatpush3.bf16.msra.mxu1 %v20104_v22 }
 0x87b   :  { %18924 = vmatprep.subr.bf16.mxu1 %v23010_v41 }
 0x87d   :  { %17257 = vmatmul.mubr.msk.f32.vlgmr.msra.gmra.mrb[152].mxu1 %vm666_vm1, %v21391_v46  ;;  %v23120_v46 = vld [vmem:[#allocation22_spill] sm:$0xff] }
 0x87e   :  { %18926 = vmatpush3.bf16.msra.mxu1 %v20154_v43  ;;  %17278 = vmatprep.mubr.msk.f32.mxu1 %vm19478_vm0, %v22998_v39 }
 0x87f   :  { %18927 = vmatprep.subr.bf16.mxu1 %v23010_v41 }
 0x882   :  { %18929 = vmatpush3.bf16.msra.mxu1 %v23045_v1 }
 0x883   :  { %18936 = vmatprep.subr.bf16.mxu1 %v23010_v41 }
 0x885   :  { %17279 = vmatmul.mubr.msk.f32.vlgmr.msra.gmra.mrb[154].mxu1 %vm666_vm1, %v21711_v47  ;;  %v22137_v47 = vadd.f32 %v22011_v62, %v23120_v46  ;;  %v23126_v46 = vld [vmem:[#allocation43_spill] sm:$0xff] }
 0x886   :  { %18938 = vmatpush3.bf16.msra.mxu1 %v20221_v16  ;;  %17300 = vmatprep.mubr.msk.f32.mxu1 %vm19478_vm0, %v22998_v39 }
 0x887   :  { %18939 = vmatprep.subr.bf16.mxu1 %v23010_v41  ;;  %v645_v34 = vmax.f32 %v22137_v47, 0.0 }
 0x88a   :  { %18941 = vmatpush3.bf16.msra.mxu1 %v23048_v37 }
 0x88b   :  { %18948 = vmatprep.subr.bf16.mxu1 %v23010_v41 }
 0x88d   :  { %17301 = vmatmul.mubr.msk.f32.vlgmr.msra.gmra.mrb[156].mxu1 %vm666_vm1, %v21814_v3 }
 0x88e   :  { %18950 = vmatpush3.bf16.msra.mxu1 %v20298_v59  ;;  %17322 = vmatprep.mubr.msk.f32.mxu1 %vm19478_vm0, %v22998_v39 }
 0x88f   :  { %18951 = vmatprep.subr.bf16.mxu1 %v23010_v41 }
 0x892   :  { %18953 = vmatpush3.bf16.msra.mxu1 %v20326_v11 }
 0x893   :  { %18960 = vmatprep.subr.bf16.mxu1 %v23010_v41 }
 0x895   :  { %17323 = vmatmul.mubr.msk.f32.vlgmr.msra.gmra.mrb[158].mxu1 %vm666_vm1, %v643_v49  ;;  %v22160_v49 = vadd.f32 %v22011_v62, %v23121_v26 }
 0x896   :  { %18962 = vmatpush3.bf16.msra.mxu1 %v23052_v20  ;;  %17344 = vmatprep.mubr.msk.f32.mxu1 %vm19478_vm0, %v22998_v39 }
 0x897   :  { %18963 = vmatprep.subr.bf16.mxu1 %v23010_v41  ;;  %v653_v17 = vmax.f32 %v22160_v49, 0.0  ;;  %v11918_v49 = vld [vmem:[%s22932_s8 + $0x18] sm:$0xff] }
 0x89a   :  { %18965 = vmatpush3.bf16.msra.mxu1 %v23054_v12 }
 0x89b   :  { %18972 = vmatprep.subr.bf16.mxu1 %v23010_v41 }
 0x89d   :  { %17345 = vmatmul.mubr.msk.f32.vlgmr.msra.gmra.mrb[160].mxu1 %vm666_vm1, %v645_v34 }
 0x89e   :  { %18974 = vmatpush3.bf16.msra.mxu1 %v23055_v36  ;;  %17366 = vmatprep.mubr.msk.f32.mxu1 %vm19478_vm0, %v22998_v39 }
 0x89f   :  { %18975 = vmatprep.subr.bf16.mxu1 %v23010_v41 }
 0x8a2   :  { %18977 = vmatpush3.bf16.msra.mxu1 %v20466_v58 }
 0x8a3   :  { %18984 = vmatprep.subr.bf16.mxu1 %v23010_v41 }
 0x8a5   :  { %17367 = vmatmul.mubr.msk.f32.vlgmr.msra.gmra.mrb[162].mxu1 %vm666_vm1, %v651_v38  ;;  %v14712_v38 = vld [vmem:[%s22930_s6 + $0x1c8] sm:$0xff] }
 0x8a6   :  { %18986 = vmatpush3.bf16.msra.mxu1 %v23056_v24  ;;  %17388 = vmatprep.mubr.msk.f32.mxu1 %vm19478_vm0, %v22998_v39  ;;  %v18997_v0 = vpack.c.bf16 %v14712_v38, %v14711_v54 }
 0x8a7   :  { %18987 = vmatprep.subr.bf16.mxu1 %v23010_v41 }
 0x8aa   :  { %18989 = vmatpush3.bf16.msra.mxu1 %v23058_v63 }
 0x8ab   :  { %18996 = vmatprep.subr.bf16.mxu1 %v23010_v41 }
 0x8ad   :  { %17389 = vmatmul.mubr.msk.f32.vlgmr.msra.gmra.mrb[164].mxu1 %vm666_vm1, %v653_v17 }
 0x8ae   :  { %17418 = vmatprep.mubr.msk.f32.mxu1 %vm19478_vm0, %v22998_v39  ;;  %18998 = vmatpush3.bf16.msra.mxu1 %v18997_v0 }
 0x8af   :  { %18999 = vmatprep.subr.bf16.mxu1 %v23010_v41 }
 0x8b2   :  { %19001 = vmatpush3.bf16.msra.mxu1 %v19000_v40 }
 0x8b3   :  { %19002 = vmatprep.subr.bf16.mxu1 %v23010_v41 }
 0x8b6   :  { %19004 = vmatpush3.bf16.msra.mxu1 %v19003_v9  ;;  %v23128_v9 = vld [vmem:[#allocation45_spill] sm:$0xff] }
 0x8b7   :  { %19005 = vmatprep.subr.bf16.mxu1 %v23010_v41 }
 0x8ba   :  { %19007 = vmatpush3.bf16.msra.mxu1 %v19006_v60 }
 0x8bb   :  { %19020 = vmatprep.subr.bf16.mxu1 %v23010_v41 }
 0x948   :  { %v9438_v50 = vpop.f32.mrb[150].mxu1 }
 0x949   :  { %v22200_v28 = vadd.f32 %v9438_v50, %v22087_v4  ;;  %v17225_v44 = vpop.f32.mrb[151].mxu1 }
 0x94a   :  { %v23129_v44 = vld [vmem:[#allocation46_spill] sm:$0xff] }
 0x950   :  { %v9649_v33 = vpop.f32.mrb[152].mxu1 }
 0x951   :  { %v9653_v27 = vadd.f32 %v9649_v33, %v23122_v23  ;;  %v17258_v45 = vpop.f32.mrb[153].mxu1 }
 0x952   :  { %v11919_v45 = vld [vmem:[%s22932_s8 + $0x20] sm:$0xff] }
 0x953   :  { %v9724_v18 = vadd.f32 %v23123_v29, %v9653_v27  ;;  %v11920_v29 = vld [vmem:[%s22932_s8 + $0x28] sm:$0xff] }
 0x958   :  { %v9791_v15 = vpop.f32.mrb[154].mxu1 }
 0x959   :  { %v9795_v25 = vadd.f32 %v9791_v15, %v9724_v18  ;;  %v17280_v52 = vpop.f32.mrb[155].mxu1  ;;  %v22330_v18 = vpack.c.bf16 %v11920_v29, %v11919_v45  ;;  %v14770_v29 = vld [vmem:[%s22932_s8 + $0xa0] sm:$0xff] }
 0x95b   :  { %v9866_v55 = vadd.f32 %v23124_v30, %v9795_v25 }
 0x960   :  { %v9933_v13 = vpop.f32.mrb[156].mxu1 }
 0x961   :  { %v9937_v42 = vadd.f32 %v9933_v13, %v9866_v55  ;;  %v17302_v56 = vpop.f32.mrb[157].mxu1  ;;  %v23132_v55 = vld [vmem:[#allocation47_spill] sm:$0xff] }
 0x962   :  { %v23133_v56 = vld [vmem:[#allocation48_spill] sm:$0xff] }
 0x963   :  { %v10008_v57 = vadd.f32 %v23125_v2, %v9937_v42 }
 0x968   :  { %v10075_v31 = vpop.f32.mrb[158].mxu1 }
 0x969   :  { %v10079_v4 = vadd.f32 %v10075_v31, %v10008_v57  ;;  %v17324_v51 = vpop.f32.mrb[159].mxu1 }
 0x96b   :  { %v10150_v26 = vadd.f32 %v23126_v46, %v10079_v4 }
 0x970   :  { %v10220_v54 = vpop.f32.mrb[160].mxu1 }
 0x971   :  { %v10224_v38 = vadd.f32 %v10220_v54, %v10150_v26  ;;  %v17346_v0 = vpop.f32.mrb[161].mxu1 }
 0x973   :  { %v10298_v48 = vadd.f32 %v23127_v61, %v10224_v38  ;;  %v23134_v38 = vld [vmem:[#allocation29_spill] sm:$0xff] }
 0x978   :  { %v10365_v40 = vpop.f32.mrb[162].mxu1 }
 0x979   :  { %v10369_v35 = vadd.f32 %v10365_v40, %v10298_v48  ;;  %v17368_v8 = vpop.f32.mrb[163].mxu1  ;;  %v23135_v40 = vld [vmem:[#allocation30_spill] sm:$0xff] }
 0x97b   :  { %v10440_v6 = vadd.f32 %v23128_v9, %v10369_v35 }
 0x980   :  { %v10510_v7 = vpop.f32.mrb[164].mxu1 }
 0x981   :  { %v10514_v60 = vadd.f32 %v10510_v7, %v10440_v6  ;;  %v17390_v50 = vpop.f32.mrb[165].mxu1  ;;  %v23136_v7 = vld [vmem:[#allocation31_spill] sm:$0xff] }
 0x983   :  { %v10588_v33 = vadd.f32 %v23129_v44, %v10514_v60 }
 0x985   :  { %v10589_v23 = vadd.f32 %v21976_v53, %v10588_v33 }
 0x987   :  { %v10590_v27 = vmax.f32 %v10589_v23, 0.0  ;;  %v23137_v23 = vld [vmem:[#allocation32_spill] sm:$0xff] }
 0x989   :  { %17419 = vmatmul.mubr.msk.f32.vlgmr.msra.gmra.mrb[166].mxu1 %vm3105_vm2, %v10590_v27 }
 0x98a   :  { %19022 = vmatpush3.bf16.msra.mxu1 %v20085_v14  ;;  %17451 = vmatprep.mubr.msk.f32.mxu1 %vm19478_vm0, %v22998_v39  ;;  %v23130_v14 = vld [vmem:[#allocation23_spill] sm:$0xff] }
 0x98b   :  { %19023 = vmatprep.subr.bf16.mxu1 %v23010_v41 }
 0x98e   :  { %19025 = vmatpush3.bf16.msra.mxu1 %v20104_v22  ;;  %v545_v22 = vadd.f32 %v22011_v62, %v23130_v14 }
 0x98f   :  { %19032 = vmatprep.subr.bf16.mxu1 %v23010_v41 }
 0x991   :  { %17452 = vmatmul.mubr.msk.f32.vlgmr.msra.gmra.mrb[168].mxu1 %vm666_vm1, %v631_v19  ;;  %v14743_v19 = vld [vmem:[%s22930_s6 + $0x238] sm:$0xff] }
 0x992   :  { %19034 = vmatpush3.bf16.msra.mxu1 %v20154_v43  ;;  %17473 = vmatprep.mubr.msk.f32.mxu1 %vm19478_vm0, %v22998_v39  ;;  %v647_v43 = vmax.f32 %v545_v22, 0.0  ;;  %v19114_v5 = vpack.c.bf16 %v14743_v19, %v14742_v21  ;;  %v14763_v21 = vld [vmem:[%s22933_s10 + $0x38] sm:$0xff] }
 0x993   :  { %19035 = vmatprep.subr.bf16.mxu1 %v23010_v41 }
 0x996   :  { %19037 = vmatpush3.bf16.msra.mxu1 %v23045_v1  ;;  %v14737_v1 = vld [vmem:[%s22930_s6 + $0x208] sm:$0xff] }
 0x997   :  { %19044 = vmatprep.subr.bf16.mxu1 %v23010_v41 }
 0x999   :  { %17474 = vmatmul.mubr.msk.f32.vlgmr.msra.gmra.mrb[170].mxu1 %vm666_vm1, %v21814_v3 }
 0x99a   :  { %19046 = vmatpush3.bf16.msra.mxu1 %v20221_v16  ;;  %17495 = vmatprep.mubr.msk.f32.mxu1 %vm19478_vm0, %v22998_v39  ;;  %v23131_v16 = vld [vmem:[#allocation28_spill] sm:$0xff] }
 0x99b   :  { %19047 = vmatprep.subr.bf16.mxu1 %v23010_v41 }
 0x99e   :  { %19049 = vmatpush3.bf16.msra.mxu1 %v23048_v37 }
 0x99f   :  { %19056 = vmatprep.subr.bf16.mxu1 %v23010_v41 }
 0x9a1   :  { %17496 = vmatmul.mubr.msk.f32.vlgmr.msra.gmra.mrb[172].mxu1 %vm666_vm1, %v639_v10  ;;  %v11915_v10 = vld [vmem:[%s22932_s8] sm:$0xff] }
 0x9a2   :  { %19058 = vmatpush3.bf16.msra.mxu1 %v20298_v59  ;;  %17517 = vmatprep.mubr.msk.f32.mxu1 %vm19478_vm0, %v22998_v39  ;;  %v585_v59 = vadd.f32 %v22011_v62, %v23131_v16  ;;  %v11916_v62 = vld [vmem:[%s22932_s8 + $0x8] sm:$0xff] }
 0x9a3   :  { %19059 = vmatprep.subr.bf16.mxu1 %v23010_v41  ;;  %v22310_v47 = vpack.c.bf16 %v11916_v62, %v11915_v10  ;;  %v14767_v10 = vld [vmem:[%s22932_s8 + $0x88] sm:$0xff] }
 0x9a5   :  { %19118 = vmatpush3.bf16.msra.mxu0 %v22310_v47 }
 0x9a6   :  { %19061 = vmatpush3.bf16.msra.mxu1 %v20326_v11  ;;  %v655_v11 = vmax.f32 %v585_v59, 0.0  ;;  %19119 = vmatprep.subr.bf16.mxu0 %v23010_v41  ;;  %v12009_v59 = vld [vmem:[%s22933_s10] sm:$0xff] }
 0x9a7   :  { %19068 = vmatprep.subr.bf16.mxu1 %v23010_v41 }
 0x9a9   :  { %17518 = vmatmul.mubr.msk.f32.vlgmr.msra.gmra.mrb[174].mxu1 %vm666_vm1, %v645_v34  ;;  %v11917_v34 = vld [vmem:[%s22932_s8 + $0x10] sm:$0xff] }
 0x9aa   :  { %19070 = vmatpush3.bf16.msra.mxu1 %v23052_v20  ;;  %17539 = vmatprep.mubr.msk.f32.mxu1 %vm19478_vm0, %v22998_v39  ;;  %v14738_v20 = vld [vmem:[%s22930_s6 + $0x210] sm:$0xff] }
 0x9ab   :  { %19071 = vmatprep.subr.bf16.mxu1 %v23010_v41 }
 0x9ae   :  { %19073 = vmatpush3.bf16.msra.mxu1 %v23054_v12  ;;  %v14739_v12 = vld [vmem:[%s22930_s6 + $0x218] sm:$0xff] }
 0x9af   :  { %19080 = vmatprep.subr.bf16.mxu1 %v23010_v41 }
 0x9b1   :  { %17540 = vmatmul.mubr.msk.f32.vlgmr.msra.gmra.mrb[176].mxu1 %vm666_vm1, %v647_v43  ;;  %v23138_v43 = vld [vmem:[#allocation33_spill] sm:$0xff] }
 0x9b2   :  { %19082 = vmatpush3.bf16.msra.mxu1 %v23055_v36  ;;  %17561 = vmatprep.mubr.msk.f32.mxu1 %vm19478_vm0, %v22998_v39  ;;  %v19108_v36 = vpack.c.bf16 %v14739_v12, %v14738_v20  ;;  %v12011_v20 = vld [vmem:[%s22933_s10 + $0x10] sm:$0xff]  ;;  %v12012_v12 = vld [vmem:[%s22933_s10 + $0x18] sm:$0xff] }
 0x9b3   :  { %19083 = vmatprep.subr.bf16.mxu1 %v23010_v41 }
 0x9b6   :  { %19085 = vmatpush3.bf16.msra.mxu1 %v20466_v58  ;;  %v14736_v58 = vld [vmem:[%s22930_s6 + $0x200] sm:$0xff] }
 0x9b7   :  { %19092 = vmatprep.subr.bf16.mxu1 %v23010_v41  ;;  %v19105_v37 = vpack.c.bf16 %v14737_v1, %v14736_v58 }
 0x9b9   :  { %17562 = vmatmul.mubr.msk.f32.vlgmr.msra.gmra.mrb[178].mxu1 %vm666_vm1, %v653_v17  ;;  %v22320_v17 = vpack.c.bf16 %v11918_v49, %v11917_v34  ;;  %v14768_v34 = vld [vmem:[%s22932_s8 + $0x90] sm:$0xff]  ;;  %v14769_v49 = vld [vmem:[%s22932_s8 + $0x98] sm:$0xff] }
 0x9ba   :  { %19094 = vmatpush3.bf16.msra.mxu1 %v23056_v24  ;;  %17583 = vmatprep.mubr.msk.f32.mxu1 %vm19478_vm0, %v22998_v39  ;;  %v14740_v24 = vld [vmem:[%s22930_s6 + $0x220] sm:$0xff]  ;;  %v22408_v45 = vpack.c.bf16 %v14769_v49, %v14768_v34 }
 0x9bb   :  { %19095 = vmatprep.subr.bf16.mxu1 %v23010_v41  ;;  %19121 = vmatpush3.bf16.msra.mxu0 %v22320_v17  ;;  %v14787_v49 = vld [vmem:[%s22932_s8 + $0xe0] sm:$0xff] }
 0x9bc   :  { %19122 = vmatprep.subr.bf16.mxu0 %v23010_v41 }
 0x9be   :  { %19097 = vmatpush3.bf16.msra.mxu1 %v23058_v63  ;;  %v14741_v63 = vld [vmem:[%s22930_s6 + $0x228] sm:$0xff] }
 0x9bf   :  { %19104 = vmatprep.subr.bf16.mxu1 %v23010_v41  ;;  %v19111_v3 = vpack.c.bf16 %v14741_v63, %v14740_v24  ;;  %19124 = vmatpush3.bf16.msra.mxu0 %v22330_v18  ;;  %v14761_v24 = vld [vmem:[%s22933_s10 + $0x28] sm:$0xff] }
 0x9c0   :  { %19125 = vmatprep.subr.bf16.mxu0 %v23010_v41 }
 0x9c1   :  { %17584 = vmatmul.mubr.msk.f32.vlgmr.msra.gmra.mrb[180].mxu1 %vm666_vm1, %v655_v11  ;;  %v12010_v11 = vld [vmem:[%s22933_s10 + $0x8] sm:$0xff] }
 0x9c2   :  { %17613 = vmatprep.mubr.msk.f32.mxu1 %vm19478_vm0, %v22998_v39  ;;  %19106 = vmatpush3.bf16.msra.mxu1 %v19105_v37  ;;  %v22352_v1 = vpack.c.bf16 %v12010_v11, %v12009_v59  ;;  %v14778_v59 = vld [vmem:[%s22933_s10 + $0x48] sm:$0xff] }
 0x9c3   :  { %19107 = vmatprep.subr.bf16.mxu1 %v23010_v41 }
 0x9c6   :  { %19109 = vmatpush3.bf16.msra.mxu1 %v19108_v36  ;;  %v22362_v36 = vpack.c.bf16 %v12012_v12, %v12011_v20  ;;  %v14780_v20 = vld [vmem:[%s22933_s10 + $0x58] sm:$0xff] }
 0x9c7   :  { %19110 = vmatprep.subr.bf16.mxu1 %v23010_v41 }
 0x9ca   :  { %19112 = vmatpush3.bf16.msra.mxu1 %v19111_v3  ;;  %v14762_v3 = vld [vmem:[%s22933_s10 + $0x30] sm:$0xff] }
 0x9cb   :  { %19113 = vmatprep.subr.bf16.mxu1 %v23010_v41  ;;  %v22385_v19 = vpack.c.bf16 %v14763_v21, %v14762_v3 }
 0x9ce   :  { %19115 = vmatpush3.bf16.msra.mxu1 %v19114_v5  ;;  %v14766_v5 = vld [vmem:[%s22932_s8 + $0x80] sm:$0xff] }
 0x9cf   :  { %19128 = vmatprep.subr.bf16.mxu1 %v23010_v41  ;;  %v22397_v62 = vpack.c.bf16 %v14767_v10, %v14766_v5  ;;  %v14785_v5 = vld [vmem:[%s22932_s8 + $0xd0] sm:$0xff]  ;;  %v14786_v10 = vld [vmem:[%s22932_s8 + $0xd8] sm:$0xff] }
 0x9d0   :  { %v22582_v34 = vpack.c.bf16 %v14786_v10, %v14785_v5  ;;  %v22658_v5 = vld [vmem:[%s22937_s11 + $0x2] ss:$0 sm:$0xff] }
 0xa5c   :  { %v10669_v15 = vpop.f32.mrb[166].mxu1 }
 0xa5d   :  { %v22335_v25 = vadd.f32 %v10669_v15, %v22200_v28  ;;  %v17420_v52 = vpop.f32.mrb[167].mxu1  ;;  %v14771_v15 = vld [vmem:[%s22932_s8 + $0xa8] sm:$0xff] }
 0xa5e   :  { %v22420_v52 = vpack.c.bf16 %v14771_v15, %v14770_v29  ;;  %v14788_v29 = vld [vmem:[%s22932_s8 + $0xe8] sm:$0xff] }
 0xa5f   :  { %v22598_v15 = vpack.c.bf16 %v14788_v29, %v14787_v49 }
 0xa64   :  { %v10880_v30 = vpop.f32.mrb[168].mxu1 }
 0xa65   :  { %v10884_v13 = vadd.f32 %v10880_v30, %v23132_v55  ;;  %v17453_v42 = vpop.f32.mrb[169].mxu1  ;;  %v11921_v30 = vld [vmem:[%s22932_s8 + $0x30] sm:$0xff]  ;;  %v11922_v55 = vld [vmem:[%s22932_s8 + $0x38] sm:$0xff] }
 0xa66   :  { %v22434_v42 = vpack.c.bf16 %v11922_v55, %v11921_v30  ;;  %v14789_v30 = vld [vmem:[%s22932_s8 + $0xf0] sm:$0xff]  ;;  %v14790_v55 = vld [vmem:[%s22932_s8 + $0xf8] sm:$0xff] }
 0xa67   :  { %v10955_v2 = vadd.f32 %v23133_v56, %v10884_v13  ;;  %v14772_v13 = vld [vmem:[%s22932_s8 + $0xb0] sm:$0xff]  ;;  %v14773_v56 = vld [vmem:[%s22932_s8 + $0xb8] sm:$0xff] }
 0xa68   :  { %19127 = vmatpush3.bf16.msra.mxu0 %v22434_v42 }
 0xa69   :  { %19134 = vmatprep.subr.bf16.mxu0 %v23010_v41 }
 0xa6c   :  { %v11022_v57 = vpop.f32.mrb[170].mxu1 }
 0xa6d   :  { %v11026_v31 = vadd.f32 %v11022_v57, %v10955_v2  ;;  %v17475_v4 = vpop.f32.mrb[171].mxu1  ;;  %v22439_v2 = vpack.c.bf16 %v14773_v56, %v14772_v13  ;;  %v19480_v57 = vmov 0   ;;  %v22610_v13 = vpack.c.bf16 %v14790_v55, %v14789_v30  ;;  %v14746_v56 = vld [vmem:[%s22936_s9] ss:$0 sm:$0xff] }
 0xa6e   :  { %19408 = vset.pattern.permute.xlu0 %v19480_v57 }
 0xa6f   :  { %v11097_v51 = vadd.f32 %v21628_v32, %v11026_v31  ;;  %v11914_v31 = vld [vmem:[%s22934_s1] sm:$0xff] }
 0xa70   :  { %11926 = vperm.xlu0 %19408, %v11914_v31  }
 0xa74   :  { %v11164_v46 = vpop.f32.mrb[172].mxu1 }
 0xa75   :  { %v11168_v26 = vadd.f32 %v11164_v46, %v11097_v51  ;;  %v17497_v54 = vpop.f32.mrb[173].mxu1  ;;  %v14745_v51 = vld [vmem:[%s22935_s7] ss:$0 sm:$0xff] }
 0xa76   :  { %v14749_v46 = vld [vmem:[%s22932_s8 + $0x40] sm:$0xff] }
 0xa77   :  { %v11239_v0 = vadd.f32 %v23134_v38, %v11168_v26  ;;  %v14750_v38 = vld [vmem:[%s22932_s8 + $0x48] sm:$0xff] }
 0xa7c   :  { %v11306_v61 = vpop.f32.mrb[174].mxu1 }
 0xa7d   :  { %v11310_v28 = vadd.f32 %v11306_v61, %v11239_v0  ;;  %v17519_v48 = vpop.f32.mrb[175].mxu1  ;;  %v14794_v0 = vld [vmem:[%s22933_s10 + $0x60] sm:$0xff]  ;;  %v14795_v61 = vld [vmem:[%s22933_s10 + $0x68] sm:$0xff] }
 0xa7e   :  { %v22464_v48 = vpack.c.bf16 %v14750_v38, %v14749_v46  ;;  %v22632_v38 = vld [vmem:[%s22937_s11] ss:$0 sm:$0xff] }
 0xa7f   :  { %v11381_v35 = vadd.f32 %v23135_v40, %v11310_v28  ;;  %v22466_v40 = vpack.c.bf16 %v14795_v61, %v14794_v0 }
 0xa84   :  { %v11451_v8 = vpop.f32.mrb[176].mxu1 }
 0xa85   :  { %v11455_v9 = vadd.f32 %v11451_v8, %v11381_v35  ;;  %v17541_v6 = vpop.f32.mrb[177].mxu1  ;;  %v14752_v8 = vld [vmem:[%s22932_s8 + $0x58] sm:$0xff] }
 0xa86   :  { %v14797_v6 = vld [vmem:[%s22933_s10 + $0x78] sm:$0xff] }
 0xa87   :  { %v11529_v60 = vadd.f32 %v23136_v7, %v11455_v9  ;;  %v14796_v9 = vld [vmem:[%s22933_s10 + $0x70] sm:$0xff] }
 0xa8c   :  { %v11596_v50 = vpop.f32.mrb[178].mxu1 }
 0xa8d   :  { %v11600_v44 = vadd.f32 %v11596_v50, %v11529_v60  ;;  %v17563_v33 = vpop.f32.mrb[179].mxu1  ;;  %v22490_v60 = vpack.c.bf16 %v14797_v6, %v14796_v9  ;;  %v14758_v9 = vld [vmem:[%s22936_s9 + $0x1] ss:$0 sm:$0xff] }
 0xa8e   :  { %v14754_v33 = vld [vmem:[%s22932_s8 + $0x68] sm:$0xff] }
 0xa8f   :  { %v11671_v32 = vadd.f32 %v23137_v23, %v11600_v44  ;;  %v14753_v44 = vld [vmem:[%s22932_s8 + $0x60] sm:$0xff] }
 0xa94   :  { %v11741_v27 = vpop.f32.mrb[180].mxu1 }
 0xa95   :  { %v11745_v14 = vadd.f32 %v11741_v27, %v11671_v32  ;;  %v17585_v22 = vpop.f32.mrb[181].mxu1  ;;  %v22508_v32 = vpack.c.bf16 %v14754_v33, %v14753_v44  ;;  %v14755_v27 = vld [vmem:[%s22932_s8 + $0x70] sm:$0xff]  ;;  %v14775_v44 = vld [vmem:[%s22936_s9 + $0x2] ss:$0 sm:$0xff] }
 0xa97   :  { %v11819_v16 = vadd.f32 %v23138_v43, %v11745_v14  ;;  %v14756_v14 = vld [vmem:[%s22932_s8 + $0x78] sm:$0xff] }
 0xa98   :  { %v22521_v22 = vpack.c.bf16 %v14756_v14, %v14755_v27  ;;  %v22648_v27 = vld [vmem:[%s22937_s11 + $0x1] ss:$0 sm:$0xff] }
 0xa99   :  { %v11820_v58 = vadd.f32 %v21976_v53, %v11819_v16  ;;  %v14760_v53 = vld [vmem:[%s22933_s10 + $0x20] sm:$0xff] }
 0xa9a   :  { %v22374_v63 = vpack.c.bf16 %v14761_v24, %v14760_v53  ;;  %v14777_v16 = vld [vmem:[%s22933_s10 + $0x40] sm:$0xff]  ;;  %v14784_v24 = vld [vmem:[%s22932_s8 + $0xc8] sm:$0xff] }
 0xa9b   :  { %v11821_v37 = vmax.f32 %v11820_v58, 0.0  ;;  %v22537_v58 = vpack.c.bf16 %v14778_v59, %v14777_v16  ;;  %v14783_v53 = vld [vmem:[%s22932_s8 + $0xc0] sm:$0xff] }
 0xa9c   :  { %v22565_v3 = vpack.c.bf16 %v14784_v24, %v14783_v53 }
 0xa9d   :  { %17614 = vmatmul.mubr.msk.f32.vlgmr.msra.gmra.mrb[182].mxu1 %vm3105_vm2, %v11821_v37  ;;  %v14779_v37 = vld [vmem:[%s22933_s10 + $0x50] sm:$0xff] }
 0xa9e   :  { %19130 = vmatpush3.bf16.msra.mxu1 %v22352_v1  ;;  %17643 = vmatprep.mubr.msk.f32.mxu1 %vm19478_vm0, %v22998_v39  ;;  %v22551_v12 = vpack.c.bf16 %v14780_v20, %v14779_v37 }
 0xa9f   :  { %19131 = vmatprep.subr.bf16.mxu1 %v23010_v41 }
 0xaa2   :  { %19133 = vmatpush3.bf16.msra.mxu1 %v22362_v36 }
 0xaa3   :  { %19146 = vmatprep.subr.bf16.mxu1 %v23010_v41 }
 0xaa5   :  { %17644 = vmatmul.mubr.f32.vlgmr.msra.gmra.mrb[184].mxu1 %v22998_v39 }
 0xaa6   :  { %19148 = vmatpush3.bf16.msra.mxu1 %v22374_v63  ;;  %17673 = vmatprep.mubr.msk.f32.mxu1 %vm19478_vm0, %v22998_v39 }
 0xaa7   :  { %19149 = vmatprep.subr.bf16.mxu1 %v23010_v41 }
 0xaaa   :  { %19151 = vmatpush3.bf16.msra.mxu1 %v22385_v19 }
 0xaab   :  { %19152 = vmatprep.subr.bf16.mxu1 %v23010_v41 }
 0xaad   :  { %17674 = vmatmul.mubr.f32.vlgmr.msra.gmra.mrb[186].mxu1 %v22998_v39 }
 0xaae   :  { %19154 = vmatpush3.bf16.msra.mxu1 %v22397_v62  ;;  %17692 = vmatprep.mubr.msk.f32.mxu1 %vm19478_vm0, %v22998_v39 }
 0xaaf   :  { %19155 = vmatprep.subr.bf16.mxu1 %v23010_v41 }
 0xab2   :  { %19157 = vmatpush3.bf16.msra.mxu1 %v22408_v45 }
 0xab3   :  { %19158 = vmatprep.subr.bf16.mxu1 %v23010_v41 }
 0xab6   :  { %19160 = vmatpush3.bf16.msra.mxu1 %v22420_v52 }
 0xab7   :  { %19161 = vmatprep.subr.bf16.mxu1 %v23010_v41 }
 0xaba   :  { %19163 = vmatpush3.bf16.msra.mxu1 %v22439_v2 }
 0xabb   :  { %19182 = vmatprep.subr.bf16.mxu1 %v23010_v41 }
 0xaef   :  { %v11927_v57 = vpop.permute.xlu0 %11926 }
 0xaf0   :  { %v22626_v31 = vmul.f32 %v14746_v56, %v11927_v57  ;;  %v22639_v6 = vmul.f32 %v14758_v9, %v11927_v57  ;;  %v22650_v14 = vmul.f32 %v14775_v44, %v11927_v57  ;;  %v14792_v56 = vld [vmem:[%s22936_s9 + $0x3] ss:$0 sm:$0xff] }
 0xb70   :  { %v11900_v4 = vpop.f32.mrb[182].mxu1 }
 0xb71   :  { %v11904_v26 = vadd.f32 %v11900_v4, %v22335_v25  ;;  %v17615_v54 = vpop.f32.mrb[183].mxu1  ;;  %v14751_v25 = vld [vmem:[%s22932_s8 + $0x50] sm:$0xff] }
 0xb72   :  { %v22488_v7 = vpack.c.bf16 %v14752_v8, %v14751_v25 }
 0xb73   :  { %v11912_v28 = vadd.f32 %v14745_v51, %v11904_v26 }
 0xb75   :  { %v22471_v35 = vmax.f32 %v11912_v28, 0.0 }
 0xb77   :  { %17633 = vmatmul.mubr.msk.f32.vlgmr.msra.gmra.mrb[250].mxu0 %vm3105_vm2, %v22471_v35  ;;  %17693 = vmatmul.mubr.msk.f32.vlgmr.msra.gmra.mrb[188].mxu1 %vm3105_vm2, %v22471_v35  ;;  %v22569_v21 = vrot.slane %v22471_v35, 2 }
 0xb78   :  { %19136 = vmatpush3.bf16.msra.mxu0 %v22464_v48  ;;  %19184 = vmatpush3.bf16.msra.mxu1 %v22466_v40  ;;  %v22492_v50 = vpop.f32.mrb[184].mxu1 }
 0xb79   :  { %19137 = vmatprep.subr.bf16.mxu0 %v23010_v41  ;;  %19185 = vmatprep.subr.bf16.mxu1 %v23010_v41  ;;  %v17645_v23 = vpop.f32.mrb[185].mxu1 }
 0xb7a   :  { %17733 = vmatprep.mubr.msk.f32.mxu1 %vm19478_vm0, %v22998_v39  ;;  %17662 = vmatprep.mubr.msk.f32.mxu0 %vm19478_vm0, %v22998_v39 }
 0xb7c   :  { %19139 = vmatpush3.bf16.msra.mxu0 %v22488_v7  ;;  %19187 = vmatpush3.bf16.msra.mxu1 %v22490_v60 }
 0xb7d   :  { %19140 = vmatprep.subr.bf16.mxu0 %v23010_v41  ;;  %19188 = vmatprep.subr.bf16.mxu1 %v23010_v41 }
 0xb7f   :  { %17734 = vmatmul.mubr.f32.vlgmr.msra.gmra.mrb[190].mxu1 %v22998_v39 }
 0xb80   :  { %19142 = vmatpush3.bf16.msra.mxu0 %v22508_v32  ;;  %19190 = vmatpush3.bf16.msra.mxu1 %v22310_v47  ;;  %v22523_v43 = vpop.f32.mrb[186].mxu1 }
 0xb81   :  { %19143 = vmatprep.subr.bf16.mxu0 %v23010_v41  ;;  %19191 = vmatprep.subr.bf16.mxu1 %v23010_v41  ;;  %v17675_v11 = vpop.f32.mrb[187].mxu1 }
 0xb82   :  { %17752 = vmatprep.mubr.msk.f32.mxu1 %vm19478_vm0, %v22998_v39 }
 0xb84   :  { %19145 = vmatpush3.bf16.msra.mxu0 %v22521_v22  ;;  %19193 = vmatpush3.bf16.msra.mxu1 %v22320_v17 }
 0xb85   :  { %19164 = vmatprep.subr.bf16.mxu0 %v23010_v41  ;;  %19194 = vmatprep.subr.bf16.mxu1 %v23010_v41 }
 0xb87   :  { %17663 = vmatmul.mubr.msk.f32.vlgmr.msra.gmra.mrb[252].mxu0 %vm3105_vm2, %v22471_v35 }
 0xb88   :  { %19166 = vmatpush3.bf16.msra.mxu0 %v22537_v58  ;;  %19196 = vmatpush3.bf16.msra.mxu1 %v22330_v18 }
 0xb89   :  { %19167 = vmatprep.subr.bf16.mxu0 %v23010_v41  ;;  %19197 = vmatprep.subr.bf16.mxu1 %v23010_v41 }
 0xb8a   :  { %17703 = vmatprep.mubr.msk.f32.mxu0 %vm19478_vm0, %v22998_v39 }
 0xb8c   :  { %19169 = vmatpush3.bf16.msra.mxu0 %v22551_v12  ;;  %19199 = vmatpush3.bf16.msra.mxu1 %v22434_v42 }
 0xb8d   :  { %19170 = vmatprep.subr.bf16.mxu0 %v23010_v41  ;;  %19218 = vmatprep.subr.bf16.mxu1 %v23010_v41 }
 0xb8f   :  { %17704 = vmatmul.mubr.f32.vlgmr.msra.gmra.mrb[254].mxu0 %v22998_v39  ;;  %17753 = vmatmul.mubr.msk.f32.vlgmr.msra.gmra.mrb[192].mxu1 %vm3105_vm2, %v22569_v21 }
 0xb90   :  { %19172 = vmatpush3.bf16.msra.mxu0 %v22565_v3  ;;  %17722 = vmatprep.mubr.msk.f32.mxu0 %vm19478_vm0, %v22998_v39 }
 0xb91   :  { %19173 = vmatprep.subr.bf16.mxu0 %v23010_v41  ;;  %19220 = vmatpush3.bf16.msra.mxu1 %v22374_v63 }
 0xb92   :  { %19221 = vmatprep.subr.bf16.mxu1 %v23010_v41  ;;  %17793 = vmatprep.mubr.msk.f32.mxu1 %vm19478_vm0, %v22998_v39 }
 0xb94   :  { %19175 = vmatpush3.bf16.msra.mxu0 %v22582_v34 }
 0xb95   :  { %19176 = vmatprep.subr.bf16.mxu0 %v23010_v41  ;;  %19223 = vmatpush3.bf16.msra.mxu1 %v22385_v19 }
 0xb96   :  { %19224 = vmatprep.subr.bf16.mxu1 %v23010_v41 }
 0xb98   :  { %19178 = vmatpush3.bf16.msra.mxu0 %v22598_v15 }
 0xb99   :  { %19179 = vmatprep.subr.bf16.mxu0 %v23010_v41 }
 0xb9c   :  { %19181 = vmatpush3.bf16.msra.mxu0 %v22610_v13 }
 0xb9d   :  { %19200 = vmatprep.subr.bf16.mxu0 %v23010_v41 }
 0xb9f   :  { %17723 = vmatmul.mubr.msk.f32.vlgmr.msra.gmra.mrb[0].mxu0 %vm3105_vm2, %v22471_v35 }
 0xba0   :  { %19202 = vmatpush3.bf16.msra.mxu0 %v22352_v1  ;;  %17763 = vmatprep.mubr.msk.f32.mxu0 %vm19478_vm0, %v22998_v39 }
 0xba1   :  { %19203 = vmatprep.subr.bf16.mxu0 %v23010_v41 }
 0xba4   :  { %19205 = vmatpush3.bf16.msra.mxu0 %v22362_v36 }
 0xba5   :  { %19206 = vmatprep.subr.bf16.mxu0 %v23010_v41 }
 0xc4a   :  { %v12005_v4 = vpop.f32.mrb[250].mxu0  ;;  %v12352_v51 = vpop.f32.mrb[188].mxu1 }
 0xc4b   :  { %v12006_v46 = vadd.f32 %v12005_v4, %v22626_v31  ;;  %v17634_v26 = vpop.f32.mrb[251].mxu0  ;;  %v17694_v54 = vpop.f32.mrb[189].mxu1  ;;  %v12353_v37 = vadd.f32 %v12352_v51, %v22650_v14 }
 0xc4c   :  { %v22666_v26 = vmul.f32 %v14792_v56, %v11927_v57 }
 0xc4d   :  { %v12086_v0 = vadd.f32 %v22492_v50, %v12006_v46 }
 0xc4f   :  { %v12094_v61 = vadd.f32 %v22632_v38, %v12086_v0 }
 0xc51   :  { %v14800_v28 = vmul.f32 -1.442695, %v12094_v61 }
 0xc52   :  { %v12600_v25 = vpop.f32.mrb[190].mxu1 }
 0xc53   :  { %v17735_v8 = vpop.f32.mrb[191].mxu1  ;;  %19409 = vpow2.f32 %v14800_v28 }
 0xc54   :  { %v22672_v8 = vld [vmem:[%s22937_s11 + $0x3] ss:$0 sm:$0xff] }
 0xc5a   :  { %v12179_v33 = vpop.f32.mrb[252].mxu0 }
 0xc5b   :  { %v12180_v23 = vadd.f32 %v12179_v33, %v22639_v6  ;;  %v17664_v50 = vpop.f32.mrb[253].mxu0 }
 0xc5d   :  { %v12258_v16 = vadd.f32 %v22523_v43, %v12180_v23  ;;  %v19410_v59 = vpop.eup %19409 }
 0xc5e   :  { %v12617_v53 = vadd.f32 1.0, %v19410_v59 }
 0xc5f   :  { %v12267_v11 = vadd.f32 %v22648_v27, %v12258_v16 }
 0xc61   :  { %v14801_v20 = vmul.f32 -1.442695, %v12267_v11 }
 0xc62   :  { %v12427_v24 = vpop.f32.mrb[254].mxu0  ;;  %v22660_v10 = vpop.f32.mrb[192].mxu1 }
 0xc63   :  { %19411 = vpow2.f32 %v14801_v20  ;;  %v12431_v49 = vadd.f32 %v12427_v24, %v12353_v37  ;;  %v17705_v29 = vpop.f32.mrb[255].mxu0  ;;  %v17754_v30 = vpop.f32.mrb[193].mxu1 }
 0xc64   :  { %19413 = vrcp.f32 %v12617_v53 }
 0xc65   :  { %v12440_v43 = vadd.f32 %v22658_v5, %v12431_v49 }
 0xc67   :  { %19415 = vtanh.f32 %v12440_v43 }
 0xc6d   :  { %v19412_v55 = vpop.eup %19411 }
 0xc6e   :  { %v12623_v4 = vadd.f32 1.0, %v19412_v55  ;;  %v19414_v51 = vpop.eup %19413 }
 0xc70   :  { %19417 = vrcp.f32 %v12623_v4  ;;  %v12790_v4 = vrot.slane %v22639_v6, 2 }
 0xc71   :  { %v19416_v46 = vpop.eup %19415 }
 0xc72   :  { %v12634_v54 = vmul.f32 %v19416_v46, %v19414_v51  ;;  %v12525_v0 = vpop.f32.mrb[0].mxu0 }
 0xc73   :  { %v12526_v61 = vadd.f32 %v12525_v0, %v22666_v26  ;;  %v17724_v28 = vpop.f32.mrb[1].mxu0 }
 0xc75   :  { %v12604_v9 = vadd.f32 %v12600_v25, %v12526_v61  ;;  %v22737_v25 = vrot.slane %v22471_v35, 4 }
 0xc77   :  { %v12613_v44 = vadd.f32 %v22672_v8, %v12604_v9 }
 0xc79   :  { %v14802_v33 = vmul.f32 -1.442695, %v12613_v44  ;;  %v12935_v44 = vrot.slane %v22650_v14, 2 }
 0xc7a   :  { %v19418_v23 = vpop.eup %19417 }
 0xc7b   :  { %v12633_v50 = vmul.f32 0.0, %v19418_v23  ;;  %19419 = vpow2.f32 %v14802_v33 }
 0xc7d   :  { %v22675_v16 = vadd.f32 %v12634_v54, %v12633_v50 }
 0xc7f   :  { %19421 = vtanh.f32 %v22675_v16 }
 0xc85   :  { %v19420_v57 = vpop.eup %19419 }
 0xc86   :  { %v12630_v59 = vadd.f32 1.0, %v19420_v57 }
 0xc88   :  { %19423 = vrcp.f32 %v12630_v59 }
 0xc89   :  { %v19422_v11 = vpop.eup %19421 }
 0xc92   :  { %v19424_v37 = vpop.eup %19423 }
 0xc93   :  { %v12637_v20 = vmul.f32 %v19424_v37, %v19422_v11 }
 0xc95   :  { %17764 = vmatmul.mubr.msk.f32.vlgmr.msra.gmra.mrb[2].mxu0 %vm666_vm1, %v12637_v20  ;;  %17794 = vmatmul.mubr.msk.f32.vlgmr.msra.gmra.mrb[194].mxu1 %vm666_vm1, %v12637_v20 }
 0xc96   :  { %19208 = vmatpush3.bf16.msra.mxu0 %v22464_v48  ;;  %19226 = vmatpush3.bf16.msra.mxu1 %v22397_v62 }
 0xc97   :  { %19209 = vmatprep.subr.bf16.mxu0 %v23010_v41  ;;  %19227 = vmatprep.subr.bf16.mxu1 %v23010_v41 }
 0xc98   :  { %17782 = vmatprep.mubr.msk.f32.mxu0 %vm19478_vm0, %v22998_v39  ;;  %17812 = vmatprep.mubr.msk.f32.mxu1 %vm19478_vm0, %v22998_v39 }
 0xc9a   :  { %19211 = vmatpush3.bf16.msra.mxu0 %v22488_v7  ;;  %19229 = vmatpush3.bf16.msra.mxu1 %v22408_v45 }
 0xc9b   :  { %19212 = vmatprep.subr.bf16.mxu0 %v23010_v41  ;;  %19230 = vmatprep.subr.bf16.mxu1 %v23010_v41 }
 0xc9e   :  { %19214 = vmatpush3.bf16.msra.mxu0 %v22508_v32  ;;  %19232 = vmatpush3.bf16.msra.mxu1 %v22420_v52 }
 0xc9f   :  { %19215 = vmatprep.subr.bf16.mxu0 %v23010_v41  ;;  %19233 = vmatprep.subr.bf16.mxu1 %v23010_v41 }
 0xca2   :  { %19217 = vmatpush3.bf16.msra.mxu0 %v22521_v22  ;;  %19235 = vmatpush3.bf16.msra.mxu1 %v22439_v2 }
 0xca3   :  { %19236 = vmatprep.subr.bf16.mxu0 %v23010_v41  ;;  %19254 = vmatprep.subr.bf16.mxu1 %v23010_v41 }
 0xca5   :  { %17783 = vmatmul.mubr.msk.f32.vlgmr.msra.gmra.mrb[4].mxu0 %vm3105_vm2, %v22569_v21  ;;  %17813 = vmatmul.mubr.msk.f32.vlgmr.msra.gmra.mrb[196].mxu1 %vm3105_vm2, %v22569_v21 }
 0xca6   :  { %19238 = vmatpush3.bf16.msra.mxu0 %v22537_v58  ;;  %19256 = vmatpush3.bf16.msra.mxu1 %v22466_v40 }
 0xca7   :  { %19239 = vmatprep.subr.bf16.mxu0 %v23010_v41  ;;  %19257 = vmatprep.subr.bf16.mxu1 %v23010_v41 }
 0xca8   :  { %17823 = vmatprep.mubr.msk.f32.mxu0 %vm19478_vm0, %v22998_v39  ;;  %17853 = vmatprep.mubr.msk.f32.mxu1 %vm19478_vm0, %v22998_v39 }
 0xcaa   :  { %19241 = vmatpush3.bf16.msra.mxu0 %v22551_v12  ;;  %19259 = vmatpush3.bf16.msra.mxu1 %v22490_v60 }
 0xcab   :  { %19242 = vmatprep.subr.bf16.mxu0 %v23010_v41  ;;  %19260 = vmatprep.subr.bf16.mxu1 %v23010_v41 }
 0xcad   :  { %17824 = vmatmul.mubr.msk.f32.vlgmr.msra.gmra.mrb[6].mxu0 %vm666_vm1, %v12637_v20  ;;  %17854 = vmatmul.mubr.msk.f32.vlgmr.msra.gmra.mrb[198].mxu1 %vm666_vm1, %v12637_v20 }
 0xcae   :  { %19244 = vmatpush3.bf16.msra.mxu0 %v22565_v3  ;;  %19262 = vmatpush3.bf16.msra.mxu1 %v22310_v47 }
 0xcaf   :  { %19245 = vmatprep.subr.bf16.mxu0 %v23010_v41  ;;  %19263 = vmatprep.subr.bf16.mxu1 %v23010_v41 }
 0xcb0   :  { %17842 = vmatprep.mubr.msk.f32.mxu0 %vm19478_vm0, %v22998_v39  ;;  %17872 = vmatprep.mubr.msk.f32.mxu1 %vm19478_vm0, %v22998_v39 }
 0xcb2   :  { %19247 = vmatpush3.bf16.msra.mxu0 %v22582_v34  ;;  %19265 = vmatpush3.bf16.msra.mxu1 %v22320_v17 }
 0xcb3   :  { %19248 = vmatprep.subr.bf16.mxu0 %v23010_v41  ;;  %19266 = vmatprep.subr.bf16.mxu1 %v23010_v41 }
 0xcb6   :  { %19250 = vmatpush3.bf16.msra.mxu0 %v22598_v15  ;;  %19268 = vmatpush3.bf16.msra.mxu1 %v22330_v18 }
 0xcb7   :  { %19251 = vmatprep.subr.bf16.mxu0 %v23010_v41  ;;  %19269 = vmatprep.subr.bf16.mxu1 %v23010_v41 }
 0xcba   :  { %19253 = vmatpush3.bf16.msra.mxu0 %v22610_v13  ;;  %19271 = vmatpush3.bf16.msra.mxu1 %v22434_v42 }
 0xcbb   :  { %19272 = vmatprep.subr.bf16.mxu0 %v23010_v41  ;;  %19290 = vmatprep.subr.bf16.mxu1 %v23010_v41 }
 0xcbd   :  { %17843 = vmatmul.mubr.msk.f32.vlgmr.msra.gmra.mrb[8].mxu0 %vm3105_vm2, %v22569_v21  ;;  %17873 = vmatmul.mubr.msk.f32.vlgmr.msra.gmra.mrb[200].mxu1 %vm3105_vm2, %v22737_v25  ;;  %v12640_v21 = vrot.slane %v22626_v31, 2 }
 0xcbe   :  { %19274 = vmatpush3.bf16.msra.mxu0 %v22352_v1  ;;  %19292 = vmatpush3.bf16.msra.mxu1 %v22374_v63 }
 0xcbf   :  { %19275 = vmatprep.subr.bf16.mxu0 %v23010_v41  ;;  %19293 = vmatprep.subr.bf16.mxu1 %v23010_v41  ;;  %v12711_v53 = vadd.f32 %v22660_v10, %v12640_v21 }
 0xcc0   :  { %17883 = vmatprep.mubr.msk.f32.mxu0 %vm19478_vm0, %v22998_v39  ;;  %17913 = vmatprep.mubr.msk.f32.mxu1 %vm19478_vm0, %v22998_v39 }
 0xcc2   :  { %19277 = vmatpush3.bf16.msra.mxu0 %v22362_v36  ;;  %19295 = vmatpush3.bf16.msra.mxu1 %v22385_v19 }
 0xcc3   :  { %19278 = vmatprep.subr.bf16.mxu0 %v23010_v41  ;;  %19296 = vmatprep.subr.bf16.mxu1 %v23010_v41 }
 0xd68   :  { %v12783_v24 = vpop.f32.mrb[2].mxu0  ;;  %v12928_v49 = vpop.f32.mrb[194].mxu1 }
 0xd69   :  { %v12787_v29 = vadd.f32 %v12783_v24, %v12711_v53  ;;  %v17765_v30 = vpop.f32.mrb[3].mxu0  ;;  %v17795_v43 = vpop.f32.mrb[195].mxu1 }
 0xd6a   :  { %v13080_v30 = vrot.slane %v22666_v26, 2 }
 0xd6b   :  { %v12788_v55 = vadd.f32 %v22632_v38, %v12787_v29 }
 0xd6d   :  { %v14811_v56 = vmul.f32 -1.442695, %v12788_v55 }
 0xd6f   :  { %19425 = vpow2.f32 %v14811_v56 }
 0xd78   :  { %v12858_v51 = vpop.f32.mrb[4].mxu0  ;;  %v13003_v46 = vpop.f32.mrb[196].mxu1 }
 0xd79   :  { %v12859_v54 = vadd.f32 %v12858_v51, %v12790_v4  ;;  %v17784_v0 = vpop.f32.mrb[5].mxu0  ;;  %v17814_v61 = vpop.f32.mrb[197].mxu1  ;;  %v13004_v23 = vadd.f32 %v13003_v46, %v12935_v44 }
 0xd7a   :  { %v19426_v9 = vpop.eup %19425 }
 0xd7b   :  { %v12932_v28 = vadd.f32 %v12928_v49, %v12859_v54  ;;  %v13227_v50 = vadd.f32 1.0, %v19426_v9 }
 0xd7d   :  { %v12933_v10 = vadd.f32 %v22648_v27, %v12932_v28 }
 0xd7f   :  { %v14812_v33 = vmul.f32 -1.442695, %v12933_v10 }
 0xd80   :  { %v13073_v57 = vpop.f32.mrb[6].mxu0  ;;  %v13218_v59 = vpop.f32.mrb[198].mxu1 }
 0xd81   :  { %19427 = vpow2.f32 %v14812_v33  ;;  %v13077_v11 = vadd.f32 %v13073_v57, %v13004_v23  ;;  %v17825_v37 = vpop.f32.mrb[7].mxu0  ;;  %v17855_v20 = vpop.f32.mrb[199].mxu1 }
 0xd82   :  { %19429 = vrcp.f32 %v13227_v50 }
 0xd83   :  { %v13078_v21 = vadd.f32 %v22658_v5, %v13077_v11 }
 0xd85   :  { %19431 = vtanh.f32 %v13078_v21 }
 0xd8b   :  { %v19428_v53 = vpop.eup %19427 }
 0xd8c   :  { %v13233_v24 = vadd.f32 1.0, %v19428_v53  ;;  %v19430_v49 = vpop.eup %19429 }
 0xd8e   :  { %19433 = vrcp.f32 %v13233_v24 }
 0xd8f   :  { %v19432_v29 = vpop.eup %19431 }
 0xd90   :  { %v13244_v43 = vmul.f32 %v19432_v29, %v19430_v49  ;;  %v13148_v55 = vpop.f32.mrb[8].mxu0  ;;  %v22765_v56 = vpop.f32.mrb[200].mxu1  ;;  %v13542_v29 = vrot.slane %v22650_v14, 4 }
 0xd91   :  { %v13149_v4 = vadd.f32 %v13148_v55, %v13080_v30  ;;  %v17844_v51 = vpop.f32.mrb[9].mxu0  ;;  %v17874_v46 = vpop.f32.mrb[201].mxu1 }
 0xd93   :  { %v13222_v54 = vadd.f32 %v13218_v59, %v13149_v4 }
 0xd95   :  { %v13223_v0 = vadd.f32 %v22672_v8, %v13222_v54 }
 0xd97   :  { %v14813_v61 = vmul.f32 -1.442695, %v13223_v0 }
 0xd98   :  { %v19434_v28 = vpop.eup %19433 }
 0xd99   :  { %v13243_v9 = vmul.f32 %v19434_v28, %v22675_v16  ;;  %19435 = vpow2.f32 %v14813_v61 }
 0xd9b   :  { %v22769_v10 = vadd.f32 %v13244_v43, %v13243_v9 }
 0xd9d   :  { %19437 = vtanh.f32 %v22769_v10 }
 0xda3   :  { %v19436_v44 = vpop.eup %19435 }
 0xda4   :  { %v13240_v33 = vadd.f32 1.0, %v19436_v44 }
 0xda6   :  { %19439 = vrcp.f32 %v13240_v33  ;;  %v13686_v33 = vrot.slane %v22666_v26, 4 }
 0xda7   :  { %v19438_v23 = vpop.eup %19437 }
 0xdb0   :  { %v19440_v50 = vpop.eup %19439 }
 0xdb1   :  { %v13247_v57 = vmul.f32 %v19440_v50, %v19438_v23 }
 0xdb3   :  { %17884 = vmatmul.mubr.msk.f32.vlgmr.msra.gmra.mrb[10].mxu0 %vm666_vm1, %v13247_v57  ;;  %17914 = vmatmul.mubr.msk.f32.vlgmr.msra.gmra.mrb[202].mxu1 %vm666_vm1, %v13247_v57 }
 0xdb4   :  { %19280 = vmatpush3.bf16.msra.mxu0 %v22464_v48  ;;  %19298 = vmatpush3.bf16.msra.mxu1 %v22397_v62 }
 0xdb5   :  { %19281 = vmatprep.subr.bf16.mxu0 %v23010_v41  ;;  %19299 = vmatprep.subr.bf16.mxu1 %v23010_v41 }
 0xdb6   :  { %17902 = vmatprep.mubr.msk.f32.mxu0 %vm19478_vm0, %v22998_v39  ;;  %17932 = vmatprep.mubr.msk.f32.mxu1 %vm19478_vm0, %v22998_v39 }
 0xdb8   :  { %19283 = vmatpush3.bf16.msra.mxu0 %v22488_v7  ;;  %19301 = vmatpush3.bf16.msra.mxu1 %v22408_v45 }
 0xdb9   :  { %19284 = vmatprep.subr.bf16.mxu0 %v23010_v41  ;;  %19302 = vmatprep.subr.bf16.mxu1 %v23010_v41 }
 0xdbc   :  { %19286 = vmatpush3.bf16.msra.mxu0 %v22508_v32  ;;  %19304 = vmatpush3.bf16.msra.mxu1 %v22420_v52 }
 0xdbd   :  { %19287 = vmatprep.subr.bf16.mxu0 %v23010_v41  ;;  %19305 = vmatprep.subr.bf16.mxu1 %v23010_v41 }
 0xdc0   :  { %19289 = vmatpush3.bf16.msra.mxu0 %v22521_v22  ;;  %19307 = vmatpush3.bf16.msra.mxu1 %v22439_v2 }
 0xdc1   :  { %19308 = vmatprep.subr.bf16.mxu0 %v23010_v41  ;;  %19326 = vmatprep.subr.bf16.mxu1 %v23010_v41 }
 0xdc3   :  { %17903 = vmatmul.mubr.msk.f32.vlgmr.msra.gmra.mrb[12].mxu0 %vm3105_vm2, %v22737_v25  ;;  %17933 = vmatmul.mubr.msk.f32.vlgmr.msra.gmra.mrb[204].mxu1 %vm3105_vm2, %v22737_v25 }
 0xdc4   :  { %19310 = vmatpush3.bf16.msra.mxu0 %v22537_v58  ;;  %19328 = vmatpush3.bf16.msra.mxu1 %v22466_v40 }
 0xdc5   :  { %19311 = vmatprep.subr.bf16.mxu0 %v23010_v41  ;;  %19329 = vmatprep.subr.bf16.mxu1 %v23010_v41 }
 0xdc6   :  { %17943 = vmatprep.mubr.msk.f32.mxu0 %vm19478_vm0, %v22998_v39  ;;  %17973 = vmatprep.mubr.msk.f32.mxu1 %vm19478_vm0, %v22998_v39 }
 0xdc8   :  { %19313 = vmatpush3.bf16.msra.mxu0 %v22551_v12  ;;  %19331 = vmatpush3.bf16.msra.mxu1 %v22490_v60 }
 0xdc9   :  { %19314 = vmatprep.subr.bf16.mxu0 %v23010_v41  ;;  %19332 = vmatprep.subr.bf16.mxu1 %v23010_v41 }
 0xdcb   :  { %17944 = vmatmul.mubr.msk.f32.vlgmr.msra.gmra.mrb[14].mxu0 %vm666_vm1, %v13247_v57  ;;  %17974 = vmatmul.mubr.msk.f32.vlgmr.msra.gmra.mrb[206].mxu1 %vm666_vm1, %v13247_v57 }
 0xdcc   :  { %19316 = vmatpush3.bf16.msra.mxu0 %v22565_v3  ;;  %19334 = vmatpush3.bf16.msra.mxu1 %v22310_v47  ;;  %v22831_v47 = vrot.slane %v22471_v35, 6 }
 0xdcd   :  { %19317 = vmatprep.subr.bf16.mxu0 %v23010_v41  ;;  %19335 = vmatprep.subr.bf16.mxu1 %v23010_v41 }
 0xdce   :  { %17962 = vmatprep.mubr.msk.f32.mxu0 %vm19478_vm0, %v22998_v39  ;;  %17992 = vmatprep.mubr.msk.f32.mxu1 %vm19478_vm0, %v22998_v39 }
 0xdd0   :  { %19319 = vmatpush3.bf16.msra.mxu0 %v22582_v34  ;;  %19337 = vmatpush3.bf16.msra.mxu1 %v22320_v17  ;;  %v13249_v17 = vrot.slane %v22626_v31, 4 }
 0xdd1   :  { %19320 = vmatprep.subr.bf16.mxu0 %v23010_v41  ;;  %19338 = vmatprep.subr.bf16.mxu1 %v23010_v41 }
 0xdd4   :  { %19322 = vmatpush3.bf16.msra.mxu0 %v22598_v15  ;;  %19340 = vmatpush3.bf16.msra.mxu1 %v22330_v18  ;;  %v13320_v18 = vadd.f32 %v22765_v56, %v13249_v17 }
 0xdd5   :  { %19323 = vmatprep.subr.bf16.mxu0 %v23010_v41  ;;  %19341 = vmatprep.subr.bf16.mxu1 %v23010_v41 }
 0xdd8   :  { %19325 = vmatpush3.bf16.msra.mxu0 %v22610_v13  ;;  %19343 = vmatpush3.bf16.msra.mxu1 %v22434_v42 }
 0xdd9   :  { %19344 = vmatprep.subr.bf16.mxu0 %v23010_v41  ;;  %19362 = vmatprep.subr.bf16.mxu1 %v23010_v41 }
 0xddb   :  { %17963 = vmatmul.mubr.msk.f32.vlgmr.msra.gmra.mrb[16].mxu0 %vm3105_vm2, %v22737_v25  ;;  %17993 = vmatmul.mubr.msk.f32.vlgmr.msra.gmra.mrb[208].mxu1 %vm3105_vm2, %v22831_v47 }
 0xddc   :  { %19346 = vmatpush3.bf16.msra.mxu0 %v22352_v1  ;;  %19364 = vmatpush3.bf16.msra.mxu1 %v22374_v63 }
 0xddd   :  { %19347 = vmatprep.subr.bf16.mxu0 %v23010_v41  ;;  %19365 = vmatprep.subr.bf16.mxu1 %v23010_v41 }
 0xdde   :  { %18003 = vmatprep.mubr.msk.f32.mxu0 %vm19478_vm0, %v22998_v39  ;;  %18033 = vmatprep.mubr.msk.f32.mxu1 %vm19478_vm0, %v22998_v39 }
 0xde0   :  { %19349 = vmatpush3.bf16.msra.mxu0 %v22362_v36  ;;  %19367 = vmatpush3.bf16.msra.mxu1 %v22385_v19  ;;  %v13398_v36 = vrot.slane %v22639_v6, 4 }
 0xde1   :  { %19350 = vmatprep.subr.bf16.mxu0 %v23010_v41  ;;  %19368 = vmatprep.subr.bf16.mxu1 %v23010_v41 }
 0xe86   :  { %v13392_v1 = vpop.f32.mrb[10].mxu0  ;;  %v13536_v63 = vpop.f32.mrb[202].mxu1 }
 0xe87   :  { %v13396_v42 = vadd.f32 %v13392_v1, %v13320_v18  ;;  %v17885_v35 = vpop.f32.mrb[11].mxu0  ;;  %v17915_v16 = vpop.f32.mrb[203].mxu1 }
 0xe89   :  { %v13397_v25 = vadd.f32 %v22632_v38, %v13396_v42 }
 0xe8b   :  { %v14822_v59 = vmul.f32 -1.442695, %v13397_v25 }
 0xe8d   :  { %19441 = vpow2.f32 %v14822_v59 }
 0xe96   :  { %v13466_v19 = vpop.f32.mrb[12].mxu0  ;;  %v13610_v11 = vpop.f32.mrb[204].mxu1 }
 0xe97   :  { %v13467_v37 = vadd.f32 %v13466_v19, %v13398_v36  ;;  %v17904_v20 = vpop.f32.mrb[13].mxu0  ;;  %v17934_v21 = vpop.f32.mrb[205].mxu1  ;;  %v13611_v43 = vadd.f32 %v13610_v11, %v13542_v29 }
 0xe98   :  { %v19442_v24 = vpop.eup %19441 }
 0xe99   :  { %v13540_v53 = vadd.f32 %v13536_v63, %v13467_v37  ;;  %v13833_v55 = vadd.f32 1.0, %v19442_v24 }
 0xe9b   :  { %v13541_v49 = vadd.f32 %v22648_v27, %v13540_v53 }
 0xe9d   :  { %v14823_v30 = vmul.f32 -1.442695, %v13541_v49 }
 0xe9e   :  { %v13680_v56 = vpop.f32.mrb[14].mxu0  ;;  %v13824_v4 = vpop.f32.mrb[206].mxu1 }
 0xe9f   :  { %19443 = vpow2.f32 %v14823_v30  ;;  %v13684_v51 = vadd.f32 %v13680_v56, %v13611_v43  ;;  %v17945_v46 = vpop.f32.mrb[15].mxu0  ;;  %v17975_v54 = vpop.f32.mrb[207].mxu1 }
 0xea0   :  { %19445 = vrcp.f32 %v13833_v55 }
 0xea1   :  { %v13685_v0 = vadd.f32 %v22658_v5, %v13684_v51 }
 0xea3   :  { %19447 = vtanh.f32 %v13685_v0 }
 0xea9   :  { %v19444_v61 = vpop.eup %19443 }
 0xeaa   :  { %v13839_v28 = vadd.f32 1.0, %v19444_v61  ;;  %v19446_v9 = vpop.eup %19445 }
 0xeac   :  { %19449 = vrcp.f32 %v13839_v28 }
 0xead   :  { %v19448_v44 = vpop.eup %19447 }
 0xeae   :  { %v13850_v23 = vmul.f32 %v19448_v44, %v19446_v9  ;;  %v13754_v50 = vpop.f32.mrb[16].mxu0  ;;  %v13925_v57 = vpop.f32.mrb[208].mxu1 }
 0xeaf   :  { %v13755_v17 = vadd.f32 %v13754_v50, %v13686_v33  ;;  %v17964_v18 = vpop.f32.mrb[17].mxu0  ;;  %v17994_v1 = vpop.f32.mrb[209].mxu1 }
 0xeb1   :  { %v13828_v63 = vadd.f32 %v13824_v4, %v13755_v17 }
 0xeb3   :  { %v13829_v42 = vadd.f32 %v22672_v8, %v13828_v63 }
 0xeb5   :  { %v14824_v35 = vmul.f32 -1.442695, %v13829_v42 }
 0xeb6   :  { %v19450_v16 = vpop.eup %19449 }
 0xeb7   :  { %v13849_v25 = vmul.f32 %v19450_v16, %v22769_v10  ;;  %19451 = vpow2.f32 %v14824_v35 }
 0xeb9   :  { %v22861_v59 = vadd.f32 %v13850_v23, %v13849_v25 }
 0xebb   :  { %19453 = vtanh.f32 %v22861_v59 }
 0xec1   :  { %v19452_v36 = vpop.eup %19451 }
 0xec2   :  { %v13846_v19 = vadd.f32 1.0, %v19452_v36 }
 0xec4   :  { %19455 = vrcp.f32 %v13846_v19 }
 0xec5   :  { %v19454_v11 = vpop.eup %19453 }
 0xece   :  { %v19456_v37 = vpop.eup %19455 }
 0xecf   :  { %v13853_v20 = vmul.f32 %v19456_v37, %v19454_v11 }
 0xed1   :  { %18004 = vmatmul.mubr.msk.f32.vlgmr.msra.gmra.mrb[18].mxu0 %vm666_vm1, %v13853_v20  ;;  %18034 = vmatmul.mubr.msk.f32.vlgmr.msra.gmra.mrb[210].mxu1 %vm666_vm1, %v13853_v20 }
 0xed2   :  { %19352 = vmatpush3.bf16.msra.mxu0 %v22464_v48  ;;  %19370 = vmatpush3.bf16.msra.mxu1 %v22397_v62  ;;  %v13855_v62 = vrot.slane %v22626_v31, 6  ;;  %v14148_v31 = vrot.slane %v22650_v14, 6  ;;  %v14292_v14 = vrot.slane %v22666_v26, 6 }
 0xed3   :  { %19353 = vmatprep.subr.bf16.mxu0 %v23010_v41  ;;  %19371 = vmatprep.subr.bf16.mxu1 %v23010_v41 }
 0xed4   :  { %18022 = vmatprep.mubr.msk.f32.mxu0 %vm19478_vm0, %v22998_v39  ;;  %18052 = vmatprep.mubr.msk.f32.mxu1 %vm19478_vm0, %v22998_v39 }
 0xed6   :  { %19355 = vmatpush3.bf16.msra.mxu0 %v22488_v7  ;;  %19373 = vmatpush3.bf16.msra.mxu1 %v22408_v45  ;;  %v13926_v45 = vadd.f32 %v13925_v57, %v13855_v62 }
 0xed7   :  { %19356 = vmatprep.subr.bf16.mxu0 %v23010_v41  ;;  %19374 = vmatprep.subr.bf16.mxu1 %v23010_v41 }
 0xeda   :  { %19358 = vmatpush3.bf16.msra.mxu0 %v22508_v32  ;;  %19376 = vmatpush3.bf16.msra.mxu1 %v22420_v52  ;;  %v14004_v32 = vrot.slane %v22639_v6, 6 }
 0xedb   :  { %19359 = vmatprep.subr.bf16.mxu0 %v23010_v41  ;;  %19377 = vmatprep.subr.bf16.mxu1 %v23010_v41 }
 0xede   :  { %19361 = vmatpush3.bf16.msra.mxu0 %v22521_v22  ;;  %19379 = vmatpush3.bf16.msra.mxu1 %v22439_v2 }
 0xedf   :  { %19380 = vmatprep.subr.bf16.mxu0 %v23010_v41  ;;  %19398 = vmatprep.subr.bf16.mxu1 %v23010_v41 }
 0xee1   :  { %18023 = vmatmul.mubr.msk.f32.vlgmr.msra.gmra.mrb[20].mxu0 %vm3105_vm2, %v22831_v47  ;;  %18053 = vmatmul.mubr.msk.f32.vlgmr.msra.gmra.mrb[212].mxu1 %vm3105_vm2, %v22831_v47 }
 0xee2   :  { %19382 = vmatpush3.bf16.msra.mxu0 %v22537_v58  ;;  %19400 = vmatpush3.bf16.msra.mxu1 %v22466_v40 }
 0xee3   :  { %19383 = vmatprep.subr.bf16.mxu0 %v23010_v41  ;;  %19401 = vmatprep.subr.bf16.mxu1 %v23010_v41 }
 0xee4   :  { %18063 = vmatprep.mubr.msk.f32.mxu0 %vm19478_vm0, %v22998_v39  ;;  %18093 = vmatprep.mubr.msk.f32.mxu1 %vm19478_vm0, %v22998_v39 }
 0xee6   :  { %19385 = vmatpush3.bf16.msra.mxu0 %v22551_v12  ;;  %19403 = vmatpush3.bf16.msra.mxu1 %v22490_v60 }
 0xee7   :  { %19386 = vmatprep.subr.bf16.mxu0 %v23010_v41 }
 0xee9   :  { %18064 = vmatmul.mubr.msk.f32.vlgmr.msra.gmra.mrb[22].mxu0 %vm666_vm1, %v13853_v20  ;;  %18094 = vmatmul.mubr.msk.f32.vlgmr.msra.gmra.mrb[214].mxu1 %vm666_vm1, %v13853_v20 }
 0xeea   :  { %19388 = vmatpush3.bf16.msra.mxu0 %v22565_v3  ;;  %18082 = vmatprep.mubr.msk.f32.mxu0 %vm19478_vm0, %v22998_v39 }
 0xeeb   :  { %19389 = vmatprep.subr.bf16.mxu0 %v23010_v41 }
 0xeee   :  { %19391 = vmatpush3.bf16.msra.mxu0 %v22582_v34 }
 0xeef   :  { %19392 = vmatprep.subr.bf16.mxu0 %v23010_v41 }
 0xef2   :  { %19394 = vmatpush3.bf16.msra.mxu0 %v22598_v15 }
 0xef3   :  { %19395 = vmatprep.subr.bf16.mxu0 %v23010_v41 }
 0xef6   :  { %19397 = vmatpush3.bf16.msra.mxu0 %v22610_v13 }
 0xef9   :  { %18083 = vmatmul.mubr.msk.f32.vlgmr.msra.gmra.mrb[24].mxu0 %vm3105_vm2, %v22831_v47 }
 0xfa4   :  { %v13998_v52 = vpop.f32.mrb[18].mxu0  ;;  %v14142_v39 = vpop.f32.mrb[210].mxu1 }
 0xfa5   :  { %v14002_v2 = vadd.f32 %v13998_v52, %v13926_v45  ;;  %v18005_v48 = vpop.f32.mrb[19].mxu0  ;;  %v18035_v40 = vpop.f32.mrb[211].mxu1 }
 0xfa7   :  { %v14003_v7 = vadd.f32 %v22632_v38, %v14002_v2 }
 0xfa9   :  { %v14833_v60 = vmul.f32 -1.442695, %v14003_v7 }
 0xfab   :  { %19457 = vpow2.f32 %v14833_v60 }
 0xfb4   :  { %v14072_v41 = vpop.f32.mrb[20].mxu0  ;;  %v14216_v22 = vpop.f32.mrb[212].mxu1 }
 0xfb5   :  { %v14073_v58 = vadd.f32 %v14072_v41, %v14004_v32  ;;  %v18024_v12 = vpop.f32.mrb[21].mxu0  ;;  %v18054_v3 = vpop.f32.mrb[213].mxu1  ;;  %v14217_v47 = vadd.f32 %v14216_v22, %v14148_v31 }
 0xfb6   :  { %v19458_v15 = vpop.eup %19457 }
 0xfb7   :  { %v14146_v34 = vadd.f32 %v14142_v39, %v14073_v58  ;;  %v14439_v21 = vadd.f32 1.0, %v19458_v15 }
 0xfb9   :  { %v14147_v13 = vadd.f32 %v22648_v27, %v14146_v34 }
 0xfbb   :  { %v14834_v10 = vmul.f32 -1.442695, %v14147_v13 }
 0xfbc   :  { %v14286_v53 = vpop.f32.mrb[22].mxu0  ;;  %v14430_v38 = vpop.f32.mrb[214].mxu1 }
 0xfbd   :  { %19459 = vpow2.f32 %v14834_v10  ;;  %v14290_v24 = vadd.f32 %v14286_v53, %v14217_v47  ;;  %v18065_v49 = vpop.f32.mrb[23].mxu0  ;;  %v18095_v6 = vpop.f32.mrb[215].mxu1 }
 0xfbe   :  { %19461 = vrcp.f32 %v14439_v21 }
 0xfbf   :  { %v14291_v29 = vadd.f32 %v22658_v5, %v14290_v24 }
 0xfc1   :  { %19463 = vtanh.f32 %v14291_v29 }
 0xfc7   :  { %v19460_v30 = vpop.eup %19459 }
 0xfc8   :  { %v14445_v43 = vadd.f32 1.0, %v19460_v30  ;;  %v19462_v55 = vpop.eup %19461 }
 0xfca   :  { %19465 = vrcp.f32 %v14445_v43 }
 0xfcb   :  { %v19464_v27 = vpop.eup %19463 }
 0xfcc   :  { %v14456_v56 = vmul.f32 %v19464_v27, %v19462_v55  ;;  %v14360_v4 = vpop.f32.mrb[24].mxu0 }
 0xfcd   :  { %v14361_v51 = vadd.f32 %v14360_v4, %v14292_v14  ;;  %v18084_v46 = vpop.f32.mrb[25].mxu0 }
 0xfcf   :  { %v14434_v54 = vadd.f32 %v14430_v38, %v14361_v51 }
 0xfd1   :  { %v14435_v0 = vadd.f32 %v22672_v8, %v14434_v54 }
 0xfd3   :  { %v14835_v61 = vmul.f32 -1.442695, %v14435_v0 }
 0xfd4   :  { %v19466_v28 = vpop.eup %19465 }
 0xfd5   :  { %v14455_v5 = vmul.f32 %v19466_v28, %v22861_v59  ;;  %19467 = vpow2.f32 %v14835_v61 }
 0xfd7   :  { %v14457_v9 = vadd.f32 %v14456_v56, %v14455_v5 }
 0xfd9   :  { %19469 = vtanh.f32 %v14457_v9 }
 0xfdf   :  { %v19468_v44 = vpop.eup %19467 }
 0xfe0   :  { %v14452_v33 = vadd.f32 1.0, %v19468_v44 }
 0xfe2   :  { %19471 = vrcp.f32 %v14452_v33 }
 0xfe3   :  { %v19470_v23 = vpop.eup %19469 }
 0xfec   :  { %v19472_v50 = vpop.eup %19471 }
 0xfed   :  { %v14459_v26 = vmul.f32 %v19472_v50, %v19470_v23 }
 0xfef   :  { %14461 = vst.msk [vmem:[%s22938_s12] sm:$0x3] %vm14460_vm3, %v14459_v26 }

</bundles_post_ra>
